<compile_context>
chip_gen: v6e
topology: v6e:2x2x1
jax: 0.10.0
libtpu: 0.0.40
codegen_flags: <defaults>
</compile_context>

<pallas_src>
import functools

import jax
import jax.numpy as jnp
from jax.experimental import pallas as pl
from jax.experimental.pallas import tpu as pltpu


_VMEM_LIMIT = 32 * 1024 * 1024


# ---------------------------------------------------------------------------
# Pallas kernels
# ---------------------------------------------------------------------------

def _conv_bn_relu_pool_kernel(xs_ref, w_ref, s_ref, b_ref, o_ref, *, l_out, wp2):
    """Fused Conv3x3(pad=1) + BatchNorm(eval) + ReLU + MaxPool2x2 for one image.

    xs_ref : (1, 4, Cin, P)   bf16  padded input split into (h,w)-parity planes;
             plane 2*s+r holds x_pad[c, 2n+s, 2m+r] at lane n*wp2 + m.
    w_ref  : (Cout, 9*Cin)    bf16  conv weight, tap-major / channel-minor.
    s_ref, b_ref : (Cout, 1)  f32   folded-BN scale / bias.
    o_ref  : (1, Cout, l_out) bf16  pooled activations; lane ho*wp2 + wo holds
             output (ho, wo); lanes with wo >= W/2 are junk, sliced off outside.
    """
    w = w_ref[...]
    s = s_ref[...]
    c0 = b_ref[...]
    planes = [xs_ref[0, k] for k in range(4)]            # each (Cin, P) bf16

    pooled = None
    for p in range(2):                                    # pooling-window corner (p, q)
        for q in range(2):
            # In-kernel im2col for this corner: stack the 9 taps on the sublane
            # (channel) axis; every tap is a static lane slice of a parity plane.
            pieces = []
            for dh in range(3):
                for dw in range(3):
                    plane = 2 * ((p + dh) % 2) + ((q + dw) % 2)
                    off = ((p + dh) // 2) * wp2 + ((q + dw) // 2)
                    pieces.append(planes[plane][:, off:off + l_out])
            rhs = jnp.concatenate(pieces, axis=0)         # (9*Cin, l_out) bf16
            acc = jnp.dot(w, rhs, preferred_element_type=jnp.float32)
            y = jnp.maximum(acc * s + c0, 0.0)            # BN + ReLU, f32 epilogue
            pooled = y if pooled is None else jnp.maximum(pooled, y)
    o_ref[0] = pooled.astype(o_ref.dtype)


def _classifier_kernel(a_ref, w1_ref, b1_ref, w2_ref, b2_ref, o_ref):
    """out = relu(a @ W1 + b1) @ W2 + b2, whole problem in a single step."""
    h = jnp.dot(a_ref[...], w1_ref[...], preferred_element_type=jnp.float32)
    h = jnp.maximum(h + b1_ref[...], 0.0)                 # (M, 128) f32
    o_ref[...] = (jnp.dot(h.astype(jnp.bfloat16), w2_ref[...],
                          preferred_element_type=jnp.float32) + b2_ref[...])


# ---------------------------------------------------------------------------
# Wrappers
# ---------------------------------------------------------------------------

def _pool_corner_planes(x_chw, pad_lanes):
    """(B, C, H, W) -> (B, 4, C, (H/2+1)*(W/2+1) + pad_lanes) parity planes.

    planes[b, 2*s+r, c, n*wp2 + m] = x_pad[b, c, 2n+s, 2m+r] (pad=1 each side).
    """
    B, C, H, W = x_chw.shape
    hp2, wp2 = (H + 2) // 2, (W + 2) // 2
    xp = jnp.pad(x_chw, ((0, 0), (0, 0), (1, 1), (1, 1)))
    xs = xp.reshape(B, C, hp2, 2, wp2, 2)                 # (b, c, n, s, m, r)
    xs = jnp.transpose(xs, (0, 3, 5, 1, 2, 4))            # (b, s, r, c, n, m)
    xs = xs.reshape(B, 4, C, hp2 * wp2)
    return jnp.pad(xs, ((0, 0), (0, 0), (0, 0), (0, pad_lanes)))


def conv_bn_relu_pool(x_chw, w_flat, scale, bias):
    """Conv2d(3x3, pad=1) + BatchNorm2d(eval) + ReLU + MaxPool2d(2,2), one kernel.

    x_chw: (B, C, H, W) bf16 (NCHW).  Returns (B, Cout, H//2, W//2) bf16 (NCHW).
    """
    B, C, H, W = x_chw.shape
    assert H % 2 == 0 and W % 2 == 0, "MaxPool2d(2,2) path assumes even H, W"
    cout = w_flat.shape[0]
    cin = w_flat.shape[1] // 9
    if cin > C:                                           # conv1: channels 3 -> 16
        x_chw = jnp.pad(x_chw, ((0, 0), (0, cin - C), (0, 0), (0, 0)))
    ho, wo = H // 2, W // 2
    hp2, wp2 = (H + 2) // 2, (W + 2) // 2
    l_out = ho * wp2

    xs = _pool_corner_planes(x_chw, pad_lanes=wp2)        # (B, 4, cin, P)
    pp = xs.shape[-1]

    kernel = functools.partial(_conv_bn_relu_pool_kernel, l_out=l_out, wp2=wp2)
    out = pl.pallas_call(
        kernel,
        out_shape=jax.ShapeDtypeStruct((B, cout, l_out), jnp.bfloat16),
        grid=(B,),
        in_specs=[
            pl.BlockSpec((1, 4, cin, pp), lambda b: (b, 0, 0, 0)),
            pl.BlockSpec((cout, 9 * cin), lambda b: (0, 0)),
            pl.BlockSpec((cout, 1), lambda b: (0, 0)),
            pl.BlockSpec((cout, 1), lambda b: (0, 0)),
        ],
        out_specs=pl.BlockSpec((1, cout, l_out), lambda b: (b, 0, 0)),
        compiler_params=pltpu.CompilerParams(
            dimension_semantics=("parallel",),
            vmem_limit_bytes=_VMEM_LIMIT,
        ),
    )(xs, w_flat, scale, bias)
    # lane ho*wp2 + wo -> (ho, wo); drop the junk columns wo in [W//2, wp2).
    return out.reshape(B, cout, ho, wp2)[:, :, :, :wo]


def classifier_fused(x, w1, b1, w2, b2):
    """relu(x @ w1 + b1) @ w2 + b2, single grid step (w1 stays VMEM resident)."""
    M, K = x.shape
    N1 = w1.shape[1]
    N2 = w2.shape[1]
    return pl.pallas_call(
        _classifier_kernel,
        out_shape=jax.ShapeDtypeStruct((M, N2), jnp.float32),
        grid=(1,),
        in_specs=[
            pl.BlockSpec((M, K), lambda i: (0, 0)),
            pl.BlockSpec((K, N1), lambda i: (0, 0)),
            pl.BlockSpec((1, N1), lambda i: (0, 0)),
            pl.BlockSpec((N1, N2), lambda i: (0, 0)),
            pl.BlockSpec((1, N2), lambda i: (0, 0)),
        ],
        out_specs=pl.BlockSpec((M, N2), lambda i: (0, 0)),
        compiler_params=pltpu.CompilerParams(
            dimension_semantics=("arbitrary",),
            vmem_limit_bytes=_VMEM_LIMIT,
        ),
    )(x, w1, b1, w2, b2)


# ---------------------------------------------------------------------------
# Forward pass
# ---------------------------------------------------------------------------

def simple_cnn_forward(x_nchw, p):
    B = x_nchw.shape[0]
    x = x_nchw.astype(jnp.bfloat16)                       # NCHW, bf16 activations
    # Block 1: Conv(3->32)+BN+ReLU+MaxPool   (Dropout2d = identity at inference)
    x = conv_bn_relu_pool(x, p["w1f"], p["s1"], p["c1"])  # (B, 32, 32, 32)
    # Block 2: Conv(32->64)+BN+ReLU+MaxPool  (Dropout2d = identity at inference)
    x = conv_bn_relu_pool(x, p["w2f"], p["s2"], p["c2"])  # (B, 64, 16, 16)
    # torch.flatten(x, 1): activations are already NCHW, so this reshape is exact.
    feat = x.reshape(B, -1)                               # (B, 16384) bf16
    # Classifier: Linear(16384->128)+ReLU (+Dropout = identity) + Linear(128->nc)
    return classifier_fused(feat, p["fc1_wt"], p["fc1_b"], p["fc2_wt"], p["fc2_b"])


# ---------------------------------------------------------------------------
# Parameter prep (one-time, outside jit): BN fold, weight reshape, bf16 cast.
# ---------------------------------------------------------------------------

def prepare_params(p, eps=1e-5):
    def fold_conv(w_oihw, conv_b, gamma, beta, mean, var, cin_pad):
        cout, cin = w_oihw.shape[0], w_oihw.shape[1]
        w9 = jnp.transpose(w_oihw, (2, 3, 0, 1)).reshape(9, cout, cin)  # [t, co, c]
        if cin_pad > cin:
            w9 = jnp.pad(w9, ((0, 0), (0, 0), (0, cin_pad - cin)))
        # (Cout, 9*cin_pad), tap-major / channel-minor: matches in-kernel im2col.
        w_flat = jnp.transpose(w9, (1, 0, 2)).reshape(cout, 9 * cin_pad)
        s = gamma / jnp.sqrt(var + eps)
        bias = (conv_b - mean) * s + beta
        return (w_flat.astype(jnp.bfloat16),
                s.reshape(cout, 1).astype(jnp.float32),
                bias.reshape(cout, 1).astype(jnp.float32))

    # Conv1 Cin padded 3 -> 16 (zero taps) so the in-kernel sublane concat stays
    # aligned to the bf16 (16, 128) tile; conv2 Cin = 32 already is.
    w1f, s1, c1 = fold_conv(p["w1"], p["b1"], p["g1"], p["be1"], p["m1"], p["v1"], 16)
    w2f, s2, c2 = fold_conv(p["w2"], p["b2"], p["g2"], p["be2"], p["m2"], p["v2"], 32)

    return {
        "w1f": w1f, "s1": s1, "c1": c1,
        "w2f": w2f, "s2": s2, "c2": c2,
        # Activations flatten in torch (c, h, w) order, so fc1 only needs transpose.
        "fc1_wt": p["fc1_w"].T.astype(jnp.bfloat16),          # (16384, 128)
        "fc1_b": p["fc1_b"].reshape(1, -1).astype(jnp.float32),
        "fc2_wt": p["fc2_w"].T.astype(jnp.bfloat16),          # (128, num_classes)
        "fc2_b": p["fc2_b"].reshape(1, -1).astype(jnp.float32),
    }


def init_params(num_classes):
    key = jax.random.PRNGKey(42)
    ks = jax.random.split(key, 12)
    f32 = jnp.float32
    return {
        # Conv1: (32, 3, 3, 3) + BN1
        "w1": 0.05 * jax.random.normal(ks[0], (32, 3, 3, 3), f32),
        "b1": 0.01 * jax.random.normal(ks[1], (32,), f32),
        "g1": 1.0 + 0.05 * jax.random.normal(ks[2], (32,), f32),
        "be1": 0.01 * jax.random.normal(ks[3], (32,), f32),
        "m1": 0.01 * jax.random.normal(ks[4], (32,), f32),
        "v1": 0.9 + 0.1 * jnp.abs(jax.random.normal(ks[5], (32,), f32)),
        # Conv2: (64, 32, 3, 3) + BN2
        "w2": 0.05 * jax.random.normal(ks[6], (64, 32, 3, 3), f32),
        "b2": 0.01 * jax.random.normal(ks[7], (64,), f32),
        "g2": 1.0 + 0.05 * jax.random.normal(ks[8], (64,), f32),
        "be2": 0.01 * jax.random.normal(ks[9], (64,), f32),
        "m2": 0.01 * jax.random.normal(ks[10], (64,), f32),
        "v2": 0.9 + 0.1 * jnp.abs(jax.random.normal(ks[11], (64,), f32)),
        # Classifier (PyTorch Linear layout: (out, in))
        "fc1_w": 0.01 * jax.random.normal(jax.random.PRNGKey(7), (128, 64 * 16 * 16), f32),
        "fc1_b": 0.01 * jax.random.normal(jax.random.PRNGKey(8), (128,), f32),
        "fc2_w": 0.05 * jax.random.normal(jax.random.PRNGKey(9), (num_classes, 128), f32),
        "fc2_b": 0.01 * jax.random.normal(jax.random.PRNGKey(10), (num_classes,), f32),
    }


if __name__ == "__main__":
    num_classes = 10
    batch = 2
    # fc1 in_features = 64*16*16 implies a 3x64x64 input after two 2x2 pools.
    x = jax.random.normal(jax.random.PRNGKey(0), (batch, 3, 64, 64), jnp.float32)
    params = init_params(num_classes)
    prepped = prepare_params(params)        # one-time prep, outside jit

    fwd = jax.jit(simple_cnn_forward)
    out = fwd(x, prepped)
    jax.block_until_ready(out)
    assert out.shape == (batch, num_classes), out.shape
    assert out.dtype == jnp.float32
    print("KERNEL_OK")
</pallas_src>

<mosaic_0001>
module attributes {stable_mosaic.version = 11 : i64} {
  func.func @_conv_bn_relu_pool_kernel(%arg0: i32, %arg1: memref<1x4x16x1122xbf16, #tpu.memory_space<vmem>>, %arg2: memref<32x144xbf16, #tpu.memory_space<vmem>>, %arg3: memref<32x1xf32, #tpu.memory_space<vmem>>, %arg4: memref<32x1xf32, #tpu.memory_space<vmem>>, %arg5: memref<1x32x1056xbf16, #tpu.memory_space<vmem>>) attributes {dimension_semantics = [#tpu.dimension_semantics<parallel>], iteration_bounds = array<i64: 2>, scalar_prefetch = 0 : i64, scratch_operands = 0 : i64, tpu.core_type = #tpu.core_type<tc>, window_params = [{transform_indices = @transform_0, window_bounds = array<i64: 1, 4, 16, 1122>}, {pipeline_mode = #tpu.pipeline_mode<synchronous>, transform_indices = @transform_1, window_bounds = array<i64: 32, 144>}, {pipeline_mode = #tpu.pipeline_mode<synchronous>, transform_indices = @transform_2, window_bounds = array<i64: 32, 1>}, {pipeline_mode = #tpu.pipeline_mode<synchronous>, transform_indices = @transform_3, window_bounds = array<i64: 32, 1>}, {transform_indices = @transform_4, window_bounds = array<i64: 1, 32, 1056>}]} {
    %c0 = arith.constant 0 : index
    %c0_0 = arith.constant 0 : index
    %0 = vector.load %arg2[%c0, %c0_0] : memref<32x144xbf16, #tpu.memory_space<vmem>>, vector<32x144xbf16>
    %c0_1 = arith.constant 0 : index
    %c0_2 = arith.constant 0 : index
    %1 = vector.load %arg3[%c0_1, %c0_2] : memref<32x1xf32, #tpu.memory_space<vmem>>, vector<32x1xf32>
    %c0_3 = arith.constant 0 : index
    %c0_4 = arith.constant 0 : index
    %2 = vector.load %arg4[%c0_3, %c0_4] : memref<32x1xf32, #tpu.memory_space<vmem>>, vector<32x1xf32>
    %c0_5 = arith.constant 0 : index
    %c0_6 = arith.constant 0 : index
    %c0_7 = arith.constant 0 : index
    %c0_8 = arith.constant 0 : index
    %3 = vector.load %arg1[%c0_5, %c0_6, %c0_7, %c0_8] : memref<1x4x16x1122xbf16, #tpu.memory_space<vmem>>, vector<1x1x16x1122xbf16>
    %4 = vector.shape_cast %3 : vector<1x1x16x1122xbf16> to vector<16x1122xbf16>
    %c0_9 = arith.constant 0 : index
    %c1 = arith.constant 1 : index
    %c0_10 = arith.constant 0 : index
    %c0_11 = arith.constant 0 : index
    %5 = vector.load %arg1[%c0_9, %c1, %c0_10, %c0_11] : memref<1x4x16x1122xbf16, #tpu.memory_space<vmem>>, vector<1x1x16x1122xbf16>
    %6 = vector.shape_cast %5 : vector<1x1x16x1122xbf16> to vector<16x1122xbf16>
    %c0_12 = arith.constant 0 : index
    %c2 = arith.constant 2 : index
    %c0_13 = arith.constant 0 : index
    %c0_14 = arith.constant 0 : index
    %7 = vector.load %arg1[%c0_12, %c2, %c0_13, %c0_14] : memref<1x4x16x1122xbf16, #tpu.memory_space<vmem>>, vector<1x1x16x1122xbf16>
    %8 = vector.shape_cast %7 : vector<1x1x16x1122xbf16> to vector<16x1122xbf16>
    %c0_15 = arith.constant 0 : index
    %c3 = arith.constant 3 : index
    %c0_16 = arith.constant 0 : index
    %c0_17 = arith.constant 0 : index
    %9 = vector.load %arg1[%c0_15, %c3, %c0_16, %c0_17] : memref<1x4x16x1122xbf16, #tpu.memory_space<vmem>>, vector<1x1x16x1122xbf16>
    %10 = vector.shape_cast %9 : vector<1x1x16x1122xbf16> to vector<16x1122xbf16>
    %11 = vector.extract_strided_slice %4 {offsets = [0, 0], sizes = [16, 1056], strides = [1, 1]} : vector<16x1122xbf16> to vector<16x1056xbf16>
    %12 = vector.extract_strided_slice %6 {offsets = [0, 0], sizes = [16, 1056], strides = [1, 1]} : vector<16x1122xbf16> to vector<16x1056xbf16>
    %13 = vector.extract_strided_slice %4 {offsets = [0, 1], sizes = [16, 1056], strides = [1, 1]} : vector<16x1122xbf16> to vector<16x1056xbf16>
    %14 = vector.extract_strided_slice %8 {offsets = [0, 0], sizes = [16, 1056], strides = [1, 1]} : vector<16x1122xbf16> to vector<16x1056xbf16>
    %15 = vector.extract_strided_slice %10 {offsets = [0, 0], sizes = [16, 1056], strides = [1, 1]} : vector<16x1122xbf16> to vector<16x1056xbf16>
    %16 = vector.extract_strided_slice %8 {offsets = [0, 1], sizes = [16, 1056], strides = [1, 1]} : vector<16x1122xbf16> to vector<16x1056xbf16>
    %17 = vector.extract_strided_slice %4 {offsets = [0, 33], sizes = [16, 1056], strides = [1, 1]} : vector<16x1122xbf16> to vector<16x1056xbf16>
    %18 = vector.extract_strided_slice %6 {offsets = [0, 33], sizes = [16, 1056], strides = [1, 1]} : vector<16x1122xbf16> to vector<16x1056xbf16>
    %19 = vector.extract_strided_slice %4 {offsets = [0, 34], sizes = [16, 1056], strides = [1, 1]} : vector<16x1122xbf16> to vector<16x1056xbf16>
    %20 = tpu.concatenate %11, %12, %13, %14, %15, %16, %17, %18, %19 in 0 : vector<16x1056xbf16>, vector<16x1056xbf16>, vector<16x1056xbf16>, vector<16x1056xbf16>, vector<16x1056xbf16>, vector<16x1056xbf16>, vector<16x1056xbf16>, vector<16x1056xbf16>, vector<16x1056xbf16> -> vector<144x1056xbf16>
    %cst = arith.constant dense<0.000000e+00> : vector<32x1056xf32>
    %21 = tpu.matmul %0, %20, %cst {dimension_numbers = #tpu.dot_dimension_numbers<[1], [0], [0], [1], [0, 0, 1, 1], [], []>} : vector<32x144xbf16>, vector<144x1056xbf16>, vector<32x1056xf32> -> vector<32x1056xf32>
    %22 = vector.broadcast %1 : vector<32x1xf32> to vector<32x1056xf32>
    %23 = arith.mulf %21, %22 : vector<32x1056xf32>
    %24 = vector.broadcast %2 : vector<32x1xf32> to vector<32x1056xf32>
    %25 = arith.addf %23, %24 : vector<32x1056xf32>
    %cst_18 = arith.constant 0.000000e+00 : f32
    %26 = vector.broadcast %cst_18 : f32 to vector<32x1056xf32>
    %27 = arith.maximumf %25, %26 : vector<32x1056xf32>
    %28 = vector.extract_strided_slice %6 {offsets = [0, 0], sizes = [16, 1056], strides = [1, 1]} : vector<16x1122xbf16> to vector<16x1056xbf16>
    %29 = vector.extract_strided_slice %4 {offsets = [0, 1], sizes = [16, 1056], strides = [1, 1]} : vector<16x1122xbf16> to vector<16x1056xbf16>
    %30 = vector.extract_strided_slice %6 {offsets = [0, 1], sizes = [16, 1056], strides = [1, 1]} : vector<16x1122xbf16> to vector<16x1056xbf16>
    %31 = vector.extract_strided_slice %10 {offsets = [0, 0], sizes = [16, 1056], strides = [1, 1]} : vector<16x1122xbf16> to vector<16x1056xbf16>
    %32 = vector.extract_strided_slice %8 {offsets = [0, 1], sizes = [16, 1056], strides = [1, 1]} : vector<16x1122xbf16> to vector<16x1056xbf16>
    %33 = vector.extract_strided_slice %10 {offsets = [0, 1], sizes = [16, 1056], strides = [1, 1]} : vector<16x1122xbf16> to vector<16x1056xbf16>
    %34 = vector.extract_strided_slice %6 {offsets = [0, 33], sizes = [16, 1056], strides = [1, 1]} : vector<16x1122xbf16> to vector<16x1056xbf16>
    %35 = vector.extract_strided_slice %4 {offsets = [0, 34], sizes = [16, 1056], strides = [1, 1]} : vector<16x1122xbf16> to vector<16x1056xbf16>
    %36 = vector.extract_strided_slice %6 {offsets = [0, 34], sizes = [16, 1056], strides = [1, 1]} : vector<16x1122xbf16> to vector<16x1056xbf16>
    %37 = tpu.concatenate %28, %29, %30, %31, %32, %33, %34, %35, %36 in 0 : vector<16x1056xbf16>, vector<16x1056xbf16>, vector<16x1056xbf16>, vector<16x1056xbf16>, vector<16x1056xbf16>, vector<16x1056xbf16>, vector<16x1056xbf16>, vector<16x1056xbf16>, vector<16x1056xbf16> -> vector<144x1056xbf16>
    %cst_19 = arith.constant dense<0.000000e+00> : vector<32x1056xf32>
    %38 = tpu.matmul %0, %37, %cst_19 {dimension_numbers = #tpu.dot_dimension_numbers<[1], [0], [0], [1], [0, 0, 1, 1], [], []>} : vector<32x144xbf16>, vector<144x1056xbf16>, vector<32x1056xf32> -> vector<32x1056xf32>
    %39 = vector.broadcast %1 : vector<32x1xf32> to vector<32x1056xf32>
    %40 = arith.mulf %38, %39 : vector<32x1056xf32>
    %41 = vector.broadcast %2 : vector<32x1xf32> to vector<32x1056xf32>
    %42 = arith.addf %40, %41 : vector<32x1056xf32>
    %cst_20 = arith.constant 0.000000e+00 : f32
    %43 = vector.broadcast %cst_20 : f32 to vector<32x1056xf32>
    %44 = arith.maximumf %42, %43 : vector<32x1056xf32>
    %45 = arith.maximumf %27, %44 : vector<32x1056xf32>
    %46 = vector.extract_strided_slice %8 {offsets = [0, 0], sizes = [16, 1056], strides = [1, 1]} : vector<16x1122xbf16> to vector<16x1056xbf16>
    %47 = vector.extract_strided_slice %10 {offsets = [0, 0], sizes = [16, 1056], strides = [1, 1]} : vector<16x1122xbf16> to vector<16x1056xbf16>
    %48 = vector.extract_strided_slice %8 {offsets = [0, 1], sizes = [16, 1056], strides = [1, 1]} : vector<16x1122xbf16> to vector<16x1056xbf16>
    %49 = vector.extract_strided_slice %4 {offsets = [0, 33], sizes = [16, 1056], strides = [1, 1]} : vector<16x1122xbf16> to vector<16x1056xbf16>
    %50 = vector.extract_strided_slice %6 {offsets = [0, 33], sizes = [16, 1056], strides = [1, 1]} : vector<16x1122xbf16> to vector<16x1056xbf16>
    %51 = vector.extract_strided_slice %4 {offsets = [0, 34], sizes = [16, 1056], strides = [1, 1]} : vector<16x1122xbf16> to vector<16x1056xbf16>
    %52 = vector.extract_strided_slice %8 {offsets = [0, 33], sizes = [16, 1056], strides = [1, 1]} : vector<16x1122xbf16> to vector<16x1056xbf16>
    %53 = vector.extract_strided_slice %10 {offsets = [0, 33], sizes = [16, 1056], strides = [1, 1]} : vector<16x1122xbf16> to vector<16x1056xbf16>
    %54 = vector.extract_strided_slice %8 {offsets = [0, 34], sizes = [16, 1056], strides = [1, 1]} : vector<16x1122xbf16> to vector<16x1056xbf16>
    %55 = tpu.concatenate %46, %47, %48, %49, %50, %51, %52, %53, %54 in 0 : vector<16x1056xbf16>, vector<16x1056xbf16>, vector<16x1056xbf16>, vector<16x1056xbf16>, vector<16x1056xbf16>, vector<16x1056xbf16>, vector<16x1056xbf16>, vector<16x1056xbf16>, vector<16x1056xbf16> -> vector<144x1056xbf16>
    %cst_21 = arith.constant dense<0.000000e+00> : vector<32x1056xf32>
    %56 = tpu.matmul %0, %55, %cst_21 {dimension_numbers = #tpu.dot_dimension_numbers<[1], [0], [0], [1], [0, 0, 1, 1], [], []>} : vector<32x144xbf16>, vector<144x1056xbf16>, vector<32x1056xf32> -> vector<32x1056xf32>
    %57 = vector.broadcast %1 : vector<32x1xf32> to vector<32x1056xf32>
    %58 = arith.mulf %56, %57 : vector<32x1056xf32>
    %59 = vector.broadcast %2 : vector<32x1xf32> to vector<32x1056xf32>
    %60 = arith.addf %58, %59 : vector<32x1056xf32>
    %cst_22 = arith.constant 0.000000e+00 : f32
    %61 = vector.broadcast %cst_22 : f32 to vector<32x1056xf32>
    %62 = arith.maximumf %60, %61 : vector<32x1056xf32>
    %63 = arith.maximumf %45, %62 : vector<32x1056xf32>
    %64 = vector.extract_strided_slice %10 {offsets = [0, 0], sizes = [16, 1056], strides = [1, 1]} : vector<16x1122xbf16> to vector<16x1056xbf16>
    %65 = vector.extract_strided_slice %8 {offsets = [0, 1], sizes = [16, 1056], strides = [1, 1]} : vector<16x1122xbf16> to vector<16x1056xbf16>
    %66 = vector.extract_strided_slice %10 {offsets = [0, 1], sizes = [16, 1056], strides = [1, 1]} : vector<16x1122xbf16> to vector<16x1056xbf16>
    %67 = vector.extract_strided_slice %6 {offsets = [0, 33], sizes = [16, 1056], strides = [1, 1]} : vector<16x1122xbf16> to vector<16x1056xbf16>
    %68 = vector.extract_strided_slice %4 {offsets = [0, 34], sizes = [16, 1056], strides = [1, 1]} : vector<16x1122xbf16> to vector<16x1056xbf16>
    %69 = vector.extract_strided_slice %6 {offsets = [0, 34], sizes = [16, 1056], strides = [1, 1]} : vector<16x1122xbf16> to vector<16x1056xbf16>
    %70 = vector.extract_strided_slice %10 {offsets = [0, 33], sizes = [16, 1056], strides = [1, 1]} : vector<16x1122xbf16> to vector<16x1056xbf16>
    %71 = vector.extract_strided_slice %8 {offsets = [0, 34], sizes = [16, 1056], strides = [1, 1]} : vector<16x1122xbf16> to vector<16x1056xbf16>
    %72 = vector.extract_strided_slice %10 {offsets = [0, 34], sizes = [16, 1056], strides = [1, 1]} : vector<16x1122xbf16> to vector<16x1056xbf16>
    %73 = tpu.concatenate %64, %65, %66, %67, %68, %69, %70, %71, %72 in 0 : vector<16x1056xbf16>, vector<16x1056xbf16>, vector<16x1056xbf16>, vector<16x1056xbf16>, vector<16x1056xbf16>, vector<16x1056xbf16>, vector<16x1056xbf16>, vector<16x1056xbf16>, vector<16x1056xbf16> -> vector<144x1056xbf16>
    %cst_23 = arith.constant dense<0.000000e+00> : vector<32x1056xf32>
    %74 = tpu.matmul %0, %73, %cst_23 {dimension_numbers = #tpu.dot_dimension_numbers<[1], [0], [0], [1], [0, 0, 1, 1], [], []>} : vector<32x144xbf16>, vector<144x1056xbf16>, vector<32x1056xf32> -> vector<32x1056xf32>
    %75 = vector.broadcast %1 : vector<32x1xf32> to vector<32x1056xf32>
    %76 = arith.mulf %74, %75 : vector<32x1056xf32>
    %77 = vector.broadcast %2 : vector<32x1xf32> to vector<32x1056xf32>
    %78 = arith.addf %76, %77 : vector<32x1056xf32>
    %cst_24 = arith.constant 0.000000e+00 : f32
    %79 = vector.broadcast %cst_24 : f32 to vector<32x1056xf32>
    %80 = arith.maximumf %78, %79 : vector<32x1056xf32>
    %81 = arith.maximumf %63, %80 : vector<32x1056xf32>
    %82 = arith.truncf %81 : vector<32x1056xf32> to vector<32x1056xbf16>
    %c0_25 = arith.constant 0 : index
    %c0_26 = arith.constant 0 : index
    %c0_27 = arith.constant 0 : index
    %83 = vector.load %arg5[%c0_25, %c0_26, %c0_27] : memref<1x32x1056xbf16, #tpu.memory_space<vmem>>, vector<1x32x1056xbf16>
    %84 = vector.shape_cast %83 : vector<1x32x1056xbf16> to vector<32x1056xbf16>
    %85 = vector.shape_cast %82 : vector<32x1056xbf16> to vector<1x32x1056xbf16>
    tpu.vector_store %arg5[%c0_25, %c0_26, %c0_27], %85 {strides = array<i32>} : memref<1x32x1056xbf16, #tpu.memory_space<vmem>>, vector<1x32x1056xbf16>,
    return
  }
  func.func @transform_0(%arg0: i32) -> (i32, i32, i32, i32) {
    %c0_i32 = arith.constant 0 : i32
    %c0_i32_0 = arith.constant 0 : i32
    %c0_i32_1 = arith.constant 0 : i32
    %c0_i32_2 = arith.constant 0 : i32
    return %arg0, %c0_i32, %c0_i32_0, %c0_i32_1 : i32, i32, i32, i32
  }
  func.func @transform_1(%arg0: i32) -> (i32, i32) {
    %c0_i32 = arith.constant 0 : i32
    %c0_i32_0 = arith.constant 0 : i32
    %c0_i32_1 = arith.constant 0 : i32
    return %c0_i32, %c0_i32_0 : i32, i32
  }
  func.func @transform_2(%arg0: i32) -> (i32, i32) {
    %c0_i32 = arith.constant 0 : i32
    %c0_i32_0 = arith.constant 0 : i32
    %c0_i32_1 = arith.constant 0 : i32
    return %c0_i32, %c0_i32_0 : i32, i32
  }
  func.func @transform_3(%arg0: i32) -> (i32, i32) {
    %c0_i32 = arith.constant 0 : i32
    %c0_i32_0 = arith.constant 0 : i32
    %c0_i32_1 = arith.constant 0 : i32
    return %c0_i32, %c0_i32_0 : i32, i32
  }
  func.func @transform_4(%arg0: i32) -> (i32, i32, i32) {
    %c0_i32 = arith.constant 0 : i32
    %c0_i32_0 = arith.constant 0 : i32
    %c0_i32_1 = arith.constant 0 : i32
    return %arg0, %c0_i32, %c0_i32_0 : i32, i32, i32
  }
}

module attributes {stable_mosaic.version = 11 : i64} {
  func.func @_conv_bn_relu_pool_kernel(%arg0: i32, %arg1: memref<1x4x32x306xbf16, #tpu.memory_space<vmem>>, %arg2: memref<64x288xbf16, #tpu.memory_space<vmem>>, %arg3: memref<64x1xf32, #tpu.memory_space<vmem>>, %arg4: memref<64x1xf32, #tpu.memory_space<vmem>>, %arg5: memref<1x64x272xbf16, #tpu.memory_space<vmem>>) attributes {dimension_semantics = [#tpu.dimension_semantics<parallel>], iteration_bounds = array<i64: 2>, scalar_prefetch = 0 : i64, scratch_operands = 0 : i64, tpu.core_type = #tpu.core_type<tc>, window_params = [{transform_indices = @transform_0, window_bounds = array<i64: 1, 4, 32, 306>}, {pipeline_mode = #tpu.pipeline_mode<synchronous>, transform_indices = @transform_1, window_bounds = array<i64: 64, 288>}, {pipeline_mode = #tpu.pipeline_mode<synchronous>, transform_indices = @transform_2, window_bounds = array<i64: 64, 1>}, {pipeline_mode = #tpu.pipeline_mode<synchronous>, transform_indices = @transform_3, window_bounds = array<i64: 64, 1>}, {transform_indices = @transform_4, window_bounds = array<i64: 1, 64, 272>}]} {
    %c0 = arith.constant 0 : index
    %c0_0 = arith.constant 0 : index
    %0 = vector.load %arg2[%c0, %c0_0] : memref<64x288xbf16, #tpu.memory_space<vmem>>, vector<64x288xbf16>
    %c0_1 = arith.constant 0 : index
    %c0_2 = arith.constant 0 : index
    %1 = vector.load %arg3[%c0_1, %c0_2] : memref<64x1xf32, #tpu.memory_space<vmem>>, vector<64x1xf32>
    %c0_3 = arith.constant 0 : index
    %c0_4 = arith.constant 0 : index
    %2 = vector.load %arg4[%c0_3, %c0_4] : memref<64x1xf32, #tpu.memory_space<vmem>>, vector<64x1xf32>
    %c0_5 = arith.constant 0 : index
    %c0_6 = arith.constant 0 : index
    %c0_7 = arith.constant 0 : index
    %c0_8 = arith.constant 0 : index
    %3 = vector.load %arg1[%c0_5, %c0_6, %c0_7, %c0_8] : memref<1x4x32x306xbf16, #tpu.memory_space<vmem>>, vector<1x1x32x306xbf16>
    %4 = vector.shape_cast %3 : vector<1x1x32x306xbf16> to vector<32x306xbf16>
    %c0_9 = arith.constant 0 : index
    %c1 = arith.constant 1 : index
    %c0_10 = arith.constant 0 : index
    %c0_11 = arith.constant 0 : index
    %5 = vector.load %arg1[%c0_9, %c1, %c0_10, %c0_11] : memref<1x4x32x306xbf16, #tpu.memory_space<vmem>>, vector<1x1x32x306xbf16>
    %6 = vector.shape_cast %5 : vector<1x1x32x306xbf16> to vector<32x306xbf16>
    %c0_12 = arith.constant 0 : index
    %c2 = arith.constant 2 : index
    %c0_13 = arith.constant 0 : index
    %c0_14 = arith.constant 0 : index
    %7 = vector.load %arg1[%c0_12, %c2, %c0_13, %c0_14] : memref<1x4x32x306xbf16, #tpu.memory_space<vmem>>, vector<1x1x32x306xbf16>
    %8 = vector.shape_cast %7 : vector<1x1x32x306xbf16> to vector<32x306xbf16>
    %c0_15 = arith.constant 0 : index
    %c3 = arith.constant 3 : index
    %c0_16 = arith.constant 0 : index
    %c0_17 = arith.constant 0 : index
    %9 = vector.load %arg1[%c0_15, %c3, %c0_16, %c0_17] : memref<1x4x32x306xbf16, #tpu.memory_space<vmem>>, vector<1x1x32x306xbf16>
    %10 = vector.shape_cast %9 : vector<1x1x32x306xbf16> to vector<32x306xbf16>
    %11 = vector.extract_strided_slice %4 {offsets = [0, 0], sizes = [32, 272], strides = [1, 1]} : vector<32x306xbf16> to vector<32x272xbf16>
    %12 = vector.extract_strided_slice %6 {offsets = [0, 0], sizes = [32, 272], strides = [1, 1]} : vector<32x306xbf16> to vector<32x272xbf16>
    %13 = vector.extract_strided_slice %4 {offsets = [0, 1], sizes = [32, 272], strides = [1, 1]} : vector<32x306xbf16> to vector<32x272xbf16>
    %14 = vector.extract_strided_slice %8 {offsets = [0, 0], sizes = [32, 272], strides = [1, 1]} : vector<32x306xbf16> to vector<32x272xbf16>
    %15 = vector.extract_strided_slice %10 {offsets = [0, 0], sizes = [32, 272], strides = [1, 1]} : vector<32x306xbf16> to vector<32x272xbf16>
    %16 = vector.extract_strided_slice %8 {offsets = [0, 1], sizes = [32, 272], strides = [1, 1]} : vector<32x306xbf16> to vector<32x272xbf16>
    %17 = vector.extract_strided_slice %4 {offsets = [0, 17], sizes = [32, 272], strides = [1, 1]} : vector<32x306xbf16> to vector<32x272xbf16>
    %18 = vector.extract_strided_slice %6 {offsets = [0, 17], sizes = [32, 272], strides = [1, 1]} : vector<32x306xbf16> to vector<32x272xbf16>
    %19 = vector.extract_strided_slice %4 {offsets = [0, 18], sizes = [32, 272], strides = [1, 1]} : vector<32x306xbf16> to vector<32x272xbf16>
    %20 = tpu.concatenate %11, %12, %13, %14, %15, %16, %17, %18, %19 in 0 : vector<32x272xbf16>, vector<32x272xbf16>, vector<32x272xbf16>, vector<32x272xbf16>, vector<32x272xbf16>, vector<32x272xbf16>, vector<32x272xbf16>, vector<32x272xbf16>, vector<32x272xbf16> -> vector<288x272xbf16>
    %cst = arith.constant dense<0.000000e+00> : vector<64x272xf32>
    %21 = tpu.matmul %0, %20, %cst {dimension_numbers = #tpu.dot_dimension_numbers<[1], [0], [0], [1], [0, 0, 1, 1], [], []>} : vector<64x288xbf16>, vector<288x272xbf16>, vector<64x272xf32> -> vector<64x272xf32>
    %22 = vector.broadcast %1 : vector<64x1xf32> to vector<64x272xf32>
    %23 = arith.mulf %21, %22 : vector<64x272xf32>
    %24 = vector.broadcast %2 : vector<64x1xf32> to vector<64x272xf32>
    %25 = arith.addf %23, %24 : vector<64x272xf32>
    %cst_18 = arith.constant 0.000000e+00 : f32
    %26 = vector.broadcast %cst_18 : f32 to vector<64x272xf32>
    %27 = arith.maximumf %25, %26 : vector<64x272xf32>
    %28 = vector.extract_strided_slice %6 {offsets = [0, 0], sizes = [32, 272], strides = [1, 1]} : vector<32x306xbf16> to vector<32x272xbf16>
    %29 = vector.extract_strided_slice %4 {offsets = [0, 1], sizes = [32, 272], strides = [1, 1]} : vector<32x306xbf16> to vector<32x272xbf16>
    %30 = vector.extract_strided_slice %6 {offsets = [0, 1], sizes = [32, 272], strides = [1, 1]} : vector<32x306xbf16> to vector<32x272xbf16>
    %31 = vector.extract_strided_slice %10 {offsets = [0, 0], sizes = [32, 272], strides = [1, 1]} : vector<32x306xbf16> to vector<32x272xbf16>
    %32 = vector.extract_strided_slice %8 {offsets = [0, 1], sizes = [32, 272], strides = [1, 1]} : vector<32x306xbf16> to vector<32x272xbf16>
    %33 = vector.extract_strided_slice %10 {offsets = [0, 1], sizes = [32, 272], strides = [1, 1]} : vector<32x306xbf16> to vector<32x272xbf16>
    %34 = vector.extract_strided_slice %6 {offsets = [0, 17], sizes = [32, 272], strides = [1, 1]} : vector<32x306xbf16> to vector<32x272xbf16>
    %35 = vector.extract_strided_slice %4 {offsets = [0, 18], sizes = [32, 272], strides = [1, 1]} : vector<32x306xbf16> to vector<32x272xbf16>
    %36 = vector.extract_strided_slice %6 {offsets = [0, 18], sizes = [32, 272], strides = [1, 1]} : vector<32x306xbf16> to vector<32x272xbf16>
    %37 = tpu.concatenate %28, %29, %30, %31, %32, %33, %34, %35, %36 in 0 : vector<32x272xbf16>, vector<32x272xbf16>, vector<32x272xbf16>, vector<32x272xbf16>, vector<32x272xbf16>, vector<32x272xbf16>, vector<32x272xbf16>, vector<32x272xbf16>, vector<32x272xbf16> -> vector<288x272xbf16>
    %cst_19 = arith.constant dense<0.000000e+00> : vector<64x272xf32>
    %38 = tpu.matmul %0, %37, %cst_19 {dimension_numbers = #tpu.dot_dimension_numbers<[1], [0], [0], [1], [0, 0, 1, 1], [], []>} : vector<64x288xbf16>, vector<288x272xbf16>, vector<64x272xf32> -> vector<64x272xf32>
    %39 = vector.broadcast %1 : vector<64x1xf32> to vector<64x272xf32>
    %40 = arith.mulf %38, %39 : vector<64x272xf32>
    %41 = vector.broadcast %2 : vector<64x1xf32> to vector<64x272xf32>
    %42 = arith.addf %40, %41 : vector<64x272xf32>
    %cst_20 = arith.constant 0.000000e+00 : f32
    %43 = vector.broadcast %cst_20 : f32 to vector<64x272xf32>
    %44 = arith.maximumf %42, %43 : vector<64x272xf32>
    %45 = arith.maximumf %27, %44 : vector<64x272xf32>
    %46 = vector.extract_strided_slice %8 {offsets = [0, 0], sizes = [32, 272], strides = [1, 1]} : vector<32x306xbf16> to vector<32x272xbf16>
    %47 = vector.extract_strided_slice %10 {offsets = [0, 0], sizes = [32, 272], strides = [1, 1]} : vector<32x306xbf16> to vector<32x272xbf16>
    %48 = vector.extract_strided_slice %8 {offsets = [0, 1], sizes = [32, 272], strides = [1, 1]} : vector<32x306xbf16> to vector<32x272xbf16>
    %49 = vector.extract_strided_slice %4 {offsets = [0, 17], sizes = [32, 272], strides = [1, 1]} : vector<32x306xbf16> to vector<32x272xbf16>
    %50 = vector.extract_strided_slice %6 {offsets = [0, 17], sizes = [32, 272], strides = [1, 1]} : vector<32x306xbf16> to vector<32x272xbf16>
    %51 = vector.extract_strided_slice %4 {offsets = [0, 18], sizes = [32, 272], strides = [1, 1]} : vector<32x306xbf16> to vector<32x272xbf16>
    %52 = vector.extract_strided_slice %8 {offsets = [0, 17], sizes = [32, 272], strides = [1, 1]} : vector<32x306xbf16> to vector<32x272xbf16>
    %53 = vector.extract_strided_slice %10 {offsets = [0, 17], sizes = [32, 272], strides = [1, 1]} : vector<32x306xbf16> to vector<32x272xbf16>
    %54 = vector.extract_strided_slice %8 {offsets = [0, 18], sizes = [32, 272], strides = [1, 1]} : vector<32x306xbf16> to vector<32x272xbf16>
    %55 = tpu.concatenate %46, %47, %48, %49, %50, %51, %52, %53, %54 in 0 : vector<32x272xbf16>, vector<32x272xbf16>, vector<32x272xbf16>, vector<32x272xbf16>, vector<32x272xbf16>, vector<32x272xbf16>, vector<32x272xbf16>, vector<32x272xbf16>, vector<32x272xbf16> -> vector<288x272xbf16>
    %cst_21 = arith.constant dense<0.000000e+00> : vector<64x272xf32>
    %56 = tpu.matmul %0, %55, %cst_21 {dimension_numbers = #tpu.dot_dimension_numbers<[1], [0], [0], [1], [0, 0, 1, 1], [], []>} : vector<64x288xbf16>, vector<288x272xbf16>, vector<64x272xf32> -> vector<64x272xf32>
    %57 = vector.broadcast %1 : vector<64x1xf32> to vector<64x272xf32>
    %58 = arith.mulf %56, %57 : vector<64x272xf32>
    %59 = vector.broadcast %2 : vector<64x1xf32> to vector<64x272xf32>
    %60 = arith.addf %58, %59 : vector<64x272xf32>
    %cst_22 = arith.constant 0.000000e+00 : f32
    %61 = vector.broadcast %cst_22 : f32 to vector<64x272xf32>
    %62 = arith.maximumf %60, %61 : vector<64x272xf32>
    %63 = arith.maximumf %45, %62 : vector<64x272xf32>
    %64 = vector.extract_strided_slice %10 {offsets = [0, 0], sizes = [32, 272], strides = [1, 1]} : vector<32x306xbf16> to vector<32x272xbf16>
    %65 = vector.extract_strided_slice %8 {offsets = [0, 1], sizes = [32, 272], strides = [1, 1]} : vector<32x306xbf16> to vector<32x272xbf16>
    %66 = vector.extract_strided_slice %10 {offsets = [0, 1], sizes = [32, 272], strides = [1, 1]} : vector<32x306xbf16> to vector<32x272xbf16>
    %67 = vector.extract_strided_slice %6 {offsets = [0, 17], sizes = [32, 272], strides = [1, 1]} : vector<32x306xbf16> to vector<32x272xbf16>
    %68 = vector.extract_strided_slice %4 {offsets = [0, 18], sizes = [32, 272], strides = [1, 1]} : vector<32x306xbf16> to vector<32x272xbf16>
    %69 = vector.extract_strided_slice %6 {offsets = [0, 18], sizes = [32, 272], strides = [1, 1]} : vector<32x306xbf16> to vector<32x272xbf16>
    %70 = vector.extract_strided_slice %10 {offsets = [0, 17], sizes = [32, 272], strides = [1, 1]} : vector<32x306xbf16> to vector<32x272xbf16>
    %71 = vector.extract_strided_slice %8 {offsets = [0, 18], sizes = [32, 272], strides = [1, 1]} : vector<32x306xbf16> to vector<32x272xbf16>
    %72 = vector.extract_strided_slice %10 {offsets = [0, 18], sizes = [32, 272], strides = [1, 1]} : vector<32x306xbf16> to vector<32x272xbf16>
    %73 = tpu.concatenate %64, %65, %66, %67, %68, %69, %70, %71, %72 in 0 : vector<32x272xbf16>, vector<32x272xbf16>, vector<32x272xbf16>, vector<32x272xbf16>, vector<32x272xbf16>, vector<32x272xbf16>, vector<32x272xbf16>, vector<32x272xbf16>, vector<32x272xbf16> -> vector<288x272xbf16>
    %cst_23 = arith.constant dense<0.000000e+00> : vector<64x272xf32>
    %74 = tpu.matmul %0, %73, %cst_23 {dimension_numbers = #tpu.dot_dimension_numbers<[1], [0], [0], [1], [0, 0, 1, 1], [], []>} : vector<64x288xbf16>, vector<288x272xbf16>, vector<64x272xf32> -> vector<64x272xf32>
    %75 = vector.broadcast %1 : vector<64x1xf32> to vector<64x272xf32>
    %76 = arith.mulf %74, %75 : vector<64x272xf32>
    %77 = vector.broadcast %2 : vector<64x1xf32> to vector<64x272xf32>
    %78 = arith.addf %76, %77 : vector<64x272xf32>
    %cst_24 = arith.constant 0.000000e+00 : f32
    %79 = vector.broadcast %cst_24 : f32 to vector<64x272xf32>
    %80 = arith.maximumf %78, %79 : vector<64x272xf32>
    %81 = arith.maximumf %63, %80 : vector<64x272xf32>
    %82 = arith.truncf %81 : vector<64x272xf32> to vector<64x272xbf16>
    %c0_25 = arith.constant 0 : index
    %c0_26 = arith.constant 0 : index
    %c0_27 = arith.constant 0 : index
    %83 = vector.load %arg5[%c0_25, %c0_26, %c0_27] : memref<1x64x272xbf16, #tpu.memory_space<vmem>>, vector<1x64x272xbf16>
    %84 = vector.shape_cast %83 : vector<1x64x272xbf16> to vector<64x272xbf16>
    %85 = vector.shape_cast %82 : vector<64x272xbf16> to vector<1x64x272xbf16>
    tpu.vector_store %arg5[%c0_25, %c0_26, %c0_27], %85 {strides = array<i32>} : memref<1x64x272xbf16, #tpu.memory_space<vmem>>, vector<1x64x272xbf16>,
    return
  }
  func.func @transform_0(%arg0: i32) -> (i32, i32, i32, i32) {
    %c0_i32 = arith.constant 0 : i32
    %c0_i32_0 = arith.constant 0 : i32
    %c0_i32_1 = arith.constant 0 : i32
    %c0_i32_2 = arith.constant 0 : i32
    return %arg0, %c0_i32, %c0_i32_0, %c0_i32_1 : i32, i32, i32, i32
  }
  func.func @transform_1(%arg0: i32) -> (i32, i32) {
    %c0_i32 = arith.constant 0 : i32
    %c0_i32_0 = arith.constant 0 : i32
    %c0_i32_1 = arith.constant 0 : i32
    return %c0_i32, %c0_i32_0 : i32, i32
  }
  func.func @transform_2(%arg0: i32) -> (i32, i32) {
    %c0_i32 = arith.constant 0 : i32
    %c0_i32_0 = arith.constant 0 : i32
    %c0_i32_1 = arith.constant 0 : i32
    return %c0_i32, %c0_i32_0 : i32, i32
  }
  func.func @transform_3(%arg0: i32) -> (i32, i32) {
    %c0_i32 = arith.constant 0 : i32
    %c0_i32_0 = arith.constant 0 : i32
    %c0_i32_1 = arith.constant 0 : i32
    return %c0_i32, %c0_i32_0 : i32, i32
  }
  func.func @transform_4(%arg0: i32) -> (i32, i32, i32) {
    %c0_i32 = arith.constant 0 : i32
    %c0_i32_0 = arith.constant 0 : i32
    %c0_i32_1 = arith.constant 0 : i32
    return %arg0, %c0_i32, %c0_i32_0 : i32, i32, i32
  }
}

module attributes {stable_mosaic.version = 11 : i64} {
  func.func @_classifier_kernel(%arg0: i32, %arg1: memref<2x16384xbf16, #tpu.memory_space<vmem>>, %arg2: memref<16384x128xbf16, #tpu.memory_space<vmem>>, %arg3: memref<1x128xf32, #tpu.memory_space<vmem>>, %arg4: memref<128x10xbf16, #tpu.memory_space<vmem>>, %arg5: memref<1x10xf32, #tpu.memory_space<vmem>>, %arg6: memref<2x10xf32, #tpu.memory_space<vmem>>) attributes {dimension_semantics = [#tpu.dimension_semantics<arbitrary>], iteration_bounds = array<i64: 1>, scalar_prefetch = 0 : i64, scratch_operands = 0 : i64, tpu.core_type = #tpu.core_type<tc>, window_params = [{pipeline_mode = #tpu.pipeline_mode<synchronous>, transform_indices = @transform_0, window_bounds = array<i64: 2, 16384>}, {pipeline_mode = #tpu.pipeline_mode<synchronous>, transform_indices = @transform_1, window_bounds = array<i64: 16384, 128>}, {pipeline_mode = #tpu.pipeline_mode<synchronous>, transform_indices = @transform_2, window_bounds = array<i64: 1, 128>}, {pipeline_mode = #tpu.pipeline_mode<synchronous>, transform_indices = @transform_3, window_bounds = array<i64: 128, 10>}, {pipeline_mode = #tpu.pipeline_mode<synchronous>, transform_indices = @transform_4, window_bounds = array<i64: 1, 10>}, {pipeline_mode = #tpu.pipeline_mode<synchronous>, transform_indices = @transform_5, window_bounds = array<i64: 2, 10>}]} {
    %c0 = arith.constant 0 : index
    %c0_0 = arith.constant 0 : index
    %0 = vector.load %arg1[%c0, %c0_0] : memref<2x16384xbf16, #tpu.memory_space<vmem>>, vector<2x16384xbf16>
    %c0_1 = arith.constant 0 : index
    %c0_2 = arith.constant 0 : index
    %1 = vector.load %arg2[%c0_1, %c0_2] : memref<16384x128xbf16, #tpu.memory_space<vmem>>, vector<16384x128xbf16>
    %cst = arith.constant dense<0.000000e+00> : vector<2x128xf32>
    %2 = tpu.matmul %0, %1, %cst {dimension_numbers = #tpu.dot_dimension_numbers<[1], [0], [0], [1], [0, 0, 1, 1], [], []>} : vector<2x16384xbf16>, vector<16384x128xbf16>, vector<2x128xf32> -> vector<2x128xf32>
    %c0_3 = arith.constant 0 : index
    %c0_4 = arith.constant 0 : index
    %3 = vector.load %arg3[%c0_3, %c0_4] : memref<1x128xf32, #tpu.memory_space<vmem>>, vector<1x128xf32>
    %4 = vector.broadcast %3 : vector<1x128xf32> to vector<2x128xf32>
    %5 = arith.addf %2, %4 : vector<2x128xf32>
    %cst_5 = arith.constant 0.000000e+00 : f32
    %6 = vector.broadcast %cst_5 : f32 to vector<2x128xf32>
    %7 = arith.maximumf %5, %6 : vector<2x128xf32>
    %8 = arith.truncf %7 : vector<2x128xf32> to vector<2x128xbf16>
    %c0_6 = arith.constant 0 : index
    %c0_7 = arith.constant 0 : index
    %9 = vector.load %arg4[%c0_6, %c0_7] : memref<128x10xbf16, #tpu.memory_space<vmem>>, vector<128x10xbf16>
    %cst_8 = arith.constant dense<0.000000e+00> : vector<2x10xf32>
    %10 = tpu.matmul %8, %9, %cst_8 {dimension_numbers = #tpu.dot_dimension_numbers<[1], [0], [0], [1], [0, 0, 1, 1], [], []>} : vector<2x128xbf16>, vector<128x10xbf16>, vector<2x10xf32> -> vector<2x10xf32>
    %c0_9 = arith.constant 0 : index
    %c0_10 = arith.constant 0 : index
    %11 = vector.load %arg5[%c0_9, %c0_10] : memref<1x10xf32, #tpu.memory_space<vmem>>, vector<1x10xf32>
    %12 = vector.broadcast %11 : vector<1x10xf32> to vector<2x10xf32>
    %13 = arith.addf %10, %12 : vector<2x10xf32>
    %c0_11 = arith.constant 0 : index
    %c0_12 = arith.constant 0 : index
    %14 = vector.load %arg6[%c0_11, %c0_12] : memref<2x10xf32, #tpu.memory_space<vmem>>, vector<2x10xf32>
    tpu.vector_store %arg6[%c0_11, %c0_12], %13 {strides = array<i32>} : memref<2x10xf32, #tpu.memory_space<vmem>>, vector<2x10xf32>,
    return
  }
  func.func @transform_0(%arg0: i32) -> (i32, i32) {
    %c0_i32 = arith.constant 0 : i32
    %c0_i32_0 = arith.constant 0 : i32
    %c0_i32_1 = arith.constant 0 : i32
    return %c0_i32, %c0_i32_0 : i32, i32
  }
  func.func @transform_1(%arg0: i32) -> (i32, i32) {
    %c0_i32 = arith.constant 0 : i32
    %c0_i32_0 = arith.constant 0 : i32
    %c0_i32_1 = arith.constant 0 : i32
    return %c0_i32, %c0_i32_0 : i32, i32
  }
  func.func @transform_2(%arg0: i32) -> (i32, i32) {
    %c0_i32 = arith.constant 0 : i32
    %c0_i32_0 = arith.constant 0 : i32
    %c0_i32_1 = arith.constant 0 : i32
    return %c0_i32, %c0_i32_0 : i32, i32
  }
  func.func @transform_3(%arg0: i32) -> (i32, i32) {
    %c0_i32 = arith.constant 0 : i32
    %c0_i32_0 = arith.constant 0 : i32
    %c0_i32_1 = arith.constant 0 : i32
    return %c0_i32, %c0_i32_0 : i32, i32
  }
  func.func @transform_4(%arg0: i32) -> (i32, i32) {
    %c0_i32 = arith.constant 0 : i32
    %c0_i32_0 = arith.constant 0 : i32
    %c0_i32_1 = arith.constant 0 : i32
    return %c0_i32, %c0_i32_0 : i32, i32
  }
  func.func @transform_5(%arg0: i32) -> (i32, i32) {
    %c0_i32 = arith.constant 0 : i32
    %c0_i32_0 = arith.constant 0 : i32
    %c0_i32_1 = arith.constant 0 : i32
    return %c0_i32, %c0_i32_0 : i32, i32
  }
}

</mosaic_0001>

<bundles_post_ra>
// kernel: simple_cnn_forward.3
= control target key start
LH: loop header
LB: loop body
LE: loop exit
PB: predicated region body
PF: predicated region fallthrough
CT: control target
= control target key end

     0   :  { %s2990_s15 = smov 0   ;;  %s4970_s0 = inlined_call_operand.vmem [shape: bf16[2,4,16,1122], index: 0, kind: input, shape index: {}]   ;;  %s4971_s1 = inlined_call_operand.vmem [shape: bf16[32,144], index: 1, kind: input, shape index: {}]   ;;  %s4972_s2 = inlined_call_operand.vmem [shape: f32[32,1], index: 2, kind: input, shape index: {}]   ;;  %s4973_s3 = inlined_call_operand.vmem [shape: f32[32,1], index: 3, kind: input, shape index: {}]   ;;  %s4974_s4 = inlined_call_operand.vmem [shape: bf16[2,32,1056], index: 4, kind: output, shape index: {}]  }
   0x1 LB: > { %s2698_s16 = sadd.s32 4294967295, %s2959_s15   ;;  %p2702_p0 = scmp.ge.s32.totalorder %s2959_s15, 1  ;;  %s2959_s15 = sphi %s2990_s15, %s14_s15  }
   0x2   : > { %p162_p1 = scmp.lt.s32.totalorder %s2959_s15, 3 }
   0x4   : > { %p163_p2 = pnand %p2702_p0, %p162_p1 }
   0x6   : > { %166 = sbr.rel (%p163_p2) target bundleno = 739 (0x2e3), region = 36 }
   0xb   : > { %p188_p3 = scmp.lt.s32.totalorder %s2698_s16, 1  ;;  %s2961_s21 = smov 95   ;;  %v3094_v15 = vld [vmem:[%s4971_s1 + $0x4] ss:$8 sps:$4 sm:$0xff]   ;;  %vm634_vm0 = vcmask 130048   ;;  %v4975_v29 = vmov 0  }
   0xc   : > { %s2962_s22 = smov 127   ;;  %s2963_s25 = smov 94   ;;  %2775 = vmatprep.mubr.msk.bf16.mxu0 %vm634_vm0, %v3094_v15  ;;  %2777 = vmatprep.mubr.msk.bf16.mxu1 %vm634_vm0, %v3094_v15  ;;  %vm527_vm1 = vcmask 777216   ;;  %vm364_vm2 = vcmask 1039360   ;;  %vm598_vm3 = vcmask 769024   ;;  %vm2626_vm4 = vcmask 257024  }
   0xd   : > { %s5167_s16 = smov (!%p188_p3, %s2698_s16), 1  ;;  %2871 = vset.pattern.permute.xlu0 %v4975_v29  ;;  %2872 = vset.pattern.permute.xlu1 %v4975_v29 }
   0xe   : > { %s2857_s17 = smul.u32 288, %s5167_s16 }
  0x10   : > { %s3004_s20 = scalar_lea.vmem %s4970_s0, %s2857_s17 }
  0x11   : > { %v3007_v0 = vld [vmem:[%s3004_s20 + $0x4c] ss:$36 sps:$4 sm:$0xff]   ;;  %v3020_v3 = vld [vmem:[%s3004_s20 + $0x54] ss:$36 sps:$4 sm:$0xff]   ;;  %v3030_v5 = vld [vmem:[%s3004_s20 + $0x4] ss:$36 sps:$4 sm:$0xff]  }
  0x12   : > { %v3010_v1 = vld [vmem:[%s3004_s20 + $0x48] ss:$36 sps:$4 sm:$0xff]   ;;  %547 = vrot.lane.b32.xlu0 %v3007_v0, %s2961_s21  ;;  %v3015_v2 = vld [vmem:[%s3004_s20 + $0x50] ss:$36 sps:$4 sm:$0xff]   ;;  %v3025_v4 = vld [vmem:[%s3004_s20 + $0x58] ss:$36 sps:$4 sm:$0xff]  }
  0x13   : > { %545 = vrot.lane.b32.xlu1 %v3010_v1, %s2961_s21  ;;  %v3035_v6 = vld [vmem:[%s3004_s20 + $0x8] ss:$36 sps:$4 sm:$0xff]   ;;  %v3040_v7 = vld [vmem:[%s3004_s20] ss:$36 sps:$4 sm:$0xff]   ;;  %v3050_v9 = vld [vmem:[%s3004_s20 + $0x10] ss:$36 sps:$4 sm:$0xff]  }
  0x14   : > { %v3045_v8 = vld [vmem:[%s3004_s20 + $0xc] ss:$36 sps:$4 sm:$0xff]   ;;  %v3055_v10 = vld [vmem:[%s3004_s20 + $0x94] ss:$36 sps:$4 sm:$0xff]   ;;  %v3070_v13 = vld [vmem:[%s3004_s20 + $0x9c] ss:$36 sps:$4 sm:$0xff]  }
  0x15   : > { %v3060_v11 = vld [vmem:[%s3004_s20 + $0x98] ss:$36 sps:$4 sm:$0xff]   ;;  %v3065_v12 = vld [vmem:[%s3004_s20 + $0x90] ss:$36 sps:$4 sm:$0xff]   ;;  %v3075_v14 = vld [vmem:[%s3004_s20 + $0xa0] ss:$36 sps:$4 sm:$0xff]  }
  0x16   : > { %549 = vrot.lane.b32.xlu0 %v3015_v2, %s2961_s21  ;;  %v3109_v16 = vld [vmem:[%s3004_s20 + $0x5c] ss:$36 sps:$4 sm:$0xff]   ;;  %v3119_v18 = vld [vmem:[%s3004_s20 + $0x64] ss:$36 sps:$4 sm:$0xff]   ;;  %v3129_v20 = vld [vmem:[%s3004_s20 + $0x14] ss:$36 sps:$4 sm:$0xff]  }
  0x17   : > { %551 = vrot.lane.b32.xlu1 %v3020_v3, %s2961_s21  ;;  %v3114_v17 = vld [vmem:[%s3004_s20 + $0x60] ss:$36 sps:$4 sm:$0xff]   ;;  %v3124_v19 = vld [vmem:[%s3004_s20 + $0x68] ss:$36 sps:$4 sm:$0xff]   ;;  %v3134_v21 = vld [vmem:[%s3004_s20 + $0x18] ss:$36 sps:$4 sm:$0xff]  }
  0x18   : > { %v3139_v22 = vld [vmem:[%s3004_s20 + $0x1c] ss:$36 sps:$4 sm:$0xff]   ;;  %v3149_v24 = vld [vmem:[%s3004_s20 + $0xa4] ss:$36 sps:$4 sm:$0xff]   ;;  %v3159_v26 = vld [vmem:[%s3004_s20 + $0xac] ss:$36 sps:$4 sm:$0xff]  }
  0x19   : > { %v3144_v23 = vld [vmem:[%s3004_s20 + $0x20] ss:$36 sps:$4 sm:$0xff]   ;;  %v3154_v25 = vld [vmem:[%s3004_s20 + $0xa8] ss:$36 sps:$4 sm:$0xff]   ;;  %v3164_v27 = vld [vmem:[%s3004_s20 + $0xb0] ss:$36 sps:$4 sm:$0xff]  }
  0x1a   : > { %553 = vrot.lane.b32.xlu0 %v3025_v4, %s2961_s21  ;;  %v3185_v28 = vld [vmem:[%s3004_s20 + $0xdc] ss:$36 sps:$4 sm:$0xff]   ;;  %v3214_v32 = vld [vmem:[%s3004_s20 + $0xe4] ss:$36 sps:$4 sm:$0xff]   ;;  %v3224_v34 = vld [vmem:[%s3004_s20 + $0xec] ss:$36 sps:$4 sm:$0xff]  }
  0x1b   : > { %511 = vrot.lane.b32.xlu1 %v3030_v5, %s2961_s21  ;;  %v3192_v30 = vld [vmem:[%s3004_s20 + $0xe0] ss:$36 sps:$4 sm:$0xff]   ;;  %v3197_v31 = vld [vmem:[%s3004_s20 + $0xd8] ss:$36 sps:$4 sm:$0xff]   ;;  %v3219_v33 = vld [vmem:[%s3004_s20 + $0xe8] ss:$36 sps:$4 sm:$0xff]  }
  0x1c   : > { %v3229_v35 = vld [vmem:[%s3004_s20 + $0xf0] ss:$36 sps:$4 sm:$0xff]   ;;  %v3282_v51 = vld [vmem:[%s3004_s20 + $0xf8] ss:$36 sps:$4 sm:$0xff]  }
  0x1d   : > { %v3276_v50 = vld [vmem:[%s3004_s20 + $0xf4] ss:$36 sps:$4 sm:$0xff]  }
  0x1e   : > { %513 = vrot.lane.b32.xlu0 %v3035_v6, %s2961_s21 }
  0x1f   : > { %509 = vrot.lane.b32.xlu1 %v3040_v7, %s2961_s21 }
  0x22   : > { %515 = vrot.lane.b32.xlu0 %v3045_v8, %s2961_s21 }
  0x23   : > { %517 = vrot.lane.b32.xlu1 %v3050_v9, %s2961_s21 }
  0x26   : > { %476 = vrot.lane.b32.xlu0 %v3055_v10, %s2962_s22 }
  0x27   : > { %478 = vrot.lane.b32.xlu1 %v3060_v11, %s2962_s22 }
  0x2a   : > { %474 = vrot.lane.b32.xlu0 %v3065_v12, %s2962_s22 }
  0x2b   : > { %480 = vrot.lane.b32.xlu1 %v3070_v13, %s2962_s22 }
  0x2e   : > { %482 = vrot.lane.b32.xlu0 %v3075_v14, %s2962_s22 }
  0x2f   : > { %348 = vrot.lane.b32.xlu1 %v3030_v5, %s2962_s22 }
  0x32   : > { %350 = vrot.lane.b32.xlu0 %v3035_v6, %s2962_s22 }
  0x33   : > { %346 = vrot.lane.b32.xlu1 %v3040_v7, %s2962_s22 }
  0x36   : > { %352 = vrot.lane.b32.xlu0 %v3045_v8, %s2962_s22 }
  0x37   : > { %354 = vrot.lane.b32.xlu1 %v3050_v9, %s2962_s22 }
  0x3a   : > { %582 = vrot.lane.b32.xlu0 %v3030_v5, %s2963_s25 }
  0x3b   : > { %584 = vrot.lane.b32.xlu1 %v3035_v6, %s2963_s25 }
  0x3e   : > { %580 = vrot.lane.b32.xlu0 %v3040_v7, %s2963_s25 }
  0x3f   : > { %586 = vrot.lane.b32.xlu1 %v3045_v8, %s2963_s25 }
  0x42   : > { %588 = vrot.lane.b32.xlu0 %v3050_v9, %s2963_s25 }
  0x43   : > { %555 = vrot.lane.b32.xlu1 %v3109_v16, %s2961_s21 }
  0x46   : > { %557 = vrot.lane.b32.xlu0 %v3114_v17, %s2961_s21 }
  0x47   : > { %559 = vrot.lane.b32.xlu1 %v3119_v18, %s2961_s21 }
  0x4a   : > { %561 = vrot.lane.b32.xlu0 %v3124_v19, %s2961_s21 }
  0x4b   : > { %519 = vrot.lane.b32.xlu1 %v3129_v20, %s2961_s21 }
  0x4e   : > { %521 = vrot.lane.b32.xlu0 %v3134_v21, %s2961_s21 }
  0x4f   : > { %523 = vrot.lane.b32.xlu1 %v3139_v22, %s2961_s21 }
  0x52   : > { %525 = vrot.lane.b32.xlu0 %v3144_v23, %s2961_s21 }
  0x53   : > { %484 = vrot.lane.b32.xlu1 %v3149_v24, %s2962_s22 }
  0x56   : > { %486 = vrot.lane.b32.xlu0 %v3154_v25, %s2962_s22 }
  0x57   : > { %488 = vrot.lane.b32.xlu1 %v3159_v26, %s2962_s22 }
  0x5a   : > { %490 = vrot.lane.b32.xlu0 %v3164_v27, %s2962_s22 }
  0x5b   : > { %356 = vrot.lane.b32.xlu1 %v3129_v20, %s2962_s22 }
  0x5e   : > { %358 = vrot.lane.b32.xlu0 %v3134_v21, %s2962_s22 }
  0x5f   : > { %360 = vrot.lane.b32.xlu1 %v3139_v22, %s2962_s22 }
  0x62   : > { %362 = vrot.lane.b32.xlu0 %v3144_v23, %s2962_s22 }
  0x63   : > { %590 = vrot.lane.b32.xlu1 %v3129_v20, %s2963_s25 }
  0x66   : > { %592 = vrot.lane.b32.xlu0 %v3134_v21, %s2963_s25 }
  0x67   : > { %594 = vrot.lane.b32.xlu1 %v3139_v22, %s2963_s25 }
  0x6a   : > { %596 = vrot.lane.b32.xlu0 %v3144_v23, %s2963_s25 }
  0x6b   : > { %1087 = vrot.lane.b32.xlu1 %v3185_v28, %s2962_s22 }
  0x6e   : > { %1089 = vrot.lane.b32.xlu0 %v3192_v30, %s2962_s22 }
  0x6f   : > { %1085 = vrot.lane.b32.xlu1 %v3197_v31, %s2962_s22 }
  0x72   : > { %1052 = vrot.lane.b32.xlu0 %v3007_v0, %s2962_s22 }
  0x73   : > { %1054 = vrot.lane.b32.xlu1 %v3015_v2, %s2962_s22 }
  0x76   : > { %1050 = vrot.lane.b32.xlu0 %v3010_v1, %s2962_s22 }
  0x77   : > { %1122 = vrot.lane.b32.xlu1 %v3007_v0, %s2963_s25 }
  0x7a   : > { %1124 = vrot.lane.b32.xlu0 %v3015_v2, %s2963_s25 }
  0x7b   : > { %1120 = vrot.lane.b32.xlu1 %v3010_v1, %s2963_s25 }
  0x7e   : > { %1091 = vrot.lane.b32.xlu0 %v3214_v32, %s2962_s22 }
  0x7f   : > { %1093 = vrot.lane.b32.xlu1 %v3219_v33, %s2962_s22 }
  0x82   : > { %1095 = vrot.lane.b32.xlu0 %v3224_v34, %s2962_s22 }
  0x83   : > { %1097 = vrot.lane.b32.xlu1 %v3229_v35, %s2962_s22 }
  0x84   : > { %v548_v36 = vpop.permute.xlu0 %547 }
  0x85   : > { %v546_v37 = vpop.permute.xlu1 %545 }
  0x86   : > { %1056 = vrot.lane.b32.xlu0 %v3020_v3, %s2962_s22  ;;  %v3243_v41 = vsel %vm527_vm1, %v546_v37, %v548_v36 }
  0x87   : > { %1058 = vrot.lane.b32.xlu1 %v3025_v4, %s2962_s22 }
  0x88   : > { %v550_v38 = vpop.permute.xlu0 %549 }
  0x89   : > { %v552_v39 = vpop.permute.xlu1 %551  ;;  %v3240_v40 = vsel %vm527_vm1, %v548_v36, %v550_v38 }
  0x8a   : > { %5022 = vst [vmem:[#allocation2_spill] sm:$0xff] %v3240_v40  ;;  %641 = vmatprep.subr.bf16.mxu0 %v3240_v40  ;;  %1060 = vrot.lane.b32.xlu0 %v3109_v16, %s2962_s22  ;;  %v3259_v45 = vsel %vm527_vm1, %v550_v38, %v552_v39 }
  0x8b   : > { %642 = vmatpush1.bf16.msra.mxu0 %v3243_v41  ;;  %1062 = vrot.lane.b32.xlu1 %v3114_v17, %s2962_s22 }
  0x8c   : > { %v3251_v42 = vpop.permute.xlu0 %553 }
  0x8d   : > { %v512_v43 = vpop.permute.xlu1 %511  ;;  %v3255_v44 = vsel %vm527_vm1, %v552_v39, %v3251_v42 }
  0x8e   : > { %694 = vmatprep.subr.bf16.mxu1 %v3255_v44  ;;  %1126 = vrot.lane.b32.xlu0 %v3020_v3, %s2963_s25 }
  0x8f   : > { %695 = vmatpush1.bf16.msra.mxu1 %v3259_v45  ;;  %1128 = vrot.lane.b32.xlu1 %v3025_v4, %s2963_s25 }
  0x90   : > { %v514_v46 = vpop.permute.xlu0 %513 }
  0x91   : > { %v510_v47 = vpop.permute.xlu1 %509  ;;  %v3267_v48 = vsel %vm527_vm1, %v512_v43, %v514_v46 }
  0x92   : > { %5023 = vst [vmem:[#allocation3_spill] sm:$0xff] %v3267_v48  ;;  %643 = vmatprep.subr.bf16.mxu0 %v3267_v48  ;;  %v3271_v49 = vsel %vm527_vm1, %v510_v47, %v512_v43  ;;  %1130 = vrot.lane.b32.xlu0 %v3109_v16, %s2963_s25 }
  0x93   : > { %5024 = vst [vmem:[#allocation4_spill] sm:$0xff] %v3271_v49  ;;  %644 = vmatpush1.bf16.msra.mxu0 %v3271_v49  ;;  %1132 = vrot.lane.b32.xlu1 %v3114_v17, %s2963_s25 }
  0x94   : > { %v516_v52 = vpop.permute.xlu0 %515 }
  0x95   : > { %v3284_v53 = vpop.permute.xlu1 %517  ;;  %v3287_v54 = vsel %vm527_vm1, %v514_v46, %v516_v52 }
  0x96   : > { %5025 = vst [vmem:[#allocation5_spill] sm:$0xff] %v3287_v54  ;;  %v3291_v55 = vsel %vm527_vm1, %v516_v52, %v3284_v53  ;;  %1099 = vrot.lane.b32.xlu0 %v3276_v50, %s2962_s22 }
  0x97   : > { %5026 = vst [vmem:[#allocation6_spill] sm:$0xff] %v3291_v55  ;;  %696 = vmatprep.subr.bf16.mxu1 %v3291_v55  ;;  %1101 = vrot.lane.b32.xlu1 %v3282_v51, %s2962_s22 }
  0x98   : > { %697 = vmatpush1.bf16.msra.mxu1 %v3287_v54  ;;  %v477_v56 = vpop.permute.xlu0 %476  ;;  %v3390_v54 = vld [vmem:[%s4971_s1] ss:$8 sps:$4 sm:$0xff]  }
  0x99   : > { %v479_v57 = vpop.permute.xlu1 %478 }
  0x9a   : > { %v3300_v58 = vsel %vm364_vm2, %v477_v56, %v479_v57  ;;  %1064 = vrot.lane.b32.xlu0 %v3119_v18, %s2962_s22 }
  0x9b   : > { %645 = vmatprep.subr.bf16.mxu0 %v3300_v58  ;;  %1066 = vrot.lane.b32.xlu1 %v3124_v19, %s2962_s22 }
  0x9c   : > { %v475_v59 = vpop.permute.xlu0 %474 }
  0x9d   : > { %v3308_v60 = vsel %vm364_vm2, %v475_v59, %v477_v56  ;;  %v481_v61 = vpop.permute.xlu1 %480 }
  0x9e   : > { %646 = vmatpush1.bf16.msra.mxu0 %v3308_v60  ;;  %1134 = vrot.lane.b32.xlu0 %v3119_v18, %s2963_s25  ;;  %v3325_v37 = vsel %vm364_vm2, %v479_v57, %v481_v61 }
  0x9f   : > { %647 = vmatprep.subr.bf16.mxu0 %v3185_v28  ;;  %1136 = vrot.lane.b32.xlu1 %v3124_v19, %s2963_s25 }
  0xa0   : > { %v3316_v62 = vpop.permute.xlu0 %482 }
  0xa1   : > { %v349_v63 = vpop.permute.xlu1 %348  ;;  %v3320_v36 = vsel %vm364_vm2, %v481_v61, %v3316_v62 }
  0xa2   : > { %648 = vmatpush1.bf16.msra.mxu0 %v3197_v31  ;;  %698 = vmatprep.subr.bf16.mxu1 %v3320_v36 }
  0xa3   : > { %699 = vmatpush1.bf16.msra.mxu1 %v3325_v37  ;;  %649 = vmatprep.subr.bf16.mxu0 %v3055_v10 }
  0xa4   : > { %v351_v38 = vpop.permute.xlu0 %350  ;;  %700 = vmatprep.subr.bf16.mxu1 %v3214_v32  ;;  %1597 = vrot.lane.b32.xlu0 %v3185_v28, %s2961_s21 }
  0xa5   : > { %v347_v39 = vpop.permute.xlu1 %346  ;;  %v3333_v43 = vsel %vm364_vm2, %v349_v63, %v351_v38  ;;  %1599 = vrot.lane.b32.xlu1 %v3192_v30, %s2961_s21 }
  0xa6   : > { %650 = vmatpush1.bf16.msra.mxu0 %v3065_v12  ;;  %v3346_v52 = vsel %vm364_vm2, %v347_v39, %v349_v63 }
  0xa7   : > { %651 = vmatprep.subr.bf16.mxu0 %v3333_v43  ;;  %701 = vmatpush1.bf16.msra.mxu1 %v3192_v30 }
  0xa8   : > { %v353_v46 = vpop.permute.xlu0 %352  ;;  %702 = vmatprep.subr.bf16.mxu1 %v3070_v13  ;;  %1595 = vrot.lane.b32.xlu0 %v3197_v31, %s2961_s21 }
  0xa9   : > { %v3343_v47 = vpop.permute.xlu1 %354  ;;  %1601 = vrot.lane.b32.xlu1 %v3214_v32, %s2961_s21  ;;  %v3364_v61 = vsel %vm364_vm2, %v351_v38, %v353_v46 }
  0xaa   : > { %652 = vmatpush1.bf16.msra.mxu0 %v3346_v52  ;;  %v3354_v56 = vsel %vm364_vm2, %v353_v46, %v3343_v47 }
  0xab   : > { %703 = vmatpush1.bf16.msra.mxu1 %v3060_v11  ;;  %653 = vmatprep.subr.bf16.mxu0 %v3007_v0 }
  0xac   : > { %v583_v57 = vpop.permute.xlu0 %582  ;;  %704 = vmatprep.subr.bf16.mxu1 %v3354_v56  ;;  %1603 = vrot.lane.b32.xlu0 %v3219_v33, %s2961_s21 }
  0xad   : > { %v585_v59 = vpop.permute.xlu1 %584  ;;  %1562 = vrot.lane.b32.xlu1 %v3055_v10, %s2961_s21 }
  0xae   : > { %654 = vmatpush1.bf16.msra.mxu0 %v3010_v1  ;;  %v3374_v29 = vsel %vm598_vm3, %v583_v57, %v585_v59 }
  0xaf   : > { %705 = vmatpush1.bf16.msra.mxu1 %v3364_v61  ;;  %655 = vmatprep.subr.bf16.mxu0 %v3030_v5 }
  0xb0   : > { %v581_v63 = vpop.permute.xlu0 %580  ;;  %706 = vmatprep.subr.bf16.mxu1 %v3020_v3  ;;  %1564 = vrot.lane.b32.xlu0 %v3060_v11, %s2961_s21 }
  0xb1   : > { %v587_v39 = vpop.permute.xlu1 %586  ;;  %1560 = vrot.lane.b32.xlu1 %v3065_v12, %s2961_s21  ;;  %v3385_v38 = vsel %vm598_vm3, %v581_v63, %v583_v57 }
  0xb2   : > { %656 = vmatpush1.bf16.msra.mxu0 %v3040_v7  ;;  %5027 = vst [vmem:[#allocation7_spill] sm:$0xff] %v3385_v38  ;;  %v3398_v7 = vld [vmem:[%s4971_s1 + $0x14] ss:$8 sps:$4 sm:$0xff]   ;;  %v3415_v49 = vsel %vm598_vm3, %v585_v59, %v587_v39 }
  0xb3   : > { %671 = vmatprep.subr.bf16.mxu0 %v3374_v29  ;;  %707 = vmatpush1.bf16.msra.mxu1 %v3015_v2 }
  0xb4   : > { %v3379_v5 = vpop.permute.xlu0 %588  ;;  %708 = vmatprep.subr.bf16.mxu1 %v3045_v8  ;;  %1566 = vrot.lane.b32.xlu0 %v3070_v13, %s2961_s21 }
  0xb5   : > { %v556_v46 = vpop.permute.xlu1 %555  ;;  %1568 = vrot.lane.b32.xlu1 %v3075_v14, %s2961_s21  ;;  %v3402_v8 = vsel %vm598_vm3, %v587_v39, %v3379_v5 }
  0xb6   : > { %672 = vmatpush2.bf16.msra.mxu0 %v3385_v38 }
  0xb7   : > { %709 = vmatpush1.bf16.msra.mxu1 %v3035_v6  ;;  %v3419_v6 = vsel %vm527_vm1, %v3251_v42, %v556_v46  ;;  %v3439_v42 = vld [vmem:[%s4971_s1 + $0x10] ss:$8 sps:$4 sm:$0xff]  }
  0xb8   : > { %v558_v57 = vpop.permute.xlu0 %557  ;;  %724 = vmatprep.subr.bf16.mxu1 %v3402_v8  ;;  %1632 = vrot.lane.b32.xlu0 %v3055_v10, %s2963_s25 }
  0xb9   : > { %v3409_v63 = vsel %vm527_vm1, %v556_v46, %v558_v57  ;;  %v560_v55 = vpop.permute.xlu1 %559  ;;  %674 = vmatmul.mubr.bf16.vlgmr.msra.gmra.mxu0 %v3390_v54  ;;  %1634 = vrot.lane.b32.xlu1 %v3060_v11, %s2963_s25 }
  0xba   : > { %747 = vmatprep.subr.bf16.mxu0 %v3409_v63  ;;  %2776 = vmatprep.mubr.msk.bf16.mxu0 %vm634_vm0, %v3398_v7  ;;  %v3442_v39 = vsel %vm527_vm1, %v558_v57, %v560_v55 }
  0xbb   : > { %725 = vmatpush2.bf16.msra.mxu1 %v3415_v49  ;;  %748 = vmatpush1.bf16.msra.mxu0 %v3419_v6  ;;  %5030 = vst [vmem:[#allocation10_spill] sm:$0xff] %v3442_v39 }
  0xbc   : > { %v3426_v10 = vpop.permute.xlu0 %561  ;;  %1630 = vrot.lane.b32.xlu0 %v3065_v12, %s2963_s25 }
  0xbd   : > { %5028 = vst [vmem:[#allocation8_spill] sm:$0xff] %v3426_v10  ;;  %v520_v11 = vpop.permute.xlu1 %519  ;;  %v3432_v59 = vsel %vm527_vm1, %v560_v55, %v3426_v10  ;;  %1636 = vrot.lane.b32.xlu1 %v3070_v13, %s2963_s25 }
  0xbe   : > { %5029 = vst [vmem:[#allocation9_spill] sm:$0xff] %v3432_v59  ;;  %800 = vmatprep.subr.bf16.mxu1 %v3432_v59  ;;  %727 = vmatmul.mubr.bf16.vlgmr.msra.gmra.mxu1 %v3390_v54  ;;  %v3459_v55 = vsel %vm527_vm1, %v3284_v53, %v520_v11 }
  0xbf   : > { %801 = vmatpush1.bf16.msra.mxu1 %v3442_v39  ;;  %2778 = vmatprep.mubr.msk.bf16.mxu1 %vm634_vm0, %v3398_v7  ;;  %5032 = vst [vmem:[#allocation12_spill] sm:$0xff] %v3459_v55 }
  0xc0   : > { %v522_v12 = vpop.permute.xlu0 %521  ;;  %1638 = vrot.lane.b32.xlu0 %v3075_v14, %s2963_s25 }
  0xc1   : > { %v524_v13 = vpop.permute.xlu1 %523  ;;  %v3452_v46 = vsel %vm527_vm1, %v520_v11, %v522_v12  ;;  %1605 = vrot.lane.b32.xlu1 %v3224_v34, %s2961_s21  ;;  %684 = vmatmul.mubr.bf16.gmra.mxu0 %v3439_v42 }
  0xc2   : > { %5031 = vst [vmem:[#allocation11_spill] sm:$0xff] %v3452_v46  ;;  %749 = vmatprep.subr.bf16.mxu0 %v3452_v46  ;;  %2779 = vmatprep.mubr.msk.bf16.mxu0 %vm634_vm0, %v3094_v15  ;;  %v3476_v53 = vsel %vm527_vm1, %v522_v12, %v524_v13 }
  0xc3   : > { %750 = vmatpush1.bf16.msra.mxu0 %v3459_v55  ;;  %5035 = vst [vmem:[#allocation15_spill] sm:$0xff] %v3476_v53 }
  0xc4   : > { %v3465_v57 = vpop.permute.xlu0 %525  ;;  %1607 = vrot.lane.b32.xlu0 %v3229_v35, %s2961_s21 }
  0xc5   : > { %5033 = vst [vmem:[#allocation13_spill] sm:$0xff] %v3465_v57  ;;  %v485_v48 = vpop.permute.xlu1 %484  ;;  %v3471_v39 = vsel %vm527_vm1, %v524_v13, %v3465_v57  ;;  %1609 = vrot.lane.b32.xlu1 %v3276_v50, %s2961_s21 }
  0xc6   : > { %5034 = vst [vmem:[#allocation14_spill] sm:$0xff] %v3471_v39  ;;  %802 = vmatprep.subr.bf16.mxu1 %v3471_v39  ;;  %737 = vmatmul.mubr.bf16.gmra.mxu1 %v3439_v42  ;;  %v3492_v12 = vsel %vm364_vm2, %v3316_v62, %v485_v48 }
  0xc7   : > { %803 = vmatpush1.bf16.msra.mxu1 %v3476_v53  ;;  %2781 = vmatprep.mubr.msk.bf16.mxu1 %vm634_vm0, %v3094_v15 }
  0xc8   : > { %v487_v11 = vpop.permute.xlu0 %486  ;;  %1611 = vrot.lane.b32.xlu0 %v3282_v51, %s2961_s21 }
  0xc9   : > { %v3486_v55 = vsel %vm364_vm2, %v485_v48, %v487_v11  ;;  %v489_v46 = vpop.permute.xlu1 %488  ;;  %1570 = vrot.lane.b32.xlu1 %v3149_v24, %s2961_s21 }
  0xca   : > { %751 = vmatprep.subr.bf16.mxu0 %v3486_v55  ;;  %v3508_v48 = vsel %vm364_vm2, %v487_v11, %v489_v46 }
  0xcb   : > { %752 = vmatpush1.bf16.msra.mxu0 %v3492_v12  ;;  %5038 = vst [vmem:[#allocation18_spill] sm:$0xff] %v3508_v48 }
  0xcc   : > { %v3496_v13 = vpop.permute.xlu0 %490  ;;  %753 = vmatprep.subr.bf16.mxu0 %v3224_v34  ;;  %1572 = vrot.lane.b32.xlu0 %v3154_v25, %s2961_s21 }
  0xcd   : > { %5036 = vst [vmem:[#allocation16_spill] sm:$0xff] %v3496_v13  ;;  %v3503_v53 = vsel %vm364_vm2, %v489_v46, %v3496_v13  ;;  %1574 = vrot.lane.b32.xlu1 %v3159_v26, %s2961_s21  ;;  %v357_v62 = vpop.permute.xlu1 %356 }
  0xce   : > { %5037 = vst [vmem:[#allocation17_spill] sm:$0xff] %v3503_v53  ;;  %804 = vmatprep.subr.bf16.mxu1 %v3503_v53 }
  0xcf   : > { %754 = vmatpush1.bf16.msra.mxu0 %v3219_v33  ;;  %805 = vmatpush1.bf16.msra.mxu1 %v3508_v48 }
  0xd0   : > { %v359_v39 = vpop.permute.xlu0 %358  ;;  %755 = vmatprep.subr.bf16.mxu0 %v3149_v24  ;;  %806 = vmatprep.subr.bf16.mxu1 %v3276_v50 }
  0xd1   : > { %v3516_v59 = vsel %vm364_vm2, %v357_v62, %v359_v39  ;;  %1576 = vrot.lane.b32.xlu0 %v3164_v27, %s2961_s21  ;;  %1640 = vrot.lane.b32.xlu1 %v3149_v24, %s2963_s25  ;;  %v361_v46 = vpop.permute.xlu1 %360 }
  0xd2   : > { %v3549_v24 = vsel %vm364_vm2, %v359_v39, %v361_v46 }
  0xd3   : > { %756 = vmatpush1.bf16.msra.mxu0 %v3075_v14  ;;  %807 = vmatpush1.bf16.msra.mxu1 %v3229_v35  ;;  %v3538_v14 = vsel %vm364_vm2, %v3343_v47, %v357_v62 }
  0xd4   : > { %v3524_v11 = vpop.permute.xlu0 %362  ;;  %757 = vmatprep.subr.bf16.mxu0 %v3516_v59  ;;  %808 = vmatprep.subr.bf16.mxu1 %v3159_v26 }
  0xd5   : > { %v3530_v48 = vsel %vm364_vm2, %v361_v46, %v3524_v11  ;;  %1642 = vrot.lane.b32.xlu0 %v3154_v25, %s2963_s25  ;;  %1644 = vrot.lane.b32.xlu1 %v3159_v26, %s2963_s25  ;;  %v591_v47 = vpop.permute.xlu1 %590 }
  0xd7   : > { %758 = vmatpush1.bf16.msra.mxu0 %v3538_v14  ;;  %809 = vmatpush1.bf16.msra.mxu1 %v3154_v25 }
  0xd8   : > { %759 = vmatprep.subr.bf16.mxu0 %v3109_v16  ;;  %810 = vmatprep.subr.bf16.mxu1 %v3530_v48  ;;  %v593_v26 = vpop.permute.xlu0 %592 }
  0xd9   : > { %1646 = vrot.lane.b32.xlu0 %v3164_v27, %s2963_s25  ;;  %2072 = vrot.lane.b32.xlu1 %v3185_v28, %s2963_s25  ;;  %v3556_v25 = vsel %vm598_vm3, %v591_v47, %v593_v26  ;;  %v595_v62 = vpop.permute.xlu1 %594 }
  0xda   : > { %v3589_v46 = vsel %vm598_vm3, %v593_v26, %v595_v62  ;;  %v204_v26 = vld [vmem:[%s4972_s2 + $0x8] sm:$0xff] }
  0xdb   : > { %760 = vmatpush1.bf16.msra.mxu0 %v3025_v4  ;;  %811 = vmatpush1.bf16.msra.mxu1 %v3549_v24  ;;  %5042 = vst [vmem:[#allocation21_spill] sm:$0xff] %v3589_v46 }
  0xdc   : > { %761 = vmatprep.subr.bf16.mxu0 %v3129_v20  ;;  %812 = vmatprep.subr.bf16.mxu1 %v3119_v18  ;;  %v3564_v39 = vpop.permute.xlu0 %596 }
  0xdd   : > { %2074 = vrot.lane.b32.xlu0 %v3192_v30, %s2963_s25  ;;  %2070 = vrot.lane.b32.xlu1 %v3197_v31, %s2963_s25  ;;  %5039 = vst [vmem:[#allocation19_spill] sm:$0xff] %v3564_v39  ;;  %v3570_v20 = vsel %vm598_vm3, %v595_v62, %v3564_v39 }
  0xde   : > { %5040 = vst [vmem:[#allocation20_spill] sm:$0xff] %v3570_v20 }
  0xdf   : > { %762 = vmatpush1.bf16.msra.mxu0 %v3050_v9  ;;  %813 = vmatpush1.bf16.msra.mxu1 %v3114_v17  ;;  %v3578_v9 = vsel %vm598_vm3, %v3379_v5, %v591_v47  ;;  %v203_v5 = vld [vmem:[%s4972_s2] sm:$0xff] }
  0xe0   : > { %777 = vmatprep.subr.bf16.mxu0 %v3556_v25  ;;  %814 = vmatprep.subr.bf16.mxu1 %v3139_v22  ;;  %v5041_v22 = vmov 0   ;;  %v3611_v47 = vpop.permute.xlu0 %1089 }
  0xe1   : > { %2076 = vrot.lane.b32.xlu0 %v3214_v32, %s2963_s25  ;;  %2078 = vrot.lane.b32.xlu1 %v3219_v33, %s2963_s25 }
  0xe3   : > { %778 = vmatpush2.bf16.msra.mxu0 %v3578_v9  ;;  %815 = vmatpush1.bf16.msra.mxu1 %v3134_v21  ;;  %v1088_v21 = vpop.permute.xlu1 %1087 }
  0xe4   : > { %830 = vmatprep.subr.bf16.mxu1 %v3570_v20  ;;  %853 = vmatprep.subr.bf16.mxu0 %v5041_v22  ;;  %v3617_v62 = vsel %vm364_vm2, %v1088_v21, %v3611_v47 }
  0xe5   : > { %2080 = vrot.lane.b32.xlu0 %v3224_v34, %s2963_s25  ;;  %2082 = vrot.lane.b32.xlu1 %v3229_v35, %s2963_s25  ;;  %5043 = vst [vmem:[#allocation22_spill] sm:$0xff] %v3617_v62 }
  0xe6   : > { %780 = vmatmul.mubr.bf16.vlgmr.msra.gmra.mxu0 %v3390_v54 }
  0xe7   : > { %831 = vmatpush2.bf16.msra.mxu1 %v3589_v46  ;;  %854 = vmatpush1.bf16.msra.mxu0 %v3426_v10 }
  0xe8   : > { %1155 = vmatprep.subr.bf16.mxu1 %v3374_v29  ;;  %855 = vmatprep.subr.bf16.mxu0 %v5041_v22 }
  0xe9   : > { %2780 = vmatprep.mubr.msk.bf16.mxu0 %vm634_vm0, %v3398_v7  ;;  %2084 = vrot.lane.b32.xlu0 %v3276_v50, %s2963_s25 }
  0xea   : > { %833 = vmatmul.mubr.bf16.vlgmr.msra.gmra.mxu1 %v3390_v54  ;;  %2086 = vrot.lane.b32.xlu1 %v3282_v51, %s2963_s25 }
  0xeb   : > { %856 = vmatpush1.bf16.msra.mxu0 %v3465_v57  ;;  %1156 = vmatpush1.bf16.msra.mxu1 %v3385_v38  ;;  %v206_v57 = vld [vmem:[%s4972_s2 + $0x18] sm:$0xff]  ;;  %v1086_v38 = vpop.permute.xlu1 %1085 }
  0xec   : > { %1157 = vmatprep.subr.bf16.mxu1 %v3240_v40  ;;  %857 = vmatprep.subr.bf16.mxu0 %v5041_v22  ;;  %v205_v40 = vld [vmem:[%s4972_s2 + $0x10] sm:$0xff] }
  0xed   : > { %2782 = vmatprep.mubr.msk.bf16.mxu1 %vm634_vm0, %v3398_v7  ;;  %904 = vperm.xlu0 %2871, %v203_v5   ;;  %v3635_v5 = vsel %vm364_vm2, %v1086_v38, %v1088_v21  ;;  %v210_v38 = vld [vmem:[%s4973_s3 + $0x18] sm:$0xff]  ;;  %v1053_v21 = vpop.permute.xlu0 %1052 }
  0xee   : > { %790 = vmatmul.mubr.bf16.gmra.mxu0 %v3439_v42  ;;  %909 = vperm.xlu1 %2872, %v204_v26   ;;  %5044 = vst [vmem:[#allocation23_spill] sm:$0xff] %v3635_v5  ;;  %v208_v26 = vld [vmem:[%s4973_s3 + $0x8] sm:$0xff] }
  0xef   : > { %858 = vmatpush1.bf16.msra.mxu0 %v3496_v13  ;;  %1158 = vmatpush1.bf16.msra.mxu1 %v3243_v41 }
  0xf0   : > { %1159 = vmatprep.subr.bf16.mxu1 %v3617_v62  ;;  %859 = vmatprep.subr.bf16.mxu0 %v5041_v22 }
  0xf1   : > { %919 = vperm.xlu0 %2871, %v206_v57   ;;  %2783 = vmatprep.mubr.msk.bf16.mxu0 %vm634_vm0, %v3094_v15  ;;  %v207_v57 = vld [vmem:[%s4973_s3] sm:$0xff] }
  0xf2   : > { %843 = vmatmul.mubr.bf16.gmra.mxu1 %v3439_v42  ;;  %914 = vperm.xlu1 %2872, %v205_v40   ;;  %v3650_v40 = vpop.permute.xlu1 %1054 }
  0xf3   : > { %860 = vmatpush1.bf16.msra.mxu0 %v3282_v51  ;;  %1160 = vmatpush1.bf16.msra.mxu1 %v3635_v5  ;;  %v209_v5 = vld [vmem:[%s4973_s3 + $0x10] sm:$0xff] }
  0xf4   : > { %1161 = vmatprep.subr.bf16.mxu1 %v3300_v58  ;;  %861 = vmatprep.subr.bf16.mxu0 %v5041_v22 }
  0xf5   : > { %965 = vperm.xlu0 %2871, %v208_v26   ;;  %2785 = vmatprep.mubr.msk.bf16.mxu1 %vm634_vm0, %v3094_v15  ;;  %v1069_v26 = vsel %vm364_vm2, %v1053_v21, %v3650_v40 }
  0xf6   : > { %960 = vperm.xlu1 %2872, %v207_v57   ;;  %v1051_v57 = vpop.permute.xlu0 %1050 }
  0xf7   : > { %862 = vmatpush1.bf16.msra.mxu0 %v3164_v27  ;;  %1162 = vmatpush1.bf16.msra.mxu1 %v3308_v60  ;;  %v1123_v27 = vpop.permute.xlu1 %1122  ;;  %v1068_v62 = vsel %vm364_vm2, %v1051_v57, %v1053_v21 }
  0xf8   : > { %863 = vmatprep.subr.bf16.mxu0 %v5041_v22  ;;  %1163 = vmatprep.subr.bf16.mxu1 %v3185_v28 }
  0xf9   : > { %975 = vperm.xlu0 %2871, %v210_v38  }
  0xfa   : > { %970 = vperm.xlu1 %2872, %v209_v5   ;;  %v3673_v5 = vpop.permute.xlu0 %1124 }
  0xfb   : > { %864 = vmatpush1.bf16.msra.mxu0 %v3524_v11  ;;  %1164 = vmatpush1.bf16.msra.mxu1 %v3197_v31  ;;  %v1121_v38 = vpop.permute.xlu1 %1120  ;;  %v3679_v21 = vsel %vm598_vm3, %v1123_v27, %v3673_v5 }
  0xfc   : > { %1165 = vmatprep.subr.bf16.mxu1 %v1069_v26  ;;  %865 = vmatprep.subr.bf16.mxu0 %v5041_v22 }
  0xff   : > { %866 = vmatpush1.bf16.msra.mxu0 %v3124_v19  ;;  %1166 = vmatpush1.bf16.msra.mxu1 %v1068_v62  ;;  %v1094_v62 = vpop.permute.xlu1 %1093 }
 0x100   : > { %1167 = vmatprep.subr.bf16.mxu1 %v3333_v43  ;;  %867 = vmatprep.subr.bf16.mxu0 %v5041_v22 }
 0x103   : > { %868 = vmatpush1.bf16.msra.mxu0 %v3144_v23  ;;  %1168 = vmatpush1.bf16.msra.mxu1 %v3346_v52  ;;  %v3686_v23 = vsel %vm598_vm3, %v1121_v38, %v1123_v27  ;;  %v3693_v43 = vpop.permute.xlu1 %1097 }
 0x104   : > { %883 = vmatprep.subr.bf16.mxu0 %v5041_v22  ;;  %1169 = vmatprep.subr.bf16.mxu1 %v3007_v0  ;;  %5045 = vst [vmem:[#allocation24_spill] sm:$0xff] %v3686_v23  ;;  %v1092_v0 = vpop.permute.xlu0 %1091 }
 0x105   : > { %v3713_v27 = vsel %vm364_vm2, %v3611_v47, %v1092_v0 }
 0x106   : > { %5048 = vst [vmem:[#allocation27_spill] sm:$0xff] %v3713_v27 }
 0x107   : > { %884 = vmatpush2.bf16.msra.mxu0 %v3564_v39  ;;  %1170 = vmatpush1.bf16.msra.mxu1 %v3010_v1  ;;  %v3696_v1 = vsel %vm364_vm2, %v1092_v0, %v1094_v62  ;;  %v1059_v57 = vpop.permute.xlu1 %1058 }
 0x108   : > { %1185 = vmatprep.subr.bf16.mxu1 %v3679_v21  ;;  %1208 = vmatprep.subr.bf16.mxu0 %v3402_v8  ;;  %5046 = vst [vmem:[#allocation25_spill] sm:$0xff] %v3696_v1  ;;  %v1096_v52 = vpop.permute.xlu0 %1095 }
 0x109   : > { %v3709_v26 = vsel %vm364_vm2, %v1096_v52, %v3693_v43 }
 0x10a   : > { %886 = vmatmul.mubr.bf16.vlgmr.msra.gmra.mxu0 %v3390_v54  ;;  %5047 = vst [vmem:[#allocation26_spill] sm:$0xff] %v3709_v26 }
 0x10b   : > { %1186 = vmatpush2.bf16.msra.mxu1 %v3686_v23  ;;  %1209 = vmatpush1.bf16.msra.mxu0 %v3415_v49  ;;  %v3730_v47 = vpop.permute.xlu1 %1062 }
 0x10c   : > { %1210 = vmatprep.subr.bf16.mxu0 %v3255_v44  ;;  %1261 = vmatprep.subr.bf16.mxu1 %v3556_v25  ;;  %v1057_v38 = vpop.permute.xlu0 %1056 }
 0x10d   : > { %2784 = vmatprep.mubr.msk.bf16.mxu0 %vm634_vm0, %v3398_v7  ;;  %v1071_v0 = vsel %vm364_vm2, %v1057_v38, %v1059_v57 }
 0x10e   : > { %1188 = vmatmul.mubr.bf16.vlgmr.msra.gmra.mxu1 %v3390_v54 }
 0x10f   : > { %1211 = vmatpush1.bf16.msra.mxu0 %v3259_v45  ;;  %1262 = vmatpush1.bf16.msra.mxu1 %v3578_v9 }
 0x110   : > { %1263 = vmatprep.subr.bf16.mxu1 %v3409_v63  ;;  %1212 = vmatprep.subr.bf16.mxu0 %v3696_v1  ;;  %v3723_v1 = vsel %vm364_vm2, %v1094_v62, %v1096_v52  ;;  %v1070_v52 = vsel %vm364_vm2, %v3650_v40, %v1057_v38 }
 0x111   : > { %2786 = vmatprep.mubr.msk.bf16.mxu1 %vm634_vm0, %v3398_v7  ;;  %5049 = vst [vmem:[#allocation28_spill] sm:$0xff] %v3723_v1 }
 0x112   : > { %894 = vmatmul.mubr.bf16.gmra.mxu0 %v3439_v42 }
 0x113   : > { %1213 = vmatpush1.bf16.msra.mxu0 %v3713_v27  ;;  %1264 = vmatpush1.bf16.msra.mxu1 %v3419_v6 }
 0x114   : > { %1214 = vmatprep.subr.bf16.mxu0 %v3320_v36  ;;  %1265 = vmatprep.subr.bf16.mxu1 %v3709_v26  ;;  %v1061_v26 = vpop.permute.xlu0 %1060 }
 0x115   : > { %2787 = vmatprep.mubr.msk.bf16.mxu0 %vm634_vm0, %v3094_v15  ;;  %v1073_v62 = vsel %vm364_vm2, %v1061_v26, %v3730_v47  ;;  %v1072_v23 = vsel %vm364_vm2, %v1059_v57, %v1061_v26 }
 0x116   : > { %1198 = vmatmul.mubr.bf16.gmra.mxu1 %v3439_v42 }
 0x117   : > { %1215 = vmatpush1.bf16.msra.mxu0 %v3325_v37  ;;  %1266 = vmatpush1.bf16.msra.mxu1 %v3723_v1  ;;  %v1129_v1 = vpop.permute.xlu1 %1128 }
 0x118   : > { %1267 = vmatprep.subr.bf16.mxu1 %v3486_v55  ;;  %1216 = vmatprep.subr.bf16.mxu0 %v3214_v32  ;;  %v1127_v27 = vpop.permute.xlu0 %1126 }
 0x119   : > { %2789 = vmatprep.mubr.msk.bf16.mxu1 %vm634_vm0, %v3094_v15  ;;  %v3751_v40 = vsel %vm598_vm3, %v1127_v27, %v1129_v1 }
 0x11b   : > { %1217 = vmatpush1.bf16.msra.mxu0 %v3192_v30  ;;  %1268 = vmatpush1.bf16.msra.mxu1 %v3492_v12 }
 0x11c   : > { %1218 = vmatprep.subr.bf16.mxu0 %v1071_v0  ;;  %1269 = vmatprep.subr.bf16.mxu1 %v3224_v34  ;;  %v1131_v34 = vpop.permute.xlu0 %1130  ;;  %v3747_v0 = vpop.permute.xlu1 %1132 }
 0x11f   : > { %1219 = vmatpush1.bf16.msra.mxu0 %v1070_v52  ;;  %1270 = vmatpush1.bf16.msra.mxu1 %v3219_v33  ;;  %v3759_v33 = vsel %vm598_vm3, %v1131_v34, %v3747_v0 }
 0x120   : > { %1220 = vmatprep.subr.bf16.mxu0 %v3354_v56  ;;  %1271 = vmatprep.subr.bf16.mxu1 %v1073_v62  ;;  %v3763_v56 = vsel %vm598_vm3, %v3673_v5, %v1127_v27 }
 0x123   : > { %1221 = vmatpush1.bf16.msra.mxu0 %v3364_v61  ;;  %1272 = vmatpush1.bf16.msra.mxu1 %v1072_v23  ;;  %v3765_v61 = vpop.permute.xlu1 %1101  ;;  %v5053_v23 = vld [vmem:[#allocation10_spill] sm:$0xff] }
 0x124   : > { %1273 = vmatprep.subr.bf16.mxu1 %v3516_v59  ;;  %1222 = vmatprep.subr.bf16.mxu0 %v3020_v3  ;;  %v1100_v3 = vpop.permute.xlu0 %1099  ;;  %5050 = vst [vmem:[#allocation29_spill] sm:$0xff] %v3765_v61 }
 0x127   : > { %1223 = vmatpush1.bf16.msra.mxu0 %v3015_v2  ;;  %1274 = vmatpush1.bf16.msra.mxu1 %v3538_v14  ;;  %v1067_v59 = vpop.permute.xlu1 %1066  ;;  %v5051_v14 = vld [vmem:[#allocation9_spill] sm:$0xff] }
 0x128   : > { %1238 = vmatprep.subr.bf16.mxu0 %v3751_v40  ;;  %1275 = vmatprep.subr.bf16.mxu1 %v3109_v16  ;;  %v1065_v2 = vpop.permute.xlu0 %1064  ;;  %v3772_v16 = vsel %vm598_vm3, %v1129_v1, %v1131_v34  ;;  %v3794_v1 = vsel %vm364_vm2, %v3693_v43, %v1100_v3  ;;  %v5056_v43 = vld [vmem:[#allocation18_spill] sm:$0xff] }
 0x129   : > { %5054 = vst [vmem:[#allocation31_spill] sm:$0xff] %v3794_v1  ;;  %v1075_v62 = vsel %vm364_vm2, %v1065_v2, %v1067_v59  ;;  %v1074_v52 = vsel %vm364_vm2, %v3730_v47, %v1065_v2 }
 0x12b   : > { %1239 = vmatpush2.bf16.msra.mxu0 %v3763_v56  ;;  %1276 = vmatpush1.bf16.msra.mxu1 %v3025_v4  ;;  %v3783_v4 = vsel %vm364_vm2, %v1100_v3, %v3765_v61  ;;  %v3796_v26 = vpop.permute.xlu1 %1136 }
 0x12c   : > { %1314 = vmatprep.subr.bf16.mxu0 %v3570_v20  ;;  %1291 = vmatprep.subr.bf16.mxu1 %v3759_v33  ;;  %5052 = vst [vmem:[#allocation30_spill] sm:$0xff] %v3783_v4  ;;  %v1135_v5 = vpop.permute.xlu0 %1134  ;;  %5055 = vst [vmem:[#allocation32_spill] sm:$0xff] %v3796_v26 }
 0x12e   : > { %1241 = vmatmul.mubr.bf16.vlgmr.msra.gmra.mxu0 %v3390_v54 }
 0x12f   : > { %1292 = vmatpush2.bf16.msra.mxu1 %v3772_v16  ;;  %1315 = vmatpush1.bf16.msra.mxu0 %v3589_v46  ;;  %v1600_v57 = vpop.permute.xlu1 %1599 }
 0x130   : > { %1316 = vmatprep.subr.bf16.mxu0 %v5051_v14  ;;  %1367 = vmatprep.subr.bf16.mxu1 %v5041_v22  ;;  %v1598_v27 = vpop.permute.xlu0 %1597 }
 0x131   : > { %2788 = vmatprep.mubr.msk.bf16.mxu0 %vm634_vm0, %v3398_v7 }
 0x132   : > { %1294 = vmatmul.mubr.bf16.vlgmr.msra.gmra.mxu1 %v3390_v54 }
 0x133   : > { %1317 = vmatpush1.bf16.msra.mxu0 %v5053_v23  ;;  %1368 = vmatpush1.bf16.msra.mxu1 %v3564_v39  ;;  %v1602_v34 = vpop.permute.xlu1 %1601 }
 0x134   : > { %1318 = vmatprep.subr.bf16.mxu0 %v3783_v4  ;;  %1369 = vmatprep.subr.bf16.mxu1 %v5041_v22  ;;  %v1596_v38 = vpop.permute.xlu0 %1595 }
 0x135   : > { %2790 = vmatprep.mubr.msk.bf16.mxu1 %vm634_vm0, %v3398_v7 }
 0x136   : > { %1251 = vmatmul.mubr.bf16.gmra.mxu0 %v3439_v42 }
 0x137   : > { %1319 = vmatpush1.bf16.msra.mxu0 %v3794_v1  ;;  %1370 = vmatpush1.bf16.msra.mxu1 %v3426_v10 }
 0x138   : > { %1320 = vmatprep.subr.bf16.mxu0 %v3503_v53  ;;  %1371 = vmatprep.subr.bf16.mxu1 %v5041_v22  ;;  %v3818_v3 = vpop.permute.xlu0 %1603 }
 0x139   : > { %2791 = vmatprep.mubr.msk.bf16.mxu0 %vm634_vm0, %v3094_v15 }
 0x13a   : > { %1304 = vmatmul.mubr.bf16.gmra.mxu1 %v3439_v42 }
 0x13b   : > { %1321 = vmatpush1.bf16.msra.mxu0 %v5056_v43  ;;  %1372 = vmatpush1.bf16.msra.mxu1 %v3765_v61  ;;  %v2933_v61 = vld [vmem:[%s3004_s20 + $0x90] ss:$36 sps:$4 sm:$0xff]  }
 0x13c   : > { %1322 = vmatprep.subr.bf16.mxu0 %v3276_v50  ;;  %1373 = vmatprep.subr.bf16.mxu1 %v5041_v22  ;;  %v3830_v50 = vsel %vm598_vm3, %v1135_v5, %v3796_v26 }
 0x13d   : > { %2793 = vmatprep.mubr.msk.bf16.mxu1 %vm634_vm0, %v3094_v15  ;;  %v1563_v15 = vpop.permute.xlu1 %1562 }
 0x13f   : > { %1323 = vmatpush1.bf16.msra.mxu0 %v3229_v35  ;;  %1374 = vmatpush1.bf16.msra.mxu1 %v3496_v13  ;;  %v1565_v35 = vpop.permute.xlu0 %1564 }
 0x140   : > { %1324 = vmatprep.subr.bf16.mxu0 %v1075_v62  ;;  %1375 = vmatprep.subr.bf16.mxu1 %v5041_v22 }
 0x143   : > { %1325 = vmatpush1.bf16.msra.mxu0 %v1074_v52  ;;  %1376 = vmatpush1.bf16.msra.mxu1 %v3282_v51  ;;  %v3836_v51 = vsel %vm598_vm3, %v3747_v0, %v1135_v5  ;;  %v5059_v52 = vld [vmem:[#allocation2_spill] sm:$0xff] }
 0x144   : > { %1326 = vmatprep.subr.bf16.mxu0 %v3530_v48  ;;  %1377 = vmatprep.subr.bf16.mxu1 %v5041_v22  ;;  %5057 = vst [vmem:[#allocation33_spill] sm:$0xff] %v3836_v51  ;;  %v1561_v48 = vpop.permute.xlu1 %1560 }
 0x145   : > { %v1578_v5 = vsel %vm527_vm1, %v1561_v48, %v1563_v15 }
 0x147   : > { %1327 = vmatpush1.bf16.msra.mxu0 %v3549_v24  ;;  %1378 = vmatpush1.bf16.msra.mxu1 %v1067_v59  ;;  %v1579_v24 = vsel %vm527_vm1, %v1563_v15, %v1565_v35  ;;  %v3864_v59 = vsel %vm527_vm1, %v1600_v57, %v1602_v34 }
 0x148   : > { %1328 = vmatprep.subr.bf16.mxu0 %v3119_v18  ;;  %1379 = vmatprep.subr.bf16.mxu1 %v5041_v22  ;;  %v1567_v18 = vpop.permute.xlu0 %1566  ;;  %v3856_v47 = vpop.permute.xlu1 %1568 }
 0x149   : > { %v1581_v2 = vsel %vm527_vm1, %v1567_v18, %v3856_v47 }
 0x14b   : > { %1329 = vmatpush1.bf16.msra.mxu0 %v3114_v17  ;;  %1380 = vmatpush1.bf16.msra.mxu1 %v3524_v11  ;;  %v3841_v17 = vsel %vm527_vm1, %v1598_v27, %v1600_v57  ;;  %v3846_v11 = vsel %vm527_vm1, %v1596_v38, %v1598_v27  ;;  %v1580_v27 = vsel %vm527_vm1, %v1565_v35, %v1567_v18  ;;  %v5058_v57 = vld [vmem:[#allocation7_spill] sm:$0xff]  ;;  %v5061_v18 = vld [vmem:[#allocation4_spill] sm:$0xff] }
 0x14c   : > { %1344 = vmatprep.subr.bf16.mxu0 %v3830_v50  ;;  %1381 = vmatprep.subr.bf16.mxu1 %v5041_v22  ;;  %v1633_v0 = vpop.permute.xlu0 %1632  ;;  %v1635_v62 = vpop.permute.xlu1 %1634  ;;  %v5060_v35 = vld [vmem:[#allocation3_spill] sm:$0xff] }
 0x14f   : > { %1345 = vmatpush2.bf16.msra.mxu0 %v3836_v51  ;;  %1382 = vmatpush1.bf16.msra.mxu1 %v3124_v19  ;;  %v3854_v19 = vsel %vm527_vm1, %v1602_v34, %v3818_v3  ;;  %v3880_v34 = vld [vmem:[%s4971_s1 + $0x4] ss:$8 sps:$4 sm:$0xff]  }
 0x150   : > { %1665 = vmatprep.subr.bf16.mxu0 %v3841_v17  ;;  %1397 = vmatprep.subr.bf16.mxu1 %v5041_v22  ;;  %v1631_v38 = vpop.permute.xlu0 %1630  ;;  %v1637_v48 = vpop.permute.xlu1 %1636 }
 0x152   : > { %1347 = vmatmul.mubr.bf16.vlgmr.msra.gmra.mxu0 %v3390_v54 }
 0x153   : > { %1398 = vmatpush2.bf16.msra.mxu1 %v3796_v26  ;;  %1666 = vmatpush1.bf16.msra.mxu0 %v3846_v11 }
 0x154   : > { %1667 = vmatprep.subr.bf16.mxu0 %v1579_v24  ;;  %1718 = vmatprep.subr.bf16.mxu1 %v3854_v19  ;;  %v3887_v15 = vpop.permute.xlu0 %1638  ;;  %v5062_v24 = vld [vmem:[#allocation6_spill] sm:$0xff] }
 0x155   : > { %2792 = vmatprep.mubr.msk.bf16.mxu0 %vm634_vm0, %v3398_v7 }
 0x156   : > { %1400 = vmatmul.mubr.bf16.vlgmr.msra.gmra.mxu1 %v3390_v54 }
 0x157   : > { %1668 = vmatpush1.bf16.msra.mxu0 %v1578_v5  ;;  %1719 = vmatpush1.bf16.msra.mxu1 %v3864_v59  ;;  %v5063_v5 = vld [vmem:[#allocation5_spill] sm:$0xff] }
 0x158   : > { %1669 = vmatprep.subr.bf16.mxu0 %v3374_v29  ;;  %1720 = vmatprep.subr.bf16.mxu1 %v1581_v2  ;;  %v1608_v2 = vpop.permute.xlu0 %1607 }
 0x159   : > { %2794 = vmatprep.mubr.msk.bf16.mxu1 %vm634_vm0, %v3398_v7 }
 0x15a   : > { %1357 = vmatmul.mubr.bf16.gmra.mxu0 %v3439_v42 }
 0x15b   : > { %1670 = vmatpush1.bf16.msra.mxu0 %v5058_v57  ;;  %1721 = vmatpush1.bf16.msra.mxu1 %v1580_v27  ;;  %v1606_v27 = vpop.permute.xlu1 %1605 }
 0x15c   : > { %1671 = vmatprep.subr.bf16.mxu0 %v5059_v52  ;;  %1722 = vmatprep.subr.bf16.mxu1 %v3402_v8 }
 0x15d   : > { %2795 = vmatprep.mubr.msk.bf16.mxu0 %vm634_vm0, %v3880_v34 }
 0x15e   : > { %1408 = vmatmul.mubr.bf16.gmra.mxu1 %v3439_v42 }
 0x15f   : > { %1672 = vmatpush1.bf16.msra.mxu0 %v3243_v41  ;;  %1723 = vmatpush1.bf16.msra.mxu1 %v3415_v49 }
 0x160   : > { %1673 = vmatprep.subr.bf16.mxu0 %v5060_v35  ;;  %1724 = vmatprep.subr.bf16.mxu1 %v3255_v44  ;;  %v3903_v35 = vpop.permute.xlu0 %1611 }
 0x161   : > { %2797 = vmatprep.mubr.msk.bf16.mxu1 %vm634_vm0, %v3880_v34  ;;  %5064 = vst [vmem:[#allocation7_spill] sm:$0xff] %v3903_v35 }
 0x163   : > { %1674 = vmatpush1.bf16.msra.mxu0 %v5061_v18  ;;  %1725 = vmatpush1.bf16.msra.mxu1 %v3259_v45  ;;  %v2932_v18 = vld [vmem:[%s3004_s20 + $0x94] ss:$36 sps:$4 sm:$0xff]  }
 0x164   : > { %1675 = vmatprep.subr.bf16.mxu0 %v3300_v58  ;;  %1726 = vmatprep.subr.bf16.mxu1 %v5062_v24  ;;  %v1610_v24 = vpop.permute.xlu1 %1609  ;;  %v1573_v1 = vpop.permute.xlu0 %1572 }
 0x167   : > { %1676 = vmatpush1.bf16.msra.mxu0 %v3308_v60  ;;  %1727 = vmatpush1.bf16.msra.mxu1 %v5063_v5  ;;  %v3910_v5 = vsel %vm598_vm3, %v1633_v0, %v1635_v62 }
 0x168   : > { %1728 = vmatprep.subr.bf16.mxu1 %v3320_v36  ;;  %1677 = vmatprep.subr.bf16.mxu0 %v3185_v28  ;;  %v2934_v28 = vld [vmem:[%s3004_s20 + $0x9c] ss:$36 sps:$4 sm:$0xff]   ;;  %v3943_v26 = vpop.permute.xlu0 %1576 }
 0x16b   : > { %1678 = vmatpush1.bf16.msra.mxu0 %v3197_v31  ;;  %1729 = vmatpush1.bf16.msra.mxu1 %v3325_v37  ;;  %v3915_v31 = vsel %vm598_vm3, %v1631_v38, %v1633_v0  ;;  %v3930_v38 = vsel %vm598_vm3, %v1635_v62, %v1637_v48  ;;  %v3951_v62 = vsel %vm527_vm1, %v1608_v2, %v1610_v24 }
 0x16c   : > { %1679 = vmatprep.subr.bf16.mxu0 %v2932_v18  ;;  %1730 = vmatprep.subr.bf16.mxu1 %v3214_v32  ;;  %v2935_v18 = vld [vmem:[%s3004_s20 + $0x98] ss:$36 sps:$4 sm:$0xff]   ;;  %v3921_v32 = vsel %vm598_vm3, %v1637_v48, %v3887_v15 }
 0x16f   : > { %1680 = vmatpush1.bf16.msra.mxu0 %v2933_v61  ;;  %1731 = vmatpush1.bf16.msra.mxu1 %v3192_v30  ;;  %v3924_v30 = vsel %vm527_vm1, %v1606_v27, %v1608_v2  ;;  %v1571_v61 = vpop.permute.xlu1 %1570  ;;  %v5068_v2 = vld [vmem:[#allocation15_spill] sm:$0xff] }
 0x170   : > { %1695 = vmatprep.subr.bf16.mxu0 %v3910_v5  ;;  %1732 = vmatprep.subr.bf16.mxu1 %v2934_v28  ;;  %v1583_v0 = vsel %vm527_vm1, %v1571_v61, %v1573_v1  ;;  %v3934_v28 = vsel %vm527_vm1, %v3818_v3, %v1606_v27  ;;  %v1582_v48 = vsel %vm527_vm1, %v3856_v47, %v1571_v61  ;;  %v5067_v47 = vld [vmem:[#allocation14_spill] sm:$0xff] }
 0x173   : > { %1696 = vmatpush2.bf16.msra.mxu0 %v3915_v31  ;;  %1733 = vmatpush1.bf16.msra.mxu1 %v2935_v18  ;;  %v3941_v18 = vsel %vm527_vm1, %v1610_v24, %v3903_v35  ;;  %v1575_v4 = vpop.permute.xlu1 %1574  ;;  %v3982_v24 = vld [vmem:[%s3004_s20 + $0xec] ss:$36 sps:$4 sm:$0xff]  }
 0x174   : > { %1748 = vmatprep.subr.bf16.mxu1 %v3921_v32  ;;  %1771 = vmatprep.subr.bf16.mxu0 %v3924_v30  ;;  %v1585_v3 = vsel %vm527_vm1, %v1575_v4, %v3943_v26  ;;  %v1584_v27 = vsel %vm527_vm1, %v1573_v1, %v1575_v4  ;;  %v5065_v4 = vld [vmem:[#allocation11_spill] sm:$0xff]  ;;  %v5066_v1 = vld [vmem:[#allocation12_spill] sm:$0xff] }
 0x176   : > { %1698 = vmatmul.mubr.bf16.vlgmr.msra.gmra.mxu0 %v3390_v54 }
 0x177   : > { %1749 = vmatpush2.bf16.msra.mxu1 %v3930_v38  ;;  %1772 = vmatpush1.bf16.msra.mxu0 %v3934_v28  ;;  %v1641_v61 = vpop.permute.xlu1 %1640 }
 0x178   : > { %1824 = vmatprep.subr.bf16.mxu1 %v3941_v18  ;;  %1773 = vmatprep.subr.bf16.mxu0 %v1583_v0  ;;  %v1643_v0 = vpop.permute.xlu0 %1642 }
 0x179   : > { %2796 = vmatprep.mubr.msk.bf16.mxu0 %vm634_vm0, %v3398_v7 }
 0x17a   : > { %1751 = vmatmul.mubr.bf16.vlgmr.msra.gmra.mxu1 %v3390_v54 }
 0x17b   : > { %1774 = vmatpush1.bf16.msra.mxu0 %v1582_v48  ;;  %1825 = vmatpush1.bf16.msra.mxu1 %v3951_v62  ;;  %v2938_v48 = vld [vmem:[%s3004_s20 + $0xa4] ss:$36 sps:$4 sm:$0xff]  }
 0x17c   : > { %1775 = vmatprep.subr.bf16.mxu0 %v3556_v25  ;;  %1826 = vmatprep.subr.bf16.mxu1 %v1585_v3  ;;  %v3986_v3 = vld [vmem:[%s3004_s20 + $0xe8] ss:$36 sps:$4 sm:$0xff]  }
 0x17d   : > { %2798 = vmatprep.mubr.msk.bf16.mxu1 %vm634_vm0, %v3398_v7 }
 0x17e   : > { %1708 = vmatmul.mubr.bf16.gmra.mxu0 %v3439_v42 }
 0x17f   : > { %1776 = vmatpush1.bf16.msra.mxu0 %v3578_v9  ;;  %1827 = vmatpush1.bf16.msra.mxu1 %v1584_v27  ;;  %v3992_v27 = vld [vmem:[%s3004_s20 + $0xf4] ss:$36 sps:$4 sm:$0xff]  }
 0x180   : > { %1777 = vmatprep.subr.bf16.mxu0 %v3409_v63  ;;  %1828 = vmatprep.subr.bf16.mxu1 %v3570_v20  ;;  %5069 = vst [vmem:[#allocation2_spill] sm:$0xff] %v3992_v27 }
 0x181   : > { %2799 = vmatprep.mubr.msk.bf16.mxu0 %vm634_vm0, %v3880_v34 }
 0x182   : > { %1761 = vmatmul.mubr.bf16.gmra.mxu1 %v3439_v42 }
 0x183   : > { %1778 = vmatpush1.bf16.msra.mxu0 %v3419_v6  ;;  %1829 = vmatpush1.bf16.msra.mxu1 %v3589_v46 }
 0x184   : > { %1779 = vmatprep.subr.bf16.mxu0 %v5065_v4  ;;  %1830 = vmatprep.subr.bf16.mxu1 %v5051_v14  ;;  %v3996_v4 = vsel %vm598_vm3, %v1641_v61, %v1643_v0  ;;  %v4019_v14 = vpop.f32.mrf.mxu1 }
 0x185   : > { %2801 = vmatprep.mubr.msk.bf16.mxu1 %vm634_vm0, %v3880_v34 }
 0x186   : > { %v4030_v20 = vpop.f32.mrf.mxu1 }
 0x187   : > { %1780 = vmatpush1.bf16.msra.mxu0 %v5066_v1  ;;  %1831 = vmatpush1.bf16.msra.mxu1 %v5053_v23  ;;  %v3998_v1 = vpop.f32.mrf.mxu0  ;;  %v4015_v23 = vsel %vm598_vm3, %v3887_v15, %v1641_v61 }
 0x188   : > { %1781 = vmatprep.subr.bf16.mxu0 %v3486_v55  ;;  %1832 = vmatprep.subr.bf16.mxu1 %v5067_v47  ;;  %v2940_v47 = vld [vmem:[%s3004_s20 + $0xa0] ss:$36 sps:$4 sm:$0xff]  }
 0x18b   : > { %1782 = vmatpush1.bf16.msra.mxu0 %v3492_v12  ;;  %1833 = vmatpush1.bf16.msra.mxu1 %v5068_v2  ;;  %v4002_v2 = vld [vmem:[%s3004_s20 + $0xf0] ss:$36 sps:$4 sm:$0xff]  }
 0x18c   : > { %1834 = vmatprep.subr.bf16.mxu1 %v3503_v53  ;;  %1783 = vmatprep.subr.bf16.mxu0 %v3982_v24  ;;  %5070 = vst [vmem:[#allocation3_spill] sm:$0xff] %v4002_v2  ;;  %v1645_v53 = vpop.permute.xlu1 %1644 }
 0x18f   : > { %1784 = vmatpush1.bf16.msra.mxu0 %v3986_v3  ;;  %1835 = vmatpush1.bf16.msra.mxu1 %v5056_v43  ;;  %v4005_v43 = vpop.permute.xlu0 %1646 }
 0x190   : > { %1785 = vmatprep.subr.bf16.mxu0 %v2938_v48  ;;  %1836 = vmatprep.subr.bf16.mxu1 %v3992_v27  ;;  %v2942_v48 = vld [vmem:[%s3004_s20 + $0xac] ss:$36 sps:$4 sm:$0xff]   ;;  %v4011_v27 = vsel %vm598_vm3, %v1645_v53, %v4005_v43 }
 0x193   : > { %1786 = vmatpush1.bf16.msra.mxu0 %v2940_v47  ;;  %1837 = vmatpush1.bf16.msra.mxu1 %v4002_v2  ;;  %v4017_v47 = vpop.f32.mrf.mxu0  ;;  %v2943_v2 = vld [vmem:[%s3004_s20 + $0xa8] ss:$36 sps:$4 sm:$0xff]  }
 0x194   : > { %1801 = vmatprep.subr.bf16.mxu0 %v3996_v4  ;;  %1838 = vmatprep.subr.bf16.mxu1 %v2942_v48  ;;  %v4026_v48 = vsel %vm598_vm3, %v1643_v0, %v1645_v53  ;;  %v4041_v53 = vpop.f32.mrf.mxu1 }
 0x195   : > { %v4028_v46 = vpop.f32.mrf.mxu0 }
 0x196   : > { %v4054_v0 = vpop.f32.mrf.mxu1 }
 0x197   : > { %1802 = vmatpush2.bf16.msra.mxu0 %v4015_v23  ;;  %1839 = vmatpush1.bf16.msra.mxu1 %v2943_v2  ;;  %v4039_v15 = vpop.f32.mrf.mxu0  ;;  %v5072_v2 = vld [vmem:[#allocation13_spill] sm:$0xff] }
 0x198   : > { %1854 = vmatprep.subr.bf16.mxu1 %v4011_v27  ;;  %1877 = vmatprep.subr.bf16.mxu0 %v5041_v22 }
 0x199   : > { %v4046_v61 = vpop.f32.mrf.mxu0 }
 0x19a   : > { %1804 = vmatmul.mubr.bf16.vlgmr.msra.gmra.mxu0 %v3390_v54 }
 0x19b   : > { %1855 = vmatpush2.bf16.msra.mxu1 %v4026_v48  ;;  %1878 = vmatpush1.bf16.msra.mxu0 %v3903_v35 }
 0x19c   : > { %2105 = vmatprep.subr.bf16.mxu1 %v3910_v5  ;;  %1879 = vmatprep.subr.bf16.mxu0 %v5041_v22  ;;  %v4050_v5 = vpop.permute.xlu1 %2072 }
 0x19d   : > { %2800 = vmatprep.mubr.msk.bf16.mxu0 %vm634_vm0, %v3398_v7 }
 0x19e   : > { %1857 = vmatmul.mubr.bf16.vlgmr.msra.gmra.mxu1 %v3390_v54  ;;  %v4059_v54 = vpop.f32.mrf.mxu0 }
 0x19f   : > { %1880 = vmatpush1.bf16.msra.mxu0 %v3943_v26  ;;  %2106 = vmatpush1.bf16.msra.mxu1 %v3915_v31  ;;  %v4061_v26 = vpop.f32.mrf.mxu1 }
 0x1a0   : > { %2107 = vmatprep.subr.bf16.mxu1 %v3841_v17  ;;  %1881 = vmatprep.subr.bf16.mxu0 %v5041_v22  ;;  %v5071_v17 = vld [vmem:[#allocation24_spill] sm:$0xff]  ;;  %v4070_v31 = vpop.f32.mrf.mxu0 }
 0x1a1   : > { %2802 = vmatprep.mubr.msk.bf16.mxu1 %vm634_vm0, %v3398_v7  ;;  %v2071_v7 = vpop.permute.xlu1 %2070 }
 0x1a2   : > { %1814 = vmatmul.mubr.bf16.gmra.mxu0 %v3439_v42 }
 0x1a3   : > { %1882 = vmatpush1.bf16.msra.mxu0 %v3564_v39  ;;  %2108 = vmatpush1.bf16.msra.mxu1 %v3846_v11  ;;  %v4072_v11 = vpop.f32.mrf.mxu1 }
 0x1a4   : > { %2109 = vmatprep.subr.bf16.mxu1 %v3679_v21  ;;  %1883 = vmatprep.subr.bf16.mxu0 %v5041_v22  ;;  %v4078_v21 = vpop.permute.xlu0 %2074 }
 0x1a5   : > { %2803 = vmatprep.mubr.msk.bf16.mxu0 %vm634_vm0, %v3880_v34 }
 0x1a6   : > { %1867 = vmatmul.mubr.bf16.gmra.mxu1 %v3439_v42  ;;  %v4082_v42 = vpop.f32.mrf.mxu0 }
 0x1a7   : > { %1884 = vmatpush1.bf16.msra.mxu0 %v3426_v10  ;;  %2110 = vmatpush1.bf16.msra.mxu1 %v5071_v17  ;;  %v4084_v17 = vpop.f32.mrf.mxu1 }
 0x1a8   : > { %2111 = vmatprep.subr.bf16.mxu1 %v3374_v29  ;;  %1885 = vmatprep.subr.bf16.mxu0 %v5041_v22  ;;  %v4088_v29 = vpop.permute.xlu1 %2078  ;;  %v4090_v10 = vpop.f32.mrf.mxu0 }
 0x1a9   : > { %2805 = vmatprep.mubr.msk.bf16.mxu1 %vm634_vm0, %v3880_v34  ;;  %5073 = vst [vmem:[#allocation4_spill] sm:$0xff] %v4090_v10  ;;  %v4098_v39 = vpop.permute.xlu0 %2076  ;;  %v4107_v10 = vld [vmem:[%s3004_s20 + $0xf8] ss:$36 sps:$4 sm:$0xff]  }
 0x1aa   : > { %5078 = vst [vmem:[#allocation12_spill] sm:$0xff] %v4107_v10 }
 0x1ab   : > { %1886 = vmatpush1.bf16.msra.mxu0 %v5072_v2  ;;  %2112 = vmatpush1.bf16.msra.mxu1 %v5058_v57  ;;  %v4094_v2 = vpop.f32.mrf.mxu1  ;;  %v5075_v57 = vld [vmem:[#allocation22_spill] sm:$0xff] }
 0x1ac   : > { %2113 = vmatprep.subr.bf16.mxu1 %v5059_v52  ;;  %1887 = vmatprep.subr.bf16.mxu0 %v5041_v22  ;;  %5074 = vst [vmem:[#allocation6_spill] sm:$0xff] %v4094_v2  ;;  %v4100_v52 = vpop.f32.mrf.mxu0  ;;  %v4104_v51 = vpop.permute.xlu1 %2082 }
 0x1ad   : > { %5076 = vst [vmem:[#allocation5_spill] sm:$0xff] %v4100_v52  ;;  %v4102_v35 = vpop.f32.mrf.mxu1  ;;  %v4117_v2 = vpop.permute.xlu0 %2080 }
 0x1ae   : > { %5077 = vst [vmem:[#allocation11_spill] sm:$0xff] %v4102_v35  ;;  %v2945_v35 = vld [vmem:[%s3004_s20 + $0xb0] ss:$36 sps:$4 sm:$0xff]  }
 0x1af   : > { %1888 = vmatpush1.bf16.msra.mxu0 %v3496_v13  ;;  %2114 = vmatpush1.bf16.msra.mxu1 %v3243_v41  ;;  %v5079_v41 = vld [vmem:[#allocation23_spill] sm:$0xff]  ;;  %v4115_v13 = vpop.f32.mrf.mxu1 }
 0x1b0   : > { %2115 = vmatprep.subr.bf16.mxu1 %v5075_v57  ;;  %1889 = vmatprep.subr.bf16.mxu0 %v5041_v22  ;;  %v4113_v57 = vpop.f32.mrf.mxu0  ;;  %5081 = vst [vmem:[#allocation15_spill] sm:$0xff] %v4115_v13  ;;  %v2947_v13 = vld [vmem:[%s3004_s20 + $0xd8] ss:$36 sps:$4 sm:$0xff]  }
 0x1b1   : > { %5080 = vst [vmem:[#allocation14_spill] sm:$0xff] %v4113_v57  ;;  %v4130_v57 = vpop.f32.mrf.mxu1 }
 0x1b2   : > { %v4128_v52 = vpop.f32.mrf.mxu0  ;;  %5083 = vst [vmem:[#allocation13_spill] sm:$0xff] %v4130_v57  ;;  %v4146_v57 = vld [vmem:[%s4971_s1] ss:$8 sps:$4 sm:$0xff]  }
 0x1b3   : > { %1890 = vmatpush1.bf16.msra.mxu0 %v4107_v10  ;;  %2116 = vmatpush1.bf16.msra.mxu1 %v5079_v41  ;;  %v2946_v10 = vld [vmem:[%s3004_s20 + $0xdc] ss:$36 sps:$4 sm:$0xff]   ;;  %v4123_v41 = vpop.permute.xlu1 %2086 }
 0x1b4   : > { %2117 = vmatprep.subr.bf16.mxu1 %v3300_v58  ;;  %1891 = vmatprep.subr.bf16.mxu0 %v5041_v22  ;;  %5082 = vst [vmem:[#allocation24_spill] sm:$0xff] %v4123_v41  ;;  %v2089_v58 = vsel %vm598_vm3, %v4050_v5, %v4078_v21  ;;  %v4141_v41 = vpop.f32.mrf.mxu1 }
 0x1b5   : > { %5084 = vst [vmem:[#allocation22_spill] sm:$0xff] %v4141_v41  ;;  %v5094_v41 = vld [vmem:[#allocation27_spill] sm:$0xff] }
 0x1b7   : > { %1892 = vmatpush1.bf16.msra.mxu0 %v2945_v35  ;;  %2118 = vmatpush1.bf16.msra.mxu1 %v3308_v60  ;;  %v4135_v60 = vpop.f32.mrf.mxu0  ;;  %v2088_v35 = vsel %vm598_vm3, %v2071_v7, %v4050_v5  ;;  %v4156_v5 = vpop.f32.mrf.mxu1  ;;  %v4161_v7 = vld [vmem:[%s4971_s1 + $0x14] ss:$8 sps:$4 sm:$0xff]  }
 0x1b8   : > { %1907 = vmatprep.subr.bf16.mxu0 %v5041_v22  ;;  %2119 = vmatprep.subr.bf16.mxu1 %v2946_v10  ;;  %v4137_v10 = vpop.permute.xlu0 %2084  ;;  %5085 = vst [vmem:[#allocation23_spill] sm:$0xff] %v4156_v5 }
 0x1bb   : > { %1908 = vmatpush2.bf16.msra.mxu0 %v4005_v43  ;;  %2120 = vmatpush1.bf16.msra.mxu1 %v2947_v13  ;;  %v4149_v13 = vpop.permute.xlu1 %909 }
 0x1bc   : > { %2135 = vmatprep.subr.bf16.mxu1 %v2089_v58  ;;  %2158 = vmatprep.subr.bf16.mxu0 %v3921_v32  ;;  %v4154_v32 = vpop.f32.mrf.mxu0  ;;  %v4166_v58 = vpop.permute.xlu0 %904 }
 0x1be   : > { %1910 = vmatmul.mubr.bf16.vlgmr.msra.gmra.mxu0 %v4146_v57 }
 0x1bf   : > { %2136 = vmatpush2.bf16.msra.mxu1 %v2088_v35  ;;  %2159 = vmatpush1.bf16.msra.mxu0 %v3930_v38  ;;  %v4172_v38 = vpop.f32.mrf.mxu1  ;;  %v4183_v35 = vld [vmem:[%s4971_s1 + $0x10] ss:$8 sps:$4 sm:$0xff]  }
 0x1c0   : > { %2160 = vmatprep.subr.bf16.mxu0 %v3854_v19  ;;  %2211 = vmatprep.subr.bf16.mxu1 %v3996_v4  ;;  %v4170_v19 = vpop.f32.mrf.mxu0  ;;  %5086 = vst [vmem:[#allocation34_spill] sm:$0xff] %v4172_v38  ;;  %v4176_v4 = vpop.permute.xlu1 %914  ;;  %v5092_v38 = vld [vmem:[#allocation25_spill] sm:$0xff] }
 0x1c1   : > { %2804 = vmatprep.mubr.msk.bf16.mxu0 %vm634_vm0, %v4161_v7 }
 0x1c2   : > { %2138 = vmatmul.mubr.bf16.vlgmr.msra.gmra.mxu1 %v4146_v57 }
 0x1c3   : > { %2161 = vmatpush1.bf16.msra.mxu0 %v3864_v59  ;;  %2212 = vmatpush1.bf16.msra.mxu1 %v4015_v23  ;;  %v4188_v23 = vpop.f32.mrf.mxu0  ;;  %v4194_v59 = vpop.permute.xlu0 %919 }
 0x1c4   : > { %2162 = vmatprep.subr.bf16.mxu0 %v3751_v40  ;;  %2213 = vmatprep.subr.bf16.mxu1 %v3924_v30  ;;  %5087 = vst [vmem:[#allocation35_spill] sm:$0xff] %v4188_v23  ;;  %v4190_v40 = vpop.f32.mrf.mxu1 }
 0x1c5   : > { %2806 = vmatprep.mubr.msk.bf16.mxu1 %vm634_vm0, %v4161_v7  ;;  %5088 = vst [vmem:[#allocation36_spill] sm:$0xff] %v4190_v40 }
 0x1c6   : > { %1918 = vmatmul.mubr.bf16.gmra.mxu0 %v4183_v35 }
 0x1c7   : > { %2163 = vmatpush1.bf16.msra.mxu0 %v3763_v56  ;;  %2214 = vmatpush1.bf16.msra.mxu1 %v3934_v28  ;;  %v922_v56 = vmul.f32 %v4166_v58, %v3998_v1  ;;  %v4203_v28 = vpop.permute.xlu1 %960  ;;  %v931_v1 = vmul.f32 %v4149_v13, %v4028_v46 }
 0x1c8   : > { %2164 = vmatprep.subr.bf16.mxu0 %v3402_v8  ;;  %2215 = vmatprep.subr.bf16.mxu1 %v3759_v33  ;;  %v923_v8 = vmul.f32 %v4166_v58, %v4017_v47  ;;  %v4209_v33 = vpop.f32.mrf.mxu1 }
 0x1c9   : > { %2807 = vmatprep.mubr.msk.bf16.mxu0 %vm634_vm0, %v3880_v34  ;;  %5090 = vst [vmem:[#allocation38_spill] sm:$0xff] %v4209_v33  ;;  %v978_v47 = vadd.f32 %v4203_v28, %v922_v56 }
 0x1ca   : > { %v4198_v30 = vpop.f32.mrf.mxu0  ;;  %2148 = vmatmul.mubr.bf16.gmra.mxu1 %v4183_v35 }
 0x1cb   : > { %5089 = vst [vmem:[#allocation37_spill] sm:$0xff] %v4198_v30  ;;  %2165 = vmatpush1.bf16.msra.mxu0 %v3415_v49  ;;  %2216 = vmatpush1.bf16.msra.mxu1 %v3772_v16  ;;  %v4219_v16 = vpop.permute.xlu0 %965 }
 0x1cc   : > { %v889_v40 = vpop.f32.mrf.mxu0  ;;  %2166 = vmatprep.subr.bf16.mxu0 %v3255_v44  ;;  %2217 = vmatprep.subr.bf16.mxu1 %v3556_v25  ;;  %v932_v44 = vmul.f32 %v4149_v13, %v4039_v15  ;;  %v4237_v15 = vpop.permute.xlu1 %970 }
 0x1cd   : > { %2809 = vmatprep.mubr.msk.bf16.mxu1 %vm634_vm0, %v3880_v34  ;;  %v979_v40 = vadd.f32 %v4203_v28, %v923_v8  ;;  %v1014_v8 = vmax.f32 %v978_v47, 0.0 }
 0x1ce   : > { %v4217_v30 = vpop.f32.mrf.mxu0  ;;  %v1189_v49 = vpop.f32.mrf.mxu1 }
 0x1cf   : > { %5091 = vst [vmem:[#allocation39_spill] sm:$0xff] %v4217_v30  ;;  %v1416_v33 = vmul.f32 %v1189_v49, %v4166_v58  ;;  %2167 = vmatpush1.bf16.msra.mxu0 %v3259_v45  ;;  %2218 = vmatpush1.bf16.msra.mxu1 %v3578_v9  ;;  %v940_v45 = vmul.f32 %v4176_v4, %v4046_v61 }
 0x1d0   : > { %v892_v25 = vpop.f32.mrf.mxu0  ;;  %v1191_v46 = vpop.f32.mrf.mxu1  ;;  %2168 = vmatprep.subr.bf16.mxu0 %v5092_v38  ;;  %2219 = vmatprep.subr.bf16.mxu1 %v3409_v63  ;;  %v987_v9 = vadd.f32 %v4219_v16, %v931_v1  ;;  %v941_v61 = vmul.f32 %v4176_v4, %v4059_v54  ;;  %v988_v1 = vadd.f32 %v4219_v16, %v932_v44 }
 0x1d1   : > { %v1452_v30 = vadd.f32 %v1416_v33, %v4203_v28  ;;  %v1417_v56 = vmul.f32 %v1191_v46, %v4166_v58  ;;  %v1015_v33 = vmax.f32 %v979_v40, 0.0  ;;  %v996_v44 = vadd.f32 %v4237_v15, %v940_v45 }
 0x1d2   : > { %v1193_v49 = vpop.f32.mrf.mxu1  ;;  %v4235_v5 = vpop.f32.mrf.mxu0  ;;  %v1023_v54 = vmax.f32 %v987_v9, 0.0  ;;  %v1024_v45 = vmax.f32 %v988_v1, 0.0  ;;  %v997_v9 = vadd.f32 %v4237_v15, %v941_v61 }
 0x1d3   : > { %5093 = vst [vmem:[#allocation25_spill] sm:$0xff] %v4235_v5  ;;  %v1488_v25 = vmax.f32 %v1452_v30, 0.0  ;;  %v1453_v38 = vadd.f32 %v1417_v56, %v4203_v28  ;;  %v1425_v63 = vmul.f32 %v1193_v49, %v4149_v13  ;;  %2169 = vmatpush1.bf16.msra.mxu0 %v5094_v41  ;;  %2220 = vmatpush1.bf16.msra.mxu1 %v3419_v6  ;;  %v5095_v5 = vld [vmem:[#allocation26_spill] sm:$0xff]  ;;  %v1032_v1 = vmax.f32 %v996_v44, 0.0 }
 0x1d4   : > { %v1195_v46 = vpop.f32.mrf.mxu1  ;;  %2170 = vmatprep.subr.bf16.mxu0 %v3320_v36  ;;  %2221 = vmatprep.subr.bf16.mxu1 %v5095_v5  ;;  %v897_v30 = vpop.f32.mrf.mxu0  ;;  %v949_v6 = vmul.f32 %v4194_v59, %v4070_v31  ;;  %v950_v31 = vmul.f32 %v4194_v59, %v4082_v42 }
 0x1d5   : > { %v4248_v47 = vmax.f32 %v1014_v8, %v1488_v25  ;;  %v1489_v56 = vmax.f32 %v1453_v38, 0.0  ;;  %v1461_v49 = vadd.f32 %v1425_v63, %v4219_v16  ;;  %v1426_v41 = vmul.f32 %v1195_v46, %v4149_v13  ;;  %v4257_v36 = vpop.permute.xlu0 %975  ;;  %v5098_v63 = vld [vmem:[#allocation28_spill] sm:$0xff] }
 0x1d6   : > { %v1199_v40 = vpop.f32.mrf.mxu1  ;;  %v4255_v23 = vpop.f32.mrf.mxu0  ;;  %v2091_v30 = vsel %vm598_vm3, %v4098_v39, %v4088_v29  ;;  %v1005_v61 = vadd.f32 %v4257_v36, %v949_v6  ;;  %v2093_v6 = vsel %vm598_vm3, %v4117_v2, %v4104_v51 }
 0x1d7   : > { %5096 = vst [vmem:[#allocation27_spill] sm:$0xff] %v4248_v47  ;;  %v4259_v5 = vmax.f32 %v1015_v33, %v1489_v56  ;;  %v1497_v8 = vmax.f32 %v1461_v49, 0.0  ;;  %v1462_v25 = vadd.f32 %v1426_v41, %v4219_v16  ;;  %v1434_v38 = vmul.f32 %v1199_v40, %v4176_v4  ;;  %2171 = vmatpush1.bf16.msra.mxu0 %v3325_v37  ;;  %v2951_v33 = vld [vmem:[%s3004_s20 + $0xe4] ss:$36 sps:$4 sm:$0xff]  }
 0x1d8   : > { %2222 = vmatpush1.bf16.msra.mxu1 %v5098_v63  ;;  %v1201_v46 = vpop.f32.mrf.mxu1  ;;  %2172 = vmatprep.subr.bf16.mxu0 %v2951_v33  ;;  %v900_v56 = vpop.f32.mrf.mxu0  ;;  %v2952_v47 = vld [vmem:[%s3004_s20 + $0xe0] ss:$36 sps:$4 sm:$0xff]   ;;  %s2858_s20 = smul.u32 144, %s5167_s16 }
 0x1d9   : > { %5097 = vst [vmem:[#allocation26_spill] sm:$0xff] %v4259_v5  ;;  %2223 = vmatprep.subr.bf16.mxu1 %v3486_v55  ;;  %v4273_v37 = vmax.f32 %v1023_v54, %v1497_v8  ;;  %v1498_v49 = vmax.f32 %v1462_v25, 0.0  ;;  %v1470_v41 = vadd.f32 %v1434_v38, %v4237_v15  ;;  %v1435_v42 = vmul.f32 %v1201_v46, %v4176_v4 }
 0x1da   : > { %v1203_v40 = vpop.f32.mrf.mxu1  ;;  %v1033_v54 = vmax.f32 %v997_v9, 0.0  ;;  %v1006_v8 = vadd.f32 %v4257_v36, %v950_v31  ;;  %v1041_v9 = vmax.f32 %v1005_v61, 0.0  ;;  %v4362_v61 = vsel %vm598_vm3, %v4104_v51, %v4137_v10  ;;  %v5106_v51 = vld [vmem:[#allocation24_spill] sm:$0xff]  ;;  %s4787_s8 = scalar_lea.vmem %s4974_s4, %s2858_s20 }
 0x1db   : > { %v4278_v55 = vmax.f32 %v1024_v45, %v1498_v49  ;;  %v1506_v63 = vmax.f32 %v1470_v41, 0.0  ;;  %v1471_v33 = vadd.f32 %v1435_v42, %v4237_v15  ;;  %v1443_v5 = vmul.f32 %v1203_v40, %v4194_v59  ;;  %2173 = vmatpush1.bf16.msra.mxu0 %v2952_v47  ;;  %v5102_v41 = vld [vmem:[#allocation33_spill] sm:$0xff]  ;;  %v5103_v42 = vld [vmem:[#allocation7_spill] sm:$0xff] }
 0x1dc   : > { %2224 = vmatpush1.bf16.msra.mxu1 %v3492_v12  ;;  %v1205_v25 = vpop.f32.mrf.mxu1  ;;  %2188 = vmatprep.subr.bf16.mxu0 %v2091_v30  ;;  %v2090_v12 = vsel %vm598_vm3, %v4078_v21, %v4098_v39  ;;  %v2092_v39 = vsel %vm598_vm3, %v4088_v29, %v4117_v2  ;;  %v933_v29 = vmul.f32 %v4149_v13, %v4041_v53  ;;  %v5101_v2 = vld [vmem:[#allocation14_spill] sm:$0xff] }
 0x1dd   : > { %2225 = vmatprep.subr.bf16.mxu1 %v3982_v24  ;;  %v4289_v44 = vmax.f32 %v1032_v1, %v1506_v63  ;;  %v1507_v38 = vmax.f32 %v1471_v33, 0.0  ;;  %v1479_v45 = vadd.f32 %v1443_v5, %v4257_v36  ;;  %v1444_v47 = vmul.f32 %v1205_v25, %v4194_v59  ;;  %v5104_v63 = vld [vmem:[#allocation20_spill] sm:$0xff] }
 0x1de   : > { %v1042_v5 = vmax.f32 %v1006_v8, 0.0  ;;  %v935_v49 = vmul.f32 %v4149_v13, %v5101_v2  ;;  %v936_v40 = vmul.f32 %v4149_v13, %v4128_v52 }
 0x1df   : > { %v4296_v31 = vmax.f32 %v1033_v54, %v1507_v38  ;;  %v1515_v46 = vmax.f32 %v1479_v45, 0.0  ;;  %v1480_v24 = vadd.f32 %v1444_v47, %v4257_v36  ;;  %2189 = vmatpush2.bf16.msra.mxu0 %v2090_v12  ;;  %v5105_v54 = vld [vmem:[#allocation6_spill] sm:$0xff]  ;;  %v4380_v38 = vsel %vm598_vm3, %v4137_v10, %v5106_v51 }
 0x1e0   : > { %2226 = vmatpush1.bf16.msra.mxu1 %v3986_v3  ;;  %2264 = vmatprep.subr.bf16.mxu0 %v4011_v27  ;;  %v924_v3 = vmul.f32 %v4166_v58, %v4019_v14  ;;  %v925_v27 = vmul.f32 %v4166_v58, %v4030_v20  ;;  %v943_v14 = vmul.f32 %v4176_v4, %v4072_v11 }
 0x1e1   : > { %2241 = vmatprep.subr.bf16.mxu1 %v2093_v6  ;;  %v4301_v30 = vmax.f32 %v1041_v9, %v1515_v46  ;;  %v1516_v56 = vmax.f32 %v1480_v24, 0.0  ;;  %v951_v20 = vmul.f32 %v4194_v59, %v4084_v17  ;;  %v4347_v11 = vadd.f32 %v4219_v16, %v933_v29 }
 0x1e2   : > { %2191 = vmatmul.mubr.bf16.vlgmr.msra.gmra.mxu0 %v4146_v57  ;;  %v4336_v53 = vadd.f32 %v4203_v28, %v924_v3  ;;  %v4369_v33 = vadd.f32 %v4237_v15, %v943_v14  ;;  %v952_v8 = vmul.f32 %v4194_v59, %v5105_v54  ;;  %v4395_v10 = vadd.f32 %v4219_v16, %v935_v49  ;;  %v5112_v54 = vld [vmem:[#allocation19_spill] sm:$0xff] }
 0x1e3   : > { %v4307_v21 = vmax.f32 %v1042_v5, %v1516_v56  ;;  %2265 = vmatpush1.bf16.msra.mxu0 %v4026_v48  ;;  %2808 = vmatprep.mubr.msk.bf16.mxu0 %vm634_vm0, %v4161_v7  ;;  %v934_v48 = vmul.f32 %v4149_v13, %v4054_v0  ;;  %v5099_v0 = vld [vmem:[#allocation4_spill] sm:$0xff]  ;;  %v4375_v6 = vadd.f32 %v4257_v36, %v951_v20  ;;  %v1025_v9 = vmax.f32 %v4347_v11, 0.0  ;;  %v5107_v5 = vld [vmem:[#allocation21_spill] sm:$0xff] }
 0x1e4   : > { %2242 = vmatpush2.bf16.msra.mxu1 %v2092_v39  ;;  %2266 = vmatprep.subr.bf16.mxu0 %v3941_v18  ;;  %v942_v18 = vmul.f32 %v4176_v4, %v4061_v26  ;;  %v1016_v25 = vmax.f32 %v4336_v53, 0.0  ;;  %v5108_v56 = vld [vmem:[#allocation32_spill] sm:$0xff]  ;;  %v4402_v3 = vadd.f32 %v4219_v16, %v936_v40  ;;  %v945_v29 = vmul.f32 %v4176_v4, %v4154_v32 }
 0x1e5   : > { %2317 = vmatprep.subr.bf16.mxu1 %v5041_v22  ;;  %v4350_v17 = vadd.f32 %v4219_v16, %v934_v48  ;;  %v1035_v14 = vmax.f32 %v4369_v33, 0.0  ;;  %v4412_v20 = vadd.f32 %v4257_v36, %v952_v8  ;;  %v1027_v8 = vmax.f32 %v4395_v10, 0.0 }
 0x1e6   : > { %v4357_v1 = vadd.f32 %v4237_v15, %v942_v18  ;;  %v5109_v18 = vld [vmem:[#allocation9_spill] sm:$0xff] }
 0x1e7   : > { %2244 = vmatmul.mubr.bf16.vlgmr.msra.gmra.mxu1 %v4146_v57  ;;  %2267 = vmatpush1.bf16.msra.mxu0 %v3951_v62  ;;  %v926_v62 = vmul.f32 %v4166_v58, %v5099_v0  ;;  %v1026_v46 = vmax.f32 %v4350_v17, 0.0 }
 0x1e8   : > { %2318 = vmatpush1.bf16.msra.mxu1 %v4005_v43  ;;  %2268 = vmatprep.subr.bf16.mxu0 %v3830_v50  ;;  %v5100_v43 = vld [vmem:[#allocation5_spill] sm:$0xff]  ;;  %v4344_v50 = vadd.f32 %v4203_v28, %v925_v27  ;;  %v1034_v39 = vmax.f32 %v4357_v1, 0.0  ;;  %v944_v27 = vmul.f32 %v4176_v4, %v4135_v60 }
 0x1e9   : > { %2319 = vmatprep.subr.bf16.mxu1 %v5041_v22  ;;  %2810 = vmatprep.mubr.msk.bf16.mxu1 %vm634_vm0, %v4161_v7  ;;  %v927_v26 = vmul.f32 %v4166_v58, %v5100_v43  ;;  %v4385_v52 = vadd.f32 %v4203_v28, %v926_v62  ;;  %v1043_v62 = vmax.f32 %v4375_v6, 0.0  ;;  %v953_v43 = vmul.f32 %v4194_v59, %v4170_v19  ;;  %v5123_v6 = vld [vmem:[#allocation12_spill] sm:$0xff] }
 0x1ea   : > { %2201 = vmatmul.mubr.bf16.gmra.mxu0 %v4183_v35  ;;  %v1017_v12 = vmax.f32 %v4344_v50, 0.0  ;;  %v1028_v19 = vmax.f32 %v4402_v3, 0.0 }
 0x1eb   : > { %2269 = vmatpush1.bf16.msra.mxu0 %v5102_v41  ;;  %2811 = vmatprep.mubr.msk.bf16.mxu0 %vm634_vm0, %v3880_v34  ;;  %v4388_v45 = vadd.f32 %v4203_v28, %v927_v26  ;;  %v1018_v60 = vmax.f32 %v4385_v52, 0.0  ;;  %v5110_v26 = vld [vmem:[#allocation35_spill] sm:$0xff]  ;;  %v4433_v52 = vadd.f32 %v4237_v15, %v944_v27 }
 0x1ec   : > { %2320 = vmatpush1.bf16.msra.mxu1 %v5103_v42  ;;  %2270 = vmatprep.subr.bf16.mxu0 %v5104_v63  ;;  %v954_v50 = vmul.f32 %v4194_v59, %v5110_v26 }
 0x1ed   : > { %2321 = vmatprep.subr.bf16.mxu1 %v5041_v22  ;;  %v1019_v32 = vmax.f32 %v4388_v45, 0.0  ;;  %v4436_v45 = vadd.f32 %v4237_v15, %v945_v29 }
 0x1ee   : > { %v1242_v47 = vpop.f32.mrf.mxu0  ;;  %v4448_v27 = vadd.f32 %v4257_v36, %v954_v50 }
 0x1ef   : > { %2254 = vmatmul.mubr.bf16.gmra.mxu1 %v4183_v35  ;;  %v1418_v24 = vmul.f32 %v1242_v47, %v4166_v58  ;;  %2271 = vmatpush1.bf16.msra.mxu0 %v5107_v5  ;;  %v5113_v5 = vld [vmem:[#allocation30_spill] sm:$0xff] }
 0x1f0   : > { %2322 = vmatpush1.bf16.msra.mxu1 %v5108_v56  ;;  %v1244_v48 = vpop.f32.mrf.mxu0  ;;  %2272 = vmatprep.subr.bf16.mxu0 %v5109_v18 }
 0x1f1   : > { %2323 = vmatprep.subr.bf16.mxu1 %v5041_v22  ;;  %v1454_v53 = vadd.f32 %v1418_v24, %v4203_v28  ;;  %v1419_v0 = vmul.f32 %v1244_v48, %v4166_v58  ;;  %2813 = vmatprep.mubr.msk.bf16.mxu1 %vm634_vm0, %v3880_v34  ;;  %v5111_v34 = vld [vmem:[#allocation10_spill] sm:$0xff] }
 0x1f2   : > { %v1246_v2 = vpop.f32.mrf.mxu0  ;;  %v1295_v49 = vpop.f32.mrf.mxu1 }
 0x1f3   : > { %v1490_v41 = vmax.f32 %v1454_v53, 0.0  ;;  %v1455_v42 = vadd.f32 %v1419_v0, %v4203_v28  ;;  %v1427_v40 = vmul.f32 %v1246_v2, %v4149_v13  ;;  %v1420_v63 = vmul.f32 %v1295_v49, %v4166_v58  ;;  %2273 = vmatpush1.bf16.msra.mxu0 %v5111_v34 }
 0x1f4   : > { %2324 = vmatpush1.bf16.msra.mxu1 %v5112_v54  ;;  %v1248_v47 = vpop.f32.mrf.mxu0  ;;  %v1297_v24 = vpop.f32.mrf.mxu1  ;;  %2274 = vmatprep.subr.bf16.mxu0 %v5113_v5  ;;  %v4445_v53 = vadd.f32 %v4257_v36, %v953_v43  ;;  %v1036_v43 = vmax.f32 %v4433_v52, 0.0 }
 0x1f5   : > { %2325 = vmatprep.subr.bf16.mxu1 %v5041_v22  ;;  %v4440_v56 = vmax.f32 %v1016_v25, %v1490_v41  ;;  %v1491_v48 = vmax.f32 %v1455_v42, 0.0  ;;  %v1463_v18 = vadd.f32 %v1427_v40, %v4219_v16  ;;  %v1456_v10 = vadd.f32 %v1420_v63, %v4203_v28  ;;  %v5114_v40 = vld [vmem:[#allocation31_spill] sm:$0xff]  ;;  %v5115_v63 = vld [vmem:[#allocation8_spill] sm:$0xff] }
 0x1f6   : > { %v1428_v29 = vmul.f32 %v1248_v47, %v4149_v13  ;;  %v1421_v0 = vmul.f32 %v1297_v24, %v4166_v58  ;;  %v1252_v26 = vpop.f32.mrf.mxu0  ;;  %v1299_v2 = vpop.f32.mrf.mxu1 }
 0x1f7   : > { %v4452_v49 = vmax.f32 %v1017_v12, %v1491_v48  ;;  %v1499_v25 = vmax.f32 %v1463_v18, 0.0  ;;  %v1492_v41 = vmax.f32 %v1456_v10, 0.0  ;;  %v1436_v42 = vmul.f32 %v1252_v26, %v4176_v4  ;;  %2275 = vmatpush1.bf16.msra.mxu0 %v5114_v40  ;;  %v5116_v12 = vld [vmem:[#allocation17_spill] sm:$0xff] }
 0x1f8   : > { %2326 = vmatpush1.bf16.msra.mxu1 %v5115_v63  ;;  %v1464_v50 = vadd.f32 %v1428_v29, %v4219_v16  ;;  %v1457_v34 = vadd.f32 %v1421_v0, %v4203_v28  ;;  %v1429_v54 = vmul.f32 %v1299_v2, %v4149_v13  ;;  %v1254_v47 = vpop.f32.mrf.mxu0  ;;  %v1301_v24 = vpop.f32.mrf.mxu1  ;;  %2276 = vmatprep.subr.bf16.mxu0 %v5116_v12 }
 0x1f9   : > { %2327 = vmatprep.subr.bf16.mxu1 %v5041_v22  ;;  %v4465_v5 = vmax.f32 %v1025_v9, %v1499_v25  ;;  %v4467_v48 = vmax.f32 %v1018_v60, %v1492_v41  ;;  %v1472_v52 = vadd.f32 %v1436_v42, %v4237_v15  ;;  %v1437_v18 = vmul.f32 %v1254_v47, %v4176_v4  ;;  %v5117_v60 = vld [vmem:[#allocation18_spill] sm:$0xff]  ;;  %v5118_v25 = vld [vmem:[#allocation29_spill] sm:$0xff] }
 0x1fa   : > { %v1500_v10 = vmax.f32 %v1464_v50, 0.0  ;;  %v1493_v29 = vmax.f32 %v1457_v34, 0.0  ;;  %v1465_v0 = vadd.f32 %v1429_v54, %v4219_v16  ;;  %v1430_v26 = vmul.f32 %v1301_v24, %v4149_v13  ;;  %v1256_v2 = vpop.f32.mrf.mxu0  ;;  %v1305_v40 = vpop.f32.mrf.mxu1  ;;  %v5119_v24 = vld [vmem:[#allocation2_spill] sm:$0xff] }
 0x1fb   : > { %v1508_v63 = vmax.f32 %v1472_v52, 0.0  ;;  %v1473_v12 = vadd.f32 %v1437_v18, %v4237_v15  ;;  %v1445_v11 = vmul.f32 %v1256_v2, %v4194_v59  ;;  %v1438_v9 = vmul.f32 %v1305_v40, %v4176_v4  ;;  %2277 = vmatpush1.bf16.msra.mxu0 %v5117_v60 }
 0x1fc   : > { %2328 = vmatpush1.bf16.msra.mxu1 %v5118_v25  ;;  %v4480_v41 = vmax.f32 %v1026_v46, %v1500_v10  ;;  %v4482_v42 = vmax.f32 %v1019_v32, %v1493_v29  ;;  %v1501_v50 = vmax.f32 %v1465_v0, 0.0  ;;  %v1466_v34 = vadd.f32 %v1430_v26, %v4219_v16  ;;  %v1258_v54 = vpop.f32.mrf.mxu0  ;;  %v1307_v47 = vpop.f32.mrf.mxu1  ;;  %2278 = vmatprep.subr.bf16.mxu0 %v5119_v24 }
 0x1fd   : > { %2329 = vmatprep.subr.bf16.mxu1 %v5041_v22  ;;  %v4489_v52 = vmax.f32 %v1034_v39, %v1508_v63  ;;  %v1509_v18 = vmax.f32 %v1473_v12, 0.0  ;;  %v1481_v17 = vadd.f32 %v1445_v11, %v4257_v36  ;;  %v1474_v46 = vadd.f32 %v1438_v9, %v4237_v15  ;;  %v5120_v63 = vld [vmem:[#allocation3_spill] sm:$0xff]  ;;  %v5121_v12 = vld [vmem:[#allocation16_spill] sm:$0xff] }
 0x1fe   : > { %v4493_v32 = vmax.f32 %v1027_v8, %v1501_v50  ;;  %v1502_v10 = vmax.f32 %v1466_v34, 0.0  ;;  %v1446_v29 = vmul.f32 %v1258_v54, %v4194_v59  ;;  %v1439_v0 = vmul.f32 %v1307_v47, %v4176_v4  ;;  %v1309_v26 = vpop.f32.mrf.mxu1 }
 0x1ff   : > { %v4499_v2 = vmax.f32 %v1035_v14, %v1509_v18  ;;  %v1517_v1 = vmax.f32 %v1481_v17, 0.0  ;;  %v1510_v39 = vmax.f32 %v1474_v46, 0.0  ;;  %v1447_v40 = vmul.f32 %v1309_v26, %v4194_v59  ;;  %2279 = vmatpush1.bf16.msra.mxu0 %v5120_v63  ;;  %v5129_v46 = vld [vmem:[#allocation13_spill] sm:$0xff]  ;;  %v5132_v26 = vld [vmem:[#allocation34_spill] sm:$0xff] }
 0x200   : > { %2330 = vmatpush1.bf16.msra.mxu1 %v5121_v12  ;;  %v4506_v8 = vmax.f32 %v1028_v19, %v1502_v10  ;;  %v1482_v11 = vadd.f32 %v1446_v29, %v4257_v36  ;;  %v1475_v9 = vadd.f32 %v1439_v0, %v4237_v15  ;;  %v1311_v60 = vpop.f32.mrf.mxu1  ;;  %2294 = vmatprep.subr.bf16.mxu0 %v4380_v38  ;;  %v1044_v19 = vmax.f32 %v4412_v20, 0.0  ;;  %v5130_v29 = vld [vmem:[#allocation22_spill] sm:$0xff]  ;;  %v5131_v0 = vld [vmem:[#allocation23_spill] sm:$0xff]  ;;  %v5133_v12 = vld [vmem:[#allocation37_spill] sm:$0xff] }
 0x201   : > { %2331 = vmatprep.subr.bf16.mxu1 %v5041_v22  ;;  %v4514_v33 = vmax.f32 %v1043_v62, %v1517_v1  ;;  %v4516_v14 = vmax.f32 %v1036_v43, %v1510_v39  ;;  %v1483_v25 = vadd.f32 %v1447_v40, %v4257_v36  ;;  %v1448_v3 = vmul.f32 %v1311_v60, %v4194_v59 }
 0x202   : > { %v1037_v50 = vmax.f32 %v4436_v45, 0.0  ;;  %v1518_v34 = vmax.f32 %v1482_v11, 0.0  ;;  %v1511_v54 = vmax.f32 %v1475_v9, 0.0  ;;  %v1045_v38 = vmax.f32 %v4445_v53, 0.0 }
 0x203   : > { %5122 = vst [vmem:[#allocation28_spill] sm:$0xff] %v4516_v14  ;;  %v1519_v47 = vmax.f32 %v1483_v25, 0.0  ;;  %v1484_v24 = vadd.f32 %v1448_v3, %v4257_v36  ;;  %2295 = vmatpush2.bf16.msra.mxu0 %v4362_v61  ;;  %v1046_v20 = vmax.f32 %v4448_v27, 0.0  ;;  %v5128_v27 = vld [vmem:[#allocation15_spill] sm:$0xff]  ;;  %v937_v10 = vmul.f32 %v4149_v13, %v5129_v46 }
 0x204   : > { %2332 = vmatpush1.bf16.msra.mxu1 %v5123_v6  ;;  %v4526_v62 = vmax.f32 %v1044_v19, %v1518_v34  ;;  %v4528_v43 = vmax.f32 %v1037_v50, %v1511_v54  ;;  %v929_v17 = vmul.f32 %v4166_v58, %v5128_v27  ;;  %v930_v11 = vmul.f32 %v4166_v58, %v5133_v12  ;;  %v5134_v19 = vld [vmem:[#allocation36_spill] sm:$0xff]  ;;  %v5136_v12 = vld [vmem:[#allocation38_spill] sm:$0xff] }
 0x205   : > { %2347 = vmatprep.subr.bf16.mxu1 %v5041_v22  ;;  %v4532_v45 = vmax.f32 %v1045_v38, %v1519_v47  ;;  %v1520_v18 = vmax.f32 %v1484_v24, 0.0  ;;  %v5127_v22 = vld [vmem:[#allocation11_spill] sm:$0xff]  ;;  %v993_v40 = vadd.f32 %v4219_v16, %v937_v10  ;;  %v955_v50 = vmul.f32 %v4194_v59, %v5134_v19 }
 0x206   : > { %5124 = vst [vmem:[#allocation4_spill] sm:$0xff] %v4528_v43  ;;  %2297 = vmatmul.mubr.bf16.vlgmr.msra.gmra.mxu0 %v4146_v57  ;;  %v928_v61 = vmul.f32 %v4166_v58, %v5127_v22  ;;  %v985_v39 = vadd.f32 %v4203_v28, %v929_v17 }
 0x207   : > { %5125 = vst [vmem:[#allocation5_spill] sm:$0xff] %v4532_v45  ;;  %v4535_v53 = vmax.f32 %v1046_v20, %v1520_v18  ;;  %2812 = vmatprep.mubr.msk.bf16.mxu0 %vm634_vm0, %v4161_v7  ;;  %v1029_v6 = vmax.f32 %v993_v40, 0.0  ;;  %v986_v20 = vadd.f32 %v4203_v28, %v930_v11  ;;  %v956_v11 = vmul.f32 %v4194_v59, %v5136_v12 }
 0x208   : > { %2348 = vmatpush2.bf16.msra.mxu1 %v5106_v51  ;;  %v938_v51 = vmul.f32 %v4149_v13, %v5130_v29  ;;  %v984_v1 = vadd.f32 %v4203_v28, %v928_v61  ;;  %v1021_v24 = vmax.f32 %v985_v39, 0.0 }
 0x209   : > { %5126 = vst [vmem:[#allocation14_spill] sm:$0xff] %v4535_v53 }
 0x20a   : > { %v4560_v63 = vadd.f32 %v4219_v16, %v938_v51  ;;  %v1020_v54 = vmax.f32 %v984_v1, 0.0  ;;  %v1011_v51 = vadd.f32 %v4257_v36, %v955_v50 }
 0x20b   : > { %2350 = vmatmul.mubr.bf16.vlgmr.msra.gmra.mxu1 %v4146_v57  ;;  %v946_v57 = vmul.f32 %v4176_v4, %v5131_v0  ;;  %v5135_v0 = vld [vmem:[#allocation39_spill] sm:$0xff] }
 0x20c   : > { %2814 = vmatprep.mubr.msk.bf16.mxu1 %vm634_vm0, %v4161_v7  ;;  %v947_v7 = vmul.f32 %v4176_v4, %v5132_v26 }
 0x20d   : > { %v4567_v25 = vadd.f32 %v4237_v15, %v946_v57  ;;  %v939_v57 = vmul.f32 %v4149_v13, %v5135_v0 }
 0x20e   : > { %2307 = vmatmul.mubr.bf16.gmra.mxu0 %v4183_v35  ;;  %v4570_v3 = vadd.f32 %v4237_v15, %v947_v7 }
 0x20f   : > { %v1038_v10 = vmax.f32 %v4567_v25, 0.0 }
 0x210   : > { %v1039_v29 = vmax.f32 %v4570_v3, 0.0 }
 0x212   : > { %v1348_v9 = vpop.f32.mrf.mxu0 }
 0x213   : > { %2358 = vmatmul.mubr.bf16.gmra.mxu1 %v4183_v35  ;;  %v1422_v60 = vmul.f32 %v1348_v9, %v4166_v58  ;;  %v1030_v35 = vmax.f32 %v4560_v63, 0.0  ;;  %v1022_v9 = vmax.f32 %v986_v20, 0.0 }
 0x214   : > { %v1350_v34 = vpop.f32.mrf.mxu0 }
 0x215   : > { %v1458_v38 = vadd.f32 %v1422_v60, %v4203_v28  ;;  %v1423_v47 = vmul.f32 %v1350_v34, %v4166_v58  ;;  %v5137_v60 = vld [vmem:[#allocation25_spill] sm:$0xff] }
 0x216   : > { %v1352_v18 = vpop.f32.mrf.mxu0  ;;  %v1401_v22 = vpop.f32.mrf.mxu1  ;;  %v948_v25 = vmul.f32 %v4176_v4, %v5137_v60 }
 0x217   : > { %v1494_v61 = vmax.f32 %v1458_v38, 0.0  ;;  %v1459_v27 = vadd.f32 %v1423_v47, %v4203_v28  ;;  %v1431_v17 = vmul.f32 %v1352_v18, %v4149_v13  ;;  %v1424_v46 = vmul.f32 %v1401_v22, %v4166_v58 }
 0x218   : > { %v1354_v26 = vpop.f32.mrf.mxu0  ;;  %v1403_v7 = vpop.f32.mrf.mxu1  ;;  %v1047_v18 = vmax.f32 %v1011_v51, 0.0  ;;  %v995_v22 = vadd.f32 %v4219_v16, %v939_v57  ;;  %v957_v51 = vmul.f32 %v4194_v59, %v4255_v23 }
 0x219   : > { %v4586_v1 = vmax.f32 %v1020_v54, %v1494_v61  ;;  %v1495_v39 = vmax.f32 %v1459_v27, 0.0  ;;  %v1467_v40 = vadd.f32 %v1431_v17, %v4219_v16  ;;  %v1460_v63 = vadd.f32 %v1424_v46, %v4203_v28 }
 0x21a   : > { %v1432_v3 = vmul.f32 %v1354_v26, %v4149_v13  ;;  %v1358_v19 = vpop.f32.mrf.mxu0  ;;  %v1404_v50 = vpop.f32.mrf.mxu1  ;;  %v1004_v7 = vadd.f32 %v4237_v15, %v948_v25 }
 0x21b   : > { %v4595_v34 = vmax.f32 %v1021_v24, %v1495_v39  ;;  %v1503_v54 = vmax.f32 %v1467_v40, 0.0  ;;  %v1496_v38 = vmax.f32 %v1460_v63, 0.0  ;;  %v1440_v47 = vmul.f32 %v1358_v19, %v4176_v4 }
 0x21c   : > { %v1468_v61 = vadd.f32 %v1432_v3, %v4219_v16  ;;  %v1433_v20 = vmul.f32 %v1404_v50, %v4149_v13  ;;  %v1360_v27 = vpop.f32.mrf.mxu0  ;;  %v1406_v17 = vpop.f32.mrf.mxu1  ;;  %v1012_v3 = vadd.f32 %v4257_v36, %v956_v11  ;;  %v1031_v19 = vmax.f32 %v995_v22, 0.0 }
 0x21d   : > { %v4601_v46 = vmax.f32 %v1029_v6, %v1503_v54  ;;  %v4603_v0 = vmax.f32 %v1022_v9, %v1496_v38  ;;  %v1476_v24 = vadd.f32 %v1440_v47, %v4237_v15  ;;  %v1441_v26 = vmul.f32 %v1360_v27, %v4176_v4 }
 0x21e   : > { %v1504_v57 = vmax.f32 %v1468_v61, 0.0  ;;  %v1469_v39 = vadd.f32 %v1433_v20, %v4219_v16  ;;  %v1362_v40 = vpop.f32.mrf.mxu0  ;;  %v1409_v63 = vpop.f32.mrf.mxu1  ;;  %v1040_v27 = vmax.f32 %v1004_v7, 0.0  ;;  %v1013_v17 = vadd.f32 %v4257_v36, %v957_v51 }
 0x21f   : > { %v1512_v12 = vmax.f32 %v1476_v24, 0.0  ;;  %v1477_v6 = vadd.f32 %v1441_v26, %v4237_v15  ;;  %v1449_v9 = vmul.f32 %v1362_v40, %v4194_v59  ;;  %v1442_v60 = vmul.f32 %v1409_v63, %v4176_v4 }
 0x220   : > { %v4615_v50 = vmax.f32 %v1030_v35, %v1504_v57  ;;  %v1505_v25 = vmax.f32 %v1469_v39, 0.0  ;;  %v1364_v54 = vpop.f32.mrf.mxu0  ;;  %v1411_v23 = vpop.f32.mrf.mxu1  ;;  %v1048_v51 = vmax.f32 %v1012_v3, 0.0 }
 0x221   : > { %v4617_v38 = vmax.f32 %v1038_v10, %v1512_v12  ;;  %v1513_v47 = vmax.f32 %v1477_v6, 0.0  ;;  %v1485_v61 = vadd.f32 %v1449_v9, %v4257_v36  ;;  %v1478_v20 = vadd.f32 %v1442_v60, %v4237_v15 }
 0x222   : > { %v4622_v24 = vmax.f32 %v1031_v19, %v1505_v25  ;;  %v1450_v11 = vmul.f32 %v1364_v54, %v4194_v59  ;;  %v1412_v22 = vpop.f32.mrf.mxu1  ;;  %v1049_v9 = vmax.f32 %v1013_v17, 0.0 }
 0x223   : > { %v4625_v35 = vmax.f32 %v1039_v29, %v1513_v47  ;;  %v1521_v26 = vmax.f32 %v1485_v61, 0.0  ;;  %v1514_v57 = vmax.f32 %v1478_v20, 0.0  ;;  %v1451_v10 = vmul.f32 %v1412_v22, %v4194_v59 }
 0x224   : > { %v1486_v39 = vadd.f32 %v1450_v11, %v4257_v36  ;;  %v1414_v40 = vpop.f32.mrf.mxu1 }
 0x225   : > { %v4629_v63 = vmax.f32 %v1047_v18, %v1521_v26  ;;  %v4631_v12 = vmax.f32 %v1040_v27, %v1514_v57  ;;  %v1487_v7 = vadd.f32 %v1451_v10, %v4257_v36 }
 0x226   : > { %v1522_v6 = vmax.f32 %v1486_v39, 0.0 }
 0x227   : > { %v1523_v60 = vmax.f32 %v1487_v7, 0.0 }
 0x228   : > { %v4634_v19 = vmax.f32 %v1048_v51, %v1522_v6 }
 0x229   : > { %v4636_v29 = vmax.f32 %v1049_v9, %v1523_v60 }
 0x236   : > { %v4648_v17 = vpop.f32.mrf.mxu0 }
 0x238   : > { %v4655_v40 = vpop.f32.mrf.mxu0 }
 0x23a   : > { %v1752_v25 = vpop.f32.mrf.mxu1 }
 0x23b   : > { %v1928_v54 = vmul.f32 %v1752_v25, %v4166_v58 }
 0x23c   : > { %v4639_v23 = vpop.f32.mrf.mxu1 }
 0x23d   : > { %v1964_v18 = vadd.f32 %v1928_v54, %v4203_v28 }
 0x23e   : > { %v1756_v47 = vpop.f32.mrf.mxu1 }
 0x23f   : > { %v2000_v61 = vmax.f32 %v1964_v18, 0.0  ;;  %v1937_v20 = vmul.f32 %v1756_v47, %v4149_v13  ;;  %v1703_v18 = vpop.f32.mrf.mxu0 }
 0x240   : > { %v4643_v27 = vpop.f32.mrf.mxu1 }
 0x241   : > { %v4646_v3 = vmax.f32 %v4440_v56, %v2000_v61  ;;  %v1973_v11 = vadd.f32 %v1937_v20, %v4219_v16 }
 0x242   : > { %v1762_v22 = vpop.f32.mrf.mxu1 }
 0x243   : > { %v1946_v26 = vmul.f32 %v1762_v22, %v4176_v4  ;;  %v2009_v57 = vmax.f32 %v1973_v11, 0.0  ;;  %v1705_v11 = vpop.f32.mrf.mxu0 }
 0x244   : > { %v4652_v10 = vpop.f32.mrf.mxu1 }
 0x245   : > { %v1982_v39 = vadd.f32 %v1946_v26, %v4237_v15  ;;  %v4658_v7 = vmax.f32 %v4465_v5, %v2009_v57  ;;  %v4673_v26 = vpop.f32.mrf.mxu0 }
 0x246   : > { %v1766_v51 = vpop.f32.mrf.mxu1 }
 0x247   : > { %v2018_v56 = vmax.f32 %v1982_v39, 0.0  ;;  %v1955_v6 = vmul.f32 %v1766_v51, %v4194_v59 }
 0x248   : > { %v1768_v9 = vpop.f32.mrf.mxu1 }
 0x249   : > { %v4662_v60 = vmax.f32 %v4489_v52, %v2018_v56  ;;  %v1991_v25 = vadd.f32 %v1955_v6, %v4257_v36  ;;  %v1956_v54 = vmul.f32 %v1768_v9, %v4194_v59  ;;  %v4675_v52 = vpop.f32.mrf.mxu0 }
 0x24b   : > { %5138 = vst [vmem:[#allocation33_spill] sm:$0xff] %v4662_v60  ;;  %v2027_v47 = vmax.f32 %v1991_v25, 0.0  ;;  %v1992_v61 = vadd.f32 %v1956_v54, %v4257_v36  ;;  %v4677_v57 = vpop.f32.mrf.mxu0 }
 0x24d   : > { %v4668_v20 = vmax.f32 %v4514_v33, %v2027_v47  ;;  %v2028_v5 = vmax.f32 %v1992_v61, 0.0  ;;  %v4679_v39 = vpop.f32.mrf.mxu0 }
 0x24f   : > { %5139 = vst [vmem:[#allocation7_spill] sm:$0xff] %v4668_v20  ;;  %v4671_v22 = vmax.f32 %v4526_v62, %v2028_v5 }
 0x251   : > { %5140 = vst [vmem:[#allocation20_spill] sm:$0xff] %v4671_v22 }
 0x25a   : > { %v4682_v6 = vpop.f32.mrf.mxu0 }
 0x25c   : > { %v4686_v47 = vpop.f32.mrf.mxu0 }
 0x25e   : > { %v1858_v51 = vpop.f32.mrf.mxu1  ;;  %v4696_v43 = vpop.f32.mrf.mxu0 }
 0x25f   : > { %v1932_v56 = vmul.f32 %v1858_v51, %v4166_v58 }
 0x260   : > { %v1860_v33 = vpop.f32.mrf.mxu1  ;;  %v4708_v60 = vpop.f32.mrf.mxu0 }
 0x261   : > { %v1968_v9 = vadd.f32 %v1932_v56, %v4203_v28  ;;  %v1933_v25 = vmul.f32 %v1860_v33, %v4166_v58 }
 0x262   : > { %v1862_v62 = vpop.f32.mrf.mxu1 }
 0x263   : > { %v2004_v54 = vmax.f32 %v1968_v9, 0.0  ;;  %v1969_v61 = vadd.f32 %v1933_v25, %v4203_v28  ;;  %v1941_v5 = vmul.f32 %v1862_v62, %v4149_v13 }
 0x264   : > { %v1864_v53 = vpop.f32.mrf.mxu1 }
 0x265   : > { %v4691_v22 = vmax.f32 %v4586_v1, %v2004_v54  ;;  %v2005_v51 = vmax.f32 %v1969_v61, 0.0  ;;  %v1977_v20 = vadd.f32 %v1941_v5, %v4219_v16  ;;  %v1942_v45 = vmul.f32 %v1864_v53, %v4149_v13 }
 0x266   : > { %v1868_v56 = vpop.f32.mrf.mxu1 }
 0x267   : > { %5141 = vst [vmem:[#allocation6_spill] sm:$0xff] %v4691_v22  ;;  %v1950_v33 = vmul.f32 %v1868_v56, %v4176_v4  ;;  %v4699_v9 = vmax.f32 %v4595_v34, %v2005_v51  ;;  %v2013_v25 = vmax.f32 %v1977_v20, 0.0  ;;  %v1978_v62 = vadd.f32 %v1942_v45, %v4219_v16 }
 0x268   : > { %v1870_v14 = vpop.f32.mrf.mxu1 }
 0x269   : > { %v1986_v1 = vadd.f32 %v1950_v33, %v4237_v15  ;;  %v4704_v54 = vmax.f32 %v4601_v46, %v2013_v25  ;;  %v2014_v61 = vmax.f32 %v1978_v62, 0.0  ;;  %v1951_v53 = vmul.f32 %v1870_v14, %v4176_v4 }
 0x26a   : > { %v1872_v5 = vpop.f32.mrf.mxu1 }
 0x26b   : > { %5142 = vst [vmem:[#allocation24_spill] sm:$0xff] %v4704_v54  ;;  %v2022_v22 = vmax.f32 %v1986_v1, 0.0  ;;  %v1959_v56 = vmul.f32 %v1872_v5, %v4194_v59  ;;  %v4711_v34 = vmax.f32 %v4615_v50, %v2014_v61  ;;  %v1987_v45 = vadd.f32 %v1951_v53, %v4237_v15  ;;  %v4720_v1 = vpop.f32.mrf.mxu0 }
 0x26c   : > { %v1874_v20 = vpop.f32.mrf.mxu1 }
 0x26d   : > { %5143 = vst [vmem:[#allocation21_spill] sm:$0xff] %v4711_v34  ;;  %v4715_v51 = vmax.f32 %v4617_v38, %v2022_v22  ;;  %v1995_v46 = vadd.f32 %v1959_v56, %v4257_v36  ;;  %v1960_v33 = vmul.f32 %v1874_v20, %v4194_v59  ;;  %v2023_v14 = vmax.f32 %v1987_v45, 0.0  ;;  %v4731_v22 = vpop.f32.mrf.mxu0 }
 0x26e   : > { %v1926_v56 = vmul.f32 %v4648_v17, %v4166_v58  ;;  %v1927_v45 = vmul.f32 %v4655_v40, %v4166_v58 }
 0x26f   : > { %5144 = vst [vmem:[#allocation32_spill] sm:$0xff] %v4715_v51  ;;  %v2031_v25 = vmax.f32 %v1995_v46, 0.0  ;;  %v1996_v62 = vadd.f32 %v1960_v33, %v4257_v36  ;;  %v4723_v5 = vmax.f32 %v4625_v35, %v2023_v14  ;;  %v4733_v53 = vpop.f32.mrf.mxu0  ;;  %v1935_v35 = vmul.f32 %v1703_v18, %v4149_v13 }
 0x270   : > { %v1963_v46 = vadd.f32 %v1927_v45, %v4203_v28 }
 0x271   : > { %5145 = vst [vmem:[#allocation9_spill] sm:$0xff] %v4723_v5  ;;  %v4726_v50 = vmax.f32 %v4629_v63, %v2031_v25  ;;  %v2032_v61 = vmax.f32 %v1996_v62, 0.0  ;;  %v4740_v20 = vpop.f32.mrf.mxu0  ;;  %v1962_v63 = vadd.f32 %v1926_v56, %v4203_v28  ;;  %v1936_v25 = vmul.f32 %v1705_v11, %v4149_v13 }
 0x272   : > { %v1999_v40 = vmax.f32 %v1963_v46, 0.0  ;;  %v1945_v11 = vmul.f32 %v4675_v52, %v4176_v4  ;;  %v1953_v52 = vmul.f32 %v4677_v57, %v4194_v59 }
 0x273   : > { %5146 = vst [vmem:[#allocation35_spill] sm:$0xff] %v4726_v50  ;;  %v4729_v38 = vmax.f32 %v4634_v19, %v2032_v61  ;;  %v1971_v19 = vadd.f32 %v1935_v35, %v4219_v16  ;;  %v1998_v61 = vmax.f32 %v1962_v63, 0.0  ;;  %v1972_v35 = vadd.f32 %v1936_v25, %v4219_v16 }
 0x274   : > { %v1981_v57 = vadd.f32 %v1945_v11, %v4237_v15 }
 0x275   : > { %5147 = vst [vmem:[#allocation10_spill] sm:$0xff] %v4729_v38  ;;  %v2007_v38 = vmax.f32 %v1971_v19, 0.0 }
 0x27e   : > { %v1911_v33 = vpop.f32.mrf.mxu0 }
 0x27f   : > { %v1934_v14 = vmul.f32 %v1911_v33, %v4166_v58  ;;  %v1944_v33 = vmul.f32 %v4673_v26, %v4176_v4  ;;  %v2043_v26 = vmax.f32 %v4273_v37, %v2007_v38 }
 0x280   : > { %v1913_v62 = vpop.f32.mrf.mxu0 }
 0x281   : > { %v1970_v17 = vadd.f32 %v1934_v14, %v4203_v28 }
 0x282   : > { %v1914_v18 = vpop.f32.mrf.mxu0  ;;  %v2139_v50 = vpop.f32.mrf.mxu1 }
 0x283   : > { %v2006_v5 = vmax.f32 %v1970_v17, 0.0  ;;  %v1943_v56 = vmul.f32 %v1914_v18, %v4149_v13  ;;  %v2366_v45 = vmul.f32 %v2139_v50, %v4166_v58  ;;  %v5149_v17 = vld [vmem:[#allocation27_spill] sm:$0xff]  ;;  %v5150_v18 = vld [vmem:[#allocation26_spill] sm:$0xff] }
 0x284   : > { %v1916_v62 = vpop.f32.mrf.mxu0  ;;  %v2141_v14 = vpop.f32.mrf.mxu1  ;;  %v2034_v25 = vmax.f32 %v5149_v17, %v1998_v61  ;;  %v2035_v51 = vmax.f32 %v5150_v18, %v1999_v40  ;;  %v1954_v61 = vmul.f32 %v4679_v39, %v4194_v59 }
 0x285   : > { %v4756_v63 = vmax.f32 %v4603_v0, %v2006_v5  ;;  %v1979_v46 = vadd.f32 %v1943_v56, %v4219_v16  ;;  %v2402_v19 = vadd.f32 %v2366_v45, %v4203_v28  ;;  %v2367_v50 = vmul.f32 %v2141_v14, %v4166_v58 }
 0x286   : > { %v1919_v62 = vpop.f32.mrf.mxu0  ;;  %v2143_v34 = vpop.f32.mrf.mxu1  ;;  %v2008_v45 = vmax.f32 %v1972_v35, 0.0  ;;  %v1980_v14 = vadd.f32 %v1944_v33, %v4237_v15  ;;  %v1989_v35 = vadd.f32 %v1953_v52, %v4257_v36 }
 0x287   : > { %5148 = vst [vmem:[#allocation19_spill] sm:$0xff] %v4756_v63  ;;  %v2015_v0 = vmax.f32 %v1979_v46, 0.0  ;;  %v2438_v5 = vmax.f32 %v2402_v19, 0.0  ;;  %v2403_v56 = vadd.f32 %v2367_v50, %v4203_v28  ;;  %v1952_v54 = vmul.f32 %v1919_v62, %v4176_v4 }
 0x288   : > { %v2375_v37 = vmul.f32 %v2143_v34, %v4149_v13  ;;  %v1921_v38 = vpop.f32.mrf.mxu0  ;;  %v2145_v40 = vpop.f32.mrf.mxu1 }
 0x289   : > { %v4775_v46 = vmax.f32 %v4622_v24, %v2015_v0  ;;  %v2439_v19 = vmax.f32 %v2403_v56, 0.0  ;;  %v1988_v50 = vadd.f32 %v1952_v54, %v4237_v15  ;;  %v2474_v17 = vmax.f32 %v2034_v25, %v2438_v5 }
 0x28a   : > { %v2411_v33 = vadd.f32 %v2375_v37, %v4219_v16  ;;  %v2376_v39 = vmul.f32 %v2145_v40, %v4149_v13  ;;  %v1922_v18 = vpop.f32.mrf.mxu0  ;;  %v2149_v62 = vpop.f32.mrf.mxu1  ;;  %v2016_v24 = vmax.f32 %v1980_v14, 0.0  ;;  %v1990_v0 = vadd.f32 %v1954_v61, %v4257_v36 }
 0x28b   : > { %v2475_v34 = vmax.f32 %v2035_v51, %v2439_v19  ;;  %v2024_v38 = vmax.f32 %v1988_v50, 0.0  ;;  %v1961_v63 = vmul.f32 %v1922_v18, %v4194_v59  ;;  %v2384_v11 = vmul.f32 %v2149_v62, %v4176_v4 }
 0x28c   : > { %v2447_v54 = vmax.f32 %v2411_v33, 0.0  ;;  %v2412_v25 = vadd.f32 %v2376_v39, %v4219_v16  ;;  %v2151_v52 = vpop.f32.mrf.mxu1  ;;  %v1924_v5 = vpop.f32.mrf.mxu0  ;;  %v2044_v61 = vmax.f32 %v4278_v55, %v2008_v45  ;;  %v2017_v40 = vmax.f32 %v1981_v57, 0.0 }
 0x28d   : > { %v2837_v51 = vpack.c.bf16 %v2475_v34, %v2474_v17  ;;  %v4791_v56 = vmax.f32 %v4631_v12, %v2024_v38  ;;  %v1997_v37 = vadd.f32 %v1961_v63, %v4257_v36  ;;  %v2420_v14 = vadd.f32 %v2384_v11, %v4237_v15 }
 0x28e   : > { %v2448_v19 = vmax.f32 %v2412_v25, 0.0  ;;  %v2385_v50 = vmul.f32 %v2151_v52, %v4176_v4  ;;  %v2153_v18 = vpop.f32.mrf.mxu1  ;;  %v2025_v33 = vmax.f32 %v1989_v35, 0.0  ;;  %v2483_v17 = vmax.f32 %v2043_v26, %v2447_v54 }
 0x28f   : > { %2622 = vst [vmem:[%s4787_s8] sm:$0xff] %v2837_v51  ;;  %v2033_v39 = vmax.f32 %v1997_v37, 0.0  ;;  %v2393_v62 = vmul.f32 %v2153_v18, %v4194_v59  ;;  %v2456_v34 = vmax.f32 %v2420_v14, 0.0  ;;  %v2026_v11 = vmax.f32 %v1990_v0, 0.0 }
 0x290   : > { %v2484_v12 = vmax.f32 %v2044_v61, %v2448_v19  ;;  %v2421_v63 = vadd.f32 %v2385_v50, %v4237_v15  ;;  %v2155_v38 = vpop.f32.mrf.mxu1  ;;  %v2052_v35 = vmax.f32 %v4289_v44, %v2016_v24  ;;  %v2053_v25 = vmax.f32 %v4296_v31, %v2017_v40 }
 0x291   : > { %v4801_v55 = vmax.f32 %v4636_v29, %v2033_v39  ;;  %v2429_v45 = vadd.f32 %v2393_v62, %v4257_v36  ;;  %v2394_v57 = vmul.f32 %v2155_v38, %v4194_v59  ;;  %v2061_v29 = vmax.f32 %v4301_v30, %v2025_v33 }
 0x292   : > { %v2842_v52 = vpack.c.bf16 %v2484_v12, %v2483_v17  ;;  %v2457_v26 = vmax.f32 %v2421_v63, 0.0  ;;  %v2492_v0 = vmax.f32 %v2052_v35, %v2456_v34  ;;  %v2062_v37 = vmax.f32 %v4307_v21, %v2026_v11 }
 0x293   : > { %v2465_v54 = vmax.f32 %v2429_v45, 0.0  ;;  %v2430_v5 = vadd.f32 %v2394_v57, %v4257_v36  ;;  %v1929_v31 = vmul.f32 %v4639_v23, %v4166_v58  ;;  %v1938_v24 = vmul.f32 %v4643_v27, %v4149_v13 }
 0x294   : > { %2628 = vst [vmem:[%s4787_s8 + $0x24] sm:$0xff] %v2842_v52  ;;  %v2493_v51 = vmax.f32 %v2053_v25, %v2457_v26  ;;  %v1947_v50 = vmul.f32 %v4652_v10, %v4176_v4  ;;  %v1930_v30 = vmul.f32 %v4682_v6, %v4166_v58  ;;  %v1931_v21 = vmul.f32 %v4686_v47, %v4166_v58 }
 0x295   : > { %v2466_v14 = vmax.f32 %v2430_v5, 0.0  ;;  %v2501_v19 = vmax.f32 %v2061_v29, %v2465_v54  ;;  %v1965_v18 = vadd.f32 %v1929_v31, %v4203_v28  ;;  %v1939_v23 = vmul.f32 %v4696_v43, %v4149_v13 }
 0x296   : > { %v2847_v61 = vpack.c.bf16 %v2493_v51, %v2492_v0  ;;  %v1974_v33 = vadd.f32 %v1938_v24, %v4219_v16  ;;  %v1940_v27 = vmul.f32 %v4708_v60, %v4149_v13  ;;  %v1983_v39 = vadd.f32 %v1947_v50, %v4237_v15 }
 0x297   : > { %v2502_v44 = vmax.f32 %v2062_v37, %v2466_v14  ;;  %v1966_v10 = vadd.f32 %v1930_v30, %v4203_v28  ;;  %v1967_v6 = vadd.f32 %v1931_v21, %v4203_v28  ;;  %v2001_v62 = vmax.f32 %v1965_v18, 0.0 }
 0x298   : > { %2633 = vst [vmem:[%s4787_s8 + $0x48] sm:$0xff] %v2847_v61  ;;  %v1975_v47 = vadd.f32 %v1939_v23, %v4219_v16  ;;  %v1948_v17 = vmul.f32 %v4720_v1, %v4176_v4  ;;  %v2010_v12 = vmax.f32 %v1974_v33, 0.0  ;;  %v1976_v43 = vadd.f32 %v1940_v27, %v4219_v16 }
 0x299   : > { %v2852_v40 = vpack.c.bf16 %v2502_v44, %v2501_v19  ;;  %v2019_v34 = vmax.f32 %v1983_v39, 0.0  ;;  %v2002_v63 = vmax.f32 %v1966_v10, 0.0  ;;  %v2003_v38 = vmax.f32 %v1967_v6, 0.0 }
 0x29a   : > { %v2037_v45 = vmax.f32 %v4452_v49, %v2001_v62  ;;  %v2011_v57 = vmax.f32 %v1975_v47, 0.0  ;;  %v4839_v35 = vadd.f32 %v1948_v17, %v4237_v15  ;;  %v1949_v25 = vmul.f32 %v4731_v22, %v4176_v4 }
 0x29b   : > { %2638 = vst [vmem:[%s4787_s8 + $0x6c] sm:$0xff] %v2852_v40  ;;  %v2046_v1 = vmax.f32 %v4480_v41, %v2010_v12  ;;  %v2012_v26 = vmax.f32 %v1976_v43, 0.0  ;;  %v4847_v0 = vmax.f32 %v4499_v2, %v2019_v34  ;;  %v2038_v49 = vmax.f32 %v4467_v48, %v2002_v63 }
 0x29c   : > { %v2039_v51 = vmax.f32 %v4482_v42, %v2003_v38  ;;  %v1957_v29 = vmul.f32 %v4733_v53, %v4194_v59  ;;  %v2047_v44 = vmax.f32 %v4493_v32, %v2011_v57  ;;  %v2020_v2 = vmax.f32 %v4839_v35, 0.0  ;;  %v5156_v35 = vld [vmem:[#allocation20_spill] sm:$0xff] }
 0x29d   : > { %v4859_v48 = vadd.f32 %v1949_v25, %v4237_v15  ;;  %v1958_v42 = vmul.f32 %v4740_v20, %v4194_v59  ;;  %v2048_v24 = vmax.f32 %v4506_v8, %v2012_v26 }
 0x29e   : > { %v4867_v21 = vadd.f32 %v1957_v29, %v4257_v36 }
 0x29f   : > { %v4874_v6 = vadd.f32 %v1958_v42, %v4257_v36 }
 0x2a2   : > { %v2192_v11 = vpop.f32.mrf.mxu0 }
 0x2a3   : > { %v2368_v60 = vmul.f32 %v2192_v11, %v4166_v58 }
 0x2a4   : > { %v2194_v52 = vpop.f32.mrf.mxu0 }
 0x2a5   : > { %v2404_v54 = vadd.f32 %v2368_v60, %v4203_v28  ;;  %v2369_v5 = vmul.f32 %v2194_v52, %v4166_v58 }
 0x2a6   : > { %v2196_v37 = vpop.f32.mrf.mxu0 }
 0x2a7   : > { %v2245_v22 = vpop.f32.mrf.mxu1  ;;  %v2440_v14 = vmax.f32 %v2404_v54, 0.0  ;;  %v2405_v41 = vadd.f32 %v2369_v5, %v4203_v28  ;;  %v2377_v61 = vmul.f32 %v2196_v37, %v4149_v13 }
 0x2a8   : > { %v2370_v19 = vmul.f32 %v2245_v22, %v4166_v58  ;;  %v2198_v53 = vpop.f32.mrf.mxu0 }
 0x2a9   : > { %v2247_v31 = vpop.f32.mrf.mxu1  ;;  %v2441_v40 = vmax.f32 %v2405_v41, 0.0  ;;  %v2413_v50 = vadd.f32 %v2377_v61, %v4219_v16  ;;  %v2476_v32 = vmax.f32 %v4646_v3, %v2440_v14  ;;  %v2378_v18 = vmul.f32 %v2198_v53, %v4149_v13 }
 0x2aa   : > { %v2406_v30 = vadd.f32 %v2370_v19, %v4203_v28  ;;  %v2371_v23 = vmul.f32 %v2247_v31, %v4166_v58  ;;  %v2202_v33 = vpop.f32.mrf.mxu0  ;;  %v2021_v61 = vmax.f32 %v4859_v48, 0.0  ;;  %v2029_v31 = vmax.f32 %v4867_v21, 0.0 }
 0x2ab   : > { %v2249_v20 = vpop.f32.mrf.mxu1  ;;  %v2477_v27 = vmax.f32 %v2037_v45, %v2441_v40  ;;  %v2449_v39 = vmax.f32 %v2413_v50, 0.0  ;;  %v2386_v8 = vmul.f32 %v2202_v33, %v4176_v4  ;;  %v2414_v62 = vadd.f32 %v2378_v18, %v4219_v16 }
 0x2ac   : > { %v2442_v10 = vmax.f32 %v2406_v30, 0.0  ;;  %v2407_v47 = vadd.f32 %v2371_v23, %v4203_v28  ;;  %v2379_v3 = vmul.f32 %v2249_v20, %v4149_v13  ;;  %v2204_v17 = vpop.f32.mrf.mxu0  ;;  %v2030_v30 = vmax.f32 %v4874_v6, 0.0 }
 0x2ad   : > { %v2251_v12 = vpop.f32.mrf.mxu1  ;;  %v2838_v43 = vpack.c.bf16 %v2477_v27, %v2476_v32  ;;  %v2485_v34 = vmax.f32 %v4658_v7, %v2449_v39  ;;  %v2422_v38 = vadd.f32 %v2386_v8, %v4237_v15  ;;  %v2450_v11 = vmax.f32 %v2414_v62, 0.0  ;;  %v5151_v32 = vld [vmem:[#allocation33_spill] sm:$0xff] }
 0x2ae   : > { %v2478_v63 = vmax.f32 %v2038_v49, %v2442_v10  ;;  %v2443_v60 = vmax.f32 %v2407_v47, 0.0  ;;  %v2415_v45 = vadd.f32 %v2379_v3, %v4219_v16  ;;  %v2387_v57 = vmul.f32 %v2204_v17, %v4176_v4  ;;  %v2206_v25 = vpop.f32.mrf.mxu0 }
 0x2af   : > { %v2255_v52 = vpop.f32.mrf.mxu1  ;;  %2623 = vst [vmem:[%s4787_s8 + $0x8] sm:$0xff] %v2838_v43  ;;  %v2458_v26 = vmax.f32 %v2422_v38, 0.0  ;;  %v2380_v54 = vmul.f32 %v2251_v12, %v4149_v13  ;;  %v2395_v5 = vmul.f32 %v2206_v25, %v4194_v59  ;;  %v2486_v7 = vmax.f32 %v2046_v1, %v2450_v11  ;;  %v5155_v25 = vld [vmem:[#allocation7_spill] sm:$0xff] }
 0x2b0   : > { %v2388_v29 = vmul.f32 %v2255_v52, %v4176_v4  ;;  %v2479_v49 = vmax.f32 %v2039_v51, %v2443_v60  ;;  %v2451_v37 = vmax.f32 %v2415_v45, 0.0  ;;  %v2423_v22 = vadd.f32 %v2387_v57, %v4237_v15  ;;  %v2208_v14 = vpop.f32.mrf.mxu0  ;;  %v5154_v45 = vld [vmem:[#allocation5_spill] sm:$0xff] }
 0x2b1   : > { %v2257_v41 = vpop.f32.mrf.mxu1  ;;  %v2416_v19 = vadd.f32 %v2380_v54, %v4219_v16  ;;  %v2431_v42 = vadd.f32 %v2395_v5, %v4257_v36  ;;  %v2843_v40 = vpack.c.bf16 %v2486_v7, %v2485_v34  ;;  %v2494_v18 = vmax.f32 %v5151_v32, %v2458_v26 }
 0x2b2   : > { %v2424_v53 = vadd.f32 %v2388_v29, %v4237_v15  ;;  %v2839_v1 = vpack.c.bf16 %v2479_v49, %v2478_v63  ;;  %v2459_v51 = vmax.f32 %v2423_v22, 0.0  ;;  %v2396_v33 = vmul.f32 %v2208_v14, %v4194_v59  ;;  %v5153_v63 = vld [vmem:[#allocation4_spill] sm:$0xff] }
 0x2b3   : > { %v2259_v50 = vpop.f32.mrf.mxu1  ;;  %v2452_v23 = vmax.f32 %v2416_v19, 0.0  ;;  %2629 = vst [vmem:[%s4787_s8 + $0x2c] sm:$0xff] %v2843_v40  ;;  %v2487_v48 = vmax.f32 %v2047_v44, %v2451_v37  ;;  %v2389_v27 = vmul.f32 %v2257_v41, %v4176_v4  ;;  %v2467_v8 = vmax.f32 %v2431_v42, 0.0 }
 0x2b4   : > { %2624 = vst [vmem:[%s4787_s8 + $0x10] sm:$0xff] %v2839_v1  ;;  %v2495_v20 = vmax.f32 %v4847_v0, %v2459_v51  ;;  %v2397_v21 = vmul.f32 %v2259_v50, %v4194_v59  ;;  %v2460_v6 = vmax.f32 %v2424_v53, 0.0  ;;  %v2432_v62 = vadd.f32 %v2396_v33, %v4257_v36  ;;  %v5152_v0 = vld [vmem:[#allocation28_spill] sm:$0xff] }
 0x2b5   : > { %v2261_v39 = vpop.f32.mrf.mxu1  ;;  %v2488_v10 = vmax.f32 %v2048_v24, %v2452_v23  ;;  %v2425_v3 = vadd.f32 %v2389_v27, %v4237_v15  ;;  %v2056_v12 = vmax.f32 %v5152_v0, %v2020_v2  ;;  %v2057_v24 = vmax.f32 %v5153_v63, %v2021_v61  ;;  %v5157_v2 = vld [vmem:[#allocation14_spill] sm:$0xff] }
 0x2b6   : > { %v2848_v47 = vpack.c.bf16 %v2495_v20, %v2494_v18  ;;  %v2433_v17 = vadd.f32 %v2397_v21, %v4257_v36  ;;  %v2398_v44 = vmul.f32 %v2261_v39, %v4194_v59  ;;  %v2468_v34 = vmax.f32 %v2432_v62, 0.0  ;;  %v5158_v27 = vld [vmem:[#allocation6_spill] sm:$0xff] }
 0x2b7   : > { %v2844_v43 = vpack.c.bf16 %v2488_v10, %v2487_v48  ;;  %v2461_v38 = vmax.f32 %v2425_v3, 0.0  ;;  %v2065_v57 = vmax.f32 %v5154_v45, %v2029_v31  ;;  %v2503_v52 = vmax.f32 %v5155_v25, %v2467_v8 }
 0x2b8   : > { %2634 = vst [vmem:[%s4787_s8 + $0x50] sm:$0xff] %v2848_v47  ;;  %v2469_v11 = vmax.f32 %v2433_v17, 0.0  ;;  %v2434_v60 = vadd.f32 %v2398_v44, %v4257_v36  ;;  %v2504_v26 = vmax.f32 %v5156_v35, %v2468_v34  ;;  %v2066_v54 = vmax.f32 %v5157_v2, %v2030_v30 }
 0x2b9   : > { %2630 = vst [vmem:[%s4787_s8 + $0x34] sm:$0xff] %v2844_v43  ;;  %v2496_v5 = vmax.f32 %v2056_v12, %v2460_v6  ;;  %v2497_v29 = vmax.f32 %v2057_v24, %v2461_v38  ;;  %v5159_v12 = vld [vmem:[#allocation19_spill] sm:$0xff] }
 0x2ba   : > { %v2470_v7 = vmax.f32 %v2434_v60, 0.0  ;;  %v2853_v49 = vpack.c.bf16 %v2504_v26, %v2503_v52  ;;  %v2505_v22 = vmax.f32 %v2065_v57, %v2469_v11  ;;  %v5160_v60 = vld [vmem:[#allocation24_spill] sm:$0xff]  ;;  %v5161_v52 = vld [vmem:[#allocation21_spill] sm:$0xff] }
 0x2bb   : > { %v2849_v37 = vpack.c.bf16 %v2497_v29, %v2496_v5 }
 0x2bc   : > { %v2506_v14 = vmax.f32 %v2066_v54, %v2470_v7  ;;  %2639 = vst [vmem:[%s4787_s8 + $0x74] sm:$0xff] %v2853_v49 }
 0x2bd   : > { %2635 = vst [vmem:[%s4787_s8 + $0x58] sm:$0xff] %v2849_v37 }
 0x2be   : > { %v2854_v41 = vpack.c.bf16 %v2506_v14, %v2505_v22 }
 0x2c0   : > { %2640 = vst [vmem:[%s4787_s8 + $0x7c] sm:$0xff] %v2854_v41 }
 0x2c6   : > { %v2298_v61 = vpop.f32.mrf.mxu0 }
 0x2c7   : > { %v2372_v19 = vmul.f32 %v2298_v61, %v4166_v58 }
 0x2c8   : > { %v2300_v42 = vpop.f32.mrf.mxu0 }
 0x2c9   : > { %v2408_v53 = vadd.f32 %v2372_v19, %v4203_v28  ;;  %v2373_v31 = vmul.f32 %v2300_v42, %v4166_v58 }
 0x2ca   : > { %v2302_v40 = vpop.f32.mrf.mxu0 }
 0x2cb   : > { %v2351_v1 = vpop.f32.mrf.mxu1  ;;  %v2444_v51 = vmax.f32 %v2408_v53, 0.0  ;;  %v2409_v50 = vadd.f32 %v2373_v31, %v4203_v28  ;;  %v2381_v30 = vmul.f32 %v2302_v40, %v4149_v13  ;;  %v5162_v53 = vld [vmem:[#allocation32_spill] sm:$0xff]  ;;  %v5163_v40 = vld [vmem:[#allocation9_spill] sm:$0xff] }
 0x2cc   : > { %v2374_v32 = vmul.f32 %v2351_v1, %v4166_v58  ;;  %v2304_v18 = vpop.f32.mrf.mxu0 }
 0x2cd   : > { %v2353_v23 = vpop.f32.mrf.mxu1  ;;  %v2445_v33 = vmax.f32 %v2409_v50, 0.0  ;;  %v2417_v48 = vadd.f32 %v2381_v30, %v4219_v16  ;;  %v2480_v21 = vmax.f32 %v5158_v27, %v2444_v51  ;;  %v2382_v39 = vmul.f32 %v2304_v18, %v4149_v13  ;;  %v5164_v18 = vld [vmem:[#allocation35_spill] sm:$0xff] }
 0x2ce   : > { %v2410_v20 = vadd.f32 %v2374_v32, %v4203_v28  ;;  %v2308_v10 = vpop.f32.mrf.mxu0 }
 0x2cf   : > { %v2354_v8 = vpop.f32.mrf.mxu1  ;;  %v2481_v6 = vmax.f32 %v4699_v9, %v2445_v33  ;;  %v2453_v62 = vmax.f32 %v2417_v48, 0.0  ;;  %v2390_v58 = vmul.f32 %v2308_v10, %v4176_v4  ;;  %v2418_v3 = vadd.f32 %v2382_v39, %v4219_v16  ;;  %v5165_v33 = vld [vmem:[#allocation10_spill] sm:$0xff] }
 0x2d0   : > { %v2446_v47 = vmax.f32 %v2410_v20, 0.0  ;;  %v2383_v17 = vmul.f32 %v2354_v8, %v4149_v13  ;;  %v2310_v44 = vpop.f32.mrf.mxu0 }
 0x2d1   : > { %v2356_v0 = vpop.f32.mrf.mxu1  ;;  %v2840_v28 = vpack.c.bf16 %v2481_v6, %v2480_v21  ;;  %v2426_v34 = vadd.f32 %v2390_v58, %v4237_v15  ;;  %v2454_v63 = vmax.f32 %v2418_v3, 0.0  ;;  %v2391_v24 = vmul.f32 %v2310_v44, %v4176_v4 }
 0x2d2   : > { %v2482_v43 = vmax.f32 %v5159_v12, %v2446_v47  ;;  %v2419_v9 = vadd.f32 %v2383_v17, %v4219_v16  ;;  %v2312_v38 = vpop.f32.mrf.mxu0  ;;  %v2489_v45 = vmax.f32 %v5160_v60, %v2453_v62 }
 0x2d3   : > { %v2359_v11 = vpop.f32.mrf.mxu1  ;;  %2625 = vst [vmem:[%s4787_s8 + $0x18] sm:$0xff] %v2840_v28  ;;  %v2399_v57 = vmul.f32 %v2312_v38, %v4194_v59  ;;  %v2490_v35 = vmax.f32 %v5161_v52, %v2454_v63  ;;  %v2462_v26 = vmax.f32 %v2426_v34, 0.0  ;;  %v2427_v54 = vadd.f32 %v2391_v24, %v4237_v15 }
 0x2d4   : > { %v2841_v13 = vpack.c.bf16 %v2482_v43, %v2482_v43  ;;  %v2392_v25 = vmul.f32 %v2359_v11, %v4176_v4  ;;  %v2455_v2 = vmax.f32 %v2419_v9, 0.0  ;;  %v2314_v16 = vpop.f32.mrf.mxu0 }
 0x2d5   : > { %v2361_v5 = vpop.f32.mrf.mxu1  ;;  %v2435_v29 = vadd.f32 %v2399_v57, %v4257_v36  ;;  %v2400_v49 = vmul.f32 %v2314_v16, %v4194_v59  ;;  %v2845_v37 = vpack.c.bf16 %v2490_v35, %v2489_v45  ;;  %v2463_v22 = vmax.f32 %v2427_v54, 0.0 }
 0x2d6   : > { %2627 = vst.msk [vmem:[%s4787_s8 + $0x20] sm:$0xf] %vm2626_vm4, %v2841_v13  ;;  %v2428_v7 = vadd.f32 %v2392_v25, %v4237_v15  ;;  %v2491_v4 = vmax.f32 %v4775_v46, %v2455_v2  ;;  %v2498_v31 = vmax.f32 %v5162_v53, %v2462_v26 }
 0x2d7   : > { %v2362_v14 = vpop.f32.mrf.mxu1  ;;  %v2471_v41 = vmax.f32 %v2435_v29, 0.0  ;;  %v2436_v19 = vadd.f32 %v2400_v49, %v4257_v36  ;;  %2631 = vst [vmem:[%s4787_s8 + $0x3c] sm:$0xff] %v2845_v37  ;;  %v2499_v1 = vmax.f32 %v5163_v40, %v2463_v22 }
 0x2d8   : > { %v2464_v61 = vmax.f32 %v2428_v7, 0.0  ;;  %v2401_v42 = vmul.f32 %v2362_v14, %v4194_v59  ;;  %v2846_v15 = vpack.c.bf16 %v2491_v4, %v2491_v4 }
 0x2d9   : > { %v2364_v51 = vpop.f32.mrf.mxu1  ;;  %v2472_v50 = vmax.f32 %v2436_v19, 0.0  ;;  %v2850_v32 = vpack.c.bf16 %v2499_v1, %v2498_v31  ;;  %v2507_v59 = vmax.f32 %v5164_v18, %v2471_v41 }
 0x2da   : > { %v2500_v46 = vmax.f32 %v4791_v56, %v2464_v61  ;;  %v2437_v30 = vadd.f32 %v2401_v42, %v4257_v36  ;;  %2632 = vst.msk [vmem:[%s4787_s8 + $0x44] sm:$0xf] %vm2626_vm4, %v2846_v15 }
 0x2db   : > { %v2508_v48 = vmax.f32 %v5165_v33, %v2472_v50  ;;  %2636 = vst [vmem:[%s4787_s8 + $0x60] sm:$0xff] %v2850_v32 }
 0x2dc   : > { %v2851_v23 = vpack.c.bf16 %v2500_v46, %v2500_v46  ;;  %v2473_v20 = vmax.f32 %v2437_v30, 0.0 }
 0x2dd   : > { %v2855_v27 = vpack.c.bf16 %v2508_v48, %v2507_v59 }
 0x2de   : > { %2637 = vst.msk [vmem:[%s4787_s8 + $0x68] sm:$0xf] %vm2626_vm4, %v2851_v23  ;;  %v2509_v21 = vmax.f32 %v4801_v55, %v2473_v20 }
 0x2df   : > { %2641 = vst [vmem:[%s4787_s8 + $0x84] sm:$0xff] %v2855_v27 }
 0x2e0   : > { %v2856_v56 = vpack.c.bf16 %v2509_v21, %v2509_v21 }
 0x2e2   : > { %2642 = vst.msk [vmem:[%s4787_s8 + $0x8c] sm:$0xf] %vm2626_vm4, %v2856_v56 }
 0x2e3 PF: > { %s14_s15 = sadd.s32 1, %s2959_s15  }
 0x2e4   : > { %p11_p4 = scmp.ge.s32.totalorder %s14_s15, 4  }
 0x2e6   :  { %13 = sbr.rel (!%p11_p4) target bundleno = 1 (0x1), region = 69 }

// kernel: simple_cnn_forward.4
= control target key start
LH: loop header
LB: loop body
LE: loop exit
PB: predicated region body
PF: predicated region fallthrough
CT: control target
= control target key end

     0   :  { %s2903_s15 = smov 0   ;;  %s4578_s0 = inlined_call_operand.vmem [shape: bf16[2,4,32,306], index: 0, kind: input, shape index: {}]   ;;  %s4579_s1 = inlined_call_operand.vmem [shape: bf16[64,288], index: 1, kind: input, shape index: {}]   ;;  %s4580_s2 = inlined_call_operand.vmem [shape: f32[64,1], index: 2, kind: input, shape index: {}]   ;;  %s4581_s3 = inlined_call_operand.vmem [shape: f32[64,1], index: 3, kind: input, shape index: {}]   ;;  %s4582_s4 = inlined_call_operand.vmem [shape: bf16[2,64,272], index: 4, kind: output, shape index: {}]  }
   0x1 LB: > { %s2430_s16 = sadd.s32 4294967295, %s2872_s15   ;;  %p2434_p0 = scmp.ge.s32.totalorder %s2872_s15, 1  ;;  %s2872_s15 = sphi %s2903_s15, %s14_s15  }
   0x2   : > { %p162_p1 = scmp.lt.s32.totalorder %s2872_s15, 3 }
   0x4   : > { %p163_p2 = pnand %p2434_p0, %p162_p1 }
   0x6   : > { %166 = sbr.rel (%p163_p2) target bundleno = 660 (0x294), region = 36 }
   0xb   : > { %p188_p3 = scmp.lt.s32.totalorder %s2430_s16, 1  ;;  %s2874_s21 = smov 110   ;;  %v4583_v4 = vmov 0   ;;  %v3013_v17 = vld [vmem:[%s4579_s1 + $0x4] ss:$12 sps:$4 sm:$0xff]   ;;  %vm496_vm0 = vcmask 900096  }
   0xc   : > { %685 = vmatprep.mubr.bf16.mxu1 %v4583_v4  ;;  %2810 = vset.pattern.permute.xlu1 %v4583_v4  ;;  %s2876_s22 = smov 111   ;;  %s2877_s23 = smov 127   ;;  %v3152_v36 = vld [vmem:[%s4579_s1 + $0x8] ss:$12 sps:$4 sm:$0xff]   ;;  %vm567_vm1 = vcmask 261120   ;;  %vm342_vm2 = vcmask 1039360  }
   0xd   : > { %s4726_s16 = smov (!%p188_p3, %s2430_s16), 1  ;;  %2809 = vset.pattern.permute.xlu0 %v4583_v4  ;;  %612 = vmatprep.mubr.bf16.mxu0 %v3013_v17  ;;  %v3183_v42 = vld [vmem:[%s4579_s1 + $0x20] ss:$12 sps:$4 sm:$0xff]   ;;  %v3215_v49 = vld [vmem:[%s4579_s1 + $0x38] ss:$12 sps:$4 sm:$0xff]   ;;  %v217_v57 = vld [vmem:[%s4580_s2 + $0x10] sm:$0xff] }
   0xe   : > { %s2795_s17 = smul.u32 192, %s4726_s16  ;;  %v216_v53 = vld [vmem:[%s4580_s2 + $0x8] sm:$0xff]  ;;  %v215_v54 = vld [vmem:[%s4580_s2] sm:$0xff]  ;;  %v3252_v58 = vld [vmem:[%s4579_s1 + $0x50] ss:$12 sps:$4 sm:$0xff]   ;;  %vm451_vm3 = vcmask 908288  }
   0xf   : > { %v218_v59 = vld [vmem:[%s4580_s2 + $0x18] sm:$0xff]  ;;  %v219_v62 = vld [vmem:[%s4580_s2 + $0x20] sm:$0xff]  ;;  %v220_v63 = vld [vmem:[%s4580_s2 + $0x28] sm:$0xff]  ;;  %s2796_s19 = smul.u32 96, %s4726_s16  ;;  %vm2359_vm4 = vcmask 125952  }
  0x10   : > { %s2917_s20 = scalar_lea.vmem %s4578_s0, %s2795_s17 }
  0x11   : > { %v2920_v0 = vld [vmem:[%s2917_s20 + $0x1c] ss:$12 sps:$4 sm:$0xff]   ;;  %v2923_v1 = vld [vmem:[%s2917_s20 + $0x18] ss:$12 sps:$4 sm:$0xff]   ;;  %v2928_v2 = vld [vmem:[%s2917_s20 + $0x20] ss:$12 sps:$4 sm:$0xff]  }
  0x12   : > { %492 = vrot.lane.b32.xlu0 %v2920_v0, %s2874_s21  ;;  %490 = vrot.lane.b32.xlu1 %v2923_v1, %s2874_s21  ;;  %v2933_v3 = vld [vmem:[%s2917_s20 + $0x4] ss:$12 sps:$4 sm:$0xff]   ;;  %v2941_v5 = vld [vmem:[%s2917_s20 + $0x8] ss:$12 sps:$4 sm:$0xff]  }
  0x13   : > { %v2946_v6 = vld [vmem:[%s2917_s20] ss:$12 sps:$4 sm:$0xff]   ;;  %v2951_v7 = vld [vmem:[%s2917_s20 + $0x50] ss:$12 sps:$4 sm:$0xff]   ;;  %v2959_v9 = vld [vmem:[%s2917_s20 + $0x78] ss:$12 sps:$4 sm:$0xff]  }
  0x14   : > { %v2956_v8 = vld [vmem:[%s2917_s20 + $0x7c] ss:$12 sps:$4 sm:$0xff]   ;;  %4610 = vst [vmem:[#allocation3_spill] sm:$0xff] %v2959_v9  ;;  %v2964_v10 = vld [vmem:[%s2917_s20 + $0x64] ss:$12 sps:$4 sm:$0xff]  }
  0x15   : > { %4609 = vst [vmem:[#allocation2_spill] sm:$0xff] %v2956_v8  ;;  %4611 = vst [vmem:[#allocation4_spill] sm:$0xff] %v2964_v10  ;;  %580 = vmatprep.subr.bf16.mxu0 %v2956_v8  ;;  %v2970_v11 = vld [vmem:[%s2917_s20 + $0x38] ss:$12 sps:$4 sm:$0xff]   ;;  %v2975_v12 = vld [vmem:[%s2917_s20 + $0x60] ss:$12 sps:$4 sm:$0xff]  }
  0x16   : > { %494 = vrot.lane.b32.xlu0 %v2928_v2, %s2874_s21  ;;  %486 = vrot.lane.b32.xlu1 %v2933_v3, %s2874_s21  ;;  %4612 = vst [vmem:[#allocation5_spill] sm:$0xff] %v2975_v12  ;;  %v2993_v13 = vld [vmem:[%s2917_s20 + $0x80] ss:$12 sps:$4 sm:$0xff]   ;;  %v2998_v14 = vld [vmem:[%s2917_s20 + $0x68] ss:$12 sps:$4 sm:$0xff]  }
  0x17   : > { %581 = vmatpush1.bf16.msra.mxu0 %v2959_v9  ;;  %4613 = vst [vmem:[#allocation6_spill] sm:$0xff] %v2993_v13  ;;  %4614 = vst [vmem:[#allocation7_spill] sm:$0xff] %v2998_v14  ;;  %v3003_v15 = vld [vmem:[%s2917_s20 + $0x4c] ss:$12 sps:$4 sm:$0xff]   ;;  %v3008_v16 = vld [vmem:[%s2917_s20 + $0x48] ss:$12 sps:$4 sm:$0xff]  }
  0x18   : > { %582 = vmatprep.subr.bf16.mxu0 %v2964_v10  ;;  %v3018_v18 = vld [vmem:[%s2917_s20 + $0x34] ss:$12 sps:$4 sm:$0xff]   ;;  %v3024_v19 = vld [vmem:[%s2917_s20 + $0x30] ss:$12 sps:$4 sm:$0xff]   ;;  %v3074_v21 = vld [vmem:[%s2917_s20 + $0x98] ss:$12 sps:$4 sm:$0xff]  }
  0x19   : > { %v3069_v20 = vld [vmem:[%s2917_s20 + $0xb0] ss:$12 sps:$4 sm:$0xff]   ;;  %v3079_v22 = vld [vmem:[%s2917_s20 + $0xac] ss:$12 sps:$4 sm:$0xff]   ;;  %v3084_v23 = vld [vmem:[%s2917_s20 + $0xa8] ss:$12 sps:$4 sm:$0xff]  }
  0x1a   : > { %488 = vrot.lane.b32.xlu0 %v2941_v5, %s2874_s21  ;;  %484 = vrot.lane.b32.xlu1 %v2946_v6, %s2874_s21  ;;  %v3089_v24 = vld [vmem:[%s2917_s20 + $0x94] ss:$12 sps:$4 sm:$0xff]   ;;  %v3094_v25 = vld [vmem:[%s2917_s20 + $0x90] ss:$12 sps:$4 sm:$0xff]  }
  0x1b   : > { %583 = vmatpush1.bf16.msra.mxu0 %v2975_v12  ;;  %4615 = vst [vmem:[#allocation8_spill] sm:$0xff] %v3089_v24 }
  0x1e   : > { %472 = vrot.lane.b32.xlu0 %v2951_v7, %s2876_s22  ;;  %338 = vrot.lane.b32.xlu1 %v2920_v0, %s2877_s23 }
  0x22   : > { %340 = vrot.lane.b32.xlu0 %v2928_v2, %s2877_s23  ;;  %466 = vrot.lane.b32.xlu1 %v2970_v11, %s2876_s22 }
  0x26   : > { %336 = vrot.lane.b32.xlu0 %v2923_v1, %s2877_s23  ;;  %332 = vrot.lane.b32.xlu1 %v2933_v3, %s2877_s23 }
  0x2a   : > { %334 = vrot.lane.b32.xlu0 %v2941_v5, %s2877_s23  ;;  %449 = vrot.lane.b32.xlu1 %v2928_v2, %s2876_s22 }
  0x2e   : > { %330 = vrot.lane.b32.xlu0 %v2946_v6, %s2877_s23  ;;  %443 = vrot.lane.b32.xlu1 %v2941_v5, %s2876_s22 }
  0x32   : > { %427 = vrot.lane.b32.xlu0 %v2993_v13, %s2877_s23  ;;  %421 = vrot.lane.b32.xlu1 %v2998_v14, %s2877_s23 }
  0x36   : > { %470 = vrot.lane.b32.xlu0 %v3003_v15, %s2876_s22  ;;  %468 = vrot.lane.b32.xlu1 %v3008_v16, %s2876_s22 }
  0x3a   : > { %464 = vrot.lane.b32.xlu0 %v3018_v18, %s2876_s22  ;;  %462 = vrot.lane.b32.xlu1 %v3024_v19, %s2876_s22 }
  0x3e   : > { %447 = vrot.lane.b32.xlu0 %v2920_v0, %s2876_s22  ;;  %445 = vrot.lane.b32.xlu1 %v2923_v1, %s2876_s22 }
  0x42   : > { %441 = vrot.lane.b32.xlu0 %v2933_v3, %s2876_s22  ;;  %439 = vrot.lane.b32.xlu1 %v2946_v6, %s2876_s22 }
  0x46   : > { %425 = vrot.lane.b32.xlu0 %v2956_v8, %s2877_s23  ;;  %423 = vrot.lane.b32.xlu1 %v2959_v9, %s2877_s23 }
  0x4a   : > { %419 = vrot.lane.b32.xlu0 %v2964_v10, %s2877_s23  ;;  %417 = vrot.lane.b32.xlu1 %v2975_v12, %s2877_s23 }
  0x4e   : > { %1016 = vrot.lane.b32.xlu0 %v3003_v15, %s2877_s23  ;;  %1018 = vrot.lane.b32.xlu1 %v2951_v7, %s2877_s23 }
  0x52   : > { %1014 = vrot.lane.b32.xlu0 %v3008_v16, %s2877_s23  ;;  %1060 = vrot.lane.b32.xlu1 %v3003_v15, %s2874_s21 }
  0x56   : > { %1062 = vrot.lane.b32.xlu0 %v2951_v7, %s2874_s21  ;;  %1010 = vrot.lane.b32.xlu1 %v3018_v18, %s2877_s23 }
  0x5a   : > { %1012 = vrot.lane.b32.xlu0 %v2970_v11, %s2877_s23  ;;  %1058 = vrot.lane.b32.xlu1 %v3008_v16, %s2874_s21 }
  0x5e   : > { %1008 = vrot.lane.b32.xlu0 %v3024_v19, %s2877_s23  ;;  %1054 = vrot.lane.b32.xlu1 %v3018_v18, %s2874_s21 }
  0x62   : > { %1056 = vrot.lane.b32.xlu0 %v2970_v11, %s2874_s21  ;;  %1052 = vrot.lane.b32.xlu1 %v3024_v19, %s2874_s21 }
  0x66   : > { %1040 = vrot.lane.b32.xlu0 %v3069_v20, %s2877_s23  ;;  %1034 = vrot.lane.b32.xlu1 %v3074_v21, %s2877_s23 }
  0x6a   : > { %1038 = vrot.lane.b32.xlu0 %v3079_v22, %s2877_s23  ;;  %1036 = vrot.lane.b32.xlu1 %v3084_v23, %s2877_s23 }
  0x6e   : > { %1032 = vrot.lane.b32.xlu0 %v3089_v24, %s2877_s23  ;;  %1030 = vrot.lane.b32.xlu1 %v3094_v25, %s2877_s23 }
  0x72   : > { %1498 = vrot.lane.b32.xlu0 %v2956_v8, %s2874_s21  ;;  %1500 = vrot.lane.b32.xlu1 %v2993_v13, %s2874_s21 }
  0x76   : > { %1496 = vrot.lane.b32.xlu0 %v2959_v9, %s2874_s21  ;;  %1492 = vrot.lane.b32.xlu1 %v2964_v10, %s2874_s21 }
  0x7a   : > { %1494 = vrot.lane.b32.xlu0 %v2998_v14, %s2874_s21  ;;  %1490 = vrot.lane.b32.xlu1 %v2975_v12, %s2874_s21 }
  0x7e   : > { %1476 = vrot.lane.b32.xlu0 %v3079_v22, %s2876_s22  ;;  %1478 = vrot.lane.b32.xlu1 %v3069_v20, %s2876_s22 }
  0x82   : > { %1474 = vrot.lane.b32.xlu0 %v3084_v23, %s2876_s22  ;;  %1470 = vrot.lane.b32.xlu1 %v3089_v24, %s2876_s22 }
  0x84   : > { %v493_v26 = vpop.permute.xlu0 %492  ;;  %v491_v27 = vpop.permute.xlu1 %490 }
  0x85   : > { %v3131_v31 = vsel %vm496_vm0, %v491_v27, %v493_v26 }
  0x86   : > { %1472 = vrot.lane.b32.xlu0 %v3074_v21, %s2876_s22  ;;  %1468 = vrot.lane.b32.xlu1 %v3094_v25, %s2876_s22 }
  0x88   : > { %v3124_v28 = vpop.permute.xlu0 %494  ;;  %v487_v29 = vpop.permute.xlu1 %486 }
  0x89   : > { %v3128_v30 = vsel %vm496_vm0, %v493_v26, %v3124_v28 }
  0x8a   : > { %665 = vmatprep.subr.bf16.mxu1 %v3128_v30  ;;  %1454 = vrot.lane.b32.xlu0 %v2956_v8, %s2876_s22 }
  0x8b   : > { %666 = vmatpush1.bf16.msra.mxu1 %v3131_v31  ;;  %1456 = vrot.lane.b32.xlu1 %v2993_v13, %s2876_s22 }
  0x8c   : > { %v3139_v32 = vpop.permute.xlu0 %488  ;;  %v485_v33 = vpop.permute.xlu1 %484 }
  0x8d   : > { %v3143_v34 = vsel %vm496_vm0, %v487_v29, %v3139_v32  ;;  %v3146_v35 = vsel %vm496_vm0, %v485_v33, %v487_v29  ;;  %v222_v29 = vld [vmem:[%s4580_s2 + $0x38] sm:$0xff] }
  0x8e   : > { %667 = vmatprep.subr.bf16.mxu1 %v3143_v34  ;;  %1452 = vrot.lane.b32.xlu0 %v2959_v9, %s2876_s22 }
  0x8f   : > { %668 = vmatpush1.bf16.msra.mxu1 %v3146_v35  ;;  %1448 = vrot.lane.b32.xlu1 %v2964_v10, %s2876_s22 }
  0x90   : > { %v3159_v37 = vpop.permute.xlu0 %472  ;;  %v339_v38 = vpop.permute.xlu1 %338 }
  0x91   : > { %2563 = vmatprep.subr.bf16.mxu1 %v3159_v37 }
  0x92   : > { %2497 = vmatmul.mubr.msk.bf16.vlgmr.msra.gmra.mxu1 %vm567_vm1, %v3152_v36  ;;  %1450 = vrot.lane.b32.xlu0 %v2998_v14, %s2876_s22 }
  0x93   : > { %2564 = vmatpush3.bf16.msra.mxu1 %v2993_v13  ;;  %695 = vmatprep.mubr.bf16.mxu1 %v4583_v4 }
  0x94   : > { %v3168_v39 = vpop.permute.xlu0 %340  ;;  %1446 = vrot.lane.b32.xlu1 %v2975_v12, %s2876_s22  ;;  %v3172_v40 = vpop.permute.xlu1 %466  ;;  %s4469_s22 = scalar_lea.vmem %s4582_s4, %s2796_s19 }
  0x95   : > { %v3176_v41 = vsel %vm342_vm2, %v339_v38, %v3168_v39  ;;  %2565 = vmatprep.subr.bf16.mxu1 %v3172_v40 }
  0x96   : > { %584 = vmatprep.subr.bf16.mxu0 %v3176_v41  ;;  %1892 = vrot.lane.b32.xlu0 %v3079_v22, %s2874_s21 }
  0x97   : > { %2566 = vmatpush3.bf16.msra.mxu1 %v2998_v14 }
  0x98   : > { %v337_v43 = vpop.permute.xlu0 %336  ;;  %1894 = vrot.lane.b32.xlu1 %v3069_v20, %s2874_s21  ;;  %v333_v44 = vpop.permute.xlu1 %332 }
  0x99   : > { %v3191_v45 = vsel %vm342_vm2, %v337_v43, %v339_v38 }
  0x9a   : > { %585 = vmatpush1.bf16.msra.mxu0 %v3191_v45  ;;  %2498 = vmatmul.mubr.msk.bf16.gmra.mxu1 %vm567_vm1, %v3183_v42 }
  0x9b   : > { %705 = vmatprep.mubr.bf16.mxu1 %v4583_v4  ;;  %1890 = vrot.lane.b32.xlu0 %v3084_v23, %s2874_s21 }
  0x9c   : > { %v3199_v46 = vpop.permute.xlu0 %334  ;;  %1886 = vrot.lane.b32.xlu1 %v3089_v24, %s2874_s21  ;;  %v3203_v47 = vpop.permute.xlu1 %449 }
  0x9d   : > { %4616 = vst [vmem:[#allocation9_spill] sm:$0xff] %v3203_v47  ;;  %v3207_v48 = vsel %vm342_vm2, %v333_v44, %v3199_v46  ;;  %2567 = vmatprep.subr.bf16.mxu1 %v3203_v47 }
  0x9e   : > { %586 = vmatprep.subr.bf16.mxu0 %v3207_v48  ;;  %2568 = vmatpush3.bf16.msra.mxu1 %v3168_v39 }
  0x9f   : > { %1888 = vrot.lane.b32.xlu0 %v3074_v21, %s2874_s21 }
  0xa0   : > { %v331_v50 = vpop.permute.xlu0 %330  ;;  %1884 = vrot.lane.b32.xlu1 %v3094_v25, %s2874_s21  ;;  %v3221_v51 = vpop.permute.xlu1 %443 }
  0xa1   : > { %4617 = vst [vmem:[#allocation10_spill] sm:$0xff] %v3221_v51  ;;  %v3224_v52 = vsel %vm342_vm2, %v331_v50, %v333_v44  ;;  %2569 = vmatprep.subr.bf16.mxu1 %v3221_v51  ;;  %v224_v44 = vld [vmem:[%s4581_s3 + $0x8] sm:$0xff] }
  0xa2   : > { %587 = vmatpush1.bf16.msra.mxu0 %v3224_v52  ;;  %2499 = vmatmul.mubr.msk.bf16.gmra.mxu1 %vm567_vm1, %v3215_v49  ;;  %v3306_v50 = vld [vmem:[%s4579_s1 + $0x1c] ss:$12 sps:$4 sm:$0xff]  }
  0xa3   : > { %588 = vmatprep.subr.bf16.mxu0 %v3003_v15  ;;  %2570 = vmatpush3.bf16.msra.mxu1 %v3199_v46 }
  0xa4   : > { %v3238_v55 = vpop.permute.xlu0 %427  ;;  %715 = vmatprep.mubr.bf16.mxu1 %v4583_v4  ;;  %v3242_v56 = vpop.permute.xlu1 %421  ;;  %863 = vperm.xlu1 %2810, %v216_v53  }
  0xa5   : > { %2571 = vmatprep.subr.bf16.mxu1 %v3238_v55  ;;  %858 = vperm.xlu0 %2809, %v215_v54  }
  0xa6   : > { %589 = vmatpush1.bf16.msra.mxu0 %v3008_v16 }
  0xa7   : > { %590 = vmatprep.subr.bf16.mxu0 %v3018_v18  ;;  %2572 = vmatpush3.bf16.msra.mxu1 %v2951_v7 }
  0xa8   : > { %v471_v60 = vpop.permute.xlu0 %470  ;;  %2573 = vmatprep.subr.bf16.mxu1 %v3242_v56  ;;  %v469_v61 = vpop.permute.xlu1 %468  ;;  %868 = vperm.xlu1 %2810, %v217_v57  }
  0xa9   : > { %873 = vperm.xlu0 %2809, %v218_v59   ;;  %v3291_v43 = vsel %vm451_vm3, %v469_v61, %v471_v60  ;;  %v226_v59 = vld [vmem:[%s4581_s3 + $0x18] sm:$0xff] }
  0xaa   : > { %591 = vmatpush1.bf16.msra.mxu0 %v3024_v19  ;;  %2500 = vmatmul.mubr.msk.bf16.gmra.mxu1 %vm567_vm1, %v3252_v58 }
  0xab   : > { %592 = vmatprep.subr.bf16.mxu0 %v2920_v0  ;;  %2574 = vmatpush3.bf16.msra.mxu1 %v2970_v11  ;;  %v221_v0 = vld [vmem:[%s4580_s2 + $0x30] sm:$0xff] }
  0xac   : > { %v465_v26 = vpop.permute.xlu0 %464  ;;  %758 = vmatprep.mubr.bf16.mxu1 %v3013_v17  ;;  %2575 = vmatprep.subr.bf16.mxu1 %v3069_v20  ;;  %v463_v27 = vpop.permute.xlu1 %462 }
  0xad   : > { %878 = vperm.xlu1 %2810, %v219_v62   ;;  %883 = vperm.xlu0 %2809, %v220_v63   ;;  %v3311_v54 = vsel %vm451_vm3, %v465_v26, %v3172_v40  ;;  %v3318_v57 = vsel %vm451_vm3, %v463_v27, %v465_v26  ;;  %v227_v63 = vld [vmem:[%s4581_s3 + $0x20] sm:$0xff] }
  0xae   : > { %593 = vmatpush1.bf16.msra.mxu0 %v2923_v1  ;;  %v3284_v1 = vsel %vm451_vm3, %v471_v60, %v3159_v37  ;;  %v3340_v26 = vld [vmem:[%s4579_s1 + $0x18] ss:$12 sps:$4 sm:$0xff]  }
  0xaf   : > { %594 = vmatprep.subr.bf16.mxu0 %v2933_v3  ;;  %2576 = vmatpush3.bf16.msra.mxu1 %v2928_v2  ;;  %v223_v3 = vld [vmem:[%s4581_s3] sm:$0xff] }
  0xb0   : > { %v448_v33 = vpop.permute.xlu0 %447  ;;  %2577 = vmatprep.subr.bf16.mxu1 %v3074_v21  ;;  %v446_v38 = vpop.permute.xlu1 %445  ;;  %v3297_v2 = vld [vmem:[%s4579_s1] ss:$12 sps:$4 sm:$0xff]  }
  0xb1   : > { %888 = vperm.xlu1 %2810, %v221_v0   ;;  %893 = vperm.xlu0 %2809, %v222_v29   ;;  %v3331_v62 = vsel %vm451_vm3, %v448_v33, %v3203_v47  ;;  %v3343_v27 = vsel %vm451_vm3, %v446_v38, %v448_v33  ;;  %v228_v0 = vld [vmem:[%s4581_s3 + $0x28] sm:$0xff]  ;;  %v229_v38 = vld [vmem:[%s4581_s3 + $0x30] sm:$0xff] }
  0xb2   : > { %595 = vmatpush1.bf16.msra.mxu0 %v2946_v6 }
  0xb3   : > { %596 = vmatprep.subr.bf16.mxu0 %v3284_v1  ;;  %2578 = vmatpush3.bf16.msra.mxu1 %v2941_v5  ;;  %v225_v5 = vld [vmem:[%s4581_s3 + $0x10] sm:$0xff] }
  0xb4   : > { %v442_v6 = vpop.permute.xlu0 %441  ;;  %2747 = vmatprep.subr.bf16.mxu1 %v3124_v28  ;;  %v440_v53 = vpop.permute.xlu1 %439 }
  0xb5   : > { %922 = vperm.xlu1 %2810, %v223_v3   ;;  %927 = vperm.xlu0 %2809, %v224_v44   ;;  %v3352_v3 = vld [vmem:[%s4579_s1 + $0x34] ss:$12 sps:$4 sm:$0xff]   ;;  %v3357_v33 = vsel %vm451_vm3, %v442_v6, %v3221_v51 }
  0xb6   : > { %597 = vmatpush2.bf16.msra.mxu0 %v3291_v43  ;;  %759 = vmatmul.mubr.bf16.vlgmr.msra.gmra.mxu1 %v3297_v2  ;;  %4618 = vst [vmem:[#allocation11_spill] sm:$0xff] %v3357_v33 }
  0xb7   : > { %598 = vmatprep.subr.bf16.mxu0 %v3311_v54  ;;  %2748 = vmatpush3.bf16.msra.mxu1 %v3124_v28 }
  0xb8   : > { %v426_v60 = vpop.permute.xlu0 %425  ;;  %766 = vmatprep.mubr.bf16.mxu1 %v3306_v50  ;;  %2749 = vmatprep.subr.bf16.mxu1 %v3139_v32  ;;  %v424_v61 = vpop.permute.xlu1 %423 }
  0xb9   : > { %932 = vperm.xlu1 %2810, %v225_v5   ;;  %937 = vperm.xlu0 %2809, %v226_v59   ;;  %v3365_v5 = vsel %vm451_vm3, %v440_v53, %v442_v6  ;;  %v230_v59 = vld [vmem:[%s4581_s3 + $0x38] sm:$0xff]  ;;  %v3379_v6 = vsel %vm342_vm2, %v424_v61, %v426_v60 }
  0xba   : > { %599 = vmatpush2.bf16.msra.mxu0 %v3318_v57  ;;  %4619 = vst [vmem:[#allocation12_spill] sm:$0xff] %v3365_v5  ;;  %v3385_v53 = vld [vmem:[%s4579_s1 + $0x30] ss:$12 sps:$4 sm:$0xff]  }
  0xbb   : > { %600 = vmatprep.subr.bf16.mxu0 %v3331_v62  ;;  %2750 = vmatpush3.bf16.msra.mxu1 %v3139_v32 }
  0xbc   : > { %v420_v29 = vpop.permute.xlu0 %419  ;;  %v418_v44 = vpop.permute.xlu1 %417 }
  0xbd   : > { %942 = vperm.xlu1 %2810, %v227_v63   ;;  %947 = vperm.xlu0 %2809, %v228_v0   ;;  %v3375_v0 = vsel %vm342_vm2, %v426_v60, %v3238_v55  ;;  %v3398_v60 = vsel %vm342_vm2, %v418_v44, %v420_v29 }
  0xbe   : > { %601 = vmatpush2.bf16.msra.mxu0 %v3343_v27  ;;  %767 = vmatmul.mubr.bf16.gmra.mxu1 %v3340_v26 }
  0xbf   : > { %602 = vmatprep.subr.bf16.mxu0 %v3357_v33  ;;  %774 = vmatprep.mubr.bf16.mxu1 %v3352_v3 }
  0xc0   : > { %v1017_v63 = vpop.permute.xlu0 %1016  ;;  %v3371_v4 = vpop.permute.xlu1 %1018 }
  0xc1   : > { %952 = vperm.xlu1 %2810, %v229_v38   ;;  %957 = vperm.xlu0 %2809, %v230_v59   ;;  %v3390_v38 = vld [vmem:[%s4579_s1 + $0x4c] ss:$12 sps:$4 sm:$0xff]   ;;  %v3394_v59 = vsel %vm342_vm2, %v420_v29, %v3242_v56  ;;  %v3415_v29 = vld [vmem:[%s4579_s1 + $0x48] ss:$12 sps:$4 sm:$0xff]  }
  0xc2   : > { %603 = vmatpush2.bf16.msra.mxu0 %v3365_v5 }
  0xc3   : > { %604 = vmatprep.subr.bf16.mxu0 %v3375_v0 }
  0xc4   : > { %v1015_v14 = vpop.permute.xlu0 %1014  ;;  %v1061_v13 = vpop.permute.xlu1 %1060 }
  0xc6   : > { %605 = vmatpush2.bf16.msra.mxu0 %v3379_v6  ;;  %775 = vmatmul.mubr.bf16.gmra.mxu1 %v3385_v53 }
  0xc7   : > { %606 = vmatprep.subr.bf16.mxu0 %v3394_v59  ;;  %782 = vmatprep.mubr.bf16.mxu1 %v3390_v38 }
  0xc8   : > { %v3402_v61 = vpop.permute.xlu0 %1062  ;;  %v1011_v51 = vpop.permute.xlu1 %1010 }
  0xc9   : > { %4620 = vst [vmem:[#allocation13_spill] sm:$0xff] %v3402_v61  ;;  %v3407_v47 = vsel %vm496_vm0, %v1061_v13, %v3402_v61 }
  0xca   : > { %4621 = vst [vmem:[#allocation14_spill] sm:$0xff] %v3407_v47  ;;  %607 = vmatpush2.bf16.msra.mxu0 %v3398_v60  ;;  %1159 = vmatprep.subr.bf16.mxu1 %v3407_v47 }
  0xcb   : > { %608 = vmatprep.subr.bf16.mxu0 %v3079_v22 }
  0xcc   : > { %v1013_v44 = vpop.permute.xlu0 %1012  ;;  %v1059_v12 = vpop.permute.xlu1 %1058 }
  0xcd   : > { %v3427_v8 = vsel %vm496_vm0, %v1059_v12, %v1061_v13  ;;  %v1023_v13 = vsel %vm342_vm2, %v1017_v63, %v3371_v4 }
  0xce   : > { %609 = vmatpush2.bf16.msra.mxu0 %v3084_v23  ;;  %783 = vmatmul.mubr.bf16.gmra.mxu1 %v3415_v29  ;;  %4623 = vst [vmem:[#allocation16_spill] sm:$0xff] %v3427_v8 }
  0xcf   : > { %610 = vmatprep.subr.bf16.mxu0 %v3089_v24  ;;  %2751 = vmatprep.mubr.msk.bf16.mxu1 %vm567_vm1, %v3152_v36 }
  0xd0   : > { %v1009_v10 = vpop.permute.xlu0 %1008  ;;  %v1055_v47 = vpop.permute.xlu1 %1054 }
  0xd2   : > { %611 = vmatpush2.bf16.msra.mxu0 %v3094_v25 }
  0xd3   : > { %1074 = vmatprep.subr.bf16.mxu0 %v3079_v22 }
  0xd4   : > { %v3424_v9 = vpop.permute.xlu0 %1056  ;;  %v1053_v5 = vpop.permute.xlu1 %1052 }
  0xd5   : > { %4622 = vst [vmem:[#allocation15_spill] sm:$0xff] %v3424_v9  ;;  %613 = vmatmul.mubr.bf16.vlgmr.msra.gmra.mxu0 %v3297_v2  ;;  %v3433_v33 = vsel %vm496_vm0, %v1055_v47, %v3424_v9  ;;  %v3443_v12 = vsel %vm496_vm0, %v1053_v5, %v1055_v47  ;;  %v1021_v47 = vsel %vm342_vm2, %v1011_v51, %v1013_v44  ;;  %v4626_v5 = vmov 0  }
  0xd6   : > { %1075 = vmatpush1.bf16.msra.mxu0 %v3084_v23  ;;  %4624 = vst [vmem:[#allocation17_spill] sm:$0xff] %v3433_v33  ;;  %622 = vmatprep.mubr.bf16.mxu0 %v3306_v50  ;;  %4625 = vst [vmem:[#allocation18_spill] sm:$0xff] %v3443_v12 }
  0xd7   : > { %2752 = vmatmul.mubr.msk.bf16.vlgmr.msra.gmra.mxu1 %vm567_vm1, %v3183_v42  ;;  %1076 = vmatprep.subr.bf16.mxu0 %v3089_v24  ;;  %v1022_v24 = vsel %vm342_vm2, %v1015_v14, %v1017_v63  ;;  %v4630_v63 = vld [vmem:[#allocation12_spill] sm:$0xff] }
  0xd8   : > { %1160 = vmatpush1.bf16.msra.mxu1 %v3427_v8  ;;  %2755 = vmatprep.mubr.msk.bf16.mxu1 %vm567_vm1, %v3215_v49  ;;  %v3488_v14 = vpop.permute.xlu1 %1034 }
  0xd9   : > { %1161 = vmatprep.subr.bf16.mxu1 %v3433_v33  ;;  %4628 = vst [vmem:[#allocation20_spill] sm:$0xff] %v3488_v14 }
  0xda   : > { %1077 = vmatpush1.bf16.msra.mxu0 %v3094_v25 }
  0xdb   : > { %1078 = vmatprep.subr.bf16.mxu0 %v1023_v13  ;;  %v1020_v13 = vsel %vm342_vm2, %v1009_v10, %v1011_v51  ;;  %v3483_v10 = vpop.permute.xlu0 %1040 }
  0xdc   : > { %1162 = vmatpush1.bf16.msra.mxu1 %v3443_v12  ;;  %4627 = vst [vmem:[#allocation19_spill] sm:$0xff] %v3483_v10 }
  0xdd   : > { %2609 = vmatprep.subr.bf16.mxu1 %v3124_v28  ;;  %623 = vmatmul.mubr.bf16.gmra.mxu0 %v3340_v26 }
  0xde   : > { %1079 = vmatpush1.bf16.msra.mxu0 %v1022_v24  ;;  %632 = vmatprep.mubr.bf16.mxu0 %v3352_v3 }
  0xdf   : > { %2756 = vmatmul.mubr.msk.bf16.gmra.mxu1 %vm567_vm1, %v3252_v58  ;;  %1080 = vmatprep.subr.bf16.mxu0 %v1021_v47 }
  0xe0   : > { %1179 = vmatprep.mubr.bf16.mxu1 %v4626_v5 }
  0xe2   : > { %1081 = vmatpush1.bf16.msra.mxu0 %v1020_v13 }
  0xe3   : > { %1082 = vmatprep.subr.bf16.mxu0 %v3176_v41 }
  0xe5   : > { %633 = vmatmul.mubr.bf16.gmra.mxu0 %v3385_v53 }
  0xe6   : > { %1083 = vmatpush1.bf16.msra.mxu0 %v3191_v45  ;;  %642 = vmatprep.mubr.bf16.mxu0 %v3390_v38 }
  0xe7   : > { %2505 = vmatmul.mubr.msk.bf16.vlgmr.msra.gmra.mxu1 %vm567_vm1, %v3152_v36  ;;  %1084 = vmatprep.subr.bf16.mxu0 %v3207_v48 }
  0xe8   : > { %2610 = vmatpush3.bf16.msra.mxu1 %v3069_v20  ;;  %1189 = vmatprep.mubr.bf16.mxu1 %v4626_v5 }
  0xe9   : > { %2611 = vmatprep.subr.bf16.mxu1 %v3139_v32 }
  0xea   : > { %1085 = vmatpush1.bf16.msra.mxu0 %v3224_v52  ;;  %v4629_v52 = vld [vmem:[#allocation11_spill] sm:$0xff] }
  0xeb   : > { %1086 = vmatprep.subr.bf16.mxu0 %v3003_v15  ;;  %v1037_v15 = vpop.permute.xlu1 %1036 }
  0xec   : > { %2612 = vmatpush3.bf16.msra.mxu1 %v3074_v21 }
  0xed   : > { %2613 = vmatprep.subr.bf16.mxu1 %v3159_v37  ;;  %643 = vmatmul.mubr.bf16.gmra.mxu0 %v3415_v29 }
  0xee   : > { %1087 = vmatpush1.bf16.msra.mxu0 %v3008_v16  ;;  %1106 = vmatprep.mubr.bf16.mxu0 %v3013_v17 }
  0xef   : > { %2506 = vmatmul.mubr.msk.bf16.gmra.mxu1 %vm567_vm1, %v3183_v42  ;;  %1088 = vmatprep.subr.bf16.mxu0 %v3018_v18  ;;  %v1031_v24 = vpop.permute.xlu1 %1030 }
  0xf0   : > { %2614 = vmatpush3.bf16.msra.mxu1 %v3371_v4  ;;  %1199 = vmatprep.mubr.bf16.mxu1 %v4626_v5  ;;  %v1039_v4 = vpop.permute.xlu0 %1038 }
  0xf1   : > { %2615 = vmatprep.subr.bf16.mxu1 %v3172_v40  ;;  %v3510_v16 = vsel %vm342_vm2, %v1039_v4, %v3483_v10 }
  0xf2   : > { %1089 = vmatpush1.bf16.msra.mxu0 %v3024_v19  ;;  %v3514_v19 = vsel %vm342_vm2, %v1037_v15, %v1039_v4 }
  0xf3   : > { %1090 = vmatprep.subr.bf16.mxu0 %v3128_v30  ;;  %v3531_v41 = vpop.permute.xlu1 %1500 }
  0xf4   : > { %2616 = vmatpush3.bf16.msra.mxu1 %v1013_v44  ;;  %v1033_v18 = vpop.permute.xlu0 %1032 }
  0xf5   : > { %2617 = vmatprep.subr.bf16.mxu1 %v3483_v10 }
  0xf6   : > { %1091 = vmatpush2.bf16.msra.mxu0 %v3131_v31 }
  0xf7   : > { %2507 = vmatmul.mubr.msk.bf16.gmra.mxu1 %vm567_vm1, %v3215_v49  ;;  %1092 = vmatprep.subr.bf16.mxu0 %v3143_v34  ;;  %v1493_v48 = vpop.permute.xlu1 %1492 }
  0xf8   : > { %2618 = vmatpush3.bf16.msra.mxu1 %v3168_v39  ;;  %1209 = vmatprep.mubr.bf16.mxu1 %v4626_v5  ;;  %v3526_v39 = vsel %vm342_vm2, %v1031_v24, %v1033_v18 }
  0xf9   : > { %2619 = vmatprep.subr.bf16.mxu1 %v3488_v14 }
  0xfa   : > { %1093 = vmatpush2.bf16.msra.mxu0 %v3146_v35 }
  0xfb   : > { %1094 = vmatprep.subr.bf16.mxu0 %v3284_v1  ;;  %v1491_v44 = vpop.permute.xlu1 %1490 }
  0xfc   : > { %2620 = vmatpush3.bf16.msra.mxu1 %v3199_v46 }
  0xfd   : > { %2621 = vmatprep.subr.bf16.mxu1 %v3238_v55 }
  0xfe   : > { %1095 = vmatpush2.bf16.msra.mxu0 %v3291_v43 }
  0xff   : > { %2508 = vmatmul.mubr.msk.bf16.gmra.mxu1 %vm567_vm1, %v3252_v58  ;;  %1096 = vmatprep.subr.bf16.mxu0 %v3311_v54 }
 0x100   : > { %2622 = vmatpush3.bf16.msra.mxu1 %v2951_v7  ;;  %1252 = vmatprep.mubr.bf16.mxu1 %v3013_v17  ;;  %v3521_v7 = vsel %vm342_vm2, %v1033_v18, %v3488_v14  ;;  %v4632_v18 = vld [vmem:[#allocation8_spill] sm:$0xff] }
 0x101   : > { %2623 = vmatprep.subr.bf16.mxu1 %v3242_v56 }
 0x102   : > { %1097 = vmatpush2.bf16.msra.mxu0 %v3318_v57 }
 0x103   : > { %1098 = vmatprep.subr.bf16.mxu0 %v3510_v16 }
 0x104   : > { %2624 = vmatpush3.bf16.msra.mxu1 %v2970_v11  ;;  %v1499_v11 = vpop.permute.xlu0 %1498 }
 0x105   : > { %2759 = vmatprep.subr.bf16.mxu1 %v3402_v61  ;;  %v3536_v45 = vsel %vm496_vm0, %v1499_v11, %v3531_v41 }
 0x106   : > { %1099 = vmatpush2.bf16.msra.mxu0 %v3514_v19 }
 0x107   : > { %1253 = vmatmul.mubr.bf16.vlgmr.msra.gmra.mxu1 %v3297_v2  ;;  %1100 = vmatprep.subr.bf16.mxu0 %v3521_v7 }
 0x108   : > { %2760 = vmatpush3.bf16.msra.mxu1 %v3402_v61  ;;  %1260 = vmatprep.mubr.bf16.mxu1 %v3306_v50  ;;  %v1497_v46 = vpop.permute.xlu0 %1496  ;;  %v4635_v61 = vld [vmem:[#allocation4_spill] sm:$0xff] }
 0x109   : > { %2761 = vmatprep.subr.bf16.mxu1 %v3424_v9  ;;  %v3576_v15 = vsel %vm496_vm0, %v1497_v46, %v1499_v11  ;;  %v4633_v11 = vld [vmem:[#allocation2_spill] sm:$0xff] }
 0x10a   : > { %1101 = vmatpush2.bf16.msra.mxu0 %v3526_v39 }
 0x10b   : > { %1102 = vmatprep.subr.bf16.mxu0 %v3375_v0 }
 0x10c   : > { %2762 = vmatpush3.bf16.msra.mxu1 %v3424_v9  ;;  %v3548_v51 = vpop.permute.xlu0 %1494  ;;  %v4634_v9 = vld [vmem:[#allocation3_spill] sm:$0xff] }
 0x10d   : > { %1597 = vmatprep.subr.bf16.mxu1 %v3536_v45  ;;  %v3572_v13 = vsel %vm496_vm0, %v1493_v48, %v3548_v51 }
 0x10e   : > { %1103 = vmatpush2.bf16.msra.mxu0 %v3379_v6 }
 0x10f   : > { %1261 = vmatmul.mubr.bf16.gmra.mxu1 %v3340_v26  ;;  %1104 = vmatprep.subr.bf16.mxu0 %v3394_v59 }
 0x110   : > { %1268 = vmatprep.mubr.bf16.mxu1 %v3352_v3 }
 0x112   : > { %1105 = vmatpush2.bf16.msra.mxu0 %v3398_v60 }
 0x113   : > { %1512 = vmatprep.subr.bf16.mxu0 %v3331_v62  ;;  %v1477_v62 = vpop.permute.xlu0 %1476 }
 0x115   : > { %1107 = vmatmul.mubr.bf16.vlgmr.msra.gmra.mxu0 %v3297_v2 }
 0x116   : > { %1513 = vmatpush1.bf16.msra.mxu0 %v3343_v27  ;;  %1116 = vmatprep.mubr.bf16.mxu0 %v3306_v50  ;;  %v3564_v27 = vpop.permute.xlu1 %1478 }
 0x117   : > { %1269 = vmatmul.mubr.bf16.gmra.mxu1 %v3385_v53  ;;  %1514 = vmatprep.subr.bf16.mxu0 %v4629_v52  ;;  %4631 = vst [vmem:[#allocation11_spill] sm:$0xff] %v3564_v27  ;;  %v1475_v47 = vpop.permute.xlu0 %1474  ;;  %v3589_v52 = vsel %vm496_vm0, %v1491_v44, %v1493_v48  ;;  %v4636_v48 = vld [vmem:[#allocation5_spill] sm:$0xff]  ;;  %v3604_v44 = vsel %vm451_vm3, %v1477_v62, %v3564_v27 }
 0x118   : > { %1276 = vmatprep.mubr.bf16.mxu1 %v3390_v38 }
 0x11a   : > { %1515 = vmatpush1.bf16.msra.mxu0 %v4630_v63  ;;  %v1471_v4 = vpop.permute.xlu1 %1470 }
 0x11b   : > { %1516 = vmatprep.subr.bf16.mxu0 %v3375_v0  ;;  %v3581_v24 = vpop.permute.xlu0 %1472 }
 0x11d   : > { %1117 = vmatmul.mubr.bf16.gmra.mxu0 %v3340_v26 }
 0x11e   : > { %1517 = vmatpush1.bf16.msra.mxu0 %v3379_v6  ;;  %1126 = vmatprep.mubr.bf16.mxu0 %v3352_v3  ;;  %v1469_v46 = vpop.permute.xlu1 %1468 }
 0x11f   : > { %1277 = vmatmul.mubr.bf16.gmra.mxu1 %v3415_v29  ;;  %1518 = vmatprep.subr.bf16.mxu0 %v3394_v59  ;;  %v1455_v63 = vpop.permute.xlu0 %1454  ;;  %v3621_v12 = vsel %vm451_vm3, %v1469_v46, %v1471_v4 }
 0x120   : > { %2763 = vmatprep.mubr.msk.bf16.mxu1 %vm567_vm1, %v3152_v36 }
 0x122   : > { %1519 = vmatpush1.bf16.msra.mxu0 %v3398_v60 }
 0x123   : > { %1520 = vmatprep.subr.bf16.mxu0 %v3079_v22  ;;  %v1453_v14 = vpop.permute.xlu0 %1452 }
 0x125   : > { %1127 = vmatmul.mubr.bf16.gmra.mxu0 %v3385_v53 }
 0x126   : > { %1521 = vmatpush1.bf16.msra.mxu0 %v3084_v23  ;;  %1136 = vmatprep.mubr.bf16.mxu0 %v3390_v38 }
 0x127   : > { %2764 = vmatmul.mubr.msk.bf16.vlgmr.msra.gmra.mxu1 %vm567_vm1, %v3183_v42  ;;  %1522 = vmatprep.subr.bf16.mxu0 %v4632_v18 }
 0x128   : > { %1598 = vmatpush1.bf16.msra.mxu1 %v3576_v15  ;;  %2767 = vmatprep.mubr.msk.bf16.mxu1 %vm567_vm1, %v3215_v49 }
 0x129   : > { %1599 = vmatprep.subr.bf16.mxu1 %v3572_v13 }
 0x12a   : > { %1523 = vmatpush1.bf16.msra.mxu0 %v3094_v25 }
 0x12b   : > { %1524 = vmatprep.subr.bf16.mxu0 %v4633_v11  ;;  %v1457_v11 = vpop.permute.xlu1 %1456 }
 0x12c   : > { %1600 = vmatpush1.bf16.msra.mxu1 %v3589_v52 }
 0x12d   : > { %1137 = vmatmul.mubr.bf16.gmra.mxu0 %v3415_v29  ;;  %2655 = vmatprep.subr.bf16.mxu1 %v3564_v27  ;;  %v4638_v27 = vld [vmem:[#allocation10_spill] sm:$0xff] }
 0x12e   : > { %1525 = vmatpush1.bf16.msra.mxu0 %v4634_v9  ;;  %1544 = vmatprep.mubr.bf16.mxu0 %v3013_v17  ;;  %v3608_v9 = vsel %vm451_vm3, %v1475_v47, %v1477_v62  ;;  %v1451_v62 = vpop.permute.xlu0 %1450  ;;  %v1461_v47 = vsel %vm451_vm3, %v1455_v63, %v1457_v11 }
 0x12f   : > { %2768 = vmatmul.mubr.msk.bf16.gmra.mxu1 %vm567_vm1, %v3252_v58  ;;  %1526 = vmatprep.subr.bf16.mxu0 %v4635_v61  ;;  %v3613_v61 = vsel %vm451_vm3, %v1471_v4, %v3581_v24  ;;  %v1449_v10 = vpop.permute.xlu1 %1448 }
 0x130   : > { %1617 = vmatprep.mubr.bf16.mxu1 %v4626_v5  ;;  %v1459_v33 = vsel %vm451_vm3, %v1449_v10, %v1451_v62 }
 0x132   : > { %1527 = vmatpush1.bf16.msra.mxu0 %v4636_v48  ;;  %v4637_v48 = vld [vmem:[#allocation9_spill] sm:$0xff] }
 0x133   : > { %1528 = vmatprep.subr.bf16.mxu0 %v3604_v44  ;;  %v1447_v8 = vpop.permute.xlu1 %1446 }
 0x134   : > { %v1458_v4 = vsel %vm451_vm3, %v1447_v8, %v1449_v10  ;;  %v4639_v8 = vld [vmem:[#allocation6_spill] sm:$0xff] }
 0x136   : > { %1529 = vmatpush2.bf16.msra.mxu0 %v3608_v9 }
 0x137   : > { %2513 = vmatmul.mubr.msk.bf16.vlgmr.msra.gmra.mxu1 %vm567_vm1, %v3152_v36  ;;  %1530 = vmatprep.subr.bf16.mxu0 %v3613_v61 }
 0x138   : > { %2656 = vmatpush3.bf16.msra.mxu1 %v4637_v48  ;;  %1627 = vmatprep.mubr.bf16.mxu1 %v4626_v5  ;;  %v1460_v48 = vsel %vm451_vm3, %v1453_v14, %v1455_v63  ;;  %v1893_v14 = vpop.permute.xlu0 %1892 }
 0x139   : > { %2657 = vmatprep.subr.bf16.mxu1 %v3581_v24 }
 0x13a   : > { %1531 = vmatpush2.bf16.msra.mxu0 %v3621_v12 }
 0x13b   : > { %1532 = vmatprep.subr.bf16.mxu0 %v1461_v47 }
 0x13c   : > { %2658 = vmatpush3.bf16.msra.mxu1 %v4638_v27  ;;  %v3670_v27 = vpop.permute.xlu1 %1894 }
 0x13d   : > { %2659 = vmatprep.subr.bf16.mxu1 %v1457_v11 }
 0x13e   : > { %1533 = vmatpush2.bf16.msra.mxu0 %v1460_v48 }
 0x13f   : > { %2514 = vmatmul.mubr.msk.bf16.gmra.mxu1 %vm567_vm1, %v3183_v42  ;;  %1534 = vmatprep.subr.bf16.mxu0 %v1459_v33 }
 0x140   : > { %2660 = vmatpush3.bf16.msra.mxu1 %v3238_v55  ;;  %1637 = vmatprep.mubr.bf16.mxu1 %v4626_v5  ;;  %v1887_v47 = vpop.permute.xlu1 %1886 }
 0x141   : > { %2661 = vmatprep.subr.bf16.mxu1 %v1451_v62 }
 0x142   : > { %1535 = vmatpush2.bf16.msra.mxu0 %v1458_v4 }
 0x143   : > { %1536 = vmatprep.subr.bf16.mxu0 %v3128_v30 }
 0x144   : > { %2662 = vmatpush3.bf16.msra.mxu1 %v3242_v56 }
 0x145   : > { %2663 = vmatprep.subr.bf16.mxu1 %v3124_v28 }
 0x146   : > { %1537 = vmatpush2.bf16.msra.mxu0 %v3131_v31 }
 0x147   : > { %2515 = vmatmul.mubr.msk.bf16.gmra.mxu1 %vm567_vm1, %v3215_v49  ;;  %1538 = vmatprep.subr.bf16.mxu0 %v3143_v34 }
 0x148   : > { %2664 = vmatpush3.bf16.msra.mxu1 %v3069_v20  ;;  %1647 = vmatprep.mubr.bf16.mxu1 %v4626_v5 }
 0x149   : > { %2665 = vmatprep.subr.bf16.mxu1 %v3139_v32 }
 0x14a   : > { %1539 = vmatpush2.bf16.msra.mxu0 %v3146_v35 }
 0x14b   : > { %1540 = vmatprep.subr.bf16.mxu0 %v3284_v1 }
 0x14c   : > { %2666 = vmatpush3.bf16.msra.mxu1 %v3074_v21  ;;  %v4640_v21 = vld [vmem:[#allocation7_spill] sm:$0xff] }
 0x14d   : > { %2667 = vmatprep.subr.bf16.mxu1 %v3159_v37 }
 0x14e   : > { %1541 = vmatpush2.bf16.msra.mxu0 %v3291_v43 }
 0x14f   : > { %2516 = vmatmul.mubr.msk.bf16.gmra.mxu1 %vm567_vm1, %v3252_v58  ;;  %1542 = vmatprep.subr.bf16.mxu0 %v3311_v54 }
 0x150   : > { %2668 = vmatpush3.bf16.msra.mxu1 %v4639_v8  ;;  %1690 = vmatprep.mubr.bf16.mxu1 %v3013_v17 }
 0x151   : > { %2669 = vmatprep.subr.bf16.mxu1 %v3172_v40 }
 0x152   : > { %v3655_v20 = vpop.f32.mrf.mxu1  ;;  %1543 = vmatpush2.bf16.msra.mxu0 %v3318_v57 }
 0x153   : > { %2771 = vmatprep.subr.bf16.mxu0 %v3531_v41 }
 0x154   : > { %2670 = vmatpush3.bf16.msra.mxu1 %v4640_v21  ;;  %v3660_v33 = vpop.f32.mrf.mxu1 }
 0x155   : > { %1906 = vmatprep.subr.bf16.mxu1 %v3284_v1  ;;  %1545 = vmatmul.mubr.bf16.vlgmr.msra.gmra.mxu0 %v3297_v2  ;;  %v1899_v1 = vsel %vm496_vm0, %v1893_v14, %v3670_v27 }
 0x156   : > { %v3664_v10 = vpop.f32.mrf.mxu1  ;;  %2772 = vmatpush3.bf16.msra.mxu0 %v3531_v41  ;;  %1554 = vmatprep.mubr.bf16.mxu0 %v3306_v50 }
 0x157   : > { %1691 = vmatmul.mubr.bf16.vlgmr.msra.gmra.mxu1 %v3297_v2  ;;  %2773 = vmatprep.subr.bf16.mxu0 %v3548_v51 }
 0x158   : > { %1907 = vmatpush1.bf16.msra.mxu1 %v3291_v43  ;;  %v3673_v46 = vpop.f32.mrf.mxu1  ;;  %1698 = vmatprep.mubr.bf16.mxu1 %v3306_v50 }
 0x159   : > { %1908 = vmatprep.subr.bf16.mxu1 %v3311_v54 }
 0x15a   : > { %v3679_v63 = vpop.f32.mrf.mxu1  ;;  %2774 = vmatpush3.bf16.msra.mxu0 %v3548_v51 }
 0x15b   : > { %1991 = vmatprep.subr.bf16.mxu0 %v1899_v1 }
 0x15c   : > { %1909 = vmatpush1.bf16.msra.mxu1 %v3318_v57  ;;  %v3683_v11 = vpop.f32.mrf.mxu1 }
 0x15d   : > { %1910 = vmatprep.subr.bf16.mxu1 %v3510_v16  ;;  %1555 = vmatmul.mubr.bf16.gmra.mxu0 %v3340_v26 }
 0x15e   : > { %v3687_v43 = vpop.f32.mrf.mxu1  ;;  %1564 = vmatprep.mubr.bf16.mxu0 %v3352_v3 }
 0x15f   : > { %1699 = vmatmul.mubr.bf16.gmra.mxu1 %v3340_v26 }
 0x160   : > { %1911 = vmatpush1.bf16.msra.mxu1 %v3514_v19  ;;  %v3692_v54 = vpop.f32.mrf.mxu1  ;;  %1706 = vmatprep.mubr.bf16.mxu1 %v3352_v3 }
 0x161   : > { %1912 = vmatprep.subr.bf16.mxu1 %v3521_v7 }
 0x162   : > { %v3696_v57 = vpop.f32.mrf.mxu1 }
 0x164   : > { %1913 = vmatpush1.bf16.msra.mxu1 %v3526_v39  ;;  %v3700_v16 = vpop.f32.mrf.mxu1 }
 0x165   : > { %1914 = vmatprep.subr.bf16.mxu1 %v3375_v0  ;;  %1565 = vmatmul.mubr.bf16.gmra.mxu0 %v3385_v53  ;;  %v1891_v0 = vpop.permute.xlu0 %1890 }
 0x166   : > { %1574 = vmatprep.mubr.bf16.mxu0 %v3390_v38  ;;  %v3704_v62 = vpop.f32.mrf.mxu1 }
 0x167   : > { %1707 = vmatmul.mubr.bf16.gmra.mxu1 %v3385_v53 }
 0x168   : > { %1915 = vmatpush1.bf16.msra.mxu1 %v3379_v6  ;;  %1714 = vmatprep.mubr.bf16.mxu1 %v3390_v38  ;;  %v3710_v19 = vpop.f32.mrf.mxu1 }
 0x169   : > { %1916 = vmatprep.subr.bf16.mxu1 %v3394_v59  ;;  %v3727_v59 = vpop.permute.xlu0 %1888 }
 0x16a   : > { %v3712_v7 = vpop.f32.mrf.mxu1  ;;  %v1897_v48 = vsel %vm496_vm0, %v1887_v47, %v3727_v59 }
 0x16c   : > { %1917 = vmatpush1.bf16.msra.mxu1 %v3398_v60  ;;  %v3715_v39 = vpop.f32.mrf.mxu1  ;;  %v1885_v60 = vpop.permute.xlu1 %1884 }
 0x16d   : > { %1918 = vmatprep.subr.bf16.mxu1 %v3079_v22  ;;  %1575 = vmatmul.mubr.bf16.gmra.mxu0 %v3415_v29  ;;  %v1898_v22 = vsel %vm496_vm0, %v1891_v0, %v1893_v14 }
 0x16e   : > { %2775 = vmatprep.mubr.msk.bf16.mxu0 %vm567_vm1, %v3152_v36  ;;  %v3724_v6 = vpop.f32.mrf.mxu1 }
 0x16f   : > { %1715 = vmatmul.mubr.bf16.gmra.mxu1 %v3415_v29 }
 0x170   : > { %1919 = vmatpush1.bf16.msra.mxu1 %v3084_v23  ;;  %1938 = vmatprep.mubr.bf16.mxu1 %v3013_v17  ;;  %v3733_v4 = vpop.f32.mrf.mxu1  ;;  %v1896_v23 = vsel %vm496_vm0, %v1885_v60, %v1887_v47  ;;  %v4644_v60 = vld [vmem:[#allocation11_spill] sm:$0xff] }
 0x171   : > { %1920 = vmatprep.subr.bf16.mxu1 %v4632_v18 }
 0x174   : > { %1921 = vmatpush1.bf16.msra.mxu1 %v3094_v25 }
 0x175   : > { %1922 = vmatprep.subr.bf16.mxu1 %v3536_v45  ;;  %2776 = vmatmul.mubr.msk.bf16.vlgmr.msra.gmra.mxu0 %vm567_vm1, %v3183_v42 }
 0x176   : > { %1992 = vmatpush1.bf16.msra.mxu0 %v1898_v22  ;;  %2779 = vmatprep.mubr.msk.bf16.mxu0 %vm567_vm1, %v3215_v49  ;;  %v2579_v17 = vpop.f32.mrf.mxu1 }
 0x177   : > { %1993 = vmatprep.subr.bf16.mxu0 %v1897_v48  ;;  %v4646_v48 = vld [vmem:[#allocation19_spill] sm:$0xff] }
 0x178   : > { %1923 = vmatpush2.bf16.msra.mxu1 %v3576_v15  ;;  %v2580_v25 = vpop.f32.mrf.mxu1 }
 0x179   : > { %1924 = vmatprep.subr.bf16.mxu1 %v3572_v13  ;;  %v3743_v18 = vadd.f32 %v2580_v25, %v2579_v17 }
 0x17a   : > { %1994 = vmatpush1.bf16.msra.mxu0 %v1896_v23  ;;  %v2582_v45 = vpop.f32.mrf.mxu1 }
 0x17b   : > { %2701 = vmatprep.subr.bf16.mxu0 %v3531_v41 }
 0x17c   : > { %1925 = vmatpush2.bf16.msra.mxu1 %v3589_v52  ;;  %v2583_v8 = vpop.f32.mrf.mxu1  ;;  %v4641_v52 = vld [vmem:[#allocation14_spill] sm:$0xff] }
 0x17d   : > { %1926 = vmatprep.subr.bf16.mxu1 %v3604_v44  ;;  %2780 = vmatmul.mubr.msk.bf16.gmra.mxu0 %vm567_vm1, %v3252_v58  ;;  %v3750_v21 = vadd.f32 %v2583_v8, %v2582_v45  ;;  %v4648_v45 = vld [vmem:[#allocation13_spill] sm:$0xff] }
 0x17e   : > { %2011 = vmatprep.mubr.bf16.mxu0 %v4626_v5  ;;  %v2585_v13 = vpop.f32.mrf.mxu1 }
 0x180   : > { %1927 = vmatpush2.bf16.msra.mxu1 %v3608_v9  ;;  %v2586_v15 = vpop.f32.mrf.mxu1  ;;  %v4642_v9 = vld [vmem:[#allocation16_spill] sm:$0xff] }
 0x181   : > { %1928 = vmatprep.subr.bf16.mxu1 %v3613_v61  ;;  %v2587_v14 = vadd.f32 %v2586_v15, %v2585_v13  ;;  %v4643_v61 = vld [vmem:[#allocation17_spill] sm:$0xff] }
 0x182   : > { %v2588_v41 = vpop.f32.mrf.mxu1 }
 0x184   : > { %1929 = vmatpush2.bf16.msra.mxu1 %v3621_v12  ;;  %v2589_v44 = vpop.f32.mrf.mxu1 }
 0x185   : > { %1930 = vmatprep.subr.bf16.mxu1 %v4641_v52  ;;  %2521 = vmatmul.mubr.msk.bf16.vlgmr.msra.gmra.mxu0 %vm567_vm1, %v3152_v36  ;;  %v2590_v1 = vadd.f32 %v2589_v44, %v2588_v41  ;;  %v4645_v36 = vld [vmem:[#allocation18_spill] sm:$0xff] }
 0x186   : > { %2702 = vmatpush3.bf16.msra.mxu0 %v3159_v37  ;;  %2021 = vmatprep.mubr.bf16.mxu0 %v4626_v5  ;;  %v2591_v0 = vpop.f32.mrf.mxu1 }
 0x187   : > { %2703 = vmatprep.subr.bf16.mxu0 %v3548_v51 }
 0x188   : > { %1931 = vmatpush2.bf16.msra.mxu1 %v4642_v9  ;;  %v2592_v47 = vpop.f32.mrf.mxu1 }
 0x189   : > { %1932 = vmatprep.subr.bf16.mxu1 %v4643_v61  ;;  %v2593_v12 = vadd.f32 %v2592_v47, %v2591_v0  ;;  %v2861_v61 = vld [vmem:[%s2917_s20 + $0x98] ss:$12 sps:$4 sm:$0xff]  }
 0x18a   : > { %2704 = vmatpush3.bf16.msra.mxu0 %v3172_v40  ;;  %v2594_v22 = vpop.f32.mrf.mxu1 }
 0x18b   : > { %2705 = vmatprep.subr.bf16.mxu0 %v4644_v60 }
 0x18c   : > { %1933 = vmatpush2.bf16.msra.mxu1 %v4645_v36  ;;  %v2595_v37 = vpop.f32.mrf.mxu1  ;;  %v3838_v36 = vpop.permute.xlu1 %863 }
 0x18d   : > { %1934 = vmatprep.subr.bf16.mxu1 %v3128_v30  ;;  %2522 = vmatmul.mubr.msk.bf16.gmra.mxu0 %vm567_vm1, %v3183_v42  ;;  %v3770_v51 = vadd.f32 %v2595_v37, %v2594_v22  ;;  %v4647_v30 = vld [vmem:[#allocation20_spill] sm:$0xff] }
 0x18e   : > { %2706 = vmatpush3.bf16.msra.mxu0 %v4646_v48  ;;  %2031 = vmatprep.mubr.bf16.mxu0 %v4626_v5  ;;  %v2597_v17 = vpop.f32.mrf.mxu1 }
 0x18f   : > { %2707 = vmatprep.subr.bf16.mxu0 %v3581_v24  ;;  %v4649_v24 = vld [vmem:[#allocation15_spill] sm:$0xff] }
 0x190   : > { %1935 = vmatpush2.bf16.msra.mxu1 %v3131_v31  ;;  %v2598_v40 = vpop.f32.mrf.mxu1 }
 0x191   : > { %1936 = vmatprep.subr.bf16.mxu1 %v3143_v34  ;;  %v2599_v23 = vadd.f32 %v2598_v40, %v2597_v17 }
 0x192   : > { %2708 = vmatpush3.bf16.msra.mxu0 %v4647_v30  ;;  %v2600_v25 = vpop.f32.mrf.mxu1 }
 0x193   : > { %2709 = vmatprep.subr.bf16.mxu0 %v4648_v45 }
 0x194   : > { %1937 = vmatpush2.bf16.msra.mxu1 %v3146_v35  ;;  %v2601_v42 = vpop.f32.mrf.mxu1 }
 0x195   : > { %2783 = vmatprep.subr.bf16.mxu1 %v3670_v27  ;;  %v3781_v8 = vpop.f32.mrf.mxu0  ;;  %2523 = vmatmul.mubr.msk.bf16.gmra.mxu0 %vm567_vm1, %v3215_v49  ;;  %v2602_v31 = vadd.f32 %v2601_v42, %v2600_v25 }
 0x196   : > { %2710 = vmatpush3.bf16.msra.mxu0 %v3238_v55  ;;  %2041 = vmatprep.mubr.bf16.mxu0 %v4626_v5 }
 0x197   : > { %1939 = vmatmul.mubr.bf16.vlgmr.msra.gmra.mxu1 %v3297_v2  ;;  %v2753_v34 = vpop.f32.mrf.mxu1  ;;  %2711 = vmatprep.subr.bf16.mxu0 %v4649_v24  ;;  %v3789_v13 = vpop.f32.mrf.mxu0 }
 0x198   : > { %v3791_v35 = vadd.f32 %v2753_v34, %v2587_v14  ;;  %2784 = vmatpush3.bf16.msra.mxu1 %v3670_v27  ;;  %1948 = vmatprep.mubr.bf16.mxu1 %v3306_v50 }
 0x199   : > { %2785 = vmatprep.subr.bf16.mxu1 %v3727_v59  ;;  %v825_v49 = vpop.f32.mrf.mxu1  ;;  %v3796_v55 = vpop.f32.mrf.mxu0 }
 0x19a   : > { %v3799_v5 = vadd.f32 %v3743_v18, %v825_v49  ;;  %2712 = vmatpush3.bf16.msra.mxu0 %v3242_v56  ;;  %v2859_v18 = vld [vmem:[%s2917_s20 + $0xb0] ss:$12 sps:$4 sm:$0xff]  }
 0x19b   : > { %v2754_v15 = vpop.f32.mrf.mxu1  ;;  %2713 = vmatprep.subr.bf16.mxu0 %v3124_v28  ;;  %v3803_v14 = vpop.f32.mrf.mxu0  ;;  %v2860_v56 = vld [vmem:[%s4579_s1 + $0x4] ss:$12 sps:$4 sm:$0xff]  }
 0x19c   : > { %v3805_v41 = vadd.f32 %v2754_v15, %v2590_v1  ;;  %2786 = vmatpush3.bf16.msra.mxu1 %v3727_v59 }
 0x19d   : > { %v828_v27 = vpop.f32.mrf.mxu1  ;;  %v3808_v52 = vpop.f32.mrf.mxu0  ;;  %2524 = vmatmul.mubr.msk.bf16.gmra.mxu0 %vm567_vm1, %v3252_v58 }
 0x19e   : > { %2714 = vmatpush3.bf16.msra.mxu0 %v2859_v18  ;;  %2084 = vmatprep.mubr.bf16.mxu0 %v2860_v56  ;;  %v3817_v28 = vadd.f32 %v3750_v21, %v828_v27  ;;  %v2863_v56 = vld [vmem:[%s4579_s1 + $0x20] ss:$12 sps:$4 sm:$0xff]  }
 0x19f   : > { %1949 = vmatmul.mubr.bf16.gmra.mxu1 %v3340_v26  ;;  %v2757_v59 = vpop.f32.mrf.mxu1  ;;  %2715 = vmatprep.subr.bf16.mxu0 %v3139_v32  ;;  %v3821_v44 = vpop.f32.mrf.mxu0 }
 0x1a0   : > { %v3823_v1 = vadd.f32 %v2757_v59, %v2599_v23  ;;  %1958 = vmatprep.mubr.bf16.mxu1 %v3352_v3 }
 0x1a1   : > { %v841_v58 = vpop.f32.mrf.mxu1  ;;  %v3826_v0 = vpop.f32.mrf.mxu0 }
 0x1a2   : > { %v3828_v9 = vadd.f32 %v2593_v12, %v841_v58  ;;  %2716 = vmatpush3.bf16.msra.mxu0 %v2861_v61 }
 0x1a3   : > { %v2758_v21 = vpop.f32.mrf.mxu1  ;;  %v3831_v47 = vpop.f32.mrf.mxu0 }
 0x1a4   : > { %v3833_v22 = vadd.f32 %v2758_v21, %v2602_v31  ;;  %v2862_v31 = vld [vmem:[%s4579_s1 + $0x8] ss:$12 sps:$4 sm:$0xff]  }
 0x1a5   : > { %v844_v60 = vpop.f32.mrf.mxu1  ;;  %v3835_v32 = vpop.f32.mrf.mxu0  ;;  %2085 = vmatmul.mubr.bf16.vlgmr.msra.gmra.mxu0 %v3297_v2 }
 0x1a6   : > { %2092 = vmatprep.mubr.bf16.mxu0 %v3306_v50  ;;  %v3842_v37 = vadd.f32 %v3770_v51, %v844_v60  ;;  %v3858_v50 = vpop.permute.xlu0 %858  ;;  %v3860_v51 = vpop.permute.xlu1 %868 }
 0x1a7   : > { %1959 = vmatmul.mubr.bf16.gmra.mxu1 %v3385_v53  ;;  %v3845_v12 = vpop.f32.mrf.mxu1  ;;  %v3847_v48 = vpop.f32.mrf.mxu0 }
 0x1a8   : > { %1968 = vmatprep.mubr.bf16.mxu1 %v3390_v38 }
 0x1a9   : > { %v3850_v17 = vpop.f32.mrf.mxu1  ;;  %v3852_v40 = vpop.f32.mrf.mxu0 }
 0x1aa   : > { %v3881_v49 = vpop.permute.xlu0 %873 }
 0x1ab   : > { %v3854_v2 = vpop.f32.mrf.mxu1  ;;  %v3856_v23 = vpop.f32.mrf.mxu0 }
 0x1ad   : > { %v3862_v30 = vpop.f32.mrf.mxu1  ;;  %v3864_v25 = vpop.f32.mrf.mxu0  ;;  %2093 = vmatmul.mubr.bf16.gmra.mxu0 %v3340_v26 }
 0x1ae   : > { %2100 = vmatprep.mubr.bf16.mxu0 %v3352_v3  ;;  %v3883_v26 = vpop.permute.xlu1 %878  ;;  %v3900_v58 = vpop.permute.xlu0 %883 }
 0x1af   : > { %1969 = vmatmul.mubr.bf16.gmra.mxu1 %v3415_v29  ;;  %v3869_v45 = vpop.f32.mrf.mxu1  ;;  %v3871_v42 = vpop.f32.mrf.mxu0 }
 0x1b0   : > { %2787 = vmatprep.mubr.msk.bf16.mxu1 %vm567_vm1, %v2862_v31 }
 0x1b1   : > { %v3877_v34 = vpop.f32.mrf.mxu1  ;;  %v3879_v24 = vpop.f32.mrf.mxu0 }
 0x1b2   : > { %v3902_v61 = vpop.permute.xlu1 %888  ;;  %v3915_v60 = vpop.permute.xlu0 %893 }
 0x1b3   : > { %v3885_v3 = vpop.f32.mrf.mxu1  ;;  %v650_v15 = vpop.f32.mrf.mxu0 }
 0x1b4   : > { %4650 = vst [vmem:[#allocation12_spill] sm:$0xff] %v3885_v3  ;;  %v3888_v27 = vadd.f32 %v3733_v4, %v650_v15  ;;  %v2864_v4 = vld [vmem:[%s4579_s1 + $0x38] ss:$12 sps:$4 sm:$0xff]   ;;  %v2865_v15 = vld [vmem:[%s4579_s1 + $0x50] ss:$12 sps:$4 sm:$0xff]  }
 0x1b5   : > { %v3890_v18 = vpop.f32.mrf.mxu1  ;;  %2101 = vmatmul.mubr.bf16.gmra.mxu0 %v3385_v53 }
 0x1b6   : > { %4651 = vst [vmem:[#allocation8_spill] sm:$0xff] %v3888_v27  ;;  %4652 = vst [vmem:[#allocation2_spill] sm:$0xff] %v3890_v18  ;;  %2108 = vmatprep.mubr.bf16.mxu0 %v3390_v38  ;;  %v3917_v31 = vpop.permute.xlu1 %922  ;;  %v690_v27 = vadd.f32 %v3660_v33, %v3789_v13  ;;  %v904_v18 = vmul.f32 %v3860_v51, %v3791_v35  ;;  %v898_v33 = vmul.f32 %v3858_v50, %v3799_v5 }
 0x1b7   : > { %2788 = vmatmul.mubr.msk.bf16.vlgmr.msra.gmra.mxu1 %vm567_vm1, %v2863_v56  ;;  %v3898_v59 = vpop.f32.mrf.mxu1  ;;  %4657 = vst [vmem:[#allocation10_spill] sm:$0xff] %v3917_v31  ;;  %v907_v5 = vmul.f32 %v3881_v49, %v3805_v41 }
 0x1b8   : > { %4653 = vst [vmem:[#allocation3_spill] sm:$0xff] %v3898_v59  ;;  %2791 = vmatprep.mubr.msk.bf16.mxu1 %vm567_vm1, %v2864_v4  ;;  %v897_v3 = vmul.f32 %v3858_v50, %v690_v27 }
 0x1b9   : > { %v3908_v53 = vpop.f32.mrf.mxu1 }
 0x1ba   : > { %4654 = vst [vmem:[#allocation4_spill] sm:$0xff] %v3908_v53 }
 0x1bb   : > { %v3910_v38 = vpop.f32.mrf.mxu1 }
 0x1bc   : > { %4655 = vst [vmem:[#allocation5_spill] sm:$0xff] %v3910_v38  ;;  %v3929_v38 = vpop.permute.xlu0 %927 }
 0x1bd   : > { %v3912_v21 = vpop.f32.mrf.mxu1  ;;  %2109 = vmatmul.mubr.bf16.gmra.mxu0 %v3415_v29  ;;  %v688_v29 = vadd.f32 %v3655_v20, %v3781_v8 }
 0x1be   : > { %4656 = vst [vmem:[#allocation9_spill] sm:$0xff] %v3912_v21  ;;  %v3931_v21 = vpop.permute.xlu1 %932 }
 0x1bf   : > { %2792 = vmatmul.mubr.msk.bf16.gmra.mxu1 %vm567_vm1, %v2865_v15  ;;  %v3923_v56 = vpop.f32.mrf.mxu1  ;;  %v692_v15 = vadd.f32 %v3664_v10, %v3796_v55  ;;  %v698_v10 = vadd.f32 %v3679_v63, %v3808_v52  ;;  %v702_v63 = vadd.f32 %v3687_v43, %v3826_v0  ;;  %v3968_v52 = vadd.f32 %v3917_v31, %v897_v3 }
 0x1c0   : > { %4658 = vst [vmem:[#allocation6_spill] sm:$0xff] %v3923_v56  ;;  %v3949_v8 = vpop.permute.xlu0 %937  ;;  %v916_v3 = vmul.f32 %v3902_v61, %v3823_v1 }
 0x1c1   : > { %v3925_v4 = vpop.f32.mrf.mxu1  ;;  %v899_v35 = vmul.f32 %v3838_v36, %v692_v15  ;;  %v902_v41 = vmul.f32 %v3860_v51, %v698_v10 }
 0x1c2   : > { %4659 = vst [vmem:[#allocation7_spill] sm:$0xff] %v3925_v4  ;;  %v694_v4 = vadd.f32 %v3673_v46, %v3803_v14  ;;  %v3953_v13 = vpop.permute.xlu1 %942  ;;  %v700_v46 = vadd.f32 %v3683_v11, %v3821_v44 }
 0x1c3   : > { %v3927_v53 = vpop.f32.mrf.mxu1  ;;  %v3984_v43 = vadd.f32 %v3929_v38, %v899_v35 }
 0x1c4   : > { %4660 = vst [vmem:[#allocation14_spill] sm:$0xff] %v3927_v53  ;;  %v896_v53 = vmul.f32 %v3858_v50, %v688_v29  ;;  %v900_v14 = vmul.f32 %v3838_v36, %v694_v4  ;;  %v901_v29 = vmul.f32 %v3838_v36, %v3817_v28  ;;  %v3977_v4 = vadd.f32 %v3917_v31, %v898_v33  ;;  %v3998_v10 = vpop.permute.xlu0 %947 }
 0x1c5   : > { %v3937_v59 = vpop.f32.mrf.mxu1  ;;  %v903_v28 = vmul.f32 %v3860_v51, %v700_v46  ;;  %v910_v33 = vmul.f32 %v3883_v26, %v3828_v9  ;;  %v905_v46 = vmul.f32 %v3881_v49, %v702_v63 }
 0x1c6   : > { %4661 = vst [vmem:[#allocation16_spill] sm:$0xff] %v3937_v59  ;;  %v3971_v44 = vadd.f32 %v3917_v31, %v896_v53  ;;  %v3987_v0 = vadd.f32 %v3929_v38, %v900_v14  ;;  %v4001_v35 = vpop.permute.xlu1 %952  ;;  %v4004_v14 = vadd.f32 %v3949_v8, %v907_v5 }
 0x1c7   : > { %v2625_v56 = vpop.f32.mrf.mxu1  ;;  %v4016_v63 = vadd.f32 %v3931_v21, %v903_v28  ;;  %v4031_v28 = vadd.f32 %v3949_v8, %v905_v46 }
 0x1c8   : > { %v4043_v1 = vpop.permute.xlu0 %957 }
 0x1c9   : > { %v2626_v20 = vpop.f32.mrf.mxu1 }
 0x1ca   : > { %v3957_v55 = vadd.f32 %v2626_v20, %v2625_v56  ;;  %v3974_v56 = vadd.f32 %v3931_v21, %v904_v18  ;;  %v704_v18 = vadd.f32 %v3692_v54, %v3831_v47  ;;  %v3994_v20 = vadd.f32 %v3929_v38, %v901_v29 }
 0x1cb   : > { %v2628_v27 = vpop.f32.mrf.mxu1  ;;  %v708_v54 = vadd.f32 %v3696_v57, %v3835_v32 }
 0x1cc   : > { %4662 = vst [vmem:[#allocation17_spill] sm:$0xff] %v3994_v20  ;;  %v906_v57 = vmul.f32 %v3881_v49, %v704_v18  ;;  %v710_v18 = vadd.f32 %v3700_v16, %v3847_v48  ;;  %v913_v16 = vmul.f32 %v3900_v58, %v3842_v37 }
 0x1cd   : > { %v2629_v11 = vpop.f32.mrf.mxu1  ;;  %v908_v29 = vmul.f32 %v3883_v26, %v708_v54 }
 0x1ce   : > { %v3981_v15 = vadd.f32 %v2629_v11, %v2628_v27  ;;  %v984_v27 = vmax.f32 %v3971_v44, 0.0  ;;  %v4013_v11 = vadd.f32 %v3931_v21, %v902_v41  ;;  %v4024_v44 = vadd.f32 %v4001_v35, %v916_v3 }
 0x1cf   : > { %v2631_v53 = vpop.f32.mrf.mxu1  ;;  %v4028_v41 = vadd.f32 %v3953_v13, %v910_v33  ;;  %v712_v3 = vadd.f32 %v3704_v62, %v3852_v40  ;;  %v4049_v54 = vadd.f32 %v3949_v8, %v906_v57  ;;  %v714_v62 = vadd.f32 %v3710_v19, %v3856_v23 }
 0x1d0   : > { %v909_v37 = vmul.f32 %v3883_v26, %v710_v18 }
 0x1d1   : > { %v2632_v47 = vpop.f32.mrf.mxu1  ;;  %v911_v57 = vmul.f32 %v3900_v58, %v712_v3  ;;  %v912_v18 = vmul.f32 %v3900_v58, %v714_v62  ;;  %v718_v3 = vadd.f32 %v3712_v7, %v3864_v25  ;;  %v720_v7 = vadd.f32 %v3715_v39, %v3871_v42 }
 0x1d2   : > { %v4018_v5 = vadd.f32 %v2632_v47, %v2631_v53  ;;  %v919_v47 = vmul.f32 %v3915_v60, %v3833_v22  ;;  %v4664_v42 = vmax.f32 %v3968_v52, 0.0  ;;  %v4665_v52 = vmax.f32 %v3984_v43, 0.0 }
 0x1d3   : > { %v2634_v32 = vpop.f32.mrf.mxu1 }
 0x1d4   : > { %v4066_v20 = vadd.f32 %v4043_v1, %v919_v47 }
 0x1d5   : > { %v2635_v9 = vpop.f32.mrf.mxu1  ;;  %v1108_v59 = vpop.f32.mrf.mxu0 }
 0x1d6   : > { %v4045_v53 = vadd.f32 %v2635_v9, %v2634_v32  ;;  %v1182_v22 = vadd.f32 %v3845_v12, %v1108_v59  ;;  %v4061_v59 = vadd.f32 %v3953_v13, %v908_v29  ;;  %4663 = vst [vmem:[#allocation11_spill] sm:$0xff] %v4066_v20 }
 0x1d7   : > { %v2637_v48 = vpop.f32.mrf.mxu1  ;;  %v1110_v40 = vpop.f32.mrf.mxu0 }
 0x1d8   : > { %v1350_v32 = vmul.f32 %v1182_v22, %v3858_v50  ;;  %v1184_v12 = vadd.f32 %v3850_v17, %v1110_v40  ;;  %v4075_v22 = vadd.f32 %v3998_v10, %v913_v16  ;;  %v4088_v16 = vadd.f32 %v3998_v10, %v911_v57 }
 0x1d9   : > { %v2638_v19 = vpop.f32.mrf.mxu1  ;;  %v1112_v23 = vpop.f32.mrf.mxu0 }
 0x1da   : > { %v1374_v46 = vadd.f32 %v1350_v32, %v3917_v31  ;;  %v1351_v33 = vmul.f32 %v1184_v12, %v3858_v50  ;;  %v4070_v9 = vadd.f32 %v2638_v19, %v2637_v48  ;;  %v1186_v17 = vadd.f32 %v3854_v2, %v1112_v23 }
 0x1db   : > { %v2640_v47 = vpop.f32.mrf.mxu1  ;;  %v1114_v40 = vpop.f32.mrf.mxu0  ;;  %v4085_v19 = vadd.f32 %v3953_v13, %v909_v37  ;;  %v914_v37 = vmul.f32 %v3902_v61, %v718_v3  ;;  %v722_v3 = vadd.f32 %v3724_v6, %v3879_v24  ;;  %v4666_v24 = vld [vmem:[#allocation12_spill] sm:$0xff] }
 0x1dc   : > { %v1398_v20 = vmax.f32 %v1374_v46, 0.0  ;;  %v1375_v32 = vadd.f32 %v1351_v33, %v3917_v31  ;;  %v1353_v48 = vmul.f32 %v1186_v17, %v3838_v36  ;;  %v1188_v12 = vadd.f32 %v3862_v30, %v1114_v40 }
 0x1dd   : > { %v2641_v25 = vpop.f32.mrf.mxu1  ;;  %v1118_v62 = vpop.f32.mrf.mxu0  ;;  %v4097_v17 = vadd.f32 %v3998_v10, %v912_v18 }
 0x1de   : > { %v4092_v46 = vmax.f32 %v984_v27, %v1398_v20  ;;  %v1399_v33 = vmax.f32 %v1375_v32, 0.0  ;;  %v1377_v23 = vadd.f32 %v1353_v48, %v3929_v38  ;;  %v1354_v30 = vmul.f32 %v1188_v12, %v3838_v36 }
 0x1df   : > { %v4100_v40 = vadd.f32 %v2641_v25, %v2640_v47  ;;  %v1192_v57 = vadd.f32 %v3869_v45, %v1118_v62  ;;  %v2643_v2 = vpop.f32.mrf.mxu1  ;;  %v1120_v39 = vpop.f32.mrf.mxu0  ;;  %v915_v12 = vmul.f32 %v3902_v61, %v720_v7  ;;  %v4123_v7 = vadd.f32 %v4001_v35, %v914_v37 }
 0x1e0   : > { %v4105_v20 = vmax.f32 %v4664_v42, %v1399_v33  ;;  %v1401_v27 = vmax.f32 %v1377_v23, 0.0  ;;  %v1378_v32 = vadd.f32 %v1354_v30, %v3929_v38  ;;  %v1194_v48 = vadd.f32 %v3877_v34, %v1120_v39 }
 0x1e1   : > { %v1356_v45 = vmul.f32 %v1192_v57, %v3860_v51  ;;  %v2644_v47 = vpop.f32.mrf.mxu1  ;;  %v1122_v25 = vpop.f32.mrf.mxu0  ;;  %v917_v37 = vmul.f32 %v3915_v60, %v722_v3 }
 0x1e2   : > { %v4116_v62 = vmax.f32 %v4665_v52, %v1401_v27  ;;  %v1402_v33 = vmax.f32 %v1378_v32, 0.0  ;;  %v1357_v23 = vmul.f32 %v1194_v48, %v3860_v51  ;;  %v4119_v30 = vadd.f32 %v2644_v47, %v2643_v2  ;;  %v4668_v48 = vld [vmem:[#allocation2_spill] sm:$0xff] }
 0x1e3   : > { %v1380_v6 = vadd.f32 %v1356_v45, %v3931_v21  ;;  %v1196_v57 = vadd.f32 %v4666_v24, %v1122_v25  ;;  %v2646_v39 = vpop.f32.mrf.mxu1  ;;  %v1124_v42 = vpop.f32.mrf.mxu0  ;;  %v4667_v27 = vmax.f32 %v3987_v0, 0.0  ;;  %v4135_v52 = vadd.f32 %v4001_v35, %v915_v12 }
 0x1e4   : > { %v1381_v2 = vadd.f32 %v1357_v23, %v3931_v21  ;;  %v1198_v47 = vadd.f32 %v4668_v48, %v1124_v42  ;;  %v4670_v42 = vld [vmem:[#allocation8_spill] sm:$0xff]  ;;  %v4671_v48 = vmax.f32 %v4013_v11, 0.0  ;;  %v4160_v11 = vadd.f32 %v4043_v1, %v917_v37 }
 0x1e5   : > { %v4130_v32 = vmax.f32 %v4667_v27, %v1402_v33  ;;  %v1404_v45 = vmax.f32 %v1380_v6, 0.0  ;;  %v1359_v25 = vmul.f32 %v1196_v57, %v3881_v49  ;;  %v2647_v24 = vpop.f32.mrf.mxu1  ;;  %v1128_v34 = vpop.f32.mrf.mxu0  ;;  %v4669_v33 = vld [vmem:[#allocation3_spill] sm:$0xff]  ;;  %v918_v12 = vmul.f32 %v3915_v60, %v4670_v42  ;;  %v4674_v42 = vld [vmem:[#allocation4_spill] sm:$0xff] }
 0x1e6   : > { %v1405_v18 = vmax.f32 %v1381_v2, 0.0  ;;  %v1360_v43 = vmul.f32 %v1198_v47, %v3881_v49  ;;  %v4140_v0 = vadd.f32 %v2647_v24, %v2646_v39  ;;  %v1202_v27 = vadd.f32 %v4669_v33, %v1128_v34 }
 0x1e7   : > { %v4148_v3 = vmax.f32 %v4671_v48, %v1404_v45  ;;  %v1383_v6 = vadd.f32 %v1359_v25, %v3949_v8  ;;  %v2765_v57 = vpop.f32.mrf.mxu1  ;;  %v1130_v29 = vpop.f32.mrf.mxu0  ;;  %v4673_v2 = vmax.f32 %v4016_v63, 0.0  ;;  %v4679_v33 = vmax.f32 %v4061_v59, 0.0 }
 0x1e8   : > { %v1384_v39 = vadd.f32 %v1360_v43, %v3949_v8  ;;  %v1362_v34 = vmul.f32 %v1202_v27, %v3883_v26  ;;  %v1328_v24 = vadd.f32 %v2765_v57, %v4018_v5  ;;  %v1204_v25 = vadd.f32 %v4674_v42, %v1130_v29 }
 0x1e9   : > { %4672 = vst [vmem:[#allocation18_spill] sm:$0xff] %v4148_v3  ;;  %v4153_v47 = vmax.f32 %v4673_v2, %v1405_v18  ;;  %v1407_v45 = vmax.f32 %v1383_v6, 0.0  ;;  %v1319_v48 = vpop.f32.mrf.mxu1  ;;  %v1132_v23 = vpop.f32.mrf.mxu0  ;;  %v4167_v27 = vadd.f32 %v4043_v1, %v918_v12  ;;  %v4675_v5 = vmax.f32 %v4031_v28, 0.0  ;;  %v4676_v6 = vld [vmem:[#allocation5_spill] sm:$0xff] }
 0x1ea   : > { %v1408_v3 = vmax.f32 %v1384_v39, 0.0  ;;  %v1386_v63 = vadd.f32 %v1362_v34, %v3953_v13  ;;  %v1358_v18 = vmul.f32 %v1328_v24, %v3860_v51  ;;  %v1320_v43 = vadd.f32 %v3957_v55, %v1319_v48 }
 0x1eb   : > { %v4171_v57 = vmax.f32 %v4675_v5, %v1407_v45  ;;  %v1363_v37 = vmul.f32 %v1204_v25, %v3883_v26  ;;  %v1206_v29 = vadd.f32 %v4676_v6, %v1132_v23  ;;  %v2766_v2 = vpop.f32.mrf.mxu1  ;;  %v1134_v42 = vpop.f32.mrf.mxu0  ;;  %v4677_v39 = vmax.f32 %v4049_v54, 0.0  ;;  %v4678_v25 = vld [vmem:[#allocation9_spill] sm:$0xff] }
 0x1ec   : > { %v1410_v24 = vmax.f32 %v1386_v63, 0.0  ;;  %v1382_v55 = vadd.f32 %v1358_v18, %v3931_v21  ;;  %v1352_v12 = vmul.f32 %v1320_v43, %v3858_v50  ;;  %v1331_v45 = vadd.f32 %v2766_v2, %v4045_v53 }
 0x1ed   : > { %v4177_v34 = vmax.f32 %v4677_v39, %v1408_v3  ;;  %v1387_v48 = vadd.f32 %v1363_v37, %v3953_v13  ;;  %v1365_v28 = vmul.f32 %v1206_v29, %v3900_v58  ;;  %v1208_v5 = vadd.f32 %v4678_v25, %v1134_v42  ;;  %v1322_v23 = vpop.f32.mrf.mxu1  ;;  %v1138_v6 = vpop.f32.mrf.mxu0 }
 0x1ee   : > { %v4187_v54 = vmax.f32 %v4679_v33, %v1410_v24  ;;  %v1406_v3 = vmax.f32 %v1382_v55, 0.0  ;;  %v1376_v63 = vadd.f32 %v1352_v12, %v3917_v31  ;;  %v1323_v18 = vadd.f32 %v3981_v15, %v1322_v23  ;;  %v4682_v24 = vld [vmem:[#allocation6_spill] sm:$0xff] }
 0x1ef   : > { %v1411_v43 = vmax.f32 %v1387_v48, 0.0  ;;  %v1389_v37 = vadd.f32 %v1365_v28, %v3998_v10  ;;  %v1361_v29 = vmul.f32 %v1331_v45, %v3881_v49  ;;  %v1366_v53 = vmul.f32 %v1208_v5, %v3900_v58  ;;  %v2769_v2 = vpop.f32.mrf.mxu1  ;;  %v1140_v42 = vpop.f32.mrf.mxu0 }
 0x1f0   : > { %v4680_v39 = vmax.f32 %v3974_v56, 0.0  ;;  %v1400_v59 = vmax.f32 %v1376_v63, 0.0  ;;  %v1355_v33 = vmul.f32 %v1323_v18, %v3838_v36  ;;  %v1212_v55 = vadd.f32 %v4682_v24, %v1138_v6 }
 0x1f1   : > { %v4683_v15 = vmax.f32 %v4085_v19, 0.0  ;;  %v1413_v48 = vmax.f32 %v1389_v37, 0.0  ;;  %v1385_v28 = vadd.f32 %v1361_v29, %v3949_v8  ;;  %v1390_v45 = vadd.f32 %v1366_v53, %v3998_v10  ;;  %v1335_v5 = vpop.f32.mrf.mxu1  ;;  %v1142_v23 = vpop.f32.mrf.mxu0 }
 0x1f2   : > { %v4196_v25 = vmax.f32 %v4680_v39, %v1406_v3  ;;  %v4684_v56 = vmax.f32 %v3977_v4, 0.0  ;;  %v1379_v63 = vadd.f32 %v1355_v33, %v3929_v38  ;;  %v1368_v18 = vmul.f32 %v1212_v55, %v3902_v61  ;;  %v4687_v39 = vld [vmem:[#allocation7_spill] sm:$0xff] }
 0x1f3   : > { %v4202_v12 = vmax.f32 %v4683_v15, %v1411_v43  ;;  %v1344_v6 = vadd.f32 %v2769_v2, %v4119_v30  ;;  %v4686_v19 = vmax.f32 %v4088_v16, 0.0  ;;  %v1409_v37 = vmax.f32 %v1385_v28, 0.0  ;;  %v2770_v24 = vpop.f32.mrf.mxu1 }
 0x1f4   : > { %4681 = vst [vmem:[#allocation19_spill] sm:$0xff] %v4196_v25  ;;  %v4208_v3 = vmax.f32 %v4684_v56, %v1400_v59  ;;  %v1414_v29 = vmax.f32 %v1390_v45, 0.0  ;;  %v1214_v53 = vadd.f32 %v4687_v39, %v1140_v42  ;;  %v1403_v15 = vmax.f32 %v1379_v63, 0.0  ;;  %v1144_v56 = vpop.f32.mrf.mxu0  ;;  %v4691_v42 = vld [vmem:[#allocation14_spill] sm:$0xff]  ;;  %v4692_v63 = vld [vmem:[#allocation17_spill] sm:$0xff] }
 0x1f5   : > { %v4215_v43 = vmax.f32 %v4686_v19, %v1413_v48  ;;  %v1392_v4 = vadd.f32 %v1368_v18, %v4001_v35  ;;  %v1370_v59 = vmul.f32 %v1344_v6, %v3902_v61  ;;  %v1336_v33 = vadd.f32 %v4070_v9, %v1335_v5  ;;  %v1338_v45 = vpop.f32.mrf.mxu1 }
 0x1f6   : > { %4685 = vst [vmem:[#allocation20_spill] sm:$0xff] %v4208_v3  ;;  %v4688_v55 = vmax.f32 %v4004_v14, 0.0  ;;  %v4690_v16 = vmax.f32 %v4097_v17, 0.0  ;;  %v1369_v48 = vmul.f32 %v1214_v53, %v3902_v61  ;;  %v1216_v28 = vadd.f32 %v4691_v42, %v1142_v23 }
 0x1f7   : > { %v4693_v18 = vmax.f32 %v4692_v63, 0.0  ;;  %v1416_v6 = vmax.f32 %v1392_v4, 0.0  ;;  %v1394_v9 = vadd.f32 %v1370_v59, %v4001_v35  ;;  %v1364_v14 = vmul.f32 %v1336_v33, %v3883_v26  ;;  %v1619_v53 = vpop.f32.mrf.mxu1 }
 0x1f8   : > { %v4223_v30 = vmax.f32 %v4688_v55, %v1409_v37  ;;  %v4227_v2 = vmax.f32 %v4690_v16, %v1414_v29  ;;  %v1393_v5 = vadd.f32 %v1369_v48, %v4001_v35  ;;  %v1371_v17 = vmul.f32 %v1216_v28, %v3915_v60  ;;  %v4695_v29 = vld [vmem:[#allocation16_spill] sm:$0xff] }
 0x1f9   : > { %v4233_v19 = vmax.f32 %v4693_v18, %v1403_v15  ;;  %v1347_v37 = vadd.f32 %v2770_v24, %v4140_v0  ;;  %v1218_v39 = vadd.f32 %v4695_v29, %v1144_v56  ;;  %v4696_v23 = vmax.f32 %v4123_v7, 0.0  ;;  %v1621_v0 = vpop.f32.mrf.mxu1 }
 0x1fa   : > { %4689 = vst [vmem:[#allocation13_spill] sm:$0xff] %v4223_v30  ;;  %v1418_v15 = vmax.f32 %v1394_v9, 0.0  ;;  %v1388_v4 = vadd.f32 %v1364_v14, %v3953_v13  ;;  %v1339_v59 = vadd.f32 %v4100_v40, %v1338_v45  ;;  %v1417_v16 = vmax.f32 %v1393_v5, 0.0 }
 0x1fb   : > { %4694 = vst [vmem:[#allocation15_spill] sm:$0xff] %v4233_v19  ;;  %v4243_v55 = vmax.f32 %v4696_v23, %v1416_v6  ;;  %v1395_v33 = vadd.f32 %v1371_v17, %v4043_v1  ;;  %v1373_v48 = vmul.f32 %v1347_v37, %v3915_v60  ;;  %v1372_v42 = vmul.f32 %v1218_v39, %v3915_v60  ;;  %v1623_v14 = vpop.f32.mrf.mxu1 }
 0x1fc   : > { %v1005_v24 = vmax.f32 %v4160_v11, 0.0  ;;  %v4697_v56 = vmax.f32 %v4024_v44, 0.0  ;;  %v1412_v28 = vmax.f32 %v1388_v4, 0.0  ;;  %v1367_v63 = vmul.f32 %v1339_v59, %v3900_v58  ;;  %v4702_v44 = vld [vmem:[#allocation11_spill] sm:$0xff] }
 0x1fd   : > { %v4699_v18 = vmax.f32 %v4135_v52, 0.0  ;;  %v1419_v45 = vmax.f32 %v1395_v33, 0.0  ;;  %v1397_v6 = vadd.f32 %v1373_v48, %v4043_v1  ;;  %v1396_v9 = vadd.f32 %v1372_v42, %v4043_v1 }
 0x1fe   : > { %v4253_v7 = vmax.f32 %v4697_v56, %v1418_v15  ;;  %v4700_v5 = vmax.f32 %v4028_v41, 0.0  ;;  %v1007_v17 = vmax.f32 %v4702_v44, 0.0  ;;  %v1391_v37 = vadd.f32 %v1367_v63, %v3998_v10  ;;  %v1625_v15 = vpop.f32.mrf.mxu1 }
 0x1ff   : > { %v4258_v40 = vmax.f32 %v4699_v18, %v1417_v16  ;;  %v1006_v29 = vmax.f32 %v4167_v27, 0.0  ;;  %v4269_v39 = vmax.f32 %v1005_v24, %v1419_v45  ;;  %v1421_v52 = vmax.f32 %v1397_v6, 0.0 }
 0x200   : > { %4698 = vst [vmem:[#allocation12_spill] sm:$0xff] %v4253_v7  ;;  %v4264_v11 = vmax.f32 %v4700_v5, %v1412_v28  ;;  %v1420_v23 = vmax.f32 %v1396_v9, 0.0  ;;  %v1001_v4 = vmax.f32 %v4075_v22, 0.0  ;;  %v1415_v59 = vmax.f32 %v1391_v37, 0.0  ;;  %v1629_v41 = vpop.f32.mrf.mxu1 }
 0x201   : > { %v4272_v16 = vmax.f32 %v1007_v17, %v1421_v52 }
 0x202   : > { %4701 = vst [vmem:[#allocation2_spill] sm:$0xff] %v4264_v11  ;;  %v4274_v33 = vmax.f32 %v1006_v29, %v1420_v23  ;;  %v4276_v48 = vmax.f32 %v1001_v4, %v1415_v59  ;;  %v1631_v42 = vpop.f32.mrf.mxu1 }
 0x203   : > { %4703 = vst [vmem:[#allocation3_spill] sm:$0xff] %v4272_v16 }
 0x204   : > { %4704 = vst [vmem:[#allocation8_spill] sm:$0xff] %v4276_v48  ;;  %v1633_v56 = vpop.f32.mrf.mxu1 }
 0x206   : > { %v1635_v28 = vpop.f32.mrf.mxu1 }
 0x208   : > { %v1639_v63 = vpop.f32.mrf.mxu1 }
 0x20a   : > { %v4278_v27 = vpop.f32.mrf.mxu1 }
 0x20c   : > { %v4280_v24 = vpop.f32.mrf.mxu1 }
 0x20e   : > { %v4282_v18 = vpop.f32.mrf.mxu1 }
 0x210   : > { %v4284_v45 = vpop.f32.mrf.mxu1 }
 0x212   : > { %v4286_v22 = vpop.f32.mrf.mxu1 }
 0x214   : > { %v4288_v6 = vpop.f32.mrf.mxu1 }
 0x215   : > { %v1546_v5 = vpop.f32.mrf.mxu0 }
 0x216   : > { %v4290_v9 = vpop.f32.mrf.mxu1  ;;  %v1620_v44 = vadd.f32 %v1619_v53, %v1546_v5 }
 0x217   : > { %v1548_v37 = vpop.f32.mrf.mxu0 }
 0x218   : > { %v4292_v17 = vpop.f32.mrf.mxu1  ;;  %v1788_v29 = vmul.f32 %v1620_v44, %v3858_v50  ;;  %v1622_v52 = vadd.f32 %v1621_v0, %v1548_v37 }
 0x219   : > { %v1550_v4 = vpop.f32.mrf.mxu0 }
 0x21a   : > { %v4295_v23 = vpop.f32.mrf.mxu1  ;;  %v1812_v59 = vadd.f32 %v1788_v29, %v3917_v31  ;;  %v1789_v48 = vmul.f32 %v1622_v52, %v3858_v50  ;;  %v1624_v16 = vadd.f32 %v1623_v14, %v1550_v4 }
 0x21b   : > { %v1552_v7 = vpop.f32.mrf.mxu0 }
 0x21c   : > { %v4299_v11 = vpop.f32.mrf.mxu1  ;;  %v1836_v19 = vmax.f32 %v1812_v59, 0.0  ;;  %v1813_v53 = vadd.f32 %v1789_v48, %v3917_v31  ;;  %v1791_v5 = vmul.f32 %v1624_v16, %v3838_v36  ;;  %v1626_v30 = vadd.f32 %v1625_v15, %v1552_v7 }
 0x21d   : > { %v1556_v0 = vpop.f32.mrf.mxu0 }
 0x21e   : > { %v4303_v3 = vpop.f32.mrf.mxu1  ;;  %v4306_v44 = vmax.f32 %v4092_v46, %v1836_v19  ;;  %v1837_v37 = vmax.f32 %v1813_v53, 0.0  ;;  %v1815_v29 = vadd.f32 %v1791_v5, %v3929_v38  ;;  %v1792_v14 = vmul.f32 %v1626_v30, %v3838_v36 }
 0x21f   : > { %v1630_v52 = vadd.f32 %v1629_v41, %v1556_v0  ;;  %v1558_v4 = vpop.f32.mrf.mxu0 }
 0x220   : > { %v2677_v25 = vpop.f32.mrf.mxu1  ;;  %v4311_v59 = vmax.f32 %v4105_v20, %v1837_v37  ;;  %v1839_v48 = vmax.f32 %v1815_v29, 0.0  ;;  %v1816_v7 = vadd.f32 %v1792_v14, %v3929_v38  ;;  %v1632_v15 = vadd.f32 %v1631_v42, %v1558_v4 }
 0x221   : > { %v1794_v16 = vmul.f32 %v1630_v52, %v3860_v51  ;;  %v1560_v31 = vpop.f32.mrf.mxu0 }
 0x222   : > { %v2678_v46 = vpop.f32.mrf.mxu1  ;;  %v4316_v19 = vmax.f32 %v4116_v62, %v1839_v48  ;;  %v1840_v53 = vmax.f32 %v1816_v7, 0.0  ;;  %v1795_v30 = vmul.f32 %v1632_v15, %v3860_v51  ;;  %v1634_v41 = vadd.f32 %v1633_v56, %v1560_v31  ;;  %v4706_v15 = vld [vmem:[#allocation18_spill] sm:$0xff] }
 0x223   : > { %v1818_v5 = vadd.f32 %v1794_v16, %v3931_v21  ;;  %v1562_v0 = vpop.f32.mrf.mxu0 }
 0x224   : > { %4705 = vst [vmem:[#allocation4_spill] sm:$0xff] %v4316_v19  ;;  %v2680_v20 = vpop.f32.mrf.mxu1  ;;  %v4321_v37 = vmax.f32 %v4130_v32, %v1840_v53  ;;  %v1819_v42 = vadd.f32 %v1795_v30, %v3931_v21  ;;  %v1797_v29 = vmul.f32 %v1634_v41, %v3881_v49  ;;  %v1636_v14 = vadd.f32 %v1635_v28, %v1562_v0 }
 0x225   : > { %v1842_v52 = vmax.f32 %v1818_v5, 0.0  ;;  %v1566_v4 = vpop.f32.mrf.mxu0 }
 0x226   : > { %v2681_v62 = vpop.f32.mrf.mxu1  ;;  %v1843_v48 = vmax.f32 %v1819_v42, 0.0  ;;  %v1821_v7 = vadd.f32 %v1797_v29, %v3949_v8  ;;  %v1798_v31 = vmul.f32 %v1636_v14, %v3881_v49  ;;  %v1640_v56 = vadd.f32 %v1639_v63, %v1566_v4 }
 0x227   : > { %v4328_v16 = vmax.f32 %v4706_v15, %v1842_v52  ;;  %v1568_v19 = vpop.f32.mrf.mxu0 }
 0x228   : > { %v4330_v32 = vpop.f32.mrf.mxu1  ;;  %v4333_v53 = vmax.f32 %v4153_v47, %v1843_v48  ;;  %v1845_v30 = vmax.f32 %v1821_v7, 0.0  ;;  %v1822_v28 = vadd.f32 %v1798_v31, %v3949_v8  ;;  %v1800_v41 = vmul.f32 %v1640_v56, %v3883_v26 }
 0x229   : > { %v1642_v5 = vadd.f32 %v4278_v27, %v1568_v19  ;;  %v1570_v0 = vpop.f32.mrf.mxu0 }
 0x22a   : > { %v4338_v42 = vpop.f32.mrf.mxu1  ;;  %v4341_v63 = vmax.f32 %v4171_v57, %v1845_v30  ;;  %v1846_v29 = vmax.f32 %v1822_v28, 0.0  ;;  %v1824_v14 = vadd.f32 %v1800_v41, %v3953_v13  ;;  %v1644_v52 = vadd.f32 %v4280_v24, %v1570_v0 }
 0x22b   : > { %v1801_v47 = vmul.f32 %v1642_v5, %v3883_v26  ;;  %v1572_v4 = vpop.f32.mrf.mxu0 }
 0x22c   : > { %v4346_v48 = vpop.f32.mrf.mxu1  ;;  %v4349_v7 = vmax.f32 %v4177_v34, %v1846_v29  ;;  %v1848_v27 = vmax.f32 %v1824_v14, 0.0  ;;  %v1803_v19 = vmul.f32 %v1644_v52, %v3900_v58  ;;  %v1646_v31 = vadd.f32 %v4282_v18, %v1572_v4 }
 0x22d   : > { %v1825_v57 = vadd.f32 %v1801_v47, %v3953_v13  ;;  %v1576_v56 = vpop.f32.mrf.mxu0 }
 0x22e   : > { %v4354_v15 = vpop.f32.mrf.mxu1  ;;  %v4357_v24 = vmax.f32 %v4187_v54, %v1848_v27  ;;  %v1827_v30 = vadd.f32 %v1803_v19, %v3998_v10  ;;  %v1804_v28 = vmul.f32 %v1646_v31, %v3900_v58  ;;  %v1650_v34 = vadd.f32 %v4284_v45, %v1576_v56 }
 0x22f   : > { %v1849_v41 = vmax.f32 %v1825_v57, 0.0  ;;  %v1578_v5 = vpop.f32.mrf.mxu0  ;;  %v2679_v54 = vadd.f32 %v2678_v46, %v2677_v25  ;;  %v2682_v46 = vadd.f32 %v2681_v62, %v2680_v20 }
 0x230   : > { %v2689_v0 = vpop.f32.mrf.mxu1  ;;  %v1851_v29 = vmax.f32 %v1827_v30, 0.0  ;;  %v1828_v18 = vadd.f32 %v1804_v28, %v3998_v10  ;;  %v1806_v14 = vmul.f32 %v1650_v34, %v3902_v61  ;;  %v1652_v52 = vadd.f32 %v4286_v22, %v1578_v5 }
 0x231   : > { %v4366_v47 = vmax.f32 %v4202_v12, %v1849_v41  ;;  %v1580_v4 = vpop.f32.mrf.mxu0 }
 0x232   : > { %v4369_v27 = vmax.f32 %v4215_v43, %v1851_v29  ;;  %v1852_v19 = vmax.f32 %v1828_v18, 0.0  ;;  %v1830_v45 = vadd.f32 %v1806_v14, %v4001_v35  ;;  %v1807_v31 = vmul.f32 %v1652_v52, %v3902_v61  ;;  %v2690_v57 = vpop.f32.mrf.mxu1 }
 0x233   : > { %v1654_v56 = vadd.f32 %v4288_v6, %v1580_v4  ;;  %v1582_v30 = vpop.f32.mrf.mxu0  ;;  %v2673_v43 = vadd.f32 %v4295_v23, %v4292_v17 }
 0x234   : > { %v4375_v28 = vmax.f32 %v4227_v2, %v1852_v19  ;;  %v1854_v22 = vmax.f32 %v1830_v45, 0.0  ;;  %v1831_v12 = vadd.f32 %v1807_v31, %v4001_v35  ;;  %v1656_v25 = vadd.f32 %v4290_v9, %v1582_v30  ;;  %v2692_v18 = vpop.f32.mrf.mxu1 }
 0x235   : > { %v1809_v34 = vmul.f32 %v1654_v56, %v3915_v60  ;;  %v2777_v41 = vpop.f32.mrf.mxu0  ;;  %v2676_v30 = vadd.f32 %v4303_v3, %v4299_v11 }
 0x236   : > { %v4383_v5 = vmax.f32 %v4243_v55, %v1854_v22  ;;  %v1855_v6 = vmax.f32 %v1831_v12, 0.0  ;;  %v1810_v29 = vmul.f32 %v1656_v25, %v3915_v60  ;;  %v1766_v2 = vadd.f32 %v2777_v41, %v2679_v54  ;;  %v2693_v56 = vpop.f32.mrf.mxu1 }
 0x237   : > { %v1833_v14 = vadd.f32 %v1809_v34, %v4043_v1  ;;  %v1757_v52 = vpop.f32.mrf.mxu0  ;;  %v2691_v55 = vadd.f32 %v2690_v57, %v2689_v0  ;;  %v2685_v22 = vadd.f32 %v4338_v42, %v4330_v32  ;;  %v4707_v57 = vld [vmem:[#allocation10_spill] sm:$0xff]  ;;  %v2688_v32 = vadd.f32 %v4354_v15, %v4346_v48 }
 0x238   : > { %v4388_v9 = vmax.f32 %v4258_v40, %v1855_v6  ;;  %v1834_v17 = vadd.f32 %v1810_v29, %v4043_v1  ;;  %v1796_v23 = vmul.f32 %v1766_v2, %v3860_v51  ;;  %v1758_v20 = vadd.f32 %v2673_v43, %v1757_v52  ;;  %v4708_v29 = vld [vmem:[#allocation19_spill] sm:$0xff] }
 0x239   : > { %v1857_v62 = vmax.f32 %v1833_v14, 0.0  ;;  %v2778_v4 = vpop.f32.mrf.mxu0  ;;  %v2694_v6 = vadd.f32 %v2693_v56, %v2692_v18  ;;  %v4709_v14 = vld [vmem:[#allocation20_spill] sm:$0xff] }
 0x23a   : > { %v1858_v19 = vmax.f32 %v1834_v17, 0.0  ;;  %v1820_v45 = vadd.f32 %v1796_v23, %v3931_v21  ;;  %v1790_v54 = vmul.f32 %v1758_v20, %v3858_v50  ;;  %v1769_v31 = vadd.f32 %v2778_v4, %v2682_v46  ;;  %v4710_v4 = vld [vmem:[#allocation13_spill] sm:$0xff] }
 0x23b   : > { %v4397_v40 = vmax.f32 %v4269_v39, %v1857_v62  ;;  %v1760_v12 = vpop.f32.mrf.mxu0 }
 0x23c   : > { %v4402_v25 = vmax.f32 %v4274_v33, %v1858_v19  ;;  %v1844_v0 = vmax.f32 %v1820_v45, 0.0  ;;  %v1814_v43 = vadd.f32 %v1790_v54, %v4707_v57  ;;  %v1799_v34 = vmul.f32 %v1769_v31, %v3881_v49 }
 0x23d   : > { %v1761_v46 = vadd.f32 %v2676_v30, %v1760_v12  ;;  %v2781_v41 = vpop.f32.mrf.mxu0 }
 0x23e   : > { %v4407_v3 = vmax.f32 %v4708_v29, %v1844_v0  ;;  %v1838_v11 = vmax.f32 %v1814_v43, 0.0  ;;  %v1823_v39 = vadd.f32 %v1799_v34, %v3949_v8  ;;  %v1782_v2 = vadd.f32 %v2781_v41, %v2691_v55  ;;  %v4712_v34 = vld [vmem:[#allocation12_spill] sm:$0xff] }
 0x23f   : > { %v1793_v33 = vmul.f32 %v1761_v46, %v3838_v36  ;;  %v1773_v42 = vpop.f32.mrf.mxu0 }
 0x240   : > { %v4414_v52 = vmax.f32 %v4709_v14, %v1838_v11  ;;  %v1847_v17 = vmax.f32 %v1823_v39, 0.0  ;;  %v1808_v23 = vmul.f32 %v1782_v2, %v3902_v61  ;;  %v1774_v18 = vadd.f32 %v2685_v22, %v1773_v42  ;;  %v4711_v22 = vld [vmem:[#allocation15_spill] sm:$0xff]  ;;  %v4714_v39 = vld [vmem:[#allocation2_spill] sm:$0xff] }
 0x241   : > { %v1817_v20 = vadd.f32 %v1793_v33, %v3929_v38  ;;  %v2782_v62 = vpop.f32.mrf.mxu0  ;;  %v4716_v14 = vld [vmem:[#allocation3_spill] sm:$0xff] }
 0x242   : > { %v4419_v19 = vmax.f32 %v4710_v4, %v1847_v17  ;;  %v1832_v55 = vadd.f32 %v1808_v23, %v4001_v35  ;;  %v1802_v48 = vmul.f32 %v1774_v18, %v3883_v26  ;;  %v1785_v15 = vadd.f32 %v2782_v62, %v2694_v6 }
 0x243   : > { %v1841_v45 = vmax.f32 %v1817_v20, 0.0  ;;  %v1776_v54 = vpop.f32.mrf.mxu0  ;;  %v4718_v20 = vld [vmem:[#allocation8_spill] sm:$0xff] }
 0x244   : > { %v1856_v31 = vmax.f32 %v1832_v55, 0.0  ;;  %v1826_v56 = vadd.f32 %v1802_v48, %v3953_v13  ;;  %v1811_v30 = vmul.f32 %v1785_v15, %v3915_v60  ;;  %v1777_v12 = vadd.f32 %v2688_v32, %v1776_v54 }
 0x245   : > { %v4426_v0 = vmax.f32 %v4711_v22, %v1841_v45  ;;  %v2013_v43 = vpop.f32.mrf.mxu0 }
 0x246   : > { %v4429_v46 = vmax.f32 %v4712_v34, %v1856_v31  ;;  %v1850_v41 = vmax.f32 %v1826_v56, 0.0  ;;  %v1835_v29 = vadd.f32 %v1811_v30, %v4043_v1  ;;  %v1805_v6 = vmul.f32 %v1777_v12, %v3900_v58 }
 0x247   : > { %v2015_v11 = vpop.f32.mrf.mxu0 }
 0x248   : > { %4713 = vst [vmem:[#allocation5_spill] sm:$0xff] %v4429_v46  ;;  %v4434_v2 = vmax.f32 %v4714_v39, %v1850_v41  ;;  %v1859_v33 = vmax.f32 %v1835_v29, 0.0  ;;  %v1829_v42 = vadd.f32 %v1805_v6, %v3998_v10 }
 0x249   : > { %v2017_v32 = vpop.f32.mrf.mxu0 }
 0x24a   : > { %4715 = vst [vmem:[#allocation9_spill] sm:$0xff] %v4434_v2  ;;  %v4438_v17 = vmax.f32 %v4716_v14, %v1859_v33  ;;  %v1853_v23 = vmax.f32 %v1829_v42, 0.0 }
 0x24b   : > { %v2019_v18 = vpop.f32.mrf.mxu0 }
 0x24c   : > { %4717 = vst [vmem:[#allocation6_spill] sm:$0xff] %v4438_v17  ;;  %v4441_v62 = vmax.f32 %v4718_v20, %v1853_v23 }
 0x24d   : > { %v2023_v4 = vpop.f32.mrf.mxu0 }
 0x24e   : > { %4719 = vst [vmem:[#allocation7_spill] sm:$0xff] %v4441_v62 }
 0x24f   : > { %v2025_v55 = vpop.f32.mrf.mxu0 }
 0x251   : > { %v2027_v48 = vpop.f32.mrf.mxu0 }
 0x253   : > { %v2029_v15 = vpop.f32.mrf.mxu0 }
 0x255   : > { %v2033_v45 = vpop.f32.mrf.mxu0 }
 0x257   : > { %v1940_v54 = vpop.f32.mrf.mxu1  ;;  %v4443_v31 = vpop.f32.mrf.mxu0 }
 0x258   : > { %v2014_v56 = vadd.f32 %v2013_v43, %v1940_v54 }
 0x259   : > { %v1942_v30 = vpop.f32.mrf.mxu1  ;;  %v4445_v12 = vpop.f32.mrf.mxu0 }
 0x25a   : > { %v2182_v22 = vmul.f32 %v2014_v56, %v3858_v50  ;;  %v2016_v34 = vadd.f32 %v2015_v11, %v1942_v30 }
 0x25b   : > { %v1944_v41 = vpop.f32.mrf.mxu1  ;;  %v4448_v29 = vpop.f32.mrf.mxu0 }
 0x25c   : > { %v2206_v6 = vadd.f32 %v2182_v22, %v4707_v57  ;;  %v2183_v39 = vmul.f32 %v2016_v34, %v3858_v50  ;;  %v2018_v33 = vadd.f32 %v2017_v32, %v1944_v41 }
 0x25d   : > { %v1946_v42 = vpop.f32.mrf.mxu1  ;;  %v4452_v14 = vpop.f32.mrf.mxu0 }
 0x25e   : > { %v2230_v23 = vmax.f32 %v2206_v6, 0.0  ;;  %v2207_v43 = vadd.f32 %v2183_v39, %v4707_v57  ;;  %v2185_v20 = vmul.f32 %v2018_v33, %v3838_v36  ;;  %v2020_v54 = vadd.f32 %v2019_v18, %v1946_v42 }
 0x25f   : > { %v1950_v56 = vpop.f32.mrf.mxu1  ;;  %v4457_v11 = vpop.f32.mrf.mxu0 }
 0x260   : > { %v2231_v30 = vmax.f32 %v2207_v43, 0.0  ;;  %v2209_v17 = vadd.f32 %v2185_v20, %v3929_v38  ;;  %v2186_v22 = vmul.f32 %v2020_v54, %v3838_v36  ;;  %v2254_v32 = vmax.f32 %v4306_v44, %v2230_v23 }
 0x261   : > { %v2024_v34 = vadd.f32 %v2023_v4, %v1950_v56  ;;  %v1952_v41 = vpop.f32.mrf.mxu1  ;;  %v4462_v62 = vpop.f32.mrf.mxu0  ;;  %v4720_v56 = vld [vmem:[#allocation4_spill] sm:$0xff] }
 0x262   : > { %v2255_v6 = vmax.f32 %v4311_v59, %v2231_v30  ;;  %v2233_v39 = vmax.f32 %v2209_v17, 0.0  ;;  %v2210_v18 = vadd.f32 %v2186_v22, %v3929_v38  ;;  %v2026_v33 = vadd.f32 %v2025_v55, %v1952_v41 }
 0x263   : > { %v2188_v42 = vmul.f32 %v2024_v34, %v3860_v51  ;;  %v1954_v43 = vpop.f32.mrf.mxu1  ;;  %v4472_v44 = vpop.f32.mrf.mxu0 }
 0x264   : > { %v2547_v4 = vpack.c.bf16 %v2255_v6, %v2254_v32  ;;  %v2234_v23 = vmax.f32 %v2210_v18, 0.0  ;;  %v2189_v20 = vmul.f32 %v2026_v33, %v3860_v51  ;;  %v2028_v17 = vadd.f32 %v2027_v48, %v1954_v43 }
 0x265   : > { %v2212_v59 = vadd.f32 %v2188_v42, %v3931_v21  ;;  %v1956_v54 = vpop.f32.mrf.mxu1  ;;  %v4476_v55 = vpop.f32.mrf.mxu0  ;;  %v2257_v30 = vmax.f32 %v4720_v56, %v2233_v39 }
 0x266   : > { %2358 = vst [vmem:[%s4469_s22] sm:$0xff] %v2547_v4  ;;  %v2258_v22 = vmax.f32 %v4321_v37, %v2234_v23  ;;  %v2213_v34 = vadd.f32 %v2189_v20, %v3931_v21  ;;  %v2030_v41 = vadd.f32 %v2029_v15, %v1956_v54  ;;  %v2191_v32 = vmul.f32 %v2028_v17, %v3881_v49 }
 0x267   : > { %v2236_v46 = vmax.f32 %v2212_v59, 0.0  ;;  %v1960_v6 = vpop.f32.mrf.mxu1  ;;  %v2718_v18 = vpop.f32.mrf.mxu0 }
 0x268   : > { %v2549_v33 = vpack.c.bf16 %v2258_v22, %v2257_v30  ;;  %v2237_v42 = vmax.f32 %v2213_v34, 0.0  ;;  %v2192_v48 = vmul.f32 %v2030_v41, %v3881_v49  ;;  %v2034_v43 = vadd.f32 %v2033_v45, %v1960_v6 }
 0x269   : > { %v2260_v4 = vmax.f32 %v4328_v16, %v2236_v46  ;;  %v2215_v39 = vadd.f32 %v2191_v32, %v3949_v8  ;;  %v1962_v56 = vpop.f32.mrf.mxu1  ;;  %v4486_v2 = vpop.f32.mrf.mxu0 }
 0x26a   : > { %2361 = vst [vmem:[%s4469_s22 + $0xc] sm:$0xff] %v2549_v33  ;;  %v2261_v37 = vmax.f32 %v4333_v53, %v2237_v42  ;;  %v2216_v15 = vadd.f32 %v2192_v48, %v3949_v8  ;;  %v2194_v23 = vmul.f32 %v2034_v43, %v3883_v26  ;;  %v2036_v20 = vadd.f32 %v4443_v31, %v1962_v56 }
 0x26b   : > { %v2239_v59 = vmax.f32 %v2215_v39, 0.0  ;;  %v1964_v17 = vpop.f32.mrf.mxu1  ;;  %v4493_v45 = vpop.f32.mrf.mxu0 }
 0x26c   : > { %v2551_v16 = vpack.c.bf16 %v2261_v37, %v2260_v4  ;;  %v2240_v46 = vmax.f32 %v2216_v15, 0.0  ;;  %v2218_v54 = vadd.f32 %v2194_v23, %v3953_v13  ;;  %v2195_v30 = vmul.f32 %v2036_v20, %v3883_v26 }
 0x26d   : > { %v2263_v22 = vmax.f32 %v4341_v63, %v2239_v59  ;;  %v2038_v53 = vadd.f32 %v4445_v12, %v1964_v17  ;;  %v1966_v34 = vpop.f32.mrf.mxu1  ;;  %v2723_v41 = vpop.f32.mrf.mxu0 }
 0x26e   : > { %2363 = vst [vmem:[%s4469_s22 + $0x18] sm:$0xff] %v2551_v16  ;;  %v2264_v31 = vmax.f32 %v4349_v7, %v2240_v46  ;;  %v2242_v32 = vmax.f32 %v2218_v54, 0.0  ;;  %v2219_v6 = vadd.f32 %v2195_v30, %v3953_v13  ;;  %v2040_v33 = vadd.f32 %v4448_v29, %v1966_v34 }
 0x26f   : > { %v2197_v42 = vmul.f32 %v2038_v53, %v3900_v58  ;;  %v1970_v48 = vpop.f32.mrf.mxu1  ;;  %v2724_v43 = vpop.f32.mrf.mxu0 }
 0x270   : > { %v2553_v4 = vpack.c.bf16 %v2264_v31, %v2263_v22  ;;  %v2243_v39 = vmax.f32 %v2219_v6, 0.0  ;;  %v2198_v63 = vmul.f32 %v2040_v33, %v3900_v58  ;;  %v2044_v56 = vadd.f32 %v4452_v14, %v1970_v48 }
 0x271   : > { %v2221_v12 = vadd.f32 %v2197_v42, %v3998_v10  ;;  %v1972_v37 = vpop.f32.mrf.mxu1  ;;  %v2726_v15 = vpop.f32.mrf.mxu0  ;;  %v2266_v7 = vmax.f32 %v4357_v24, %v2242_v32  ;;  %v2719_v33 = vadd.f32 %v2718_v18, %v4476_v55 }
 0x272   : > { %2365 = vst [vmem:[%s4469_s22 + $0x24] sm:$0xff] %v2553_v4  ;;  %v2267_v29 = vmax.f32 %v4366_v47, %v2243_v39  ;;  %v2222_v23 = vadd.f32 %v2198_v63, %v3998_v10  ;;  %v2046_v20 = vadd.f32 %v4457_v11, %v1972_v37  ;;  %v2200_v17 = vmul.f32 %v2044_v56, %v3902_v61 }
 0x273   : > { %v2245_v59 = vmax.f32 %v2221_v12, 0.0  ;;  %v1974_v16 = vpop.f32.mrf.mxu1  ;;  %v2727_v46 = vpop.f32.mrf.mxu0 }
 0x274   : > { %v2555_v54 = vpack.c.bf16 %v2267_v29, %v2266_v7  ;;  %v2246_v30 = vmax.f32 %v2222_v23, 0.0  ;;  %v2201_v14 = vmul.f32 %v2046_v20, %v3902_v61  ;;  %v2048_v22 = vadd.f32 %v4462_v62, %v1974_v16 }
 0x275   : > { %v2269_v24 = vmax.f32 %v4369_v27, %v2245_v59  ;;  %v2224_v53 = vadd.f32 %v2200_v17, %v4001_v35  ;;  %v1976_v47 = vpop.f32.mrf.mxu1  ;;  %v2729_v34 = vpop.f32.mrf.mxu0  ;;  %v2725_v62 = vadd.f32 %v2724_v43, %v2723_v41  ;;  %v2728_v43 = vadd.f32 %v2727_v46, %v2726_v15 }
 0x276   : > { %2367 = vst [vmem:[%s4469_s22 + $0x30] sm:$0xff] %v2555_v54  ;;  %v2270_v11 = vmax.f32 %v4375_v28, %v2246_v30  ;;  %v2225_v31 = vadd.f32 %v2201_v14, %v4001_v35  ;;  %v2203_v32 = vmul.f32 %v2048_v22, %v3915_v60  ;;  %v2050_v6 = vadd.f32 %v4472_v44, %v1976_v47 }
 0x277   : > { %v2248_v42 = vmax.f32 %v2224_v53, 0.0  ;;  %v2789_v48 = vpop.f32.mrf.mxu1  ;;  %v2730_v27 = vpop.f32.mrf.mxu0  ;;  %v2722_v59 = vadd.f32 %v4493_v45, %v4486_v2 }
 0x278   : > { %v2557_v4 = vpack.c.bf16 %v2270_v11, %v2269_v24  ;;  %v2249_v39 = vmax.f32 %v2225_v31, 0.0  ;;  %v2227_v63 = vadd.f32 %v2203_v32, %v4043_v1  ;;  %v2204_v12 = vmul.f32 %v2050_v6, %v3915_v60 }
 0x279   : > { %v2272_v28 = vmax.f32 %v4383_v5, %v2248_v42  ;;  %v2160_v56 = vadd.f32 %v2789_v48, %v2725_v62  ;;  %v2151_v37 = vpop.f32.mrf.mxu1  ;;  %v2732_v7 = vpop.f32.mrf.mxu0  ;;  %v2731_v2 = vadd.f32 %v2730_v27, %v2729_v34 }
 0x27a   : > { %2369 = vst [vmem:[%s4469_s22 + $0x3c] sm:$0xff] %v2557_v4  ;;  %v2273_v44 = vmax.f32 %v4388_v9, %v2249_v39  ;;  %v2251_v55 = vmax.f32 %v2227_v63, 0.0  ;;  %v2228_v18 = vadd.f32 %v2204_v12, %v4043_v1  ;;  %v2152_v41 = vadd.f32 %v2719_v33, %v2151_v37 }
 0x27b   : > { %v2190_v29 = vmul.f32 %v2160_v56, %v3860_v51  ;;  %v2790_v23 = vpop.f32.mrf.mxu1  ;;  %v2733_v20 = vpop.f32.mrf.mxu0 }
 0x27c   : > { %v2559_v5 = vpack.c.bf16 %v2273_v44, %v2272_v28  ;;  %v2252_v17 = vmax.f32 %v2228_v18, 0.0  ;;  %v2184_v16 = vmul.f32 %v2152_v41, %v3858_v50  ;;  %v2163_v9 = vadd.f32 %v2790_v23, %v2728_v43 }
 0x27d   : > { %v2214_v54 = vadd.f32 %v2190_v29, %v3931_v21  ;;  %v2154_v30 = vpop.f32.mrf.mxu1  ;;  %v2735_v14 = vpop.f32.mrf.mxu0  ;;  %v2275_v22 = vmax.f32 %v4397_v40, %v2251_v55 }
 0x27e   : > { %2371 = vst [vmem:[%s4469_s22 + $0x48] sm:$0xff] %v2559_v5  ;;  %v2276_v15 = vmax.f32 %v4402_v25, %v2252_v17  ;;  %v2208_v51 = vadd.f32 %v2184_v16, %v4707_v57  ;;  %v2155_v46 = vadd.f32 %v2722_v59, %v2154_v30  ;;  %v2193_v45 = vmul.f32 %v2163_v9, %v3881_v49  ;;  %v4724_v17 = vld [vmem:[#allocation6_spill] sm:$0xff] }
 0x27f   : > { %v2238_v24 = vmax.f32 %v2214_v54, 0.0  ;;  %v2793_v53 = vpop.f32.mrf.mxu1  ;;  %v2736_v50 = vpop.f32.mrf.mxu0 }
 0x280   : > { %v2561_v47 = vpack.c.bf16 %v2276_v15, %v2275_v22  ;;  %v2232_v21 = vmax.f32 %v2208_v51, 0.0  ;;  %v2187_v11 = vmul.f32 %v2155_v46, %v3838_v36  ;;  %v2737_v31 = vadd.f32 %v2736_v50, %v2735_v14 }
 0x281   : > { %v2262_v32 = vmax.f32 %v4407_v3, %v2238_v24  ;;  %v2217_v40 = vadd.f32 %v2193_v45, %v3949_v8  ;;  %v2167_v25 = vpop.f32.mrf.mxu1  ;;  %v2738_v57 = vpop.f32.mrf.mxu0  ;;  %v2734_v36 = vadd.f32 %v2733_v20, %v2732_v7 }
 0x282   : > { %2373 = vst [vmem:[%s4469_s22 + $0x54] sm:$0xff] %v2561_v47  ;;  %v2256_v34 = vmax.f32 %v4414_v52, %v2232_v21  ;;  %v2211_v49 = vadd.f32 %v2187_v11, %v3929_v38  ;;  %v2168_v6 = vadd.f32 %v2731_v2, %v2167_v25  ;;  %v2176_v33 = vadd.f32 %v2793_v53, %v2737_v31 }
 0x283   : > { %v2552_v42 = vpack.c.bf16 %v2262_v32, %v2262_v32  ;;  %v2241_v62 = vmax.f32 %v2217_v40, 0.0  ;;  %v2794_v48 = vpop.f32.mrf.mxu1  ;;  %v2739_v27 = vpop.f32.mrf.mxu0 }
 0x284   : > { %v2548_v3 = vpack.c.bf16 %v2256_v34, %v2256_v34  ;;  %v2235_v4 = vmax.f32 %v2211_v49, 0.0  ;;  %v2196_v8 = vmul.f32 %v2168_v6, %v3883_v26  ;;  %v2202_v39 = vmul.f32 %v2176_v33, %v3902_v61 }
 0x285   : > { %2364 = vst.msk [vmem:[%s4469_s22 + $0x20] sm:$0xf] %vm2359_vm4, %v2552_v42  ;;  %v2265_v52 = vmax.f32 %v4419_v19, %v2241_v62  ;;  %v2170_v38 = vpop.f32.mrf.mxu1  ;;  %v2740_v63 = vadd.f32 %v2739_v27, %v2738_v57 }
 0x286   : > { %2360 = vst.msk [vmem:[%s4469_s22 + $0x8] sm:$0xf] %vm2359_vm4, %v2548_v3  ;;  %v2259_v12 = vmax.f32 %v4426_v0, %v2235_v4  ;;  %v2220_v28 = vadd.f32 %v2196_v8, %v3953_v13  ;;  %v2226_v56 = vadd.f32 %v2202_v39, %v4001_v35  ;;  %v2171_v37 = vadd.f32 %v2734_v36, %v2170_v38  ;;  %v4721_v13 = vld [vmem:[#allocation9_spill] sm:$0xff] }
 0x287   : > { %v2554_v26 = vpack.c.bf16 %v2265_v52, %v2265_v52  ;;  %v2179_v7 = vadd.f32 %v2794_v48, %v2740_v63  ;;  %v4722_v0 = vld [vmem:[#allocation5_spill] sm:$0xff] }
 0x288   : > { %v2550_v61 = vpack.c.bf16 %v2259_v12, %v2259_v12  ;;  %v2244_v44 = vmax.f32 %v2220_v28, 0.0  ;;  %v2250_v55 = vmax.f32 %v2226_v56, 0.0  ;;  %v2199_v19 = vmul.f32 %v2171_v37, %v3900_v58 }
 0x289   : > { %2366 = vst.msk [vmem:[%s4469_s22 + $0x2c] sm:$0xf] %vm2359_vm4, %v2554_v26  ;;  %v2205_v18 = vmul.f32 %v2179_v7, %v3915_v60  ;;  %v4723_v60 = vld [vmem:[#allocation7_spill] sm:$0xff] }
 0x28a   : > { %2362 = vst.msk [vmem:[%s4469_s22 + $0x14] sm:$0xf] %vm2359_vm4, %v2550_v61  ;;  %v2268_v35 = vmax.f32 %v4721_v13, %v2244_v44  ;;  %v2274_v41 = vmax.f32 %v4722_v0, %v2250_v55  ;;  %v2223_v43 = vadd.f32 %v2199_v19, %v3998_v10 }
 0x28b   : > { %v2229_v29 = vadd.f32 %v2205_v18, %v4043_v1 }
 0x28c   : > { %v2556_v23 = vpack.c.bf16 %v2268_v35, %v2268_v35  ;;  %v2560_v20 = vpack.c.bf16 %v2274_v41, %v2274_v41  ;;  %v2247_v59 = vmax.f32 %v2223_v43, 0.0 }
 0x28d   : > { %v2253_v58 = vmax.f32 %v2229_v29, 0.0 }
 0x28e   : > { %2368 = vst.msk [vmem:[%s4469_s22 + $0x38] sm:$0xf] %vm2359_vm4, %v2556_v23  ;;  %2372 = vst.msk [vmem:[%s4469_s22 + $0x50] sm:$0xf] %vm2359_vm4, %v2560_v20  ;;  %v2271_v5 = vmax.f32 %v4723_v60, %v2247_v59 }
 0x28f   : > { %v2277_v16 = vmax.f32 %v4724_v17, %v2253_v58 }
 0x290   : > { %v2558_v54 = vpack.c.bf16 %v2271_v5, %v2271_v5 }
 0x291   : > { %v2562_v9 = vpack.c.bf16 %v2277_v16, %v2277_v16 }
 0x292   : > { %2370 = vst.msk [vmem:[%s4469_s22 + $0x44] sm:$0xf] %vm2359_vm4, %v2558_v54 }
 0x293   : > { %2374 = vst.msk [vmem:[%s4469_s22 + $0x5c] sm:$0xf] %vm2359_vm4, %v2562_v9 }
 0x294 PF: > { %s14_s15 = sadd.s32 1, %s2872_s15  }
 0x295   : > { %p11_p4 = scmp.ge.s32.totalorder %s14_s15, 4  }
 0x297   :  { %13 = sbr.rel (!%p11_p4) target bundleno = 1 (0x1), region = 69 }

// kernel: simple_cnn_forward.5
= control target key start
LH: loop header
LB: loop body
LE: loop exit
PB: predicated region body
PF: predicated region fallthrough
CT: control target
= control target key end

     0   :  { %v2113_v28 = vlaneseq  ;;  %v15399_v36 = vmov 1966171168   ;;  %s18836_s0 = inlined_call_operand.vmem [shape: bf16[2,16384], index: 0, kind: input, shape index: {}]   ;;  %s18837_s1 = inlined_call_operand.vmem [shape: bf16[16384,128], index: 1, kind: input, shape index: {}]   ;;  %s18838_s2 = inlined_call_operand.vmem [shape: f32[1,128], index: 2, kind: input, shape index: {}]   ;;  %s18839_s3 = inlined_call_operand.vmem [shape: bf16[128,10], index: 3, kind: input, shape index: {}]   ;;  %s18840_s4 = inlined_call_operand.vmem [shape: f32[1,10], index: 4, kind: input, shape index: {}]   ;;  %s18841_s5 = inlined_call_operand.hbm [shape: f32[2,10], index: 5, kind: output, shape index: {}]  }
   0x1   :  { %v14329_v0 = vld [vmem:[%s18837_s1 + $0x78] sm:$0xff]   ;;  %v14333_v4 = vld [vmem:[%s18837_s1 + $0x70] sm:$0xff]   ;;  %v14337_v8 = vld [vmem:[%s18837_s1 + $0x68] sm:$0xff]   ;;  %v2111_v37 = vunpack.c.l.s4 %v15399_v36 }
   0x2   :  { %v14330_v1 = vld [vmem:[%s18837_s1 + $0xf8] sm:$0xff]   ;;  %12888 = vmatprep.subr.bf16.mxu0 %v14329_v0  ;;  %v14334_v5 = vld [vmem:[%s18837_s1 + $0xf0] sm:$0xff]   ;;  %v14338_v9 = vld [vmem:[%s18837_s1 + $0xe8] sm:$0xff]   ;;  %v2114_v33 = vshrl.u32 %v2113_v28, 7 }
   0x3   :  { %v14331_v2 = vld [vmem:[%s18837_s1 + $0x38] sm:$0xff]   ;;  %12910 = vmatprep.subr.bf16.mxu1 %v14330_v1  ;;  %v14335_v6 = vld [vmem:[%s18837_s1 + $0x30] sm:$0xff]   ;;  %v14339_v10 = vld [vmem:[%s18837_s1 + $0x28] sm:$0xff]   ;;  %v2112_v40 = vunpack.c.0.s8 %v2111_v37 }
   0x4   :  { %v14332_v3 = vld [vmem:[%s18837_s1 + $0xb8] sm:$0xff]   ;;  %12889 = vmatpush3.bf16.msra.mxu0 %v14331_v2  ;;  %v14336_v7 = vld [vmem:[%s18837_s1 + $0xb0] sm:$0xff]   ;;  %v14340_v11 = vld [vmem:[%s18837_s1 + $0xa8] sm:$0xff]  }
   0x5   :  { %12911 = vmatpush3.bf16.msra.mxu1 %v14332_v3  ;;  %12890 = vmatprep.subr.bf16.mxu0 %v14333_v4  ;;  %v14341_v12 = vld [vmem:[%s18837_s1 + $0x60] sm:$0xff]   ;;  %v14345_v16 = vld [vmem:[%s18837_s1 + $0x58] sm:$0xff]   ;;  %v14349_v20 = vld [vmem:[%s18837_s1 + $0x50] sm:$0xff]   ;;  %v15538_v41 = vsub.s32 %v2112_v40, %v2114_v33 }
   0x6   :  { %12912 = vmatprep.subr.bf16.mxu1 %v14334_v5  ;;  %v14342_v13 = vld [vmem:[%s18837_s1 + $0xe0] sm:$0xff]   ;;  %v14346_v17 = vld [vmem:[%s18837_s1 + $0xd8] sm:$0xff]   ;;  %v14350_v21 = vld [vmem:[%s18837_s1 + $0xd0] sm:$0xff]  }
   0x7   :  { %v14343_v14 = vld [vmem:[%s18837_s1 + $0x20] sm:$0xff]   ;;  %v14347_v18 = vld [vmem:[%s18837_s1 + $0x18] sm:$0xff]   ;;  %v14351_v22 = vld [vmem:[%s18837_s1 + $0x10] sm:$0xff]  }
   0x8   :  { %12891 = vmatpush3.bf16.msra.mxu0 %v14335_v6  ;;  %v14344_v15 = vld [vmem:[%s18837_s1 + $0xa0] sm:$0xff]   ;;  %v14348_v19 = vld [vmem:[%s18837_s1 + $0x98] sm:$0xff]   ;;  %v14352_v23 = vld [vmem:[%s18837_s1 + $0x90] sm:$0xff]  }
   0x9   :  { %12913 = vmatpush3.bf16.msra.mxu1 %v14336_v7  ;;  %12892 = vmatprep.subr.bf16.mxu0 %v14337_v8  ;;  %v14353_v24 = vld [vmem:[%s18837_s1 + $0x48] sm:$0xff]   ;;  %v14357_v29 = vld [vmem:[%s18837_s1 + $0x40] sm:$0xff]   ;;  %v14362_v35 = vld [vmem:[%s18837_s1 + $0x178] sm:$0xff]  }
   0xa   :  { %12914 = vmatprep.subr.bf16.mxu1 %v14338_v9  ;;  %v14354_v25 = vld [vmem:[%s18837_s1 + $0xc8] sm:$0xff]   ;;  %v14358_v30 = vld [vmem:[%s18837_s1 + $0xc0] sm:$0xff]   ;;  %v14363_v38 = vld [vmem:[%s18837_s1 + $0x1f8] sm:$0xff]  }
   0xb   :  { %v14355_v26 = vld [vmem:[%s18837_s1 + $0x8] sm:$0xff]   ;;  %v14359_v31 = vld [vmem:[%s18837_s1] sm:$0xff]   ;;  %v14364_v47 = vld [vmem:[%s18837_s1 + $0x138] sm:$0xff]  }
   0xc   :  { %12893 = vmatpush3.bf16.msra.mxu0 %v14339_v10  ;;  %v14356_v27 = vld [vmem:[%s18837_s1 + $0x88] sm:$0xff]   ;;  %v14360_v32 = vld [vmem:[%s18837_s1 + $0x80] sm:$0xff]   ;;  %v14365_v49 = vld [vmem:[%s18837_s1 + $0x1b8] sm:$0xff]  }
   0xd   :  { %12915 = vmatpush3.bf16.msra.mxu1 %v14340_v11  ;;  %12894 = vmatprep.subr.bf16.mxu0 %v14341_v12  ;;  %v22_v34 = vld [vmem:[%s18836_s0] sm:$0xff]  ;;  %v14366_v52 = vld [vmem:[%s18837_s1 + $0x170] sm:$0xff]   ;;  %v14370_v58 = vld [vmem:[%s18837_s1 + $0x168] sm:$0xff]  }
   0xe   :  { %12916 = vmatprep.subr.bf16.mxu1 %v14342_v13  ;;  %v2109_v39 = vcombine.high %v22_v34, %v22_v34  ;;  %v2116_v42 = vrot.slane %v22_v34, %v15538_v41  ;;  %v14367_v54 = vld [vmem:[%s18837_s1 + $0x1f0] sm:$0xff]   ;;  %v14371_v59 = vld [vmem:[%s18837_s1 + $0x1e8] sm:$0xff]   ;;  %v14374_v62 = vld [vmem:[%s18837_s1 + $0x160] sm:$0xff]  }
   0xf   :  { %v14368_v55 = vld [vmem:[%s18837_s1 + $0x130] sm:$0xff]   ;;  %v14372_v60 = vld [vmem:[%s18837_s1 + $0x128] sm:$0xff]   ;;  %v14375_v63 = vld [vmem:[%s18837_s1 + $0x1e0] sm:$0xff]  }
  0x10   :  { %12895 = vmatpush3.bf16.msra.mxu0 %v14343_v14  ;;  %v15542_v43 = vrot.slane %v2109_v39, %v15538_v41  ;;  %v2124_v44 = vcombine.high %v2116_v42, %v2116_v42  ;;  %v2132_v45 = vrot.slane %v2116_v42, %v15538_v41  ;;  %v14369_v57 = vld [vmem:[%s18837_s1 + $0x1b0] sm:$0xff]   ;;  %v14373_v61 = vld [vmem:[%s18837_s1 + $0x1a8] sm:$0xff]   ;;  %v14376_v0 = vld [vmem:[%s18837_s1 + $0x120] sm:$0xff]  }
  0x11   :  { %12917 = vmatpush3.bf16.msra.mxu1 %v14344_v15  ;;  %12896 = vmatprep.subr.bf16.mxu0 %v14345_v16  ;;  %v14377_v1 = vld [vmem:[%s18837_s1 + $0x1a0] sm:$0xff]   ;;  %v14378_v2 = vld [vmem:[%s18837_s1 + $0x158] sm:$0xff]   ;;  %v14382_v6 = vld [vmem:[%s18837_s1 + $0x150] sm:$0xff]  }
  0x12   :  { %12918 = vmatprep.subr.bf16.mxu1 %v14346_v17  ;;  %v2125_v46 = vcombine.high %v15542_v43, %v15542_v43  ;;  %v2146_v48 = vrot.slane %v2124_v44, %v15538_v41  ;;  %v2154_v51 = vcombine.high %v2132_v45, %v2132_v45  ;;  %v14379_v3 = vld [vmem:[%s18837_s1 + $0x1d8] sm:$0xff]   ;;  %v14383_v7 = vld [vmem:[%s18837_s1 + $0x1d0] sm:$0xff]   ;;  %v14386_v10 = vld [vmem:[%s18837_s1 + $0x148] sm:$0xff]  }
  0x13   :  { %v14380_v4 = vld [vmem:[%s18837_s1 + $0x118] sm:$0xff]   ;;  %v14384_v8 = vld [vmem:[%s18837_s1 + $0x110] sm:$0xff]   ;;  %v14387_v11 = vld [vmem:[%s18837_s1 + $0x1c8] sm:$0xff]  }
  0x14   :  { %12897 = vmatpush3.bf16.msra.mxu0 %v14347_v18  ;;  %v2153_v50 = vrot.slane %v2125_v46, %v15538_v41  ;;  %9197 = vmatprep.mubr.bf16.mxu0 %v2146_v48  ;;  %v2156_v53 = vcombine.high %v2146_v48, %v2146_v48  ;;  %v14381_v5 = vld [vmem:[%s18837_s1 + $0x198] sm:$0xff]   ;;  %v14385_v9 = vld [vmem:[%s18837_s1 + $0x190] sm:$0xff]   ;;  %v14388_v12 = vld [vmem:[%s18837_s1 + $0x108] sm:$0xff]   ;;  %v2139_v18 = vrot.slane %v15542_v43, %v15538_v41 }
  0x15   :  { %12919 = vmatpush3.bf16.msra.mxu1 %v14348_v19  ;;  %12898 = vmatprep.subr.bf16.mxu0 %v14349_v20  ;;  %v14389_v13 = vld [vmem:[%s18837_s1 + $0x188] sm:$0xff]   ;;  %v14390_v14 = vld [vmem:[%s18837_s1 + $0x140] sm:$0xff]   ;;  %v14394_v19 = vld [vmem:[%s18837_s1 + $0x278] sm:$0xff]  }
  0x16   :  { %12920 = vmatprep.subr.bf16.mxu1 %v14350_v21  ;;  %v2157_v56 = vcombine.high %v2153_v50, %v2153_v50  ;;  %9237 = vmatprep.mubr.bf16.mxu1 %v2156_v53  ;;  %v14391_v15 = vld [vmem:[%s18837_s1 + $0x1c0] sm:$0xff]   ;;  %v14395_v20 = vld [vmem:[%s18837_s1 + $0x2f8] sm:$0xff]   ;;  %v14402_v28 = vld [vmem:[%s18837_s1 + $0x268] sm:$0xff]  }
  0x17   :  { %v14392_v16 = vld [vmem:[%s18837_s1 + $0x100] sm:$0xff]   ;;  %v14396_v21 = vld [vmem:[%s18837_s1 + $0x238] sm:$0xff]   ;;  %v14414_v40 = vld [vmem:[%s18837_s1 + $0x250] sm:$0xff]  }
  0x18   :  { %12899 = vmatpush3.bf16.msra.mxu0 %v14351_v22  ;;  %v14393_v17 = vld [vmem:[%s18837_s1 + $0x180] sm:$0xff]   ;;  %v14397_v22 = vld [vmem:[%s18837_s1 + $0x2b8] sm:$0xff]   ;;  %v14415_v42 = vld [vmem:[%s18837_s1 + $0x2d0] sm:$0xff]  }
  0x19   :  { %12921 = vmatpush3.bf16.msra.mxu1 %v14352_v23  ;;  %12900 = vmatprep.subr.bf16.mxu0 %v14353_v24  ;;  %v2155_v23 = vcombine.high %v2139_v18, %v2139_v18  ;;  %v14398_v24 = vld [vmem:[%s18837_s1 + $0x270] sm:$0xff]   ;;  %v14407_v33 = vld [vmem:[%s18837_s1 + $0x2e0] sm:$0xff]   ;;  %v14410_v36 = vld [vmem:[%s18837_s1 + $0x258] sm:$0xff]  }
  0x1a   :  { %12922 = vmatprep.subr.bf16.mxu1 %v14354_v25  ;;  %v14399_v25 = vld [vmem:[%s18837_s1 + $0x2f0] sm:$0xff]   ;;  %v14408_v34 = vld [vmem:[%s18837_s1 + $0x220] sm:$0xff]   ;;  %v14411_v37 = vld [vmem:[%s18837_s1 + $0x2d8] sm:$0xff]  }
  0x1b   :  { %v14413_v39 = vld [vmem:[%s18837_s1 + $0x298] sm:$0xff]   ;;  %v14416_v43 = vld [vmem:[%s18837_s1 + $0x210] sm:$0xff]   ;;  %v23_v46 = vld [vmem:[%s18836_s0 + $0x8] sm:$0xff] }
  0x1c   :  { %12901 = vmatpush3.bf16.msra.mxu0 %v14355_v26  ;;  %v14400_v26 = vld [vmem:[%s18837_s1 + $0x230] sm:$0xff]   ;;  %v2165_v48 = vrot.slane %v23_v46, %v15538_v41 }
  0x1d   :  { %12923 = vmatpush3.bf16.msra.mxu1 %v14356_v27  ;;  %12902 = vmatprep.subr.bf16.mxu0 %v14357_v29  ;;  %v14401_v27 = vld [vmem:[%s18837_s1 + $0x2b0] sm:$0xff]   ;;  %v14403_v29 = vld [vmem:[%s18837_s1 + $0x2e8] sm:$0xff]  }
  0x1e   :  { %12924 = vmatprep.subr.bf16.mxu1 %v14358_v30  ;;  %v14404_v30 = vld [vmem:[%s18837_s1 + $0x228] sm:$0xff]   ;;  %v14417_v44 = vld [vmem:[%s18837_s1 + $0x290] sm:$0xff]  }
  0x20   :  { %12903 = vmatpush3.bf16.msra.mxu0 %v14359_v31  ;;  %v14405_v31 = vld [vmem:[%s18837_s1 + $0x2a8] sm:$0xff]  }
  0x21   :  { %12925 = vmatpush3.bf16.msra.mxu1 %v14360_v32  ;;  %12932 = vmatprep.subr.bf16.mxu0 %v14362_v35  ;;  %v14406_v32 = vld [vmem:[%s18837_s1 + $0x260] sm:$0xff]  }
  0x22   :  { %12954 = vmatprep.subr.bf16.mxu1 %v14363_v38  ;;  %v14409_v35 = vld [vmem:[%s18837_s1 + $0x2a0] sm:$0xff]   ;;  %v14412_v38 = vld [vmem:[%s18837_s1 + $0x218] sm:$0xff]  }
  0x23   :  { %9198 = vmatmul.mubr.bf16.vlgmr.msra.gmra.mxu0 %v2132_v45  ;;  %v14418_v45 = vld [vmem:[%s18837_s1 + $0x248] sm:$0xff]  }
  0x24   :  { %12933 = vmatpush3.bf16.msra.mxu0 %v14364_v47  ;;  %9238 = vmatmul.mubr.bf16.vlgmr.msra.gmra.mxu1 %v2154_v51  ;;  %v14419_v47 = vld [vmem:[%s18837_s1 + $0x2c8] sm:$0xff]  }
  0x25   :  { %12934 = vmatprep.subr.bf16.mxu0 %v14366_v52  ;;  %12955 = vmatpush3.bf16.msra.mxu1 %v14365_v49  ;;  %v2158_v49 = vcombine.high %v23_v46, %v23_v46  ;;  %v14421_v51 = vld [vmem:[%s18837_s1 + $0x288] sm:$0xff]   ;;  %v2173_v52 = vcombine.high %v2165_v48, %v2165_v48 }
  0x26   :  { %9277 = vmatprep.mubr.bf16.mxu0 %v2153_v50  ;;  %12956 = vmatprep.subr.bf16.mxu1 %v14367_v54  ;;  %v14420_v50 = vld [vmem:[%s18837_s1 + $0x208] sm:$0xff]   ;;  %v14422_v54 = vld [vmem:[%s18837_s1 + $0x240] sm:$0xff]  }
  0x27   :  { %9317 = vmatprep.mubr.bf16.mxu1 %v2157_v56  ;;  %v15730_v53 = vrot.slane %v2158_v49, %v15538_v41  ;;  %v2195_v56 = vrot.slane %v2173_v52, %v15538_v41  ;;  %v14469_v46 = vld [vmem:[%s18837_s1 + $0x428] sm:$0xff]   ;;  %v14472_v49 = vld [vmem:[%s18837_s1 + $0x4e0] sm:$0xff]   ;;  %v14475_v52 = vld [vmem:[%s18837_s1 + $0x458] sm:$0xff]  }
  0x28   :  { %12935 = vmatpush3.bf16.msra.mxu0 %v14368_v55  ;;  %v14423_v55 = vld [vmem:[%s18837_s1 + $0x2c0] sm:$0xff]  }
  0x29   :  { %12936 = vmatprep.subr.bf16.mxu0 %v14370_v58  ;;  %12957 = vmatpush3.bf16.msra.mxu1 %v14369_v57  ;;  %v2174_v57 = vcombine.high %v15730_v53, %v15730_v53  ;;  %v14424_v58 = vld [vmem:[%s18837_s1 + $0x200] sm:$0xff]  }
  0x2a   :  { %12958 = vmatprep.subr.bf16.mxu1 %v14371_v59  ;;  %v14425_v59 = vld [vmem:[%s18837_s1 + $0x280] sm:$0xff]  }
  0x2c   :  { %12937 = vmatpush3.bf16.msra.mxu0 %v14372_v60  ;;  %v2205_v60 = vcombine.high %v2195_v56, %v2195_v56 }
  0x2d   :  { %12938 = vmatprep.subr.bf16.mxu0 %v14374_v62  ;;  %12959 = vmatpush3.bf16.msra.mxu1 %v14373_v61  ;;  %v2181_v61 = vrot.slane %v2165_v48, %v15538_v41  ;;  %v14426_v62 = vld [vmem:[%s18837_s1 + $0x378] sm:$0xff]   ;;  %v14471_v48 = vld [vmem:[%s18837_s1 + $0x460] sm:$0xff]  }
  0x2e   :  { %12960 = vmatprep.subr.bf16.mxu1 %v14375_v63  ;;  %v14427_v63 = vld [vmem:[%s18837_s1 + $0x3f8] sm:$0xff]  }
  0x30   :  { %12939 = vmatpush3.bf16.msra.mxu0 %v14376_v0  ;;  %v2202_v0 = vrot.slane %v2174_v57, %v15538_v41  ;;  %v14480_v57 = vld [vmem:[%s18837_s1 + $0x4d0] sm:$0xff]  }
  0x31   :  { %12940 = vmatprep.subr.bf16.mxu0 %v14378_v2  ;;  %12961 = vmatpush3.bf16.msra.mxu1 %v14377_v1  ;;  %v14428_v1 = vld [vmem:[%s18837_s1 + $0x338] sm:$0xff]  }
  0x32   :  { %12962 = vmatprep.subr.bf16.mxu1 %v14379_v3  ;;  %v14429_v2 = vld [vmem:[%s18837_s1 + $0x3b8] sm:$0xff]   ;;  %v2203_v3 = vcombine.high %v2181_v61, %v2181_v61 }
  0x34   :  { %12941 = vmatpush3.bf16.msra.mxu0 %v14380_v4  ;;  %v14430_v4 = vld [vmem:[%s18837_s1 + $0x370] sm:$0xff]  }
  0x35   :  { %12942 = vmatprep.subr.bf16.mxu0 %v14382_v6  ;;  %12963 = vmatpush3.bf16.msra.mxu1 %v14381_v5  ;;  %v14431_v5 = vld [vmem:[%s18837_s1 + $0x3f0] sm:$0xff]   ;;  %v2206_v6 = vcombine.high %v2202_v0, %v2202_v0 }
  0x36   :  { %12964 = vmatprep.subr.bf16.mxu1 %v14383_v7  ;;  %v14432_v7 = vld [vmem:[%s18837_s1 + $0x330] sm:$0xff]  }
  0x38   :  { %12943 = vmatpush3.bf16.msra.mxu0 %v14384_v8  ;;  %v14433_v8 = vld [vmem:[%s18837_s1 + $0x3b0] sm:$0xff]  }
  0x39   :  { %12944 = vmatprep.subr.bf16.mxu0 %v14386_v10  ;;  %12965 = vmatpush3.bf16.msra.mxu1 %v14385_v9  ;;  %v14434_v9 = vld [vmem:[%s18837_s1 + $0x368] sm:$0xff]  }
  0x3a   :  { %12966 = vmatprep.subr.bf16.mxu1 %v14387_v11  ;;  %v14435_v10 = vld [vmem:[%s18837_s1 + $0x3e8] sm:$0xff]  }
  0x3b   :  { %v14436_v11 = vld [vmem:[%s18837_s1 + $0x328] sm:$0xff]  }
  0x3c   :  { %12945 = vmatpush3.bf16.msra.mxu0 %v14388_v12  ;;  %v14437_v12 = vld [vmem:[%s18837_s1 + $0x3a8] sm:$0xff]  }
  0x3d   :  { %12946 = vmatprep.subr.bf16.mxu0 %v14390_v14  ;;  %12967 = vmatpush3.bf16.msra.mxu1 %v14389_v13  ;;  %v14438_v13 = vld [vmem:[%s18837_s1 + $0x360] sm:$0xff]  }
  0x3e   :  { %12968 = vmatprep.subr.bf16.mxu1 %v14391_v15  ;;  %v14439_v14 = vld [vmem:[%s18837_s1 + $0x3e0] sm:$0xff]  }
  0x3f   :  { %v14440_v15 = vld [vmem:[%s18837_s1 + $0x320] sm:$0xff]  }
  0x40   :  { %12947 = vmatpush3.bf16.msra.mxu0 %v14392_v16  ;;  %v14441_v16 = vld [vmem:[%s18837_s1 + $0x3a0] sm:$0xff]  }
  0x41   :  { %12976 = vmatprep.subr.bf16.mxu0 %v14394_v19  ;;  %12969 = vmatpush3.bf16.msra.mxu1 %v14393_v17  ;;  %v14442_v17 = vld [vmem:[%s18837_s1 + $0x358] sm:$0xff]  }
  0x42   :  { %12998 = vmatprep.subr.bf16.mxu1 %v14395_v20  ;;  %v14444_v19 = vld [vmem:[%s18837_s1 + $0x318] sm:$0xff]  }
  0x43   :  { %9278 = vmatmul.mubr.bf16.vlgmr.msra.gmra.mxu0 %v2139_v18  ;;  %v14443_v18 = vld [vmem:[%s18837_s1 + $0x3d8] sm:$0xff]  }
  0x44   :  { %12977 = vmatpush3.bf16.msra.mxu0 %v14396_v21  ;;  %9318 = vmatmul.mubr.bf16.vlgmr.msra.gmra.mxu1 %v2155_v23  ;;  %v14445_v20 = vld [vmem:[%s18837_s1 + $0x398] sm:$0xff]   ;;  %v14446_v21 = vld [vmem:[%s18837_s1 + $0x350] sm:$0xff]  }
  0x45   :  { %12978 = vmatprep.subr.bf16.mxu0 %v14398_v24  ;;  %12999 = vmatpush3.bf16.msra.mxu1 %v14397_v22  ;;  %v14447_v22 = vld [vmem:[%s18837_s1 + $0x3d0] sm:$0xff]  }
  0x46   :  { %13000 = vmatprep.subr.bf16.mxu1 %v14399_v25  ;;  %9357 = vmatprep.mubr.bf16.mxu0 %v2195_v56  ;;  %v14448_v23 = vld [vmem:[%s18837_s1 + $0x310] sm:$0xff]   ;;  %v14450_v25 = vld [vmem:[%s18837_s1 + $0x348] sm:$0xff]  }
  0x47   :  { %9397 = vmatprep.mubr.bf16.mxu1 %v2205_v60  ;;  %v14449_v24 = vld [vmem:[%s18837_s1 + $0x390] sm:$0xff]   ;;  %v14483_v60 = vld [vmem:[%s18837_s1 + $0x448] sm:$0xff]  }
  0x48   :  { %12979 = vmatpush3.bf16.msra.mxu0 %v14400_v26  ;;  %v14451_v26 = vld [vmem:[%s18837_s1 + $0x3c8] sm:$0xff]   ;;  %v14479_v56 = vld [vmem:[%s18837_s1 + $0x450] sm:$0xff]  }
  0x49   :  { %12980 = vmatprep.subr.bf16.mxu0 %v14402_v28  ;;  %13001 = vmatpush3.bf16.msra.mxu1 %v14401_v27  ;;  %v14452_v27 = vld [vmem:[%s18837_s1 + $0x308] sm:$0xff]  }
  0x4a   :  { %13002 = vmatprep.subr.bf16.mxu1 %v14403_v29  ;;  %v14453_v28 = vld [vmem:[%s18837_s1 + $0x388] sm:$0xff]   ;;  %v14454_v29 = vld [vmem:[%s18837_s1 + $0x340] sm:$0xff]  }
  0x4c   :  { %12981 = vmatpush3.bf16.msra.mxu0 %v14404_v30  ;;  %v14455_v30 = vld [vmem:[%s18837_s1 + $0x3c0] sm:$0xff]  }
  0x4d   :  { %12982 = vmatprep.subr.bf16.mxu0 %v14406_v32  ;;  %13003 = vmatpush3.bf16.msra.mxu1 %v14405_v31  ;;  %v14456_v31 = vld [vmem:[%s18837_s1 + $0x300] sm:$0xff]  }
  0x4e   :  { %13004 = vmatprep.subr.bf16.mxu1 %v14407_v33  ;;  %v14457_v32 = vld [vmem:[%s18837_s1 + $0x380] sm:$0xff]   ;;  %v2188_v33 = vrot.slane %v15730_v53, %v15538_v41  ;;  %v14476_v53 = vld [vmem:[%s18837_s1 + $0x4d8] sm:$0xff]  }
  0x50   :  { %12983 = vmatpush3.bf16.msra.mxu0 %v14408_v34  ;;  %v14459_v34 = vld [vmem:[%s18837_s1 + $0x478] sm:$0xff]  }
  0x51   :  { %12984 = vmatprep.subr.bf16.mxu0 %v14410_v36  ;;  %13005 = vmatpush3.bf16.msra.mxu1 %v14409_v35  ;;  %v14460_v35 = vld [vmem:[%s18837_s1 + $0x4f8] sm:$0xff]  }
  0x52   :  { %13006 = vmatprep.subr.bf16.mxu1 %v14411_v37  ;;  %v14461_v36 = vld [vmem:[%s18837_s1 + $0x438] sm:$0xff]  }
  0x53   :  { %v14462_v37 = vld [vmem:[%s18837_s1 + $0x4b8] sm:$0xff]  }
  0x54   :  { %12985 = vmatpush3.bf16.msra.mxu0 %v14412_v38  ;;  %v2204_v38 = vcombine.high %v2188_v33, %v2188_v33 }
  0x55   :  { %12986 = vmatprep.subr.bf16.mxu0 %v14414_v40  ;;  %13007 = vmatpush3.bf16.msra.mxu1 %v14413_v39  ;;  %v14463_v39 = vld [vmem:[%s18837_s1 + $0x470] sm:$0xff]  }
  0x56   :  { %13008 = vmatprep.subr.bf16.mxu1 %v14415_v42  ;;  %v14464_v40 = vld [vmem:[%s18837_s1 + $0x4f0] sm:$0xff]  }
  0x57   :  { %v14465_v42 = vld [vmem:[%s18837_s1 + $0x430] sm:$0xff]  }
  0x58   :  { %12987 = vmatpush3.bf16.msra.mxu0 %v14416_v43  ;;  %v14466_v43 = vld [vmem:[%s18837_s1 + $0x4b0] sm:$0xff]  }
  0x59   :  { %12988 = vmatprep.subr.bf16.mxu0 %v14418_v45  ;;  %13009 = vmatpush3.bf16.msra.mxu1 %v14417_v44  ;;  %v14467_v44 = vld [vmem:[%s18837_s1 + $0x468] sm:$0xff]  }
  0x5a   :  { %13010 = vmatprep.subr.bf16.mxu1 %v14419_v47  ;;  %v14468_v45 = vld [vmem:[%s18837_s1 + $0x4e8] sm:$0xff]  }
  0x5b   :  { %v14470_v47 = vld [vmem:[%s18837_s1 + $0x4a8] sm:$0xff]  }
  0x5c   :  { %12989 = vmatpush3.bf16.msra.mxu0 %v14420_v50  ;;  %v14473_v50 = vld [vmem:[%s18837_s1 + $0x420] sm:$0xff]  }
  0x5d   :  { %12990 = vmatprep.subr.bf16.mxu0 %v14422_v54  ;;  %13011 = vmatpush3.bf16.msra.mxu1 %v14421_v51  ;;  %v14474_v51 = vld [vmem:[%s18837_s1 + $0x4a0] sm:$0xff]   ;;  %v14477_v54 = vld [vmem:[%s18837_s1 + $0x418] sm:$0xff]  }
  0x5e   :  { %13012 = vmatprep.subr.bf16.mxu1 %v14423_v55  ;;  %v14478_v55 = vld [vmem:[%s18837_s1 + $0x498] sm:$0xff]  }
  0x60   :  { %12991 = vmatpush3.bf16.msra.mxu0 %v14424_v58  ;;  %v14481_v58 = vld [vmem:[%s18837_s1 + $0x410] sm:$0xff]  }
  0x61   :  { %13020 = vmatprep.subr.bf16.mxu0 %v14426_v62  ;;  %13013 = vmatpush3.bf16.msra.mxu1 %v14425_v59  ;;  %v14482_v59 = vld [vmem:[%s18837_s1 + $0x490] sm:$0xff]   ;;  %v14484_v62 = vld [vmem:[%s18837_s1 + $0x4c8] sm:$0xff]  }
  0x62   :  { %13042 = vmatprep.subr.bf16.mxu1 %v14427_v63 }
  0x63   :  { %9358 = vmatmul.mubr.bf16.vlgmr.msra.gmra.mxu0 %v2181_v61  ;;  %v24_v61 = vld [vmem:[%s18836_s0 + $0x10] sm:$0xff] }
  0x64   :  { %13021 = vmatpush3.bf16.msra.mxu0 %v14428_v1  ;;  %9437 = vmatprep.mubr.bf16.mxu0 %v2202_v0  ;;  %v2214_v63 = vrot.slane %v24_v61, %v15538_v41  ;;  %v2207_v0 = vcombine.high %v24_v61, %v24_v61  ;;  %v14485_v1 = vld [vmem:[%s18837_s1 + $0x408] sm:$0xff]  }
  0x65   :  { %9398 = vmatmul.mubr.bf16.vlgmr.msra.gmra.mxu1 %v2203_v3  ;;  %13022 = vmatprep.subr.bf16.mxu0 %v14430_v4  ;;  %v14534_v61 = vld [vmem:[%s18837_s1 + $0x628] sm:$0xff]  }
  0x66   :  { %13043 = vmatpush3.bf16.msra.mxu1 %v14429_v2  ;;  %9477 = vmatprep.mubr.bf16.mxu1 %v2206_v6  ;;  %v14486_v2 = vld [vmem:[%s18837_s1 + $0x488] sm:$0xff]   ;;  %v2222_v3 = vcombine.high %v2214_v63, %v2214_v63  ;;  %v15936_v4 = vrot.slane %v2207_v0, %v15538_v41  ;;  %v14488_v6 = vld [vmem:[%s18837_s1 + $0x4c0] sm:$0xff]  }
  0x67   :  { %13044 = vmatprep.subr.bf16.mxu1 %v14431_v5  ;;  %v14487_v5 = vld [vmem:[%s18837_s1 + $0x440] sm:$0xff]  }
  0x68   :  { %13023 = vmatpush3.bf16.msra.mxu0 %v14432_v7  ;;  %v2244_v7 = vrot.slane %v2222_v3, %v15538_v41  ;;  %v14537_v0 = vld [vmem:[%s18837_s1 + $0x6e0] sm:$0xff]   ;;  %v14540_v3 = vld [vmem:[%s18837_s1 + $0x658] sm:$0xff]  }
  0x69   :  { %13024 = vmatprep.subr.bf16.mxu0 %v14434_v9  ;;  %v14489_v9 = vld [vmem:[%s18837_s1 + $0x400] sm:$0xff]  }
  0x6a   :  { %13045 = vmatpush3.bf16.msra.mxu1 %v14433_v8  ;;  %v2223_v8 = vcombine.high %v15936_v4, %v15936_v4 }
  0x6b   :  { %13046 = vmatprep.subr.bf16.mxu1 %v14435_v10  ;;  %v14490_v10 = vld [vmem:[%s18837_s1 + $0x480] sm:$0xff]  }
  0x6c   :  { %13025 = vmatpush3.bf16.msra.mxu0 %v14436_v11  ;;  %v2254_v11 = vcombine.high %v2244_v7, %v2244_v7 }
  0x6d   :  { %13026 = vmatprep.subr.bf16.mxu0 %v14438_v13  ;;  %v14491_v13 = vld [vmem:[%s18837_s1 + $0x578] sm:$0xff]  }
  0x6e   :  { %13047 = vmatpush3.bf16.msra.mxu1 %v14437_v12  ;;  %v2230_v12 = vrot.slane %v2214_v63, %v15538_v41  ;;  %v14536_v63 = vld [vmem:[%s18837_s1 + $0x660] sm:$0xff]  }
  0x6f   :  { %13048 = vmatprep.subr.bf16.mxu1 %v14439_v14  ;;  %v14492_v14 = vld [vmem:[%s18837_s1 + $0x5f8] sm:$0xff]  }
  0x70   :  { %13027 = vmatpush3.bf16.msra.mxu0 %v14440_v15  ;;  %v2251_v15 = vrot.slane %v2223_v8, %v15538_v41  ;;  %v14545_v8 = vld [vmem:[%s18837_s1 + $0x6d0] sm:$0xff]  }
  0x71   :  { %13028 = vmatprep.subr.bf16.mxu0 %v14442_v17  ;;  %v14494_v17 = vld [vmem:[%s18837_s1 + $0x5b8] sm:$0xff]  }
  0x72   :  { %13049 = vmatpush3.bf16.msra.mxu1 %v14441_v16  ;;  %v14493_v16 = vld [vmem:[%s18837_s1 + $0x538] sm:$0xff]  }
  0x73   :  { %13050 = vmatprep.subr.bf16.mxu1 %v14443_v18  ;;  %v2252_v18 = vcombine.high %v2230_v12, %v2230_v12 }
  0x74   :  { %13029 = vmatpush3.bf16.msra.mxu0 %v14444_v19  ;;  %v14495_v19 = vld [vmem:[%s18837_s1 + $0x570] sm:$0xff]  }
  0x75   :  { %13030 = vmatprep.subr.bf16.mxu0 %v14446_v21  ;;  %v2255_v21 = vcombine.high %v2251_v15, %v2251_v15 }
  0x76   :  { %13051 = vmatpush3.bf16.msra.mxu1 %v14445_v20  ;;  %v14496_v20 = vld [vmem:[%s18837_s1 + $0x5f0] sm:$0xff]  }
  0x77   :  { %13052 = vmatprep.subr.bf16.mxu1 %v14447_v22  ;;  %v14497_v22 = vld [vmem:[%s18837_s1 + $0x530] sm:$0xff]  }
  0x78   :  { %13031 = vmatpush3.bf16.msra.mxu0 %v14448_v23  ;;  %v14498_v23 = vld [vmem:[%s18837_s1 + $0x5b0] sm:$0xff]  }
  0x79   :  { %13032 = vmatprep.subr.bf16.mxu0 %v14450_v25  ;;  %v14500_v25 = vld [vmem:[%s18837_s1 + $0x5e8] sm:$0xff]  }
  0x7a   :  { %13053 = vmatpush3.bf16.msra.mxu1 %v14449_v24  ;;  %v14499_v24 = vld [vmem:[%s18837_s1 + $0x568] sm:$0xff]  }
  0x7b   :  { %13054 = vmatprep.subr.bf16.mxu1 %v14451_v26  ;;  %v14501_v26 = vld [vmem:[%s18837_s1 + $0x528] sm:$0xff]  }
  0x7c   :  { %13033 = vmatpush3.bf16.msra.mxu0 %v14452_v27  ;;  %v14502_v27 = vld [vmem:[%s18837_s1 + $0x5a8] sm:$0xff]  }
  0x7d   :  { %13034 = vmatprep.subr.bf16.mxu0 %v14454_v29  ;;  %v14504_v29 = vld [vmem:[%s18837_s1 + $0x5e0] sm:$0xff]  }
  0x7e   :  { %13055 = vmatpush3.bf16.msra.mxu1 %v14453_v28  ;;  %v14503_v28 = vld [vmem:[%s18837_s1 + $0x560] sm:$0xff]  }
  0x7f   :  { %13056 = vmatprep.subr.bf16.mxu1 %v14455_v30  ;;  %v14505_v30 = vld [vmem:[%s18837_s1 + $0x520] sm:$0xff]  }
  0x80   :  { %13035 = vmatpush3.bf16.msra.mxu0 %v14456_v31  ;;  %v14506_v31 = vld [vmem:[%s18837_s1 + $0x5a0] sm:$0xff]  }
  0x81   :  { %13064 = vmatprep.subr.bf16.mxu0 %v14459_v34  ;;  %v14509_v34 = vld [vmem:[%s18837_s1 + $0x518] sm:$0xff]  }
  0x82   :  { %13057 = vmatpush3.bf16.msra.mxu1 %v14457_v32  ;;  %v14507_v32 = vld [vmem:[%s18837_s1 + $0x558] sm:$0xff]  }
  0x83   :  { %9438 = vmatmul.mubr.bf16.vlgmr.msra.gmra.mxu0 %v2188_v33  ;;  %13086 = vmatprep.subr.bf16.mxu1 %v14460_v35  ;;  %v14508_v33 = vld [vmem:[%s18837_s1 + $0x5d8] sm:$0xff]  }
  0x84   :  { %13065 = vmatpush3.bf16.msra.mxu0 %v14461_v36  ;;  %9517 = vmatprep.mubr.bf16.mxu0 %v2244_v7  ;;  %v14510_v35 = vld [vmem:[%s18837_s1 + $0x598] sm:$0xff]   ;;  %v14511_v36 = vld [vmem:[%s18837_s1 + $0x550] sm:$0xff]  }
  0x85   :  { %9478 = vmatmul.mubr.bf16.vlgmr.msra.gmra.mxu1 %v2204_v38  ;;  %13066 = vmatprep.subr.bf16.mxu0 %v14463_v39  ;;  %v14513_v38 = vld [vmem:[%s18837_s1 + $0x510] sm:$0xff]  }
  0x86   :  { %13087 = vmatpush3.bf16.msra.mxu1 %v14462_v37  ;;  %9557 = vmatprep.mubr.bf16.mxu1 %v2254_v11  ;;  %v14512_v37 = vld [vmem:[%s18837_s1 + $0x5d0] sm:$0xff]   ;;  %v14548_v11 = vld [vmem:[%s18837_s1 + $0x648] sm:$0xff]  }
  0x87   :  { %13088 = vmatprep.subr.bf16.mxu1 %v14464_v40  ;;  %v14514_v39 = vld [vmem:[%s18837_s1 + $0x590] sm:$0xff]   ;;  %v14515_v40 = vld [vmem:[%s18837_s1 + $0x548] sm:$0xff]  }
  0x88   :  { %13067 = vmatpush3.bf16.msra.mxu0 %v14465_v42  ;;  %v14516_v42 = vld [vmem:[%s18837_s1 + $0x5c8] sm:$0xff]   ;;  %v14544_v7 = vld [vmem:[%s18837_s1 + $0x650] sm:$0xff]  }
  0x89   :  { %13068 = vmatprep.subr.bf16.mxu0 %v14467_v44  ;;  %v14518_v44 = vld [vmem:[%s18837_s1 + $0x588] sm:$0xff]  }
  0x8a   :  { %13089 = vmatpush3.bf16.msra.mxu1 %v14466_v43  ;;  %v14517_v43 = vld [vmem:[%s18837_s1 + $0x508] sm:$0xff]  }
  0x8b   :  { %13090 = vmatprep.subr.bf16.mxu1 %v14468_v45  ;;  %v14519_v45 = vld [vmem:[%s18837_s1 + $0x540] sm:$0xff]  }
  0x8c   :  { %13069 = vmatpush3.bf16.msra.mxu0 %v14469_v46  ;;  %v14520_v46 = vld [vmem:[%s18837_s1 + $0x5c0] sm:$0xff]  }
  0x8d   :  { %13070 = vmatprep.subr.bf16.mxu0 %v14471_v48  ;;  %v14522_v48 = vld [vmem:[%s18837_s1 + $0x580] sm:$0xff]  }
  0x8e   :  { %13091 = vmatpush3.bf16.msra.mxu1 %v14470_v47  ;;  %v14521_v47 = vld [vmem:[%s18837_s1 + $0x500] sm:$0xff]  }
  0x8f   :  { %13092 = vmatprep.subr.bf16.mxu1 %v14472_v49  ;;  %v2237_v49 = vrot.slane %v15936_v4, %v15538_v41  ;;  %v14541_v4 = vld [vmem:[%s18837_s1 + $0x6d8] sm:$0xff]  }
  0x90   :  { %13071 = vmatpush3.bf16.msra.mxu0 %v14473_v50  ;;  %v14524_v50 = vld [vmem:[%s18837_s1 + $0x678] sm:$0xff]  }
  0x91   :  { %13072 = vmatprep.subr.bf16.mxu0 %v14475_v52  ;;  %v14526_v52 = vld [vmem:[%s18837_s1 + $0x638] sm:$0xff]  }
  0x92   :  { %13093 = vmatpush3.bf16.msra.mxu1 %v14474_v51  ;;  %v14525_v51 = vld [vmem:[%s18837_s1 + $0x6f8] sm:$0xff]  }
  0x93   :  { %13094 = vmatprep.subr.bf16.mxu1 %v14476_v53  ;;  %v14527_v53 = vld [vmem:[%s18837_s1 + $0x6b8] sm:$0xff]  }
  0x94   :  { %13073 = vmatpush3.bf16.msra.mxu0 %v14477_v54  ;;  %v2253_v54 = vcombine.high %v2237_v49, %v2237_v49 }
  0x95   :  { %13074 = vmatprep.subr.bf16.mxu0 %v14479_v56  ;;  %v14529_v56 = vld [vmem:[%s18837_s1 + $0x6f0] sm:$0xff]  }
  0x96   :  { %13095 = vmatpush3.bf16.msra.mxu1 %v14478_v55  ;;  %v14528_v55 = vld [vmem:[%s18837_s1 + $0x670] sm:$0xff]  }
  0x97   :  { %13096 = vmatprep.subr.bf16.mxu1 %v14480_v57  ;;  %v14530_v57 = vld [vmem:[%s18837_s1 + $0x630] sm:$0xff]  }
  0x98   :  { %13075 = vmatpush3.bf16.msra.mxu0 %v14481_v58  ;;  %v14531_v58 = vld [vmem:[%s18837_s1 + $0x6b0] sm:$0xff]  }
  0x99   :  { %13076 = vmatprep.subr.bf16.mxu0 %v14483_v60  ;;  %v14533_v60 = vld [vmem:[%s18837_s1 + $0x6e8] sm:$0xff]  }
  0x9a   :  { %13097 = vmatpush3.bf16.msra.mxu1 %v14482_v59  ;;  %v14532_v59 = vld [vmem:[%s18837_s1 + $0x668] sm:$0xff]  }
  0x9b   :  { %13098 = vmatprep.subr.bf16.mxu1 %v14484_v62  ;;  %v14535_v62 = vld [vmem:[%s18837_s1 + $0x6a8] sm:$0xff]  }
  0x9c   :  { %13077 = vmatpush3.bf16.msra.mxu0 %v14485_v1  ;;  %v14538_v1 = vld [vmem:[%s18837_s1 + $0x620] sm:$0xff]  }
  0x9d   :  { %13078 = vmatprep.subr.bf16.mxu0 %v14487_v5  ;;  %v14542_v5 = vld [vmem:[%s18837_s1 + $0x618] sm:$0xff]  }
  0x9e   :  { %13099 = vmatpush3.bf16.msra.mxu1 %v14486_v2  ;;  %v14539_v2 = vld [vmem:[%s18837_s1 + $0x6a0] sm:$0xff]  }
  0x9f   :  { %13100 = vmatprep.subr.bf16.mxu1 %v14488_v6  ;;  %v14543_v6 = vld [vmem:[%s18837_s1 + $0x698] sm:$0xff]  }
  0xa0   :  { %13079 = vmatpush3.bf16.msra.mxu0 %v14489_v9  ;;  %v14546_v9 = vld [vmem:[%s18837_s1 + $0x610] sm:$0xff]  }
  0xa1   :  { %13108 = vmatprep.subr.bf16.mxu0 %v14491_v13  ;;  %v14549_v13 = vld [vmem:[%s18837_s1 + $0x6c8] sm:$0xff]  }
  0xa2   :  { %13101 = vmatpush3.bf16.msra.mxu1 %v14490_v10  ;;  %v14547_v10 = vld [vmem:[%s18837_s1 + $0x690] sm:$0xff]  }
  0xa3   :  { %9518 = vmatmul.mubr.bf16.vlgmr.msra.gmra.mxu0 %v2230_v12  ;;  %13130 = vmatprep.subr.bf16.mxu1 %v14492_v14  ;;  %v25_v12 = vld [vmem:[%s18836_s0 + $0x18] sm:$0xff] }
  0xa4   :  { %13109 = vmatpush3.bf16.msra.mxu0 %v14493_v16  ;;  %9597 = vmatprep.mubr.bf16.mxu0 %v2251_v15  ;;  %v2263_v14 = vrot.slane %v25_v12, %v15538_v41  ;;  %v2256_v15 = vcombine.high %v25_v12, %v25_v12  ;;  %v14550_v16 = vld [vmem:[%s18837_s1 + $0x608] sm:$0xff]   ;;  %v14587_v12 = vld [vmem:[%s18837_s1 + $0x780] sm:$0xff]  }
  0xa5   :  { %9558 = vmatmul.mubr.bf16.vlgmr.msra.gmra.mxu1 %v2252_v18  ;;  %13110 = vmatprep.subr.bf16.mxu0 %v14495_v19 }
  0xa6   :  { %13131 = vmatpush3.bf16.msra.mxu1 %v14494_v17  ;;  %9637 = vmatprep.mubr.bf16.mxu1 %v2255_v21  ;;  %v14552_v17 = vld [vmem:[%s18837_s1 + $0x640] sm:$0xff]   ;;  %v2271_v18 = vcombine.high %v2263_v14, %v2263_v14  ;;  %v16142_v19 = vrot.slane %v2256_v15, %v15538_v41  ;;  %v14590_v15 = vld [vmem:[%s18837_s1 + $0x8f8] sm:$0xff]  }
  0xa7   :  { %13132 = vmatprep.subr.bf16.mxu1 %v14496_v20  ;;  %v14551_v20 = vld [vmem:[%s18837_s1 + $0x688] sm:$0xff]   ;;  %v14553_v21 = vld [vmem:[%s18837_s1 + $0x6c0] sm:$0xff]  }
  0xa8   :  { %13111 = vmatpush3.bf16.msra.mxu0 %v14497_v22  ;;  %v14554_v22 = vld [vmem:[%s18837_s1 + $0x600] sm:$0xff]  }
  0xa9   :  { %13112 = vmatprep.subr.bf16.mxu0 %v14499_v24  ;;  %v2272_v24 = vcombine.high %v16142_v19, %v16142_v19 }
  0xaa   :  { %13133 = vmatpush3.bf16.msra.mxu1 %v14498_v23  ;;  %v2293_v23 = vrot.slane %v2271_v18, %v15538_v41 }
  0xab   :  { %13134 = vmatprep.subr.bf16.mxu1 %v14500_v25  ;;  %v14555_v25 = vld [vmem:[%s18837_s1 + $0x680] sm:$0xff]  }
  0xac   :  { %13113 = vmatpush3.bf16.msra.mxu0 %v14501_v26  ;;  %v2303_v26 = vcombine.high %v2293_v23, %v2293_v23 }
  0xad   :  { %13114 = vmatprep.subr.bf16.mxu0 %v14503_v28  ;;  %v14556_v28 = vld [vmem:[%s18837_s1 + $0x778] sm:$0xff]  }
  0xae   :  { %13135 = vmatpush3.bf16.msra.mxu1 %v14502_v27  ;;  %v2279_v27 = vrot.slane %v2263_v14, %v15538_v41  ;;  %v14589_v14 = vld [vmem:[%s18837_s1 + $0x878] sm:$0xff]  }
  0xaf   :  { %13136 = vmatprep.subr.bf16.mxu1 %v14504_v29  ;;  %v14557_v29 = vld [vmem:[%s18837_s1 + $0x7f8] sm:$0xff]  }
  0xb0   :  { %13115 = vmatpush3.bf16.msra.mxu0 %v14505_v30  ;;  %v2300_v30 = vrot.slane %v2272_v24, %v15538_v41 }
  0xb1   :  { %13116 = vmatprep.subr.bf16.mxu0 %v14507_v32  ;;  %v14559_v32 = vld [vmem:[%s18837_s1 + $0x7b8] sm:$0xff]  }
  0xb2   :  { %13137 = vmatpush3.bf16.msra.mxu1 %v14506_v31  ;;  %v14558_v31 = vld [vmem:[%s18837_s1 + $0x738] sm:$0xff]  }
  0xb3   :  { %13138 = vmatprep.subr.bf16.mxu1 %v14508_v33  ;;  %v2301_v33 = vcombine.high %v2279_v27, %v2279_v27 }
  0xb4   :  { %13117 = vmatpush3.bf16.msra.mxu0 %v14509_v34  ;;  %v14560_v34 = vld [vmem:[%s18837_s1 + $0x770] sm:$0xff]  }
  0xb5   :  { %13118 = vmatprep.subr.bf16.mxu0 %v14511_v36  ;;  %v2304_v36 = vcombine.high %v2300_v30, %v2300_v30 }
  0xb6   :  { %13139 = vmatpush3.bf16.msra.mxu1 %v14510_v35  ;;  %v14561_v35 = vld [vmem:[%s18837_s1 + $0x7f0] sm:$0xff]  }
  0xb7   :  { %13140 = vmatprep.subr.bf16.mxu1 %v14512_v37 }
  0xb8   :  { %13119 = vmatpush3.bf16.msra.mxu0 %v14513_v38  ;;  %v11854_v38 = vld [vmem:[%s18838_s2] ss:$0 sm:$0xff] }
  0xb9   :  { %13120 = vmatprep.subr.bf16.mxu0 %v14515_v40  ;;  %v14563_v40 = vld [vmem:[%s18837_s1 + $0x7b0] sm:$0xff]  }
  0xba   :  { %13141 = vmatpush3.bf16.msra.mxu1 %v14514_v39  ;;  %v14562_v39 = vld [vmem:[%s18837_s1 + $0x730] sm:$0xff]  }
  0xbb   :  { %13142 = vmatprep.subr.bf16.mxu1 %v14516_v42 }
  0xbc   :  { %13121 = vmatpush3.bf16.msra.mxu0 %v14517_v43 }
  0xbd   :  { %13122 = vmatprep.subr.bf16.mxu0 %v14519_v45 }
  0xbe   :  { %13143 = vmatpush3.bf16.msra.mxu1 %v14518_v44  ;;  %v14564_v44 = vld [vmem:[%s18837_s1 + $0x768] sm:$0xff]  }
  0xbf   :  { %13144 = vmatprep.subr.bf16.mxu1 %v14520_v46  ;;  %v14565_v46 = vld [vmem:[%s18837_s1 + $0x7e8] sm:$0xff]  }
  0xc0   :  { %13123 = vmatpush3.bf16.msra.mxu0 %v14521_v47 }
  0xc1   :  { %13152 = vmatprep.subr.bf16.mxu0 %v14524_v50 }
  0xc2   :  { %13145 = vmatpush3.bf16.msra.mxu1 %v14522_v48 }
  0xc3   :  { %9598 = vmatmul.mubr.bf16.vlgmr.msra.gmra.mxu0 %v2237_v49  ;;  %13174 = vmatprep.subr.bf16.mxu1 %v14525_v51  ;;  %v14566_v49 = vld [vmem:[%s18837_s1 + $0x728] sm:$0xff]  }
  0xc4   :  { %13153 = vmatpush3.bf16.msra.mxu0 %v14526_v52  ;;  %9677 = vmatprep.mubr.bf16.mxu0 %v2293_v23  ;;  %v14567_v52 = vld [vmem:[%s18837_s1 + $0x7a8] sm:$0xff]   ;;  %v14596_v23 = vld [vmem:[%s18837_s1 + $0x8b0] sm:$0xff]  }
  0xc5   :  { %9638 = vmatmul.mubr.bf16.vlgmr.msra.gmra.mxu1 %v2253_v54  ;;  %13154 = vmatprep.subr.bf16.mxu0 %v14528_v55  ;;  %v14568_v55 = vld [vmem:[%s18837_s1 + $0x760] sm:$0xff]  }
  0xc6   :  { %13175 = vmatpush3.bf16.msra.mxu1 %v14527_v53  ;;  %9717 = vmatprep.mubr.bf16.mxu1 %v2303_v26  ;;  %v14597_v26 = vld [vmem:[%s18837_s1 + $0x868] sm:$0xff]  }
  0xc7   :  { %13176 = vmatprep.subr.bf16.mxu1 %v14529_v56 }
  0xc8   :  { %13155 = vmatpush3.bf16.msra.mxu0 %v14530_v57  ;;  %v14569_v57 = vld [vmem:[%s18837_s1 + $0x7e0] sm:$0xff]  }
  0xc9   :  { %13156 = vmatprep.subr.bf16.mxu0 %v14532_v59  ;;  %v14570_v59 = vld [vmem:[%s18837_s1 + $0x720] sm:$0xff]  }
  0xca   :  { %13177 = vmatpush3.bf16.msra.mxu1 %v14531_v58 }
  0xcb   :  { %13178 = vmatprep.subr.bf16.mxu1 %v14533_v60  ;;  %v14571_v60 = vld [vmem:[%s18837_s1 + $0x7a0] sm:$0xff]  }
  0xcc   :  { %13157 = vmatpush3.bf16.msra.mxu0 %v14534_v61  ;;  %v14572_v61 = vld [vmem:[%s18837_s1 + $0x758] sm:$0xff]  }
  0xcd   :  { %13158 = vmatprep.subr.bf16.mxu0 %v14536_v63  ;;  %v14574_v63 = vld [vmem:[%s18837_s1 + $0x718] sm:$0xff]  }
  0xce   :  { %13179 = vmatpush3.bf16.msra.mxu1 %v14535_v62  ;;  %v14573_v62 = vld [vmem:[%s18837_s1 + $0x7d8] sm:$0xff]  }
  0xcf   :  { %13180 = vmatprep.subr.bf16.mxu1 %v14537_v0  ;;  %v14575_v0 = vld [vmem:[%s18837_s1 + $0x798] sm:$0xff]  }
  0xd0   :  { %13159 = vmatpush3.bf16.msra.mxu0 %v14538_v1  ;;  %v14576_v1 = vld [vmem:[%s18837_s1 + $0x750] sm:$0xff]  }
  0xd1   :  { %13160 = vmatprep.subr.bf16.mxu0 %v14540_v3  ;;  %v14578_v3 = vld [vmem:[%s18837_s1 + $0x710] sm:$0xff]  }
  0xd2   :  { %13181 = vmatpush3.bf16.msra.mxu1 %v14539_v2  ;;  %v14577_v2 = vld [vmem:[%s18837_s1 + $0x7d0] sm:$0xff]  }
  0xd3   :  { %13182 = vmatprep.subr.bf16.mxu1 %v14541_v4  ;;  %v14579_v4 = vld [vmem:[%s18837_s1 + $0x790] sm:$0xff]  }
  0xd4   :  { %13161 = vmatpush3.bf16.msra.mxu0 %v14542_v5  ;;  %v14580_v5 = vld [vmem:[%s18837_s1 + $0x748] sm:$0xff]  }
  0xd5   :  { %13162 = vmatprep.subr.bf16.mxu0 %v14544_v7  ;;  %v14582_v7 = vld [vmem:[%s18837_s1 + $0x708] sm:$0xff]  }
  0xd6   :  { %13183 = vmatpush3.bf16.msra.mxu1 %v14543_v6  ;;  %v14581_v6 = vld [vmem:[%s18837_s1 + $0x7c8] sm:$0xff]  }
  0xd7   :  { %13184 = vmatprep.subr.bf16.mxu1 %v14545_v8  ;;  %v14583_v8 = vld [vmem:[%s18837_s1 + $0x788] sm:$0xff]  }
  0xd8   :  { %13163 = vmatpush3.bf16.msra.mxu0 %v14546_v9  ;;  %v14584_v9 = vld [vmem:[%s18837_s1 + $0x740] sm:$0xff]  }
  0xd9   :  { %13164 = vmatprep.subr.bf16.mxu0 %v14548_v11  ;;  %v14586_v11 = vld [vmem:[%s18837_s1 + $0x700] sm:$0xff]  }
  0xda   :  { %13185 = vmatpush3.bf16.msra.mxu1 %v14547_v10  ;;  %v14585_v10 = vld [vmem:[%s18837_s1 + $0x7c0] sm:$0xff]  }
  0xdb   :  { %13186 = vmatprep.subr.bf16.mxu1 %v14549_v13  ;;  %v2286_v13 = vrot.slane %v16142_v19, %v15538_v41  ;;  %v14593_v19 = vld [vmem:[%s18837_s1 + $0x870] sm:$0xff]  }
  0xdc   :  { %13165 = vmatpush3.bf16.msra.mxu0 %v14550_v16  ;;  %v14591_v16 = vld [vmem:[%s18837_s1 + $0x838] sm:$0xff]  }
  0xdd   :  { %13166 = vmatprep.subr.bf16.mxu0 %v14552_v17  ;;  %v14592_v17 = vld [vmem:[%s18837_s1 + $0x8b8] sm:$0xff]   ;;  %v2302_v18 = vcombine.high %v2286_v13, %v2286_v13 }
  0xde   :  { %13187 = vmatpush3.bf16.msra.mxu1 %v14551_v20  ;;  %v14594_v20 = vld [vmem:[%s18837_s1 + $0x8f0] sm:$0xff]  }
  0xdf   :  { %13188 = vmatprep.subr.bf16.mxu1 %v14553_v21 }
  0xe0   :  { %13167 = vmatpush3.bf16.msra.mxu0 %v14554_v22  ;;  %v14595_v22 = vld [vmem:[%s18837_s1 + $0x830] sm:$0xff]  }
  0xe1   :  { %13196 = vmatprep.subr.bf16.mxu0 %v14556_v28  ;;  %v14598_v28 = vld [vmem:[%s18837_s1 + $0x8e8] sm:$0xff]  }
  0xe2   :  { %13189 = vmatpush3.bf16.msra.mxu1 %v14555_v25 }
  0xe3   :  { %v12904_v37 = vpop.f32.mrf.mxu0  ;;  %9678 = vmatmul.mubr.bf16.vlgmr.msra.gmra.mxu0 %v2279_v27  ;;  %13218 = vmatprep.subr.bf16.mxu1 %v14557_v29 }
  0xe4   :  { %13197 = vmatpush3.bf16.msra.mxu0 %v14558_v31  ;;  %9757 = vmatprep.mubr.bf16.mxu0 %v2300_v30  ;;  %v12926_v42 = vpop.f32.mrf.mxu1  ;;  %v14599_v31 = vld [vmem:[%s18837_s1 + $0x828] sm:$0xff]  }
  0xe5   :  { %9718 = vmatmul.mubr.bf16.vlgmr.msra.gmra.mxu1 %v2301_v33  ;;  %v12905_v43 = vpop.f32.mrf.mxu0  ;;  %13198 = vmatprep.subr.bf16.mxu0 %v14560_v34  ;;  %v14600_v34 = vld [vmem:[%s18837_s1 + $0x8a8] sm:$0xff]  }
  0xe6   :  { %13219 = vmatpush3.bf16.msra.mxu1 %v14559_v32  ;;  %v12906_v45 = vadd.f32 %v12905_v43, %v12904_v37  ;;  %9797 = vmatprep.mubr.bf16.mxu1 %v2304_v36  ;;  %v12927_v47 = vpop.f32.mrf.mxu1  ;;  %v14601_v37 = vld [vmem:[%s18837_s1 + $0x860] sm:$0xff]  }
  0xe7   :  { %v12907_v48 = vpop.f32.mrf.mxu0  ;;  %13220 = vmatprep.subr.bf16.mxu1 %v14561_v35  ;;  %v12928_v51 = vadd.f32 %v12927_v47, %v12926_v42  ;;  %v14603_v42 = vld [vmem:[%s18837_s1 + $0x820] sm:$0xff]   ;;  %v14608_v47 = vld [vmem:[%s18837_s1 + $0x898] sm:$0xff]  }
  0xe8   :  { %v9200_v50 = vadd.f32 %v12906_v45, %v11854_v38  ;;  %13199 = vmatpush3.bf16.msra.mxu0 %v14562_v39  ;;  %v12929_v53 = vpop.f32.mrf.mxu1  ;;  %v14602_v39 = vld [vmem:[%s18837_s1 + $0x8e0] sm:$0xff]   ;;  %v14606_v45 = vld [vmem:[%s18837_s1 + $0x8d8] sm:$0xff]   ;;  %v14609_v48 = vld [vmem:[%s18837_s1 + $0x850] sm:$0xff]  }
  0xe9   :  { %v12908_v54 = vpop.f32.mrf.mxu0  ;;  %13200 = vmatprep.subr.bf16.mxu0 %v14564_v44  ;;  %v14604_v43 = vld [vmem:[%s18837_s1 + $0x8a0] sm:$0xff]   ;;  %v14605_v44 = vld [vmem:[%s18837_s1 + $0x858] sm:$0xff]   ;;  %v14614_v53 = vld [vmem:[%s18837_s1 + $0x8c8] sm:$0xff]  }
  0xea   :  { %v16203_v56 = vadd.f32 %v12928_v51, %v9200_v50  ;;  %13221 = vmatpush3.bf16.msra.mxu1 %v14563_v40  ;;  %v12930_v58 = vpop.f32.mrf.mxu1  ;;  %v14611_v50 = vld [vmem:[%s18837_s1 + $0x810] sm:$0xff]   ;;  %v26_v54 = vld [vmem:[%s18836_s0 + $0x20] sm:$0xff] }
  0xeb   :  { %13222 = vmatprep.subr.bf16.mxu1 %v14565_v46  ;;  %v14607_v46 = vld [vmem:[%s18837_s1 + $0x818] sm:$0xff]   ;;  %v14612_v51 = vld [vmem:[%s18837_s1 + $0x890] sm:$0xff]   ;;  %v14616_v58 = vld [vmem:[%s18837_s1 + $0x888] sm:$0xff]  }
  0xec   :  { %13201 = vmatpush3.bf16.msra.mxu0 %v14566_v49  ;;  %v14610_v49 = vld [vmem:[%s18837_s1 + $0x8d0] sm:$0xff]  }
  0xed   :  { %13202 = vmatprep.subr.bf16.mxu0 %v14568_v55  ;;  %v14615_v55 = vld [vmem:[%s18837_s1 + $0x808] sm:$0xff]  }
  0xee   :  { %13223 = vmatpush3.bf16.msra.mxu1 %v14567_v52  ;;  %v14613_v52 = vld [vmem:[%s18837_s1 + $0x848] sm:$0xff]  }
  0xef   :  { %13224 = vmatprep.subr.bf16.mxu1 %v14569_v57  ;;  %v2305_v57 = vcombine.high %v26_v54, %v26_v54 }
  0xf0   :  { %13203 = vmatpush3.bf16.msra.mxu0 %v14570_v59  ;;  %v14617_v59 = vld [vmem:[%s18837_s1 + $0x840] sm:$0xff]  }
  0xf1   :  { %13204 = vmatprep.subr.bf16.mxu0 %v14572_v61  ;;  %v16359_v61 = vrot.slane %v2305_v57, %v15538_v41  ;;  %v14657_v57 = vld [vmem:[%s18837_s1 + $0xab8] sm:$0xff]  }
  0xf2   :  { %13225 = vmatpush3.bf16.msra.mxu1 %v14571_v60 }
  0xf3   :  { %13226 = vmatprep.subr.bf16.mxu1 %v14573_v62  ;;  %v14618_v62 = vld [vmem:[%s18837_s1 + $0x8c0] sm:$0xff]  }
  0xf4   :  { %13205 = vmatpush3.bf16.msra.mxu0 %v14574_v63  ;;  %v14619_v63 = vld [vmem:[%s18837_s1 + $0x800] sm:$0xff]  }
  0xf5   :  { %13206 = vmatprep.subr.bf16.mxu0 %v14576_v1  ;;  %v2321_v1 = vcombine.high %v16359_v61, %v16359_v61 }
  0xf6   :  { %13227 = vmatpush3.bf16.msra.mxu1 %v14575_v0 }
  0xf7   :  { %13228 = vmatprep.subr.bf16.mxu1 %v14577_v2  ;;  %v14620_v2 = vld [vmem:[%s18837_s1 + $0x880] sm:$0xff]  }
  0xf8   :  { %13207 = vmatpush3.bf16.msra.mxu0 %v14578_v3 }
  0xf9   :  { %13208 = vmatprep.subr.bf16.mxu0 %v14580_v5  ;;  %v14621_v5 = vld [vmem:[%s18837_s1 + $0x978] sm:$0xff]  }
  0xfa   :  { %13229 = vmatpush3.bf16.msra.mxu1 %v14579_v4 }
  0xfb   :  { %13230 = vmatprep.subr.bf16.mxu1 %v14581_v6  ;;  %v14622_v6 = vld [vmem:[%s18837_s1 + $0x9f8] sm:$0xff]  }
  0xfc   :  { %13209 = vmatpush3.bf16.msra.mxu0 %v14582_v7  ;;  %v2349_v7 = vrot.slane %v2321_v1, %v15538_v41 }
  0xfd   :  { %13210 = vmatprep.subr.bf16.mxu0 %v14584_v9  ;;  %v14624_v9 = vld [vmem:[%s18837_s1 + $0x9b8] sm:$0xff]  }
  0xfe   :  { %13231 = vmatpush3.bf16.msra.mxu1 %v14583_v8  ;;  %v14623_v8 = vld [vmem:[%s18837_s1 + $0x938] sm:$0xff]  }
  0xff   :  { %13232 = vmatprep.subr.bf16.mxu1 %v14585_v10 }
 0x100   :  { %13211 = vmatpush3.bf16.msra.mxu0 %v14586_v11  ;;  %v14625_v11 = vld [vmem:[%s18837_s1 + $0x970] sm:$0xff]  }
 0x101   :  { %13240 = vmatprep.subr.bf16.mxu0 %v14589_v14 }
 0x102   :  { %13233 = vmatpush3.bf16.msra.mxu1 %v14587_v12  ;;  %v14626_v12 = vld [vmem:[%s18837_s1 + $0x9f0] sm:$0xff]  }
 0x103   :  { %v12948_v21 = vpop.f32.mrf.mxu0  ;;  %9758 = vmatmul.mubr.bf16.vlgmr.msra.gmra.mxu0 %v2286_v13  ;;  %13262 = vmatprep.subr.bf16.mxu1 %v14590_v15  ;;  %v2353_v13 = vcombine.high %v2349_v7, %v2349_v7  ;;  %v14627_v15 = vld [vmem:[%s18837_s1 + $0x930] sm:$0xff]  }
 0x104   :  { %13241 = vmatpush3.bf16.msra.mxu0 %v14591_v16  ;;  %v12970_v24 = vpop.f32.mrf.mxu1  ;;  %v14628_v16 = vld [vmem:[%s18837_s1 + $0x9b0] sm:$0xff]  }
 0x105   :  { %9798 = vmatmul.mubr.bf16.vlgmr.msra.gmra.mxu1 %v2302_v18  ;;  %v12949_v25 = vpop.f32.mrf.mxu0  ;;  %13242 = vmatprep.subr.bf16.mxu0 %v14593_v19  ;;  %v14629_v19 = vld [vmem:[%s18837_s1 + $0x968] sm:$0xff]  }
 0x106   :  { %13263 = vmatpush3.bf16.msra.mxu1 %v14592_v17  ;;  %v12950_v27 = vadd.f32 %v12949_v25, %v12948_v21  ;;  %v12971_v29 = vpop.f32.mrf.mxu1  ;;  %v14630_v21 = vld [vmem:[%s18837_s1 + $0x9e8] sm:$0xff]  }
 0x107   :  { %v12951_v30 = vpop.f32.mrf.mxu0  ;;  %13264 = vmatprep.subr.bf16.mxu1 %v14594_v20  ;;  %v12972_v33 = vadd.f32 %v12971_v29, %v12970_v24  ;;  %v14631_v24 = vld [vmem:[%s18837_s1 + $0x928] sm:$0xff]  }
 0x108   :  { %v9280_v32 = vadd.f32 %v12950_v27, %v16203_v56  ;;  %13243 = vmatpush3.bf16.msra.mxu0 %v14595_v22  ;;  %v12973_v35 = vpop.f32.mrf.mxu1  ;;  %v2312_v56 = vrot.slane %v26_v54, %v15538_v41  ;;  %v14632_v27 = vld [vmem:[%s18837_s1 + $0x9a8] sm:$0xff]   ;;  %v14633_v30 = vld [vmem:[%s18837_s1 + $0x960] sm:$0xff]   ;;  %v14654_v54 = vld [vmem:[%s18837_s1 + $0xa78] sm:$0xff]  }
 0x109   :  { %v12952_v36 = vpop.f32.mrf.mxu0  ;;  %13244 = vmatprep.subr.bf16.mxu0 %v14597_v26  ;;  %v14636_v35 = vld [vmem:[%s18837_s1 + $0x9a0] sm:$0xff]  }
 0x10a   :  { %v16304_v38 = vadd.f32 %v12972_v33, %v9280_v32  ;;  %13265 = vmatpush3.bf16.msra.mxu1 %v14596_v23  ;;  %v12974_v40 = vpop.f32.mrf.mxu1  ;;  %v2320_v60 = vcombine.high %v2312_v56, %v2312_v56  ;;  %v2328_v4 = vrot.slane %v2312_v56, %v15538_v41  ;;  %v14634_v32 = vld [vmem:[%s18837_s1 + $0x9e0] sm:$0xff]   ;;  %v14637_v36 = vld [vmem:[%s18837_s1 + $0x958] sm:$0xff]  }
 0x10b   :  { %13266 = vmatprep.subr.bf16.mxu1 %v14598_v28  ;;  %v14641_v40 = vld [vmem:[%s18837_s1 + $0x950] sm:$0xff]   ;;  %v14656_v56 = vld [vmem:[%s18837_s1 + $0xa38] sm:$0xff]  }
 0x10c   :  { %13245 = vmatpush3.bf16.msra.mxu0 %v14599_v31  ;;  %v2342_v0 = vrot.slane %v2320_v60, %v15538_v41  ;;  %v2350_v10 = vcombine.high %v2328_v4, %v2328_v4  ;;  %v14659_v60 = vld [vmem:[%s18837_s1 + $0xaf0] sm:$0xff]  }
 0x10d   :  { %13246 = vmatprep.subr.bf16.mxu0 %v14601_v37  ;;  %v14638_v37 = vld [vmem:[%s18837_s1 + $0x9d8] sm:$0xff]  }
 0x10e   :  { %13267 = vmatpush3.bf16.msra.mxu1 %v14600_v34  ;;  %9837 = vmatprep.mubr.bf16.mxu0 %v2342_v0  ;;  %v2352_v3 = vcombine.high %v2342_v0, %v2342_v0  ;;  %v14635_v34 = vld [vmem:[%s18837_s1 + $0x920] sm:$0xff]  }
 0x10f   :  { %13268 = vmatprep.subr.bf16.mxu1 %v14602_v39  ;;  %v14640_v39 = vld [vmem:[%s18837_s1 + $0x998] sm:$0xff]  }
 0x110   :  { %13247 = vmatpush3.bf16.msra.mxu0 %v14603_v42  ;;  %9877 = vmatprep.mubr.bf16.mxu1 %v2352_v3  ;;  %v14642_v42 = vld [vmem:[%s18837_s1 + $0x9d0] sm:$0xff]  }
 0x111   :  { %13248 = vmatprep.subr.bf16.mxu0 %v14605_v44  ;;  %v14644_v44 = vld [vmem:[%s18837_s1 + $0x990] sm:$0xff]  }
 0x112   :  { %13269 = vmatpush3.bf16.msra.mxu1 %v14604_v43  ;;  %v14643_v43 = vld [vmem:[%s18837_s1 + $0x910] sm:$0xff]  }
 0x113   :  { %13270 = vmatprep.subr.bf16.mxu1 %v14606_v45  ;;  %v14645_v45 = vld [vmem:[%s18837_s1 + $0x948] sm:$0xff]  }
 0x114   :  { %13249 = vmatpush3.bf16.msra.mxu0 %v14607_v46  ;;  %v14646_v46 = vld [vmem:[%s18837_s1 + $0x9c8] sm:$0xff]  }
 0x115   :  { %13250 = vmatprep.subr.bf16.mxu0 %v14609_v48  ;;  %v14648_v48 = vld [vmem:[%s18837_s1 + $0x988] sm:$0xff]  }
 0x116   :  { %13271 = vmatpush3.bf16.msra.mxu1 %v14608_v47  ;;  %v14647_v47 = vld [vmem:[%s18837_s1 + $0x908] sm:$0xff]  }
 0x117   :  { %13272 = vmatprep.subr.bf16.mxu1 %v14610_v49  ;;  %v14649_v49 = vld [vmem:[%s18837_s1 + $0x940] sm:$0xff]  }
 0x118   :  { %13251 = vmatpush3.bf16.msra.mxu0 %v14611_v50  ;;  %v14650_v50 = vld [vmem:[%s18837_s1 + $0x9c0] sm:$0xff]  }
 0x119   :  { %13252 = vmatprep.subr.bf16.mxu0 %v14613_v52  ;;  %v14652_v52 = vld [vmem:[%s18837_s1 + $0x980] sm:$0xff]  }
 0x11a   :  { %13273 = vmatpush3.bf16.msra.mxu1 %v14612_v51  ;;  %v14651_v51 = vld [vmem:[%s18837_s1 + $0x900] sm:$0xff]  }
 0x11b   :  { %13274 = vmatprep.subr.bf16.mxu1 %v14614_v53  ;;  %v2335_v53 = vrot.slane %v16359_v61, %v15538_v41 }
 0x11c   :  { %13253 = vmatpush3.bf16.msra.mxu0 %v14615_v55  ;;  %v14655_v55 = vld [vmem:[%s18837_s1 + $0xaf8] sm:$0xff]  }
 0x11d   :  { %13254 = vmatprep.subr.bf16.mxu0 %v14617_v59  ;;  %v14658_v59 = vld [vmem:[%s18837_s1 + $0xa70] sm:$0xff]  }
 0x11e   :  { %13275 = vmatpush3.bf16.msra.mxu1 %v14616_v58  ;;  %v2351_v58 = vcombine.high %v2335_v53, %v2335_v53 }
 0x11f   :  { %13276 = vmatprep.subr.bf16.mxu1 %v14618_v62  ;;  %v14660_v62 = vld [vmem:[%s18837_s1 + $0xa30] sm:$0xff]  }
 0x120   :  { %13255 = vmatpush3.bf16.msra.mxu0 %v14619_v63  ;;  %v14661_v63 = vld [vmem:[%s18837_s1 + $0xab0] sm:$0xff]  }
 0x121   :  { %13284 = vmatprep.subr.bf16.mxu0 %v14621_v5 }
 0x122   :  { %13277 = vmatpush3.bf16.msra.mxu1 %v14620_v2  ;;  %v14662_v2 = vld [vmem:[%s18837_s1 + $0xa68] sm:$0xff]  }
 0x123   :  { %v12992_v14 = vpop.f32.mrf.mxu0  ;;  %9838 = vmatmul.mubr.bf16.vlgmr.msra.gmra.mxu0 %v2328_v4  ;;  %13306 = vmatprep.subr.bf16.mxu1 %v14622_v6  ;;  %v14663_v4 = vld [vmem:[%s18837_s1 + $0xae8] sm:$0xff]  }
 0x124   :  { %13285 = vmatpush3.bf16.msra.mxu0 %v14623_v8  ;;  %9917 = vmatprep.mubr.bf16.mxu0 %v2349_v7  ;;  %v14664_v7 = vld [vmem:[%s18837_s1 + $0xa28] sm:$0xff]  }
 0x125   :  { %v13014_v17 = vpop.f32.mrf.mxu1  ;;  %9878 = vmatmul.mubr.bf16.vlgmr.msra.gmra.mxu1 %v2350_v10  ;;  %v12993_v18 = vpop.f32.mrf.mxu0  ;;  %13286 = vmatprep.subr.bf16.mxu0 %v14625_v11  ;;  %v14665_v10 = vld [vmem:[%s18837_s1 + $0xaa8] sm:$0xff]  }
 0x126   :  { %13307 = vmatpush3.bf16.msra.mxu1 %v14624_v9  ;;  %v12994_v20 = vadd.f32 %v12993_v18, %v12992_v14  ;;  %9957 = vmatprep.mubr.bf16.mxu1 %v2353_v13  ;;  %v14666_v13 = vld [vmem:[%s18837_s1 + $0xa60] sm:$0xff]  }
 0x127   :  { %v13015_v22 = vpop.f32.mrf.mxu1  ;;  %v12995_v23 = vpop.f32.mrf.mxu0  ;;  %13308 = vmatprep.subr.bf16.mxu1 %v14626_v12  ;;  %v14669_v18 = vld [vmem:[%s18837_s1 + $0xaa0] sm:$0xff]  }
 0x128   :  { %v9360_v25 = vadd.f32 %v12994_v20, %v16304_v38  ;;  %v13016_v26 = vadd.f32 %v13015_v22, %v13014_v17  ;;  %13287 = vmatpush3.bf16.msra.mxu0 %v14627_v15  ;;  %v14639_v38 = vld [vmem:[%s18837_s1 + $0x918] sm:$0xff]   ;;  %v14667_v15 = vld [vmem:[%s18837_s1 + $0xae0] sm:$0xff]   ;;  %v14674_v23 = vld [vmem:[%s18837_s1 + $0xa50] sm:$0xff]  }
 0x129   :  { %v13017_v28 = vpop.f32.mrf.mxu1  ;;  %v12996_v29 = vpop.f32.mrf.mxu0  ;;  %13288 = vmatprep.subr.bf16.mxu0 %v14629_v19  ;;  %v14668_v17 = vld [vmem:[%s18837_s1 + $0xa20] sm:$0xff]   ;;  %v14670_v19 = vld [vmem:[%s18837_s1 + $0xa58] sm:$0xff]  }
 0x12a   :  { %v16415_v31 = vadd.f32 %v13016_v26, %v9360_v25  ;;  %13309 = vmatpush3.bf16.msra.mxu1 %v14628_v16  ;;  %v14671_v20 = vld [vmem:[%s18837_s1 + $0xad8] sm:$0xff]   ;;  %v14676_v25 = vld [vmem:[%s18837_s1 + $0xa10] sm:$0xff]   ;;  %v14679_v28 = vld [vmem:[%s18837_s1 + $0xac8] sm:$0xff]  }
 0x12b   :  { %v13018_v33 = vpop.f32.mrf.mxu1  ;;  %13310 = vmatprep.subr.bf16.mxu1 %v14630_v21  ;;  %v14672_v21 = vld [vmem:[%s18837_s1 + $0xa18] sm:$0xff]   ;;  %v14677_v26 = vld [vmem:[%s18837_s1 + $0xa90] sm:$0xff]   ;;  %v14680_v29 = vld [vmem:[%s18837_s1 + $0xa08] sm:$0xff]  }
 0x12c   :  { %13289 = vmatpush3.bf16.msra.mxu0 %v14631_v24  ;;  %v14673_v22 = vld [vmem:[%s18837_s1 + $0xa98] sm:$0xff]   ;;  %v14675_v24 = vld [vmem:[%s18837_s1 + $0xad0] sm:$0xff]  }
 0x12d   :  { %13290 = vmatprep.subr.bf16.mxu0 %v14633_v30  ;;  %v27_v30 = vld [vmem:[%s18836_s0 + $0x28] sm:$0xff] }
 0x12e   :  { %13311 = vmatpush3.bf16.msra.mxu1 %v14632_v27  ;;  %v14678_v27 = vld [vmem:[%s18837_s1 + $0xa48] sm:$0xff]   ;;  %v2354_v33 = vcombine.high %v27_v30, %v27_v30 }
 0x12f   :  { %13312 = vmatprep.subr.bf16.mxu1 %v14634_v32  ;;  %v2361_v32 = vrot.slane %v27_v30, %v15538_v41  ;;  %v14720_v30 = vld [vmem:[%s18837_s1 + $0xcf8] sm:$0xff]  }
 0x130   :  { %13291 = vmatpush3.bf16.msra.mxu0 %v14635_v34  ;;  %v14682_v34 = vld [vmem:[%s18837_s1 + $0xa40] sm:$0xff]  }
 0x131   :  { %13292 = vmatprep.subr.bf16.mxu0 %v14637_v36  ;;  %v2369_v36 = vcombine.high %v2361_v32, %v2361_v32 }
 0x132   :  { %13313 = vmatpush3.bf16.msra.mxu1 %v14636_v35  ;;  %v14683_v35 = vld [vmem:[%s18837_s1 + $0xac0] sm:$0xff]  }
 0x133   :  { %13314 = vmatprep.subr.bf16.mxu1 %v14638_v37  ;;  %v16574_v37 = vrot.slane %v2354_v33, %v15538_v41 }
 0x134   :  { %13293 = vmatpush3.bf16.msra.mxu0 %v14639_v38  ;;  %v14684_v38 = vld [vmem:[%s18837_s1 + $0xa00] sm:$0xff]  }
 0x135   :  { %13294 = vmatprep.subr.bf16.mxu0 %v14641_v40  ;;  %v2391_v40 = vrot.slane %v2369_v36, %v15538_v41 }
 0x136   :  { %13315 = vmatpush3.bf16.msra.mxu1 %v14640_v39  ;;  %v14685_v39 = vld [vmem:[%s18837_s1 + $0xa80] sm:$0xff]  }
 0x137   :  { %13316 = vmatprep.subr.bf16.mxu1 %v14642_v42  ;;  %v2370_v42 = vcombine.high %v16574_v37, %v16574_v37 }
 0x138   :  { %13295 = vmatpush3.bf16.msra.mxu0 %v14643_v43  ;;  %v2377_v43 = vrot.slane %v2361_v32, %v15538_v41  ;;  %v14722_v32 = vld [vmem:[%s18837_s1 + $0xcb8] sm:$0xff]  }
 0x139   :  { %13296 = vmatprep.subr.bf16.mxu0 %v14645_v45  ;;  %v2401_v45 = vcombine.high %v2391_v40, %v2391_v40 }
 0x13a   :  { %13317 = vmatpush3.bf16.msra.mxu1 %v14644_v44  ;;  %v14686_v44 = vld [vmem:[%s18837_s1 + $0xb78] sm:$0xff]  }
 0x13b   :  { %13318 = vmatprep.subr.bf16.mxu1 %v14646_v46  ;;  %v14687_v46 = vld [vmem:[%s18837_s1 + $0xbf8] sm:$0xff]  }
 0x13c   :  { %13297 = vmatpush3.bf16.msra.mxu0 %v14647_v47  ;;  %v2398_v47 = vrot.slane %v2370_v42, %v15538_v41  ;;  %v14727_v42 = vld [vmem:[%s18837_s1 + $0xc68] sm:$0xff]  }
 0x13d   :  { %13298 = vmatprep.subr.bf16.mxu0 %v14649_v49  ;;  %v14689_v49 = vld [vmem:[%s18837_s1 + $0xbb8] sm:$0xff]  }
 0x13e   :  { %13319 = vmatpush3.bf16.msra.mxu1 %v14648_v48  ;;  %v14688_v48 = vld [vmem:[%s18837_s1 + $0xb38] sm:$0xff]  }
 0x13f   :  { %13320 = vmatprep.subr.bf16.mxu1 %v14650_v50  ;;  %v2399_v50 = vcombine.high %v2377_v43, %v2377_v43 }
 0x140   :  { %13299 = vmatpush3.bf16.msra.mxu0 %v14651_v51  ;;  %v14690_v51 = vld [vmem:[%s18837_s1 + $0xb70] sm:$0xff]  }
 0x141   :  { %13328 = vmatprep.subr.bf16.mxu0 %v14654_v54 }
 0x142   :  { %13321 = vmatpush3.bf16.msra.mxu1 %v14652_v52  ;;  %v14691_v52 = vld [vmem:[%s18837_s1 + $0xbf0] sm:$0xff]  }
 0x143   :  { %v13036_v61 = vpop.f32.mrf.mxu0  ;;  %9918 = vmatmul.mubr.bf16.vlgmr.msra.gmra.mxu0 %v2335_v53  ;;  %13350 = vmatprep.subr.bf16.mxu1 %v14655_v55  ;;  %v2402_v53 = vcombine.high %v2398_v47, %v2398_v47  ;;  %v14692_v55 = vld [vmem:[%s18837_s1 + $0xb30] sm:$0xff]  }
 0x144   :  { %13329 = vmatpush3.bf16.msra.mxu0 %v14656_v56  ;;  %9997 = vmatprep.mubr.bf16.mxu0 %v2391_v40  ;;  %v14693_v56 = vld [vmem:[%s18837_s1 + $0xbb0] sm:$0xff]  }
 0x145   :  { %v13058_v0 = vpop.f32.mrf.mxu1  ;;  %9958 = vmatmul.mubr.bf16.vlgmr.msra.gmra.mxu1 %v2351_v58  ;;  %v13037_v1 = vpop.f32.mrf.mxu0  ;;  %13330 = vmatprep.subr.bf16.mxu0 %v14658_v59  ;;  %v14694_v59 = vld [vmem:[%s18837_s1 + $0xb68] sm:$0xff]  }
 0x146   :  { %13351 = vmatpush3.bf16.msra.mxu1 %v14657_v57  ;;  %v13038_v3 = vadd.f32 %v13037_v1, %v13036_v61  ;;  %10037 = vmatprep.mubr.bf16.mxu1 %v2401_v45  ;;  %v14695_v61 = vld [vmem:[%s18837_s1 + $0xbe8] sm:$0xff]  }
 0x147   :  { %v13059_v5 = vpop.f32.mrf.mxu1  ;;  %v13039_v6 = vpop.f32.mrf.mxu0  ;;  %13352 = vmatprep.subr.bf16.mxu1 %v14659_v60 }
 0x148   :  { %v9440_v8 = vadd.f32 %v13038_v3, %v16415_v31  ;;  %v13060_v9 = vadd.f32 %v13059_v5, %v13058_v0  ;;  %13331 = vmatpush3.bf16.msra.mxu0 %v14660_v62  ;;  %v14681_v31 = vld [vmem:[%s18837_s1 + $0xa88] sm:$0xff]   ;;  %v14698_v6 = vld [vmem:[%s18837_s1 + $0xb60] sm:$0xff]  }
 0x149   :  { %v13061_v11 = vpop.f32.mrf.mxu1  ;;  %v13040_v12 = vpop.f32.mrf.mxu0  ;;  %13332 = vmatprep.subr.bf16.mxu0 %v14662_v2  ;;  %v14696_v0 = vld [vmem:[%s18837_s1 + $0xb28] sm:$0xff]  }
 0x14a   :  { %v16516_v14 = vadd.f32 %v13060_v9, %v9440_v8  ;;  %13353 = vmatpush3.bf16.msra.mxu1 %v14661_v63  ;;  %v14697_v3 = vld [vmem:[%s18837_s1 + $0xba8] sm:$0xff]   ;;  %v14699_v8 = vld [vmem:[%s18837_s1 + $0xbe0] sm:$0xff]   ;;  %v14702_v12 = vld [vmem:[%s18837_s1 + $0xb58] sm:$0xff]  }
 0x14b   :  { %v13062_v16 = vpop.f32.mrf.mxu1  ;;  %13354 = vmatprep.subr.bf16.mxu1 %v14663_v4  ;;  %v14701_v11 = vld [vmem:[%s18837_s1 + $0xba0] sm:$0xff]  }
 0x14c   :  { %13333 = vmatpush3.bf16.msra.mxu0 %v14664_v7  ;;  %v14706_v16 = vld [vmem:[%s18837_s1 + $0xb50] sm:$0xff]  }
 0x14d   :  { %13334 = vmatprep.subr.bf16.mxu0 %v14666_v13  ;;  %v14703_v13 = vld [vmem:[%s18837_s1 + $0xbd8] sm:$0xff]  }
 0x14e   :  { %13355 = vmatpush3.bf16.msra.mxu1 %v14665_v10  ;;  %v14700_v10 = vld [vmem:[%s18837_s1 + $0xb20] sm:$0xff]  }
 0x14f   :  { %13356 = vmatprep.subr.bf16.mxu1 %v14667_v15  ;;  %v14705_v15 = vld [vmem:[%s18837_s1 + $0xb98] sm:$0xff]  }
 0x150   :  { %13335 = vmatpush3.bf16.msra.mxu0 %v14668_v17  ;;  %v14707_v17 = vld [vmem:[%s18837_s1 + $0xbd0] sm:$0xff]  }
 0x151   :  { %13336 = vmatprep.subr.bf16.mxu0 %v14670_v19  ;;  %v14709_v19 = vld [vmem:[%s18837_s1 + $0xb90] sm:$0xff]  }
 0x152   :  { %13357 = vmatpush3.bf16.msra.mxu1 %v14669_v18  ;;  %v14708_v18 = vld [vmem:[%s18837_s1 + $0xb10] sm:$0xff]  }
 0x153   :  { %13358 = vmatprep.subr.bf16.mxu1 %v14671_v20  ;;  %v14710_v20 = vld [vmem:[%s18837_s1 + $0xb48] sm:$0xff]  }
 0x154   :  { %13337 = vmatpush3.bf16.msra.mxu0 %v14672_v21  ;;  %v14711_v21 = vld [vmem:[%s18837_s1 + $0xbc8] sm:$0xff]  }
 0x155   :  { %13338 = vmatprep.subr.bf16.mxu0 %v14674_v23  ;;  %v14713_v23 = vld [vmem:[%s18837_s1 + $0xb88] sm:$0xff]  }
 0x156   :  { %13359 = vmatpush3.bf16.msra.mxu1 %v14673_v22  ;;  %v14712_v22 = vld [vmem:[%s18837_s1 + $0xb08] sm:$0xff]  }
 0x157   :  { %13360 = vmatprep.subr.bf16.mxu1 %v14675_v24  ;;  %v14714_v24 = vld [vmem:[%s18837_s1 + $0xb40] sm:$0xff]  }
 0x158   :  { %13339 = vmatpush3.bf16.msra.mxu0 %v14676_v25  ;;  %v14715_v25 = vld [vmem:[%s18837_s1 + $0xbc0] sm:$0xff]  }
 0x159   :  { %13340 = vmatprep.subr.bf16.mxu0 %v14678_v27  ;;  %v14717_v27 = vld [vmem:[%s18837_s1 + $0xb80] sm:$0xff]  }
 0x15a   :  { %13361 = vmatpush3.bf16.msra.mxu1 %v14677_v26  ;;  %v14716_v26 = vld [vmem:[%s18837_s1 + $0xb00] sm:$0xff]  }
 0x15b   :  { %13362 = vmatprep.subr.bf16.mxu1 %v14679_v28  ;;  %v2384_v28 = vrot.slane %v16574_v37, %v15538_v41  ;;  %v14725_v37 = vld [vmem:[%s18837_s1 + $0xc30] sm:$0xff]  }
 0x15c   :  { %13341 = vmatpush3.bf16.msra.mxu0 %v14680_v29  ;;  %v14719_v29 = vld [vmem:[%s18837_s1 + $0xc78] sm:$0xff]  }
 0x15d   :  { %13342 = vmatprep.subr.bf16.mxu0 %v14682_v34  ;;  %v2400_v33 = vcombine.high %v2384_v28, %v2384_v28  ;;  %v14723_v34 = vld [vmem:[%s18837_s1 + $0xc70] sm:$0xff]  }
 0x15e   :  { %13363 = vmatpush3.bf16.msra.mxu1 %v14681_v31  ;;  %v14721_v31 = vld [vmem:[%s18837_s1 + $0xc38] sm:$0xff]  }
 0x15f   :  { %13364 = vmatprep.subr.bf16.mxu1 %v14683_v35  ;;  %v14724_v35 = vld [vmem:[%s18837_s1 + $0xcf0] sm:$0xff]  }
 0x160   :  { %13343 = vmatpush3.bf16.msra.mxu0 %v14684_v38  ;;  %v14726_v38 = vld [vmem:[%s18837_s1 + $0xcb0] sm:$0xff]  }
 0x161   :  { %13372 = vmatprep.subr.bf16.mxu0 %v14686_v44  ;;  %v14728_v44 = vld [vmem:[%s18837_s1 + $0xce8] sm:$0xff]  }
 0x162   :  { %13365 = vmatpush3.bf16.msra.mxu1 %v14685_v39 }
 0x163   :  { %v13080_v54 = vpop.f32.mrf.mxu0  ;;  %9998 = vmatmul.mubr.bf16.vlgmr.msra.gmra.mxu0 %v2377_v43  ;;  %13394 = vmatprep.subr.bf16.mxu1 %v14687_v46 }
 0x164   :  { %13373 = vmatpush3.bf16.msra.mxu0 %v14688_v48  ;;  %10077 = vmatprep.mubr.bf16.mxu0 %v2398_v47  ;;  %v14729_v47 = vld [vmem:[%s18837_s1 + $0xc28] sm:$0xff]  }
 0x165   :  { %v13102_v57 = vpop.f32.mrf.mxu1  ;;  %10038 = vmatmul.mubr.bf16.vlgmr.msra.gmra.mxu1 %v2399_v50  ;;  %v13081_v58 = vpop.f32.mrf.mxu0  ;;  %13374 = vmatprep.subr.bf16.mxu0 %v14690_v51  ;;  %v14730_v50 = vld [vmem:[%s18837_s1 + $0xca8] sm:$0xff]  }
 0x166   :  { %13395 = vmatpush3.bf16.msra.mxu1 %v14689_v49  ;;  %v13082_v60 = vadd.f32 %v13081_v58, %v13080_v54  ;;  %10117 = vmatprep.mubr.bf16.mxu1 %v2402_v53  ;;  %v14731_v53 = vld [vmem:[%s18837_s1 + $0xc60] sm:$0xff]  }
 0x167   :  { %v13103_v62 = vpop.f32.mrf.mxu1  ;;  %v13083_v63 = vpop.f32.mrf.mxu0  ;;  %13396 = vmatprep.subr.bf16.mxu1 %v14691_v52  ;;  %v14734_v58 = vld [vmem:[%s18837_s1 + $0xca0] sm:$0xff]  }
 0x168   :  { %v9520_v1 = vadd.f32 %v13082_v60, %v16516_v14  ;;  %v13104_v2 = vadd.f32 %v13103_v62, %v13102_v57  ;;  %13375 = vmatpush3.bf16.msra.mxu0 %v14692_v55  ;;  %v14704_v14 = vld [vmem:[%s18837_s1 + $0xb18] sm:$0xff]   ;;  %v14732_v55 = vld [vmem:[%s18837_s1 + $0xce0] sm:$0xff]   ;;  %v14739_v63 = vld [vmem:[%s18837_s1 + $0xc50] sm:$0xff]  }
 0x169   :  { %v13105_v4 = vpop.f32.mrf.mxu1  ;;  %v13084_v5 = vpop.f32.mrf.mxu0  ;;  %13376 = vmatprep.subr.bf16.mxu0 %v14694_v59  ;;  %v14733_v57 = vld [vmem:[%s18837_s1 + $0xc20] sm:$0xff]   ;;  %v14735_v59 = vld [vmem:[%s18837_s1 + $0xc58] sm:$0xff]  }
 0x16a   :  { %v16627_v7 = vadd.f32 %v13104_v2, %v9520_v1  ;;  %13397 = vmatpush3.bf16.msra.mxu1 %v14693_v56  ;;  %v14736_v60 = vld [vmem:[%s18837_s1 + $0xcd8] sm:$0xff]   ;;  %v14741_v1 = vld [vmem:[%s18837_s1 + $0xc10] sm:$0xff]   ;;  %v14744_v4 = vld [vmem:[%s18837_s1 + $0xcc8] sm:$0xff]  }
 0x16b   :  { %v13106_v9 = vpop.f32.mrf.mxu1  ;;  %13398 = vmatprep.subr.bf16.mxu1 %v14695_v61  ;;  %v14737_v61 = vld [vmem:[%s18837_s1 + $0xc18] sm:$0xff]   ;;  %v14742_v2 = vld [vmem:[%s18837_s1 + $0xc90] sm:$0xff]   ;;  %v14745_v5 = vld [vmem:[%s18837_s1 + $0xc08] sm:$0xff]  }
 0x16c   :  { %13377 = vmatpush3.bf16.msra.mxu0 %v14696_v0  ;;  %v14738_v62 = vld [vmem:[%s18837_s1 + $0xc98] sm:$0xff]   ;;  %v14740_v0 = vld [vmem:[%s18837_s1 + $0xcd0] sm:$0xff]  }
 0x16d   :  { %13378 = vmatprep.subr.bf16.mxu0 %v14698_v6  ;;  %v28_v6 = vld [vmem:[%s18836_s0 + $0x30] sm:$0xff] }
 0x16e   :  { %13399 = vmatpush3.bf16.msra.mxu1 %v14697_v3  ;;  %v14743_v3 = vld [vmem:[%s18837_s1 + $0xc48] sm:$0xff]   ;;  %v2403_v9 = vcombine.high %v28_v6, %v28_v6 }
 0x16f   :  { %13400 = vmatprep.subr.bf16.mxu1 %v14699_v8  ;;  %v2410_v8 = vrot.slane %v28_v6, %v15538_v41  ;;  %v14785_v6 = vld [vmem:[%s18837_s1 + $0xef8] sm:$0xff]  }
 0x170   :  { %13379 = vmatpush3.bf16.msra.mxu0 %v14700_v10  ;;  %v14747_v10 = vld [vmem:[%s18837_s1 + $0xc40] sm:$0xff]  }
 0x171   :  { %13380 = vmatprep.subr.bf16.mxu0 %v14702_v12  ;;  %v2418_v12 = vcombine.high %v2410_v8, %v2410_v8 }
 0x172   :  { %13401 = vmatpush3.bf16.msra.mxu1 %v14701_v11  ;;  %v14748_v11 = vld [vmem:[%s18837_s1 + $0xcc0] sm:$0xff]  }
 0x173   :  { %13402 = vmatprep.subr.bf16.mxu1 %v14703_v13  ;;  %v16786_v13 = vrot.slane %v2403_v9, %v15538_v41 }
 0x174   :  { %13381 = vmatpush3.bf16.msra.mxu0 %v14704_v14  ;;  %v14749_v14 = vld [vmem:[%s18837_s1 + $0xc00] sm:$0xff]  }
 0x175   :  { %13382 = vmatprep.subr.bf16.mxu0 %v14706_v16  ;;  %v2440_v16 = vrot.slane %v2418_v12, %v15538_v41 }
 0x176   :  { %13403 = vmatpush3.bf16.msra.mxu1 %v14705_v15  ;;  %v14750_v15 = vld [vmem:[%s18837_s1 + $0xc80] sm:$0xff]  }
 0x177   :  { %13404 = vmatprep.subr.bf16.mxu1 %v14707_v17  ;;  %v2419_v17 = vcombine.high %v16786_v13, %v16786_v13 }
 0x178   :  { %13383 = vmatpush3.bf16.msra.mxu0 %v14708_v18  ;;  %v2426_v18 = vrot.slane %v2410_v8, %v15538_v41  ;;  %v14787_v8 = vld [vmem:[%s18837_s1 + $0xeb8] sm:$0xff]  }
 0x179   :  { %13384 = vmatprep.subr.bf16.mxu0 %v14710_v20  ;;  %v2450_v20 = vcombine.high %v2440_v16, %v2440_v16 }
 0x17a   :  { %13405 = vmatpush3.bf16.msra.mxu1 %v14709_v19  ;;  %v14751_v19 = vld [vmem:[%s18837_s1 + $0xd78] sm:$0xff]  }
 0x17b   :  { %13406 = vmatprep.subr.bf16.mxu1 %v14711_v21  ;;  %v14752_v21 = vld [vmem:[%s18837_s1 + $0xdf8] sm:$0xff]  }
 0x17c   :  { %13385 = vmatpush3.bf16.msra.mxu0 %v14712_v22  ;;  %v2447_v22 = vrot.slane %v2419_v17, %v15538_v41  ;;  %v14792_v17 = vld [vmem:[%s18837_s1 + $0xe68] sm:$0xff]  }
 0x17d   :  { %13386 = vmatprep.subr.bf16.mxu0 %v14714_v24  ;;  %v14754_v24 = vld [vmem:[%s18837_s1 + $0xdb8] sm:$0xff]  }
 0x17e   :  { %13407 = vmatpush3.bf16.msra.mxu1 %v14713_v23  ;;  %v14753_v23 = vld [vmem:[%s18837_s1 + $0xd38] sm:$0xff]  }
 0x17f   :  { %13408 = vmatprep.subr.bf16.mxu1 %v14715_v25  ;;  %v2448_v25 = vcombine.high %v2426_v18, %v2426_v18 }
 0x180   :  { %13387 = vmatpush3.bf16.msra.mxu0 %v14716_v26  ;;  %v14755_v26 = vld [vmem:[%s18837_s1 + $0xd70] sm:$0xff]  }
 0x181   :  { %13416 = vmatprep.subr.bf16.mxu0 %v14719_v29 }
 0x182   :  { %13409 = vmatpush3.bf16.msra.mxu1 %v14717_v27  ;;  %v14756_v27 = vld [vmem:[%s18837_s1 + $0xdf0] sm:$0xff]  }
 0x183   :  { %v13124_v36 = vpop.f32.mrf.mxu0  ;;  %10078 = vmatmul.mubr.bf16.vlgmr.msra.gmra.mxu0 %v2384_v28  ;;  %13438 = vmatprep.subr.bf16.mxu1 %v14720_v30  ;;  %v2451_v28 = vcombine.high %v2447_v22, %v2447_v22  ;;  %v14757_v30 = vld [vmem:[%s18837_s1 + $0xd30] sm:$0xff]  }
 0x184   :  { %13417 = vmatpush3.bf16.msra.mxu0 %v14721_v31  ;;  %10157 = vmatprep.mubr.bf16.mxu0 %v2440_v16  ;;  %v14758_v31 = vld [vmem:[%s18837_s1 + $0xdb0] sm:$0xff]  }
 0x185   :  { %v13146_v39 = vpop.f32.mrf.mxu1  ;;  %10118 = vmatmul.mubr.bf16.vlgmr.msra.gmra.mxu1 %v2400_v33  ;;  %v13125_v40 = vpop.f32.mrf.mxu0  ;;  %13418 = vmatprep.subr.bf16.mxu0 %v14723_v34  ;;  %v14759_v34 = vld [vmem:[%s18837_s1 + $0xd68] sm:$0xff]  }
 0x186   :  { %13439 = vmatpush3.bf16.msra.mxu1 %v14722_v32  ;;  %v13126_v43 = vadd.f32 %v13125_v40, %v13124_v36  ;;  %10197 = vmatprep.mubr.bf16.mxu1 %v2450_v20  ;;  %v14760_v36 = vld [vmem:[%s18837_s1 + $0xde8] sm:$0xff]  }
 0x187   :  { %v13147_v45 = vpop.f32.mrf.mxu1  ;;  %v13127_v46 = vpop.f32.mrf.mxu0  ;;  %13440 = vmatprep.subr.bf16.mxu1 %v14724_v35 }
 0x188   :  { %v9600_v48 = vadd.f32 %v13126_v43, %v16627_v7  ;;  %v13148_v49 = vadd.f32 %v13147_v45, %v13146_v39  ;;  %13419 = vmatpush3.bf16.msra.mxu0 %v14725_v37  ;;  %v14746_v7 = vld [vmem:[%s18837_s1 + $0xc88] sm:$0xff]   ;;  %v14763_v46 = vld [vmem:[%s18837_s1 + $0xd60] sm:$0xff]  }
 0x189   :  { %v13149_v51 = vpop.f32.mrf.mxu1  ;;  %v13128_v52 = vpop.f32.mrf.mxu0  ;;  %13420 = vmatprep.subr.bf16.mxu0 %v14727_v42  ;;  %v14761_v39 = vld [vmem:[%s18837_s1 + $0xd28] sm:$0xff]  }
 0x18a   :  { %v16728_v54 = vadd.f32 %v13148_v49, %v9600_v48  ;;  %13441 = vmatpush3.bf16.msra.mxu1 %v14726_v38  ;;  %v14762_v43 = vld [vmem:[%s18837_s1 + $0xda8] sm:$0xff]   ;;  %v14764_v48 = vld [vmem:[%s18837_s1 + $0xde0] sm:$0xff]   ;;  %v14767_v52 = vld [vmem:[%s18837_s1 + $0xd58] sm:$0xff]  }
 0x18b   :  { %v13150_v56 = vpop.f32.mrf.mxu1  ;;  %13442 = vmatprep.subr.bf16.mxu1 %v14728_v44  ;;  %v14766_v51 = vld [vmem:[%s18837_s1 + $0xda0] sm:$0xff]  }
 0x18c   :  { %13421 = vmatpush3.bf16.msra.mxu0 %v14729_v47  ;;  %v14771_v56 = vld [vmem:[%s18837_s1 + $0xd50] sm:$0xff]  }
 0x18d   :  { %13422 = vmatprep.subr.bf16.mxu0 %v14731_v53  ;;  %v14768_v53 = vld [vmem:[%s18837_s1 + $0xdd8] sm:$0xff]  }
 0x18e   :  { %13443 = vmatpush3.bf16.msra.mxu1 %v14730_v50  ;;  %v14765_v50 = vld [vmem:[%s18837_s1 + $0xd20] sm:$0xff]  }
 0x18f   :  { %13444 = vmatprep.subr.bf16.mxu1 %v14732_v55  ;;  %v14770_v55 = vld [vmem:[%s18837_s1 + $0xd98] sm:$0xff]  }
 0x190   :  { %13423 = vmatpush3.bf16.msra.mxu0 %v14733_v57  ;;  %v14772_v57 = vld [vmem:[%s18837_s1 + $0xdd0] sm:$0xff]  }
 0x191   :  { %13424 = vmatprep.subr.bf16.mxu0 %v14735_v59  ;;  %v14774_v59 = vld [vmem:[%s18837_s1 + $0xd90] sm:$0xff]  }
 0x192   :  { %13445 = vmatpush3.bf16.msra.mxu1 %v14734_v58  ;;  %v14773_v58 = vld [vmem:[%s18837_s1 + $0xd10] sm:$0xff]  }
 0x193   :  { %13446 = vmatprep.subr.bf16.mxu1 %v14736_v60  ;;  %v14775_v60 = vld [vmem:[%s18837_s1 + $0xd48] sm:$0xff]  }
 0x194   :  { %13425 = vmatpush3.bf16.msra.mxu0 %v14737_v61  ;;  %v14776_v61 = vld [vmem:[%s18837_s1 + $0xdc8] sm:$0xff]  }
 0x195   :  { %13426 = vmatprep.subr.bf16.mxu0 %v14739_v63  ;;  %v14778_v63 = vld [vmem:[%s18837_s1 + $0xd88] sm:$0xff]  }
 0x196   :  { %13447 = vmatpush3.bf16.msra.mxu1 %v14738_v62  ;;  %v14777_v62 = vld [vmem:[%s18837_s1 + $0xd08] sm:$0xff]  }
 0x197   :  { %13448 = vmatprep.subr.bf16.mxu1 %v14740_v0  ;;  %v14779_v0 = vld [vmem:[%s18837_s1 + $0xd40] sm:$0xff]  }
 0x198   :  { %13427 = vmatpush3.bf16.msra.mxu0 %v14741_v1  ;;  %v14780_v1 = vld [vmem:[%s18837_s1 + $0xdc0] sm:$0xff]  }
 0x199   :  { %13428 = vmatprep.subr.bf16.mxu0 %v14743_v3  ;;  %v14782_v3 = vld [vmem:[%s18837_s1 + $0xd80] sm:$0xff]  }
 0x19a   :  { %13449 = vmatpush3.bf16.msra.mxu1 %v14742_v2  ;;  %v14781_v2 = vld [vmem:[%s18837_s1 + $0xd00] sm:$0xff]  }
 0x19b   :  { %13450 = vmatprep.subr.bf16.mxu1 %v14744_v4  ;;  %v2433_v4 = vrot.slane %v16786_v13, %v15538_v41  ;;  %v14790_v13 = vld [vmem:[%s18837_s1 + $0xe30] sm:$0xff]  }
 0x19c   :  { %13429 = vmatpush3.bf16.msra.mxu0 %v14745_v5  ;;  %v14784_v5 = vld [vmem:[%s18837_s1 + $0xe78] sm:$0xff]  }
 0x19d   :  { %13430 = vmatprep.subr.bf16.mxu0 %v14747_v10  ;;  %v2449_v9 = vcombine.high %v2433_v4, %v2433_v4  ;;  %v14788_v10 = vld [vmem:[%s18837_s1 + $0xe70] sm:$0xff]  }
 0x19e   :  { %13451 = vmatpush3.bf16.msra.mxu1 %v14746_v7  ;;  %v14786_v7 = vld [vmem:[%s18837_s1 + $0xe38] sm:$0xff]  }
 0x19f   :  { %13452 = vmatprep.subr.bf16.mxu1 %v14748_v11  ;;  %v14789_v11 = vld [vmem:[%s18837_s1 + $0xef0] sm:$0xff]  }
 0x1a0   :  { %13431 = vmatpush3.bf16.msra.mxu0 %v14749_v14  ;;  %v14791_v14 = vld [vmem:[%s18837_s1 + $0xeb0] sm:$0xff]  }
 0x1a1   :  { %13460 = vmatprep.subr.bf16.mxu0 %v14751_v19  ;;  %v14793_v19 = vld [vmem:[%s18837_s1 + $0xee8] sm:$0xff]  }
 0x1a2   :  { %13453 = vmatpush3.bf16.msra.mxu1 %v14750_v15 }
 0x1a3   :  { %v13168_v29 = vpop.f32.mrf.mxu0  ;;  %10158 = vmatmul.mubr.bf16.vlgmr.msra.gmra.mxu0 %v2426_v18  ;;  %13482 = vmatprep.subr.bf16.mxu1 %v14752_v21 }
 0x1a4   :  { %13461 = vmatpush3.bf16.msra.mxu0 %v14753_v23  ;;  %10237 = vmatprep.mubr.bf16.mxu0 %v2447_v22  ;;  %v14794_v22 = vld [vmem:[%s18837_s1 + $0xe28] sm:$0xff]  }
 0x1a5   :  { %v13190_v32 = vpop.f32.mrf.mxu1  ;;  %10198 = vmatmul.mubr.bf16.vlgmr.msra.gmra.mxu1 %v2448_v25  ;;  %v13169_v33 = vpop.f32.mrf.mxu0  ;;  %13462 = vmatprep.subr.bf16.mxu0 %v14755_v26  ;;  %v14795_v25 = vld [vmem:[%s18837_s1 + $0xea8] sm:$0xff]  }
 0x1a6   :  { %13483 = vmatpush3.bf16.msra.mxu1 %v14754_v24  ;;  %v13170_v35 = vadd.f32 %v13169_v33, %v13168_v29  ;;  %10277 = vmatprep.mubr.bf16.mxu1 %v2451_v28  ;;  %v14796_v28 = vld [vmem:[%s18837_s1 + $0xe60] sm:$0xff]  }
 0x1a7   :  { %v13191_v37 = vpop.f32.mrf.mxu1  ;;  %v13171_v38 = vpop.f32.mrf.mxu0  ;;  %13484 = vmatprep.subr.bf16.mxu1 %v14756_v27  ;;  %v14799_v33 = vld [vmem:[%s18837_s1 + $0xea0] sm:$0xff]  }
 0x1a8   :  { %v9680_v40 = vadd.f32 %v13170_v35, %v16728_v54  ;;  %v13192_v42 = vadd.f32 %v13191_v37, %v13190_v32  ;;  %13463 = vmatpush3.bf16.msra.mxu0 %v14757_v30  ;;  %v14769_v54 = vld [vmem:[%s18837_s1 + $0xd18] sm:$0xff]   ;;  %v14797_v30 = vld [vmem:[%s18837_s1 + $0xee0] sm:$0xff]   ;;  %v14804_v38 = vld [vmem:[%s18837_s1 + $0xe50] sm:$0xff]  }
 0x1a9   :  { %v13193_v44 = vpop.f32.mrf.mxu1  ;;  %v13172_v45 = vpop.f32.mrf.mxu0  ;;  %13464 = vmatprep.subr.bf16.mxu0 %v14759_v34  ;;  %v14798_v32 = vld [vmem:[%s18837_s1 + $0xe20] sm:$0xff]   ;;  %v14800_v34 = vld [vmem:[%s18837_s1 + $0xe58] sm:$0xff]  }
 0x1aa   :  { %v16839_v47 = vadd.f32 %v13192_v42, %v9680_v40  ;;  %13485 = vmatpush3.bf16.msra.mxu1 %v14758_v31  ;;  %v14801_v35 = vld [vmem:[%s18837_s1 + $0xed8] sm:$0xff]   ;;  %v14806_v40 = vld [vmem:[%s18837_s1 + $0xe10] sm:$0xff]   ;;  %v14809_v44 = vld [vmem:[%s18837_s1 + $0xec8] sm:$0xff]  }
 0x1ab   :  { %v13194_v49 = vpop.f32.mrf.mxu1  ;;  %13486 = vmatprep.subr.bf16.mxu1 %v14760_v36  ;;  %v14802_v36 = vld [vmem:[%s18837_s1 + $0xe18] sm:$0xff]   ;;  %v14807_v42 = vld [vmem:[%s18837_s1 + $0xe90] sm:$0xff]   ;;  %v14810_v45 = vld [vmem:[%s18837_s1 + $0xe08] sm:$0xff]  }
 0x1ac   :  { %13465 = vmatpush3.bf16.msra.mxu0 %v14761_v39  ;;  %v14803_v37 = vld [vmem:[%s18837_s1 + $0xe98] sm:$0xff]   ;;  %v14805_v39 = vld [vmem:[%s18837_s1 + $0xed0] sm:$0xff]  }
 0x1ad   :  { %13466 = vmatprep.subr.bf16.mxu0 %v14763_v46  ;;  %v29_v46 = vld [vmem:[%s18836_s0 + $0x38] sm:$0xff] }
 0x1ae   :  { %13487 = vmatpush3.bf16.msra.mxu1 %v14762_v43  ;;  %v14808_v43 = vld [vmem:[%s18837_s1 + $0xe48] sm:$0xff]   ;;  %v2452_v49 = vcombine.high %v29_v46, %v29_v46 }
 0x1af   :  { %13488 = vmatprep.subr.bf16.mxu1 %v14764_v48  ;;  %v2459_v48 = vrot.slane %v29_v46, %v15538_v41  ;;  %v14850_v46 = vld [vmem:[%s18837_s1 + $0x10f8] sm:$0xff]  }
 0x1b0   :  { %13467 = vmatpush3.bf16.msra.mxu0 %v14765_v50  ;;  %v14812_v50 = vld [vmem:[%s18837_s1 + $0xe40] sm:$0xff]  }
 0x1b1   :  { %13468 = vmatprep.subr.bf16.mxu0 %v14767_v52  ;;  %v2467_v52 = vcombine.high %v2459_v48, %v2459_v48 }
 0x1b2   :  { %13489 = vmatpush3.bf16.msra.mxu1 %v14766_v51  ;;  %v14813_v51 = vld [vmem:[%s18837_s1 + $0xec0] sm:$0xff]  }
 0x1b3   :  { %13490 = vmatprep.subr.bf16.mxu1 %v14768_v53  ;;  %v16998_v53 = vrot.slane %v2452_v49, %v15538_v41 }
 0x1b4   :  { %13469 = vmatpush3.bf16.msra.mxu0 %v14769_v54  ;;  %v14814_v54 = vld [vmem:[%s18837_s1 + $0xe00] sm:$0xff]  }
 0x1b5   :  { %13470 = vmatprep.subr.bf16.mxu0 %v14771_v56  ;;  %v2489_v56 = vrot.slane %v2467_v52, %v15538_v41 }
 0x1b6   :  { %13491 = vmatpush3.bf16.msra.mxu1 %v14770_v55  ;;  %v14815_v55 = vld [vmem:[%s18837_s1 + $0xe80] sm:$0xff]  }
 0x1b7   :  { %13492 = vmatprep.subr.bf16.mxu1 %v14772_v57  ;;  %v2468_v57 = vcombine.high %v16998_v53, %v16998_v53 }
 0x1b8   :  { %13471 = vmatpush3.bf16.msra.mxu0 %v14773_v58  ;;  %v2475_v58 = vrot.slane %v2459_v48, %v15538_v41  ;;  %v14852_v48 = vld [vmem:[%s18837_s1 + $0x10b8] sm:$0xff]  }
 0x1b9   :  { %13472 = vmatprep.subr.bf16.mxu0 %v14775_v60  ;;  %v2499_v60 = vcombine.high %v2489_v56, %v2489_v56 }
 0x1ba   :  { %13493 = vmatpush3.bf16.msra.mxu1 %v14774_v59  ;;  %v14816_v59 = vld [vmem:[%s18837_s1 + $0xf78] sm:$0xff]  }
 0x1bb   :  { %13494 = vmatprep.subr.bf16.mxu1 %v14776_v61  ;;  %v14817_v61 = vld [vmem:[%s18837_s1 + $0xff8] sm:$0xff]  }
 0x1bc   :  { %13473 = vmatpush3.bf16.msra.mxu0 %v14777_v62  ;;  %v2496_v62 = vrot.slane %v2468_v57, %v15538_v41  ;;  %v14857_v57 = vld [vmem:[%s18837_s1 + $0x1068] sm:$0xff]  }
 0x1bd   :  { %13474 = vmatprep.subr.bf16.mxu0 %v14779_v0  ;;  %v14819_v0 = vld [vmem:[%s18837_s1 + $0xfb8] sm:$0xff]  }
 0x1be   :  { %13495 = vmatpush3.bf16.msra.mxu1 %v14778_v63  ;;  %v14818_v63 = vld [vmem:[%s18837_s1 + $0xf38] sm:$0xff]  }
 0x1bf   :  { %13496 = vmatprep.subr.bf16.mxu1 %v14780_v1  ;;  %v2497_v1 = vcombine.high %v2475_v58, %v2475_v58 }
 0x1c0   :  { %13475 = vmatpush3.bf16.msra.mxu0 %v14781_v2  ;;  %v14820_v2 = vld [vmem:[%s18837_s1 + $0xf70] sm:$0xff]  }
 0x1c1   :  { %13504 = vmatprep.subr.bf16.mxu0 %v14784_v5 }
 0x1c2   :  { %13497 = vmatpush3.bf16.msra.mxu1 %v14782_v3  ;;  %v14821_v3 = vld [vmem:[%s18837_s1 + $0xff0] sm:$0xff]  }
 0x1c3   :  { %v13212_v12 = vpop.f32.mrf.mxu0  ;;  %10238 = vmatmul.mubr.bf16.vlgmr.msra.gmra.mxu0 %v2433_v4  ;;  %13526 = vmatprep.subr.bf16.mxu1 %v14785_v6  ;;  %v2500_v4 = vcombine.high %v2496_v62, %v2496_v62  ;;  %v14822_v6 = vld [vmem:[%s18837_s1 + $0xf30] sm:$0xff]  }
 0x1c4   :  { %13505 = vmatpush3.bf16.msra.mxu0 %v14786_v7  ;;  %10317 = vmatprep.mubr.bf16.mxu0 %v2489_v56  ;;  %v14823_v7 = vld [vmem:[%s18837_s1 + $0xfb0] sm:$0xff]  }
 0x1c5   :  { %v13234_v15 = vpop.f32.mrf.mxu1  ;;  %10278 = vmatmul.mubr.bf16.vlgmr.msra.gmra.mxu1 %v2449_v9  ;;  %v13213_v16 = vpop.f32.mrf.mxu0  ;;  %13506 = vmatprep.subr.bf16.mxu0 %v14788_v10  ;;  %v14824_v10 = vld [vmem:[%s18837_s1 + $0xf68] sm:$0xff]  }
 0x1c6   :  { %13527 = vmatpush3.bf16.msra.mxu1 %v14787_v8  ;;  %v13214_v18 = vadd.f32 %v13213_v16, %v13212_v12  ;;  %10357 = vmatprep.mubr.bf16.mxu1 %v2499_v60  ;;  %v14825_v12 = vld [vmem:[%s18837_s1 + $0xfe8] sm:$0xff]  }
 0x1c7   :  { %v13235_v20 = vpop.f32.mrf.mxu1  ;;  %v13215_v21 = vpop.f32.mrf.mxu0  ;;  %13528 = vmatprep.subr.bf16.mxu1 %v14789_v11 }
 0x1c8   :  { %v9760_v23 = vadd.f32 %v13214_v18, %v16839_v47  ;;  %v13236_v24 = vadd.f32 %v13235_v20, %v13234_v15  ;;  %13507 = vmatpush3.bf16.msra.mxu0 %v14790_v13  ;;  %v14811_v47 = vld [vmem:[%s18837_s1 + $0xe88] sm:$0xff]   ;;  %v14828_v21 = vld [vmem:[%s18837_s1 + $0xf60] sm:$0xff]  }
 0x1c9   :  { %v13237_v26 = vpop.f32.mrf.mxu1  ;;  %v13216_v27 = vpop.f32.mrf.mxu0  ;;  %13508 = vmatprep.subr.bf16.mxu0 %v14792_v17  ;;  %v14826_v15 = vld [vmem:[%s18837_s1 + $0xf28] sm:$0xff]  }
 0x1ca   :  { %v16940_v29 = vadd.f32 %v13236_v24, %v9760_v23  ;;  %13529 = vmatpush3.bf16.msra.mxu1 %v14791_v14  ;;  %v14827_v18 = vld [vmem:[%s18837_s1 + $0xfa8] sm:$0xff]   ;;  %v14829_v23 = vld [vmem:[%s18837_s1 + $0xfe0] sm:$0xff]   ;;  %v14832_v27 = vld [vmem:[%s18837_s1 + $0xf58] sm:$0xff]  }
 0x1cb   :  { %v13238_v31 = vpop.f32.mrf.mxu1  ;;  %13530 = vmatprep.subr.bf16.mxu1 %v14793_v19  ;;  %v14831_v26 = vld [vmem:[%s18837_s1 + $0xfa0] sm:$0xff]  }
 0x1cc   :  { %13509 = vmatpush3.bf16.msra.mxu0 %v14794_v22  ;;  %v14836_v31 = vld [vmem:[%s18837_s1 + $0xf50] sm:$0xff]  }
 0x1cd   :  { %13510 = vmatprep.subr.bf16.mxu0 %v14796_v28  ;;  %v14833_v28 = vld [vmem:[%s18837_s1 + $0xfd8] sm:$0xff]  }
 0x1ce   :  { %13531 = vmatpush3.bf16.msra.mxu1 %v14795_v25  ;;  %v14830_v25 = vld [vmem:[%s18837_s1 + $0xf20] sm:$0xff]  }
 0x1cf   :  { %13532 = vmatprep.subr.bf16.mxu1 %v14797_v30  ;;  %v14835_v30 = vld [vmem:[%s18837_s1 + $0xf98] sm:$0xff]  }
 0x1d0   :  { %13511 = vmatpush3.bf16.msra.mxu0 %v14798_v32  ;;  %v14837_v32 = vld [vmem:[%s18837_s1 + $0xfd0] sm:$0xff]  }
 0x1d1   :  { %13512 = vmatprep.subr.bf16.mxu0 %v14800_v34  ;;  %v14839_v34 = vld [vmem:[%s18837_s1 + $0xf90] sm:$0xff]  }
 0x1d2   :  { %13533 = vmatpush3.bf16.msra.mxu1 %v14799_v33  ;;  %v14838_v33 = vld [vmem:[%s18837_s1 + $0xf10] sm:$0xff]  }
 0x1d3   :  { %13534 = vmatprep.subr.bf16.mxu1 %v14801_v35  ;;  %v14840_v35 = vld [vmem:[%s18837_s1 + $0xf48] sm:$0xff]  }
 0x1d4   :  { %13513 = vmatpush3.bf16.msra.mxu0 %v14802_v36  ;;  %v14841_v36 = vld [vmem:[%s18837_s1 + $0xfc8] sm:$0xff]  }
 0x1d5   :  { %13514 = vmatprep.subr.bf16.mxu0 %v14804_v38  ;;  %v14843_v38 = vld [vmem:[%s18837_s1 + $0xf88] sm:$0xff]  }
 0x1d6   :  { %13535 = vmatpush3.bf16.msra.mxu1 %v14803_v37  ;;  %v14842_v37 = vld [vmem:[%s18837_s1 + $0xf08] sm:$0xff]  }
 0x1d7   :  { %13536 = vmatprep.subr.bf16.mxu1 %v14805_v39  ;;  %v14844_v39 = vld [vmem:[%s18837_s1 + $0xf40] sm:$0xff]  }
 0x1d8   :  { %13515 = vmatpush3.bf16.msra.mxu0 %v14806_v40  ;;  %v14845_v40 = vld [vmem:[%s18837_s1 + $0xfc0] sm:$0xff]  }
 0x1d9   :  { %13516 = vmatprep.subr.bf16.mxu0 %v14808_v43  ;;  %v14847_v43 = vld [vmem:[%s18837_s1 + $0xf80] sm:$0xff]  }
 0x1da   :  { %13537 = vmatpush3.bf16.msra.mxu1 %v14807_v42  ;;  %v14846_v42 = vld [vmem:[%s18837_s1 + $0xf00] sm:$0xff]  }
 0x1db   :  { %13538 = vmatprep.subr.bf16.mxu1 %v14809_v44  ;;  %v2482_v44 = vrot.slane %v16998_v53, %v15538_v41  ;;  %v14855_v53 = vld [vmem:[%s18837_s1 + $0x1030] sm:$0xff]  }
 0x1dc   :  { %13517 = vmatpush3.bf16.msra.mxu0 %v14810_v45  ;;  %v14849_v45 = vld [vmem:[%s18837_s1 + $0x1078] sm:$0xff]  }
 0x1dd   :  { %13518 = vmatprep.subr.bf16.mxu0 %v14812_v50  ;;  %v2498_v49 = vcombine.high %v2482_v44, %v2482_v44  ;;  %v14853_v50 = vld [vmem:[%s18837_s1 + $0x1070] sm:$0xff]  }
 0x1de   :  { %13539 = vmatpush3.bf16.msra.mxu1 %v14811_v47  ;;  %v14851_v47 = vld [vmem:[%s18837_s1 + $0x1038] sm:$0xff]  }
 0x1df   :  { %13540 = vmatprep.subr.bf16.mxu1 %v14813_v51  ;;  %v14854_v51 = vld [vmem:[%s18837_s1 + $0x10f0] sm:$0xff]  }
 0x1e0   :  { %13519 = vmatpush3.bf16.msra.mxu0 %v14814_v54  ;;  %v14856_v54 = vld [vmem:[%s18837_s1 + $0x10b0] sm:$0xff]  }
 0x1e1   :  { %13548 = vmatprep.subr.bf16.mxu0 %v14816_v59  ;;  %v14858_v59 = vld [vmem:[%s18837_s1 + $0x10e8] sm:$0xff]  }
 0x1e2   :  { %13541 = vmatpush3.bf16.msra.mxu1 %v14815_v55 }
 0x1e3   :  { %v13256_v5 = vpop.f32.mrf.mxu0  ;;  %10318 = vmatmul.mubr.bf16.vlgmr.msra.gmra.mxu0 %v2475_v58  ;;  %13570 = vmatprep.subr.bf16.mxu1 %v14817_v61 }
 0x1e4   :  { %13549 = vmatpush3.bf16.msra.mxu0 %v14818_v63  ;;  %10397 = vmatprep.mubr.bf16.mxu0 %v2496_v62  ;;  %v14859_v62 = vld [vmem:[%s18837_s1 + $0x1028] sm:$0xff]  }
 0x1e5   :  { %v13278_v8 = vpop.f32.mrf.mxu1  ;;  %10358 = vmatmul.mubr.bf16.vlgmr.msra.gmra.mxu1 %v2497_v1  ;;  %v13257_v9 = vpop.f32.mrf.mxu0  ;;  %13550 = vmatprep.subr.bf16.mxu0 %v14820_v2  ;;  %v14860_v1 = vld [vmem:[%s18837_s1 + $0x10a8] sm:$0xff]  }
 0x1e6   :  { %13571 = vmatpush3.bf16.msra.mxu1 %v14819_v0  ;;  %v13258_v11 = vadd.f32 %v13257_v9, %v13256_v5  ;;  %10437 = vmatprep.mubr.bf16.mxu1 %v2500_v4  ;;  %v14861_v4 = vld [vmem:[%s18837_s1 + $0x1060] sm:$0xff]  }
 0x1e7   :  { %v13279_v13 = vpop.f32.mrf.mxu1  ;;  %v13259_v14 = vpop.f32.mrf.mxu0  ;;  %13572 = vmatprep.subr.bf16.mxu1 %v14821_v3  ;;  %v14864_v9 = vld [vmem:[%s18837_s1 + $0x10a0] sm:$0xff]  }
 0x1e8   :  { %v9840_v16 = vadd.f32 %v13258_v11, %v16940_v29  ;;  %v13280_v17 = vadd.f32 %v13279_v13, %v13278_v8  ;;  %13551 = vmatpush3.bf16.msra.mxu0 %v14822_v6  ;;  %v14834_v29 = vld [vmem:[%s18837_s1 + $0xf18] sm:$0xff]   ;;  %v14862_v6 = vld [vmem:[%s18837_s1 + $0x10e0] sm:$0xff]   ;;  %v14869_v14 = vld [vmem:[%s18837_s1 + $0x1050] sm:$0xff]  }
 0x1e9   :  { %v13281_v19 = vpop.f32.mrf.mxu1  ;;  %v13260_v20 = vpop.f32.mrf.mxu0  ;;  %13552 = vmatprep.subr.bf16.mxu0 %v14824_v10  ;;  %v14863_v8 = vld [vmem:[%s18837_s1 + $0x1020] sm:$0xff]   ;;  %v14865_v10 = vld [vmem:[%s18837_s1 + $0x1058] sm:$0xff]  }
 0x1ea   :  { %v17051_v22 = vadd.f32 %v13280_v17, %v9840_v16  ;;  %13573 = vmatpush3.bf16.msra.mxu1 %v14823_v7  ;;  %v14866_v11 = vld [vmem:[%s18837_s1 + $0x10d8] sm:$0xff]   ;;  %v14871_v16 = vld [vmem:[%s18837_s1 + $0x1010] sm:$0xff]   ;;  %v14874_v19 = vld [vmem:[%s18837_s1 + $0x10c8] sm:$0xff]  }
 0x1eb   :  { %v13282_v24 = vpop.f32.mrf.mxu1  ;;  %13574 = vmatprep.subr.bf16.mxu1 %v14825_v12  ;;  %v14867_v12 = vld [vmem:[%s18837_s1 + $0x1018] sm:$0xff]   ;;  %v14872_v17 = vld [vmem:[%s18837_s1 + $0x1090] sm:$0xff]   ;;  %v14875_v20 = vld [vmem:[%s18837_s1 + $0x1008] sm:$0xff]  }
 0x1ec   :  { %13553 = vmatpush3.bf16.msra.mxu0 %v14826_v15  ;;  %v14868_v13 = vld [vmem:[%s18837_s1 + $0x1098] sm:$0xff]   ;;  %v14870_v15 = vld [vmem:[%s18837_s1 + $0x10d0] sm:$0xff]  }
 0x1ed   :  { %13554 = vmatprep.subr.bf16.mxu0 %v14828_v21  ;;  %v14876_v21 = vld [vmem:[%s18837_s1 + $0x1088] sm:$0xff]  }
 0x1ee   :  { %13575 = vmatpush3.bf16.msra.mxu1 %v14827_v18  ;;  %v14873_v18 = vld [vmem:[%s18837_s1 + $0x1048] sm:$0xff]  }
 0x1ef   :  { %13576 = vmatprep.subr.bf16.mxu1 %v14829_v23  ;;  %v14877_v23 = vld [vmem:[%s18837_s1 + $0x1040] sm:$0xff]  }
 0x1f0   :  { %13555 = vmatpush3.bf16.msra.mxu0 %v14830_v25 }
 0x1f1   :  { %13556 = vmatprep.subr.bf16.mxu0 %v14832_v27  ;;  %v14879_v27 = vld [vmem:[%s18837_s1 + $0x1000] sm:$0xff]  }
 0x1f2   :  { %13577 = vmatpush3.bf16.msra.mxu1 %v14831_v26  ;;  %v14878_v26 = vld [vmem:[%s18837_s1 + $0x10c0] sm:$0xff]  }
 0x1f3   :  { %13578 = vmatprep.subr.bf16.mxu1 %v14833_v28 }
 0x1f4   :  { %13557 = vmatpush3.bf16.msra.mxu0 %v14834_v29 }
 0x1f5   :  { %13558 = vmatprep.subr.bf16.mxu0 %v14836_v31 }
 0x1f6   :  { %13579 = vmatpush3.bf16.msra.mxu1 %v14835_v30  ;;  %v14880_v30 = vld [vmem:[%s18837_s1 + $0x1080] sm:$0xff]  }
 0x1f7   :  { %13580 = vmatprep.subr.bf16.mxu1 %v14837_v32 }
 0x1f8   :  { %13559 = vmatpush3.bf16.msra.mxu0 %v14838_v33  ;;  %v14881_v33 = vld [vmem:[%s18837_s1 + $0x1178] sm:$0xff]  }
 0x1f9   :  { %13560 = vmatprep.subr.bf16.mxu0 %v14840_v35  ;;  %v14882_v35 = vld [vmem:[%s18837_s1 + $0x11f8] sm:$0xff]  }
 0x1fa   :  { %13581 = vmatpush3.bf16.msra.mxu1 %v14839_v34 }
 0x1fb   :  { %13582 = vmatprep.subr.bf16.mxu1 %v14841_v36 }
 0x1fc   :  { %13561 = vmatpush3.bf16.msra.mxu0 %v14842_v37  ;;  %v14883_v37 = vld [vmem:[%s18837_s1 + $0x1138] sm:$0xff]  }
 0x1fd   :  { %13562 = vmatprep.subr.bf16.mxu0 %v14844_v39  ;;  %v14884_v39 = vld [vmem:[%s18837_s1 + $0x11b8] sm:$0xff]  }
 0x1fe   :  { %13583 = vmatpush3.bf16.msra.mxu1 %v14843_v38 }
 0x1ff   :  { %13584 = vmatprep.subr.bf16.mxu1 %v14845_v40 }
 0x200   :  { %13563 = vmatpush3.bf16.msra.mxu0 %v14846_v42  ;;  %v14885_v42 = vld [vmem:[%s18837_s1 + $0x1170] sm:$0xff]  }
 0x201   :  { %13592 = vmatprep.subr.bf16.mxu0 %v14849_v45 }
 0x202   :  { %13585 = vmatpush3.bf16.msra.mxu1 %v14847_v43  ;;  %v14886_v43 = vld [vmem:[%s18837_s1 + $0x11f0] sm:$0xff]  }
 0x203   :  { %v13300_v52 = vpop.f32.mrf.mxu0  ;;  %10398 = vmatmul.mubr.bf16.vlgmr.msra.gmra.mxu0 %v2482_v44  ;;  %13614 = vmatprep.subr.bf16.mxu1 %v14850_v46  ;;  %v14887_v46 = vld [vmem:[%s18837_s1 + $0x1130] sm:$0xff]  }
 0x204   :  { %13593 = vmatpush3.bf16.msra.mxu0 %v14851_v47  ;;  %v14888_v47 = vld [vmem:[%s18837_s1 + $0x11b0] sm:$0xff]  }
 0x205   :  { %v13322_v55 = vpop.f32.mrf.mxu1  ;;  %10438 = vmatmul.mubr.bf16.vlgmr.msra.gmra.mxu1 %v2498_v49  ;;  %v13301_v56 = vpop.f32.mrf.mxu0  ;;  %13594 = vmatprep.subr.bf16.mxu0 %v14853_v50  ;;  %v14889_v50 = vld [vmem:[%s18837_s1 + $0x1168] sm:$0xff]  }
 0x206   :  { %13615 = vmatpush3.bf16.msra.mxu1 %v14852_v48  ;;  %v13302_v58 = vadd.f32 %v13301_v56, %v13300_v52  ;;  %v14890_v52 = vld [vmem:[%s18837_s1 + $0x11e8] sm:$0xff]  }
 0x207   :  { %v13323_v60 = vpop.f32.mrf.mxu1  ;;  %v13303_v61 = vpop.f32.mrf.mxu0  ;;  %13616 = vmatprep.subr.bf16.mxu1 %v14854_v51 }
 0x208   :  { %v9920_v63 = vadd.f32 %v13302_v58, %v17051_v22  ;;  %v13324_v0 = vadd.f32 %v13323_v60, %v13322_v55  ;;  %13595 = vmatpush3.bf16.msra.mxu0 %v14855_v53  ;;  %v30_v22 = vld [vmem:[%s18836_s0 + $0x40] sm:$0xff]  ;;  %v14891_v55 = vld [vmem:[%s18837_s1 + $0x1128] sm:$0xff]  }
 0x209   :  { %v13325_v2 = vpop.f32.mrf.mxu1  ;;  %v13304_v3 = vpop.f32.mrf.mxu0  ;;  %13596 = vmatprep.subr.bf16.mxu0 %v14857_v57  ;;  %v2508_v24 = vrot.slane %v30_v22, %v15538_v41  ;;  %v2501_v25 = vcombine.high %v30_v22, %v30_v22  ;;  %v14892_v58 = vld [vmem:[%s18837_s1 + $0x11a8] sm:$0xff]   ;;  %v14893_v61 = vld [vmem:[%s18837_s1 + $0x1160] sm:$0xff]   ;;  %v14916_v22 = vld [vmem:[%s18837_s1 + $0x1238] sm:$0xff]  }
 0x20a   :  { %v17152_v5 = vadd.f32 %v13324_v0, %v9920_v63  ;;  %13617 = vmatpush3.bf16.msra.mxu1 %v14856_v54  ;;  %v14894_v63 = vld [vmem:[%s18837_s1 + $0x11e0] sm:$0xff]   ;;  %v14897_v3 = vld [vmem:[%s18837_s1 + $0x1158] sm:$0xff]  }
 0x20b   :  { %v13326_v7 = vpop.f32.mrf.mxu1  ;;  %13618 = vmatprep.subr.bf16.mxu1 %v14858_v59  ;;  %v2516_v28 = vcombine.high %v2508_v24, %v2508_v24  ;;  %v17213_v29 = vrot.slane %v2501_v25, %v15538_v41  ;;  %v2524_v32 = vrot.slane %v2508_v24, %v15538_v41  ;;  %v14896_v2 = vld [vmem:[%s18837_s1 + $0x11a0] sm:$0xff]   ;;  %v14918_v25 = vld [vmem:[%s18837_s1 + $0x1270] sm:$0xff]  }
 0x20c   :  { %13597 = vmatpush3.bf16.msra.mxu0 %v14859_v62  ;;  %v14901_v7 = vld [vmem:[%s18837_s1 + $0x1150] sm:$0xff]  }
 0x20d   :  { %13598 = vmatprep.subr.bf16.mxu0 %v14861_v4  ;;  %v2538_v31 = vrot.slane %v2516_v28, %v15538_v41  ;;  %v2517_v34 = vcombine.high %v17213_v29, %v17213_v29  ;;  %v2546_v40 = vcombine.high %v2524_v32, %v2524_v32  ;;  %v14898_v4 = vld [vmem:[%s18837_s1 + $0x11d8] sm:$0xff]   ;;  %v14920_v28 = vld [vmem:[%s18837_s1 + $0x1230] sm:$0xff]  }
 0x20e   :  { %13619 = vmatpush3.bf16.msra.mxu1 %v14860_v1  ;;  %v14895_v1 = vld [vmem:[%s18837_s1 + $0x1120] sm:$0xff]  }
 0x20f   :  { %13620 = vmatprep.subr.bf16.mxu1 %v14862_v6  ;;  %10477 = vmatprep.mubr.bf16.mxu0 %v2538_v31  ;;  %v2548_v36 = vcombine.high %v2538_v31, %v2538_v31  ;;  %v2545_v38 = vrot.slane %v2517_v34, %v15538_v41  ;;  %v14900_v6 = vld [vmem:[%s18837_s1 + $0x1198] sm:$0xff]   ;;  %v14923_v34 = vld [vmem:[%s18837_s1 + $0x12e8] sm:$0xff]  }
 0x210   :  { %13599 = vmatpush3.bf16.msra.mxu0 %v14863_v8  ;;  %v14902_v8 = vld [vmem:[%s18837_s1 + $0x11d0] sm:$0xff]  }
 0x211   :  { %13600 = vmatprep.subr.bf16.mxu0 %v14865_v10  ;;  %10517 = vmatprep.mubr.bf16.mxu1 %v2548_v36  ;;  %v2549_v44 = vcombine.high %v2545_v38, %v2545_v38  ;;  %v14904_v10 = vld [vmem:[%s18837_s1 + $0x1190] sm:$0xff]  }
 0x212   :  { %13621 = vmatpush3.bf16.msra.mxu1 %v14864_v9  ;;  %v14903_v9 = vld [vmem:[%s18837_s1 + $0x1110] sm:$0xff]  }
 0x213   :  { %13622 = vmatprep.subr.bf16.mxu1 %v14866_v11  ;;  %v14905_v11 = vld [vmem:[%s18837_s1 + $0x1148] sm:$0xff]  }
 0x214   :  { %13601 = vmatpush3.bf16.msra.mxu0 %v14867_v12  ;;  %v14906_v12 = vld [vmem:[%s18837_s1 + $0x11c8] sm:$0xff]  }
 0x215   :  { %13602 = vmatprep.subr.bf16.mxu0 %v14869_v14  ;;  %v14908_v14 = vld [vmem:[%s18837_s1 + $0x1188] sm:$0xff]  }
 0x216   :  { %13623 = vmatpush3.bf16.msra.mxu1 %v14868_v13  ;;  %v14907_v13 = vld [vmem:[%s18837_s1 + $0x1108] sm:$0xff]  }
 0x217   :  { %13624 = vmatprep.subr.bf16.mxu1 %v14870_v15  ;;  %v14909_v15 = vld [vmem:[%s18837_s1 + $0x1140] sm:$0xff]  }
 0x218   :  { %13603 = vmatpush3.bf16.msra.mxu0 %v14871_v16  ;;  %v14910_v16 = vld [vmem:[%s18837_s1 + $0x11c0] sm:$0xff]  }
 0x219   :  { %13604 = vmatprep.subr.bf16.mxu0 %v14873_v18  ;;  %v14912_v18 = vld [vmem:[%s18837_s1 + $0x1180] sm:$0xff]  }
 0x21a   :  { %13625 = vmatpush3.bf16.msra.mxu1 %v14872_v17  ;;  %v14911_v17 = vld [vmem:[%s18837_s1 + $0x1100] sm:$0xff]  }
 0x21b   :  { %13626 = vmatprep.subr.bf16.mxu1 %v14874_v19  ;;  %v2531_v19 = vrot.slane %v17213_v29, %v15538_v41  ;;  %v14921_v29 = vld [vmem:[%s18837_s1 + $0x12b0] sm:$0xff]  }
 0x21c   :  { %13605 = vmatpush3.bf16.msra.mxu0 %v14875_v20  ;;  %v14914_v20 = vld [vmem:[%s18837_s1 + $0x1278] sm:$0xff]  }
 0x21d   :  { %13606 = vmatprep.subr.bf16.mxu0 %v14877_v23  ;;  %v14917_v23 = vld [vmem:[%s18837_s1 + $0x12b8] sm:$0xff]   ;;  %v2547_v24 = vcombine.high %v2531_v19, %v2531_v19 }
 0x21e   :  { %13627 = vmatpush3.bf16.msra.mxu1 %v14876_v21  ;;  %v14915_v21 = vld [vmem:[%s18837_s1 + $0x12f8] sm:$0xff]  }
 0x21f   :  { %13628 = vmatprep.subr.bf16.mxu1 %v14878_v26  ;;  %v14919_v26 = vld [vmem:[%s18837_s1 + $0x12f0] sm:$0xff]  }
 0x220   :  { %13607 = vmatpush3.bf16.msra.mxu0 %v14879_v27 }
 0x221   :  { %13636 = vmatprep.subr.bf16.mxu0 %v14881_v33 }
 0x222   :  { %13629 = vmatpush3.bf16.msra.mxu1 %v14880_v30 }
 0x223   :  { %v13344_v45 = vpop.f32.mrf.mxu0  ;;  %10478 = vmatmul.mubr.bf16.vlgmr.msra.gmra.mxu0 %v2524_v32  ;;  %13658 = vmatprep.subr.bf16.mxu1 %v14882_v35  ;;  %v14922_v32 = vld [vmem:[%s18837_s1 + $0x1268] sm:$0xff]  }
 0x224   :  { %13637 = vmatpush3.bf16.msra.mxu0 %v14883_v37  ;;  %10557 = vmatprep.mubr.bf16.mxu0 %v2545_v38  ;;  %v14924_v37 = vld [vmem:[%s18837_s1 + $0x1228] sm:$0xff]  }
 0x225   :  { %v13366_v48 = vpop.f32.mrf.mxu1  ;;  %10518 = vmatmul.mubr.bf16.vlgmr.msra.gmra.mxu1 %v2546_v40  ;;  %v13345_v49 = vpop.f32.mrf.mxu0  ;;  %13638 = vmatprep.subr.bf16.mxu0 %v14885_v42  ;;  %v14925_v40 = vld [vmem:[%s18837_s1 + $0x12a8] sm:$0xff]  }
 0x226   :  { %13659 = vmatpush3.bf16.msra.mxu1 %v14884_v39  ;;  %v13346_v51 = vadd.f32 %v13345_v49, %v13344_v45  ;;  %10597 = vmatprep.mubr.bf16.mxu1 %v2549_v44  ;;  %v14926_v44 = vld [vmem:[%s18837_s1 + $0x1260] sm:$0xff]  }
 0x227   :  { %v13367_v53 = vpop.f32.mrf.mxu1  ;;  %v13347_v54 = vpop.f32.mrf.mxu0  ;;  %13660 = vmatprep.subr.bf16.mxu1 %v14886_v43  ;;  %v14929_v49 = vld [vmem:[%s18837_s1 + $0x12a0] sm:$0xff]  }
 0x228   :  { %v10000_v56 = vadd.f32 %v13346_v51, %v17152_v5  ;;  %v13368_v57 = vadd.f32 %v13367_v53, %v13366_v48  ;;  %13639 = vmatpush3.bf16.msra.mxu0 %v14887_v46  ;;  %v14899_v5 = vld [vmem:[%s18837_s1 + $0x1118] sm:$0xff]   ;;  %v14927_v46 = vld [vmem:[%s18837_s1 + $0x12e0] sm:$0xff]   ;;  %v14934_v54 = vld [vmem:[%s18837_s1 + $0x1250] sm:$0xff]  }
 0x229   :  { %v13369_v59 = vpop.f32.mrf.mxu1  ;;  %v13348_v60 = vpop.f32.mrf.mxu0  ;;  %13640 = vmatprep.subr.bf16.mxu0 %v14889_v50  ;;  %v14928_v48 = vld [vmem:[%s18837_s1 + $0x1220] sm:$0xff]   ;;  %v14930_v50 = vld [vmem:[%s18837_s1 + $0x1258] sm:$0xff]  }
 0x22a   :  { %v17263_v62 = vadd.f32 %v13368_v57, %v10000_v56  ;;  %13661 = vmatpush3.bf16.msra.mxu1 %v14888_v47  ;;  %v14931_v51 = vld [vmem:[%s18837_s1 + $0x12d8] sm:$0xff]   ;;  %v14936_v56 = vld [vmem:[%s18837_s1 + $0x1210] sm:$0xff]   ;;  %v14939_v59 = vld [vmem:[%s18837_s1 + $0x12c8] sm:$0xff]  }
 0x22b   :  { %v13370_v0 = vpop.f32.mrf.mxu1  ;;  %13662 = vmatprep.subr.bf16.mxu1 %v14890_v52  ;;  %v14932_v52 = vld [vmem:[%s18837_s1 + $0x1218] sm:$0xff]   ;;  %v14937_v57 = vld [vmem:[%s18837_s1 + $0x1290] sm:$0xff]   ;;  %v14940_v60 = vld [vmem:[%s18837_s1 + $0x1208] sm:$0xff]  }
 0x22c   :  { %13641 = vmatpush3.bf16.msra.mxu0 %v14891_v55  ;;  %v14933_v53 = vld [vmem:[%s18837_s1 + $0x1298] sm:$0xff]   ;;  %v14935_v55 = vld [vmem:[%s18837_s1 + $0x12d0] sm:$0xff]  }
 0x22d   :  { %13642 = vmatprep.subr.bf16.mxu0 %v14893_v61  ;;  %v14941_v61 = vld [vmem:[%s18837_s1 + $0x1288] sm:$0xff]  }
 0x22e   :  { %13663 = vmatpush3.bf16.msra.mxu1 %v14892_v58  ;;  %v14938_v58 = vld [vmem:[%s18837_s1 + $0x1248] sm:$0xff]  }
 0x22f   :  { %13664 = vmatprep.subr.bf16.mxu1 %v14894_v63  ;;  %v14942_v63 = vld [vmem:[%s18837_s1 + $0x1240] sm:$0xff]  }
 0x230   :  { %13643 = vmatpush3.bf16.msra.mxu0 %v14895_v1 }
 0x231   :  { %13644 = vmatprep.subr.bf16.mxu0 %v14897_v3  ;;  %v14944_v3 = vld [vmem:[%s18837_s1 + $0x1200] sm:$0xff]  }
 0x232   :  { %13665 = vmatpush3.bf16.msra.mxu1 %v14896_v2  ;;  %v14943_v2 = vld [vmem:[%s18837_s1 + $0x12c0] sm:$0xff]  }
 0x233   :  { %13666 = vmatprep.subr.bf16.mxu1 %v14898_v4 }
 0x234   :  { %13645 = vmatpush3.bf16.msra.mxu0 %v14899_v5 }
 0x235   :  { %13646 = vmatprep.subr.bf16.mxu0 %v14901_v7 }
 0x236   :  { %13667 = vmatpush3.bf16.msra.mxu1 %v14900_v6  ;;  %v14945_v6 = vld [vmem:[%s18837_s1 + $0x1280] sm:$0xff]  }
 0x237   :  { %13668 = vmatprep.subr.bf16.mxu1 %v14902_v8 }
 0x238   :  { %13647 = vmatpush3.bf16.msra.mxu0 %v14903_v9  ;;  %v14946_v9 = vld [vmem:[%s18837_s1 + $0x1378] sm:$0xff]  }
 0x239   :  { %13648 = vmatprep.subr.bf16.mxu0 %v14905_v11  ;;  %v14947_v11 = vld [vmem:[%s18837_s1 + $0x13f8] sm:$0xff]  }
 0x23a   :  { %13669 = vmatpush3.bf16.msra.mxu1 %v14904_v10 }
 0x23b   :  { %13670 = vmatprep.subr.bf16.mxu1 %v14906_v12 }
 0x23c   :  { %13649 = vmatpush3.bf16.msra.mxu0 %v14907_v13  ;;  %v14948_v13 = vld [vmem:[%s18837_s1 + $0x1338] sm:$0xff]  }
 0x23d   :  { %13650 = vmatprep.subr.bf16.mxu0 %v14909_v15  ;;  %v14949_v15 = vld [vmem:[%s18837_s1 + $0x13b8] sm:$0xff]  }
 0x23e   :  { %13671 = vmatpush3.bf16.msra.mxu1 %v14908_v14 }
 0x23f   :  { %13672 = vmatprep.subr.bf16.mxu1 %v14910_v16 }
 0x240   :  { %13651 = vmatpush3.bf16.msra.mxu0 %v14911_v17  ;;  %v14950_v17 = vld [vmem:[%s18837_s1 + $0x1370] sm:$0xff]  }
 0x241   :  { %13680 = vmatprep.subr.bf16.mxu0 %v14914_v20 }
 0x242   :  { %13673 = vmatpush3.bf16.msra.mxu1 %v14912_v18  ;;  %v14951_v18 = vld [vmem:[%s18837_s1 + $0x13f0] sm:$0xff]  }
 0x243   :  { %v13388_v27 = vpop.f32.mrf.mxu0  ;;  %10558 = vmatmul.mubr.bf16.vlgmr.msra.gmra.mxu0 %v2531_v19  ;;  %13702 = vmatprep.subr.bf16.mxu1 %v14915_v21  ;;  %v14952_v21 = vld [vmem:[%s18837_s1 + $0x1330] sm:$0xff]  }
 0x244   :  { %13681 = vmatpush3.bf16.msra.mxu0 %v14916_v22  ;;  %v14953_v22 = vld [vmem:[%s18837_s1 + $0x13b0] sm:$0xff]  }
 0x245   :  { %v13410_v30 = vpop.f32.mrf.mxu1  ;;  %10598 = vmatmul.mubr.bf16.vlgmr.msra.gmra.mxu1 %v2547_v24  ;;  %v13389_v31 = vpop.f32.mrf.mxu0  ;;  %13682 = vmatprep.subr.bf16.mxu0 %v14918_v25  ;;  %v14954_v25 = vld [vmem:[%s18837_s1 + $0x1368] sm:$0xff]  }
 0x246   :  { %13703 = vmatpush3.bf16.msra.mxu1 %v14917_v23  ;;  %v13390_v33 = vadd.f32 %v13389_v31, %v13388_v27  ;;  %v14955_v27 = vld [vmem:[%s18837_s1 + $0x13e8] sm:$0xff]  }
 0x247   :  { %v13411_v35 = vpop.f32.mrf.mxu1  ;;  %v13391_v36 = vpop.f32.mrf.mxu0  ;;  %13704 = vmatprep.subr.bf16.mxu1 %v14919_v26 }
 0x248   :  { %v10080_v38 = vadd.f32 %v13390_v33, %v17263_v62  ;;  %v13412_v39 = vadd.f32 %v13411_v35, %v13410_v30  ;;  %13683 = vmatpush3.bf16.msra.mxu0 %v14920_v28  ;;  %v31_v62 = vld [vmem:[%s18836_s0 + $0x48] sm:$0xff]  ;;  %v14958_v36 = vld [vmem:[%s18837_s1 + $0x1360] sm:$0xff]  }
 0x249   :  { %v13413_v42 = vpop.f32.mrf.mxu1  ;;  %v13392_v43 = vpop.f32.mrf.mxu0  ;;  %13684 = vmatprep.subr.bf16.mxu0 %v14922_v32  ;;  %v2557_v0 = vrot.slane %v31_v62, %v15538_v41  ;;  %v2550_v1 = vcombine.high %v31_v62, %v31_v62  ;;  %v14956_v30 = vld [vmem:[%s18837_s1 + $0x1328] sm:$0xff]   ;;  %v14981_v62 = vld [vmem:[%s18837_s1 + $0x1438] sm:$0xff]  }
 0x24a   :  { %v17364_v45 = vadd.f32 %v13412_v39, %v10080_v38  ;;  %13705 = vmatpush3.bf16.msra.mxu1 %v14921_v29  ;;  %v14957_v33 = vld [vmem:[%s18837_s1 + $0x13a8] sm:$0xff]   ;;  %v14959_v38 = vld [vmem:[%s18837_s1 + $0x13e0] sm:$0xff]   ;;  %v14962_v43 = vld [vmem:[%s18837_s1 + $0x1358] sm:$0xff]  }
 0x24b   :  { %v13414_v47 = vpop.f32.mrf.mxu1  ;;  %13706 = vmatprep.subr.bf16.mxu1 %v14923_v34  ;;  %v2565_v4 = vcombine.high %v2557_v0, %v2557_v0  ;;  %v17425_v5 = vrot.slane %v2550_v1, %v15538_v41  ;;  %v2573_v8 = vrot.slane %v2557_v0, %v15538_v41  ;;  %v14961_v42 = vld [vmem:[%s18837_s1 + $0x13a0] sm:$0xff]   ;;  %v14983_v1 = vld [vmem:[%s18837_s1 + $0x1470] sm:$0xff]  }
 0x24c   :  { %13685 = vmatpush3.bf16.msra.mxu0 %v14924_v37  ;;  %v14966_v47 = vld [vmem:[%s18837_s1 + $0x1350] sm:$0xff]  }
 0x24d   :  { %13686 = vmatprep.subr.bf16.mxu0 %v14926_v44  ;;  %v2587_v7 = vrot.slane %v2565_v4, %v15538_v41  ;;  %v2566_v10 = vcombine.high %v17425_v5, %v17425_v5  ;;  %v2595_v16 = vcombine.high %v2573_v8, %v2573_v8  ;;  %v14963_v44 = vld [vmem:[%s18837_s1 + $0x13d8] sm:$0xff]   ;;  %v14985_v4 = vld [vmem:[%s18837_s1 + $0x1430] sm:$0xff]  }
 0x24e   :  { %13707 = vmatpush3.bf16.msra.mxu1 %v14925_v40  ;;  %v14960_v40 = vld [vmem:[%s18837_s1 + $0x1320] sm:$0xff]  }
 0x24f   :  { %13708 = vmatprep.subr.bf16.mxu1 %v14927_v46  ;;  %10637 = vmatprep.mubr.bf16.mxu0 %v2587_v7  ;;  %v2597_v12 = vcombine.high %v2587_v7, %v2587_v7  ;;  %v2594_v14 = vrot.slane %v2566_v10, %v15538_v41  ;;  %v14965_v46 = vld [vmem:[%s18837_s1 + $0x1398] sm:$0xff]   ;;  %v14988_v10 = vld [vmem:[%s18837_s1 + $0x14e8] sm:$0xff]  }
 0x250   :  { %13687 = vmatpush3.bf16.msra.mxu0 %v14928_v48  ;;  %v14967_v48 = vld [vmem:[%s18837_s1 + $0x13d0] sm:$0xff]  }
 0x251   :  { %13688 = vmatprep.subr.bf16.mxu0 %v14930_v50  ;;  %10677 = vmatprep.mubr.bf16.mxu1 %v2597_v12  ;;  %v2598_v19 = vcombine.high %v2594_v14, %v2594_v14  ;;  %v14969_v50 = vld [vmem:[%s18837_s1 + $0x1390] sm:$0xff]  }
 0x252   :  { %13709 = vmatpush3.bf16.msra.mxu1 %v14929_v49  ;;  %v14968_v49 = vld [vmem:[%s18837_s1 + $0x1310] sm:$0xff]  }
 0x253   :  { %13710 = vmatprep.subr.bf16.mxu1 %v14931_v51  ;;  %v14970_v51 = vld [vmem:[%s18837_s1 + $0x1348] sm:$0xff]  }
 0x254   :  { %13689 = vmatpush3.bf16.msra.mxu0 %v14932_v52  ;;  %v14971_v52 = vld [vmem:[%s18837_s1 + $0x13c8] sm:$0xff]  }
 0x255   :  { %13690 = vmatprep.subr.bf16.mxu0 %v14934_v54  ;;  %v14973_v54 = vld [vmem:[%s18837_s1 + $0x1388] sm:$0xff]  }
 0x256   :  { %13711 = vmatpush3.bf16.msra.mxu1 %v14933_v53  ;;  %v14972_v53 = vld [vmem:[%s18837_s1 + $0x1308] sm:$0xff]  }
 0x257   :  { %13712 = vmatprep.subr.bf16.mxu1 %v14935_v55  ;;  %v14974_v55 = vld [vmem:[%s18837_s1 + $0x1340] sm:$0xff]  }
 0x258   :  { %13691 = vmatpush3.bf16.msra.mxu0 %v14936_v56  ;;  %v14975_v56 = vld [vmem:[%s18837_s1 + $0x13c0] sm:$0xff]  }
 0x259   :  { %13692 = vmatprep.subr.bf16.mxu0 %v14938_v58  ;;  %v14977_v58 = vld [vmem:[%s18837_s1 + $0x1380] sm:$0xff]  }
 0x25a   :  { %13713 = vmatpush3.bf16.msra.mxu1 %v14937_v57  ;;  %v14976_v57 = vld [vmem:[%s18837_s1 + $0x1300] sm:$0xff]  }
 0x25b   :  { %13714 = vmatprep.subr.bf16.mxu1 %v14939_v59  ;;  %v2580_v59 = vrot.slane %v17425_v5, %v15538_v41  ;;  %v14986_v5 = vld [vmem:[%s18837_s1 + $0x14b0] sm:$0xff]  }
 0x25c   :  { %13693 = vmatpush3.bf16.msra.mxu0 %v14940_v60  ;;  %v14979_v60 = vld [vmem:[%s18837_s1 + $0x1478] sm:$0xff]  }
 0x25d   :  { %13694 = vmatprep.subr.bf16.mxu0 %v14942_v63  ;;  %v14982_v63 = vld [vmem:[%s18837_s1 + $0x14b8] sm:$0xff]   ;;  %v2596_v0 = vcombine.high %v2580_v59, %v2580_v59 }
 0x25e   :  { %13715 = vmatpush3.bf16.msra.mxu1 %v14941_v61  ;;  %v14980_v61 = vld [vmem:[%s18837_s1 + $0x14f8] sm:$0xff]  }
 0x25f   :  { %13716 = vmatprep.subr.bf16.mxu1 %v14943_v2  ;;  %v14984_v2 = vld [vmem:[%s18837_s1 + $0x14f0] sm:$0xff]  }
 0x260   :  { %13695 = vmatpush3.bf16.msra.mxu0 %v14944_v3 }
 0x261   :  { %13724 = vmatprep.subr.bf16.mxu0 %v14946_v9 }
 0x262   :  { %13717 = vmatpush3.bf16.msra.mxu1 %v14945_v6 }
 0x263   :  { %v13432_v20 = vpop.f32.mrf.mxu0  ;;  %10638 = vmatmul.mubr.bf16.vlgmr.msra.gmra.mxu0 %v2573_v8  ;;  %13746 = vmatprep.subr.bf16.mxu1 %v14947_v11  ;;  %v14987_v8 = vld [vmem:[%s18837_s1 + $0x1468] sm:$0xff]  }
 0x264   :  { %13725 = vmatpush3.bf16.msra.mxu0 %v14948_v13  ;;  %10717 = vmatprep.mubr.bf16.mxu0 %v2594_v14  ;;  %v14989_v13 = vld [vmem:[%s18837_s1 + $0x1428] sm:$0xff]  }
 0x265   :  { %v13454_v23 = vpop.f32.mrf.mxu1  ;;  %10678 = vmatmul.mubr.bf16.vlgmr.msra.gmra.mxu1 %v2595_v16  ;;  %v13433_v24 = vpop.f32.mrf.mxu0  ;;  %13726 = vmatprep.subr.bf16.mxu0 %v14950_v17  ;;  %v14990_v16 = vld [vmem:[%s18837_s1 + $0x14a8] sm:$0xff]  }
 0x266   :  { %13747 = vmatpush3.bf16.msra.mxu1 %v14949_v15  ;;  %v13434_v26 = vadd.f32 %v13433_v24, %v13432_v20  ;;  %10757 = vmatprep.mubr.bf16.mxu1 %v2598_v19  ;;  %v14991_v19 = vld [vmem:[%s18837_s1 + $0x1460] sm:$0xff]  }
 0x267   :  { %v13455_v28 = vpop.f32.mrf.mxu1  ;;  %v13435_v29 = vpop.f32.mrf.mxu0  ;;  %13748 = vmatprep.subr.bf16.mxu1 %v14951_v18  ;;  %v14994_v24 = vld [vmem:[%s18837_s1 + $0x14a0] sm:$0xff]  }
 0x268   :  { %v10160_v31 = vadd.f32 %v13434_v26, %v17364_v45  ;;  %v13456_v32 = vadd.f32 %v13455_v28, %v13454_v23  ;;  %13727 = vmatpush3.bf16.msra.mxu0 %v14952_v21  ;;  %v14964_v45 = vld [vmem:[%s18837_s1 + $0x1318] sm:$0xff]   ;;  %v14992_v21 = vld [vmem:[%s18837_s1 + $0x14e0] sm:$0xff]   ;;  %v14999_v29 = vld [vmem:[%s18837_s1 + $0x1450] sm:$0xff]  }
 0x269   :  { %v13457_v34 = vpop.f32.mrf.mxu1  ;;  %v13436_v35 = vpop.f32.mrf.mxu0  ;;  %13728 = vmatprep.subr.bf16.mxu0 %v14954_v25  ;;  %v14993_v23 = vld [vmem:[%s18837_s1 + $0x1420] sm:$0xff]   ;;  %v14995_v25 = vld [vmem:[%s18837_s1 + $0x1458] sm:$0xff]  }
 0x26a   :  { %v17475_v37 = vadd.f32 %v13456_v32, %v10160_v31  ;;  %13749 = vmatpush3.bf16.msra.mxu1 %v14953_v22  ;;  %v14996_v26 = vld [vmem:[%s18837_s1 + $0x14d8] sm:$0xff]   ;;  %v15001_v31 = vld [vmem:[%s18837_s1 + $0x1410] sm:$0xff]   ;;  %v15004_v34 = vld [vmem:[%s18837_s1 + $0x14c8] sm:$0xff]  }
 0x26b   :  { %v13458_v39 = vpop.f32.mrf.mxu1  ;;  %13750 = vmatprep.subr.bf16.mxu1 %v14955_v27  ;;  %v14997_v27 = vld [vmem:[%s18837_s1 + $0x1418] sm:$0xff]   ;;  %v15002_v32 = vld [vmem:[%s18837_s1 + $0x1490] sm:$0xff]   ;;  %v15005_v35 = vld [vmem:[%s18837_s1 + $0x1408] sm:$0xff]  }
 0x26c   :  { %13729 = vmatpush3.bf16.msra.mxu0 %v14956_v30  ;;  %v14998_v28 = vld [vmem:[%s18837_s1 + $0x1498] sm:$0xff]   ;;  %v15000_v30 = vld [vmem:[%s18837_s1 + $0x14d0] sm:$0xff]  }
 0x26d   :  { %13730 = vmatprep.subr.bf16.mxu0 %v14958_v36  ;;  %v15006_v36 = vld [vmem:[%s18837_s1 + $0x1488] sm:$0xff]  }
 0x26e   :  { %13751 = vmatpush3.bf16.msra.mxu1 %v14957_v33  ;;  %v15003_v33 = vld [vmem:[%s18837_s1 + $0x1448] sm:$0xff]  }
 0x26f   :  { %13752 = vmatprep.subr.bf16.mxu1 %v14959_v38  ;;  %v15007_v38 = vld [vmem:[%s18837_s1 + $0x1440] sm:$0xff]  }
 0x270   :  { %13731 = vmatpush3.bf16.msra.mxu0 %v14960_v40 }
 0x271   :  { %13732 = vmatprep.subr.bf16.mxu0 %v14962_v43  ;;  %v15009_v43 = vld [vmem:[%s18837_s1 + $0x1400] sm:$0xff]  }
 0x272   :  { %13753 = vmatpush3.bf16.msra.mxu1 %v14961_v42  ;;  %v15008_v42 = vld [vmem:[%s18837_s1 + $0x14c0] sm:$0xff]  }
 0x273   :  { %13754 = vmatprep.subr.bf16.mxu1 %v14963_v44 }
 0x274   :  { %13733 = vmatpush3.bf16.msra.mxu0 %v14964_v45 }
 0x275   :  { %13734 = vmatprep.subr.bf16.mxu0 %v14966_v47 }
 0x276   :  { %13755 = vmatpush3.bf16.msra.mxu1 %v14965_v46  ;;  %v15010_v46 = vld [vmem:[%s18837_s1 + $0x1480] sm:$0xff]  }
 0x277   :  { %13756 = vmatprep.subr.bf16.mxu1 %v14967_v48 }
 0x278   :  { %13735 = vmatpush3.bf16.msra.mxu0 %v14968_v49  ;;  %v15011_v49 = vld [vmem:[%s18837_s1 + $0x1578] sm:$0xff]  }
 0x279   :  { %13736 = vmatprep.subr.bf16.mxu0 %v14970_v51  ;;  %v15012_v51 = vld [vmem:[%s18837_s1 + $0x15f8] sm:$0xff]  }
 0x27a   :  { %13757 = vmatpush3.bf16.msra.mxu1 %v14969_v50 }
 0x27b   :  { %13758 = vmatprep.subr.bf16.mxu1 %v14971_v52 }
 0x27c   :  { %13737 = vmatpush3.bf16.msra.mxu0 %v14972_v53  ;;  %v15013_v53 = vld [vmem:[%s18837_s1 + $0x1538] sm:$0xff]  }
 0x27d   :  { %13738 = vmatprep.subr.bf16.mxu0 %v14974_v55  ;;  %v15014_v55 = vld [vmem:[%s18837_s1 + $0x15b8] sm:$0xff]  }
 0x27e   :  { %13759 = vmatpush3.bf16.msra.mxu1 %v14973_v54 }
 0x27f   :  { %13760 = vmatprep.subr.bf16.mxu1 %v14975_v56 }
 0x280   :  { %13739 = vmatpush3.bf16.msra.mxu0 %v14976_v57  ;;  %v15015_v57 = vld [vmem:[%s18837_s1 + $0x1570] sm:$0xff]  }
 0x281   :  { %13768 = vmatprep.subr.bf16.mxu0 %v14979_v60 }
 0x282   :  { %13761 = vmatpush3.bf16.msra.mxu1 %v14977_v58  ;;  %v15016_v58 = vld [vmem:[%s18837_s1 + $0x15f0] sm:$0xff]  }
 0x283   :  { %v13476_v3 = vpop.f32.mrf.mxu0  ;;  %10718 = vmatmul.mubr.bf16.vlgmr.msra.gmra.mxu0 %v2580_v59  ;;  %13790 = vmatprep.subr.bf16.mxu1 %v14980_v61  ;;  %v15017_v61 = vld [vmem:[%s18837_s1 + $0x1530] sm:$0xff]  }
 0x284   :  { %13769 = vmatpush3.bf16.msra.mxu0 %v14981_v62  ;;  %v15018_v62 = vld [vmem:[%s18837_s1 + $0x15b0] sm:$0xff]  }
 0x285   :  { %v13498_v6 = vpop.f32.mrf.mxu1  ;;  %10758 = vmatmul.mubr.bf16.vlgmr.msra.gmra.mxu1 %v2596_v0  ;;  %v13477_v7 = vpop.f32.mrf.mxu0  ;;  %13770 = vmatprep.subr.bf16.mxu0 %v14983_v1  ;;  %v15019_v1 = vld [vmem:[%s18837_s1 + $0x1568] sm:$0xff]  }
 0x286   :  { %13791 = vmatpush3.bf16.msra.mxu1 %v14982_v63  ;;  %v13478_v9 = vadd.f32 %v13477_v7, %v13476_v3  ;;  %v15020_v3 = vld [vmem:[%s18837_s1 + $0x15e8] sm:$0xff]  }
 0x287   :  { %v13499_v11 = vpop.f32.mrf.mxu1  ;;  %v13479_v12 = vpop.f32.mrf.mxu0  ;;  %13792 = vmatprep.subr.bf16.mxu1 %v14984_v2 }
 0x288   :  { %v10240_v14 = vadd.f32 %v13478_v9, %v17475_v37  ;;  %v13500_v15 = vadd.f32 %v13499_v11, %v13498_v6  ;;  %13771 = vmatpush3.bf16.msra.mxu0 %v14985_v4  ;;  %v32_v37 = vld [vmem:[%s18836_s0 + $0x50] sm:$0xff]  ;;  %v15021_v6 = vld [vmem:[%s18837_s1 + $0x1528] sm:$0xff]   ;;  %v15023_v12 = vld [vmem:[%s18837_s1 + $0x1560] sm:$0xff]  }
 0x289   :  { %v13501_v17 = vpop.f32.mrf.mxu1  ;;  %v13480_v18 = vpop.f32.mrf.mxu0  ;;  %13772 = vmatprep.subr.bf16.mxu0 %v14987_v8  ;;  %v2606_v39 = vrot.slane %v32_v37, %v15538_v41  ;;  %v2599_v40 = vcombine.high %v32_v37, %v32_v37  ;;  %v15022_v9 = vld [vmem:[%s18837_s1 + $0x15a8] sm:$0xff]   ;;  %v15046_v37 = vld [vmem:[%s18837_s1 + $0x1638] sm:$0xff]  }
 0x28a   :  { %v17576_v20 = vadd.f32 %v13500_v15, %v10240_v14  ;;  %13793 = vmatpush3.bf16.msra.mxu1 %v14986_v5  ;;  %v15024_v14 = vld [vmem:[%s18837_s1 + $0x15e0] sm:$0xff]   ;;  %v15027_v18 = vld [vmem:[%s18837_s1 + $0x1558] sm:$0xff]  }
 0x28b   :  { %v13502_v22 = vpop.f32.mrf.mxu1  ;;  %13794 = vmatprep.subr.bf16.mxu1 %v14988_v10  ;;  %v2614_v44 = vcombine.high %v2606_v39, %v2606_v39  ;;  %v17637_v45 = vrot.slane %v2599_v40, %v15538_v41  ;;  %v2622_v48 = vrot.slane %v2606_v39, %v15538_v41  ;;  %v15026_v17 = vld [vmem:[%s18837_s1 + $0x15a0] sm:$0xff]   ;;  %v15048_v40 = vld [vmem:[%s18837_s1 + $0x1670] sm:$0xff]  }
 0x28c   :  { %13773 = vmatpush3.bf16.msra.mxu0 %v14989_v13  ;;  %v15031_v22 = vld [vmem:[%s18837_s1 + $0x1550] sm:$0xff]  }
 0x28d   :  { %13774 = vmatprep.subr.bf16.mxu0 %v14991_v19  ;;  %v2636_v47 = vrot.slane %v2614_v44, %v15538_v41  ;;  %v2615_v50 = vcombine.high %v17637_v45, %v17637_v45  ;;  %v2644_v56 = vcombine.high %v2622_v48, %v2622_v48  ;;  %v15028_v19 = vld [vmem:[%s18837_s1 + $0x15d8] sm:$0xff]   ;;  %v15050_v44 = vld [vmem:[%s18837_s1 + $0x1630] sm:$0xff]  }
 0x28e   :  { %13795 = vmatpush3.bf16.msra.mxu1 %v14990_v16  ;;  %v15025_v16 = vld [vmem:[%s18837_s1 + $0x1520] sm:$0xff]  }
 0x28f   :  { %13796 = vmatprep.subr.bf16.mxu1 %v14992_v21  ;;  %10797 = vmatprep.mubr.bf16.mxu0 %v2636_v47  ;;  %v2646_v52 = vcombine.high %v2636_v47, %v2636_v47  ;;  %v2643_v54 = vrot.slane %v2615_v50, %v15538_v41  ;;  %v15030_v21 = vld [vmem:[%s18837_s1 + $0x1598] sm:$0xff]   ;;  %v15053_v50 = vld [vmem:[%s18837_s1 + $0x16e8] sm:$0xff]  }
 0x290   :  { %13775 = vmatpush3.bf16.msra.mxu0 %v14993_v23  ;;  %v15032_v23 = vld [vmem:[%s18837_s1 + $0x15d0] sm:$0xff]  }
 0x291   :  { %13776 = vmatprep.subr.bf16.mxu0 %v14995_v25  ;;  %10837 = vmatprep.mubr.bf16.mxu1 %v2646_v52  ;;  %v2647_v59 = vcombine.high %v2643_v54, %v2643_v54  ;;  %v15034_v25 = vld [vmem:[%s18837_s1 + $0x1590] sm:$0xff]  }
 0x292   :  { %13797 = vmatpush3.bf16.msra.mxu1 %v14994_v24  ;;  %v15033_v24 = vld [vmem:[%s18837_s1 + $0x1510] sm:$0xff]  }
 0x293   :  { %13798 = vmatprep.subr.bf16.mxu1 %v14996_v26  ;;  %v15035_v26 = vld [vmem:[%s18837_s1 + $0x1548] sm:$0xff]  }
 0x294   :  { %13777 = vmatpush3.bf16.msra.mxu0 %v14997_v27  ;;  %v15036_v27 = vld [vmem:[%s18837_s1 + $0x15c8] sm:$0xff]  }
 0x295   :  { %13778 = vmatprep.subr.bf16.mxu0 %v14999_v29  ;;  %v15038_v29 = vld [vmem:[%s18837_s1 + $0x1588] sm:$0xff]  }
 0x296   :  { %13799 = vmatpush3.bf16.msra.mxu1 %v14998_v28  ;;  %v15037_v28 = vld [vmem:[%s18837_s1 + $0x1508] sm:$0xff]  }
 0x297   :  { %13800 = vmatprep.subr.bf16.mxu1 %v15000_v30  ;;  %v15039_v30 = vld [vmem:[%s18837_s1 + $0x1540] sm:$0xff]  }
 0x298   :  { %13779 = vmatpush3.bf16.msra.mxu0 %v15001_v31  ;;  %v15040_v31 = vld [vmem:[%s18837_s1 + $0x15c0] sm:$0xff]  }
 0x299   :  { %13780 = vmatprep.subr.bf16.mxu0 %v15003_v33  ;;  %v15042_v33 = vld [vmem:[%s18837_s1 + $0x1580] sm:$0xff]  }
 0x29a   :  { %13801 = vmatpush3.bf16.msra.mxu1 %v15002_v32  ;;  %v15041_v32 = vld [vmem:[%s18837_s1 + $0x1500] sm:$0xff]  }
 0x29b   :  { %13802 = vmatprep.subr.bf16.mxu1 %v15004_v34  ;;  %v2629_v34 = vrot.slane %v17637_v45, %v15538_v41  ;;  %v15051_v45 = vld [vmem:[%s18837_s1 + $0x16b0] sm:$0xff]  }
 0x29c   :  { %13781 = vmatpush3.bf16.msra.mxu0 %v15005_v35  ;;  %v15044_v35 = vld [vmem:[%s18837_s1 + $0x1678] sm:$0xff]  }
 0x29d   :  { %13782 = vmatprep.subr.bf16.mxu0 %v15007_v38  ;;  %v15047_v38 = vld [vmem:[%s18837_s1 + $0x16b8] sm:$0xff]   ;;  %v2645_v39 = vcombine.high %v2629_v34, %v2629_v34 }
 0x29e   :  { %13803 = vmatpush3.bf16.msra.mxu1 %v15006_v36  ;;  %v15045_v36 = vld [vmem:[%s18837_s1 + $0x16f8] sm:$0xff]  }
 0x29f   :  { %13804 = vmatprep.subr.bf16.mxu1 %v15008_v42  ;;  %v15049_v42 = vld [vmem:[%s18837_s1 + $0x16f0] sm:$0xff]  }
 0x2a0   :  { %13783 = vmatpush3.bf16.msra.mxu0 %v15009_v43 }
 0x2a1   :  { %13812 = vmatprep.subr.bf16.mxu0 %v15011_v49 }
 0x2a2   :  { %13805 = vmatpush3.bf16.msra.mxu1 %v15010_v46 }
 0x2a3   :  { %v13520_v60 = vpop.f32.mrf.mxu0  ;;  %10798 = vmatmul.mubr.bf16.vlgmr.msra.gmra.mxu0 %v2622_v48  ;;  %13834 = vmatprep.subr.bf16.mxu1 %v15012_v51  ;;  %v15052_v48 = vld [vmem:[%s18837_s1 + $0x1668] sm:$0xff]  }
 0x2a4   :  { %13813 = vmatpush3.bf16.msra.mxu0 %v15013_v53  ;;  %10877 = vmatprep.mubr.bf16.mxu0 %v2643_v54  ;;  %v15054_v53 = vld [vmem:[%s18837_s1 + $0x1628] sm:$0xff]  }
 0x2a5   :  { %v13542_v63 = vpop.f32.mrf.mxu1  ;;  %10838 = vmatmul.mubr.bf16.vlgmr.msra.gmra.mxu1 %v2644_v56  ;;  %v13521_v0 = vpop.f32.mrf.mxu0  ;;  %13814 = vmatprep.subr.bf16.mxu0 %v15015_v57  ;;  %v15055_v56 = vld [vmem:[%s18837_s1 + $0x16a8] sm:$0xff]  }
 0x2a6   :  { %13835 = vmatpush3.bf16.msra.mxu1 %v15014_v55  ;;  %v13522_v2 = vadd.f32 %v13521_v0, %v13520_v60  ;;  %10917 = vmatprep.mubr.bf16.mxu1 %v2647_v59  ;;  %v15056_v59 = vld [vmem:[%s18837_s1 + $0x1660] sm:$0xff]  }
 0x2a7   :  { %v13543_v4 = vpop.f32.mrf.mxu1  ;;  %v13523_v5 = vpop.f32.mrf.mxu0  ;;  %13836 = vmatprep.subr.bf16.mxu1 %v15016_v58  ;;  %v15059_v0 = vld [vmem:[%s18837_s1 + $0x16a0] sm:$0xff]  }
 0x2a8   :  { %v10320_v7 = vadd.f32 %v13522_v2, %v17576_v20  ;;  %v13544_v8 = vadd.f32 %v13543_v4, %v13542_v63  ;;  %13815 = vmatpush3.bf16.msra.mxu0 %v15017_v61  ;;  %v15029_v20 = vld [vmem:[%s18837_s1 + $0x1518] sm:$0xff]   ;;  %v15057_v61 = vld [vmem:[%s18837_s1 + $0x16e0] sm:$0xff]   ;;  %v15064_v5 = vld [vmem:[%s18837_s1 + $0x1650] sm:$0xff]  }
 0x2a9   :  { %v13545_v10 = vpop.f32.mrf.mxu1  ;;  %v13524_v11 = vpop.f32.mrf.mxu0  ;;  %13816 = vmatprep.subr.bf16.mxu0 %v15019_v1  ;;  %v15058_v63 = vld [vmem:[%s18837_s1 + $0x1620] sm:$0xff]   ;;  %v15060_v1 = vld [vmem:[%s18837_s1 + $0x1658] sm:$0xff]  }
 0x2aa   :  { %v17687_v13 = vadd.f32 %v13544_v8, %v10320_v7  ;;  %13837 = vmatpush3.bf16.msra.mxu1 %v15018_v62  ;;  %v15061_v2 = vld [vmem:[%s18837_s1 + $0x16d8] sm:$0xff]   ;;  %v15066_v7 = vld [vmem:[%s18837_s1 + $0x1610] sm:$0xff]   ;;  %v15069_v10 = vld [vmem:[%s18837_s1 + $0x16c8] sm:$0xff]  }
 0x2ab   :  { %v13546_v15 = vpop.f32.mrf.mxu1  ;;  %13838 = vmatprep.subr.bf16.mxu1 %v15020_v3  ;;  %v15062_v3 = vld [vmem:[%s18837_s1 + $0x1618] sm:$0xff]   ;;  %v15067_v8 = vld [vmem:[%s18837_s1 + $0x1690] sm:$0xff]   ;;  %v15070_v11 = vld [vmem:[%s18837_s1 + $0x1608] sm:$0xff]  }
 0x2ac   :  { %13817 = vmatpush3.bf16.msra.mxu0 %v15021_v6  ;;  %v15063_v4 = vld [vmem:[%s18837_s1 + $0x1698] sm:$0xff]   ;;  %v15065_v6 = vld [vmem:[%s18837_s1 + $0x16d0] sm:$0xff]   ;;  %v15073_v15 = vld [vmem:[%s18837_s1 + $0x16c0] sm:$0xff]  }
 0x2ad   :  { %13818 = vmatprep.subr.bf16.mxu0 %v15023_v12  ;;  %v15071_v12 = vld [vmem:[%s18837_s1 + $0x1688] sm:$0xff]  }
 0x2ae   :  { %13839 = vmatpush3.bf16.msra.mxu1 %v15022_v9  ;;  %v15068_v9 = vld [vmem:[%s18837_s1 + $0x1648] sm:$0xff]  }
 0x2af   :  { %13840 = vmatprep.subr.bf16.mxu1 %v15024_v14  ;;  %v33_v14 = vld [vmem:[%s18836_s0 + $0x58] sm:$0xff] }
 0x2b0   :  { %13819 = vmatpush3.bf16.msra.mxu0 %v15025_v16  ;;  %v2655_v16 = vrot.slane %v33_v14, %v15538_v41 }
 0x2b1   :  { %13820 = vmatprep.subr.bf16.mxu0 %v15027_v18  ;;  %v15074_v18 = vld [vmem:[%s18837_s1 + $0x1600] sm:$0xff]  }
 0x2b2   :  { %13841 = vmatpush3.bf16.msra.mxu1 %v15026_v17  ;;  %v2648_v17 = vcombine.high %v33_v14, %v33_v14  ;;  %v15112_v14 = vld [vmem:[%s18837_s1 + $0x18b8] sm:$0xff]  }
 0x2b3   :  { %13842 = vmatprep.subr.bf16.mxu1 %v15028_v19  ;;  %v15075_v19 = vld [vmem:[%s18837_s1 + $0x1680] sm:$0xff]  }
 0x2b4   :  { %13821 = vmatpush3.bf16.msra.mxu0 %v15029_v20  ;;  %v2663_v20 = vcombine.high %v2655_v16, %v2655_v16 }
 0x2b5   :  { %13822 = vmatprep.subr.bf16.mxu0 %v15031_v22  ;;  %v2671_v22 = vrot.slane %v2655_v16, %v15538_v41  ;;  %v15113_v16 = vld [vmem:[%s18837_s1 + $0x1870] sm:$0xff]  }
 0x2b6   :  { %13843 = vmatpush3.bf16.msra.mxu1 %v15030_v21  ;;  %v17852_v21 = vrot.slane %v2648_v17, %v15538_v41  ;;  %v15114_v17 = vld [vmem:[%s18837_s1 + $0x18f0] sm:$0xff]  }
 0x2b7   :  { %13844 = vmatprep.subr.bf16.mxu1 %v15032_v23  ;;  %v15076_v23 = vld [vmem:[%s18837_s1 + $0x1778] sm:$0xff]  }
 0x2b8   :  { %13823 = vmatpush3.bf16.msra.mxu0 %v15033_v24  ;;  %v2685_v24 = vrot.slane %v2663_v20, %v15538_v41  ;;  %v15116_v20 = vld [vmem:[%s18837_s1 + $0x18b0] sm:$0xff]  }
 0x2b9   :  { %13824 = vmatprep.subr.bf16.mxu0 %v15035_v26  ;;  %v2664_v26 = vcombine.high %v17852_v21, %v17852_v21 }
 0x2ba   :  { %13845 = vmatpush3.bf16.msra.mxu1 %v15034_v25  ;;  %v15077_v25 = vld [vmem:[%s18837_s1 + $0x17f8] sm:$0xff]  }
 0x2bb   :  { %13846 = vmatprep.subr.bf16.mxu1 %v15036_v27  ;;  %v15078_v27 = vld [vmem:[%s18837_s1 + $0x1738] sm:$0xff]  }
 0x2bc   :  { %13825 = vmatpush3.bf16.msra.mxu0 %v15037_v28  ;;  %v2695_v28 = vcombine.high %v2685_v24, %v2685_v24 }
 0x2bd   :  { %13826 = vmatprep.subr.bf16.mxu0 %v15039_v30  ;;  %v2692_v30 = vrot.slane %v2664_v26, %v15538_v41 }
 0x2be   :  { %13847 = vmatpush3.bf16.msra.mxu1 %v15038_v29  ;;  %v15079_v29 = vld [vmem:[%s18837_s1 + $0x17b8] sm:$0xff]  }
 0x2bf   :  { %13848 = vmatprep.subr.bf16.mxu1 %v15040_v31  ;;  %v2693_v31 = vcombine.high %v2671_v22, %v2671_v22 }
 0x2c0   :  { %13827 = vmatpush3.bf16.msra.mxu0 %v15041_v32  ;;  %v15080_v32 = vld [vmem:[%s18837_s1 + $0x1770] sm:$0xff]  }
 0x2c1   :  { %13856 = vmatprep.subr.bf16.mxu0 %v15044_v35 }
 0x2c2   :  { %13849 = vmatpush3.bf16.msra.mxu1 %v15042_v33  ;;  %v15081_v33 = vld [vmem:[%s18837_s1 + $0x17f0] sm:$0xff]  }
 0x2c3   :  { %v13564_v43 = vpop.f32.mrf.mxu0  ;;  %10878 = vmatmul.mubr.bf16.vlgmr.msra.gmra.mxu0 %v2629_v34  ;;  %13878 = vmatprep.subr.bf16.mxu1 %v15045_v36  ;;  %v2696_v34 = vcombine.high %v2692_v30, %v2692_v30  ;;  %v15082_v36 = vld [vmem:[%s18837_s1 + $0x1730] sm:$0xff]  }
 0x2c4   :  { %13857 = vmatpush3.bf16.msra.mxu0 %v15046_v37  ;;  %10957 = vmatprep.mubr.bf16.mxu0 %v2685_v24  ;;  %v15083_v37 = vld [vmem:[%s18837_s1 + $0x17b0] sm:$0xff]  }
 0x2c5   :  { %v13586_v46 = vpop.f32.mrf.mxu1  ;;  %10918 = vmatmul.mubr.bf16.vlgmr.msra.gmra.mxu1 %v2645_v39  ;;  %v13565_v47 = vpop.f32.mrf.mxu0  ;;  %13858 = vmatprep.subr.bf16.mxu0 %v15048_v40  ;;  %v15084_v40 = vld [vmem:[%s18837_s1 + $0x1768] sm:$0xff]  }
 0x2c6   :  { %13879 = vmatpush3.bf16.msra.mxu1 %v15047_v38  ;;  %v13566_v49 = vadd.f32 %v13565_v47, %v13564_v43  ;;  %10997 = vmatprep.mubr.bf16.mxu1 %v2695_v28  ;;  %v15085_v43 = vld [vmem:[%s18837_s1 + $0x17e8] sm:$0xff]  }
 0x2c7   :  { %v13587_v51 = vpop.f32.mrf.mxu1  ;;  %v13567_v52 = vpop.f32.mrf.mxu0  ;;  %13880 = vmatprep.subr.bf16.mxu1 %v15049_v42  ;;  %v15119_v28 = vld [vmem:[%s18837_s1 + $0x1828] sm:$0xff]  }
 0x2c8   :  { %v10400_v54 = vadd.f32 %v13566_v49, %v17687_v13  ;;  %v13588_v55 = vadd.f32 %v13587_v51, %v13586_v46  ;;  %13859 = vmatpush3.bf16.msra.mxu0 %v15050_v44  ;;  %v15072_v13 = vld [vmem:[%s18837_s1 + $0x1640] sm:$0xff]   ;;  %v15086_v46 = vld [vmem:[%s18837_s1 + $0x1728] sm:$0xff]  }
 0x2c9   :  { %v13589_v57 = vpop.f32.mrf.mxu1  ;;  %v13568_v58 = vpop.f32.mrf.mxu0  ;;  %13860 = vmatprep.subr.bf16.mxu0 %v15052_v48  ;;  %v15087_v49 = vld [vmem:[%s18837_s1 + $0x17a8] sm:$0xff]   ;;  %v15088_v52 = vld [vmem:[%s18837_s1 + $0x1760] sm:$0xff]  }
 0x2ca   :  { %v17788_v60 = vadd.f32 %v13588_v55, %v10400_v54  ;;  %13881 = vmatpush3.bf16.msra.mxu1 %v15051_v45  ;;  %v15089_v54 = vld [vmem:[%s18837_s1 + $0x17e0] sm:$0xff]   ;;  %v15092_v58 = vld [vmem:[%s18837_s1 + $0x1758] sm:$0xff]  }
 0x2cb   :  { %v13590_v62 = vpop.f32.mrf.mxu1  ;;  %13882 = vmatprep.subr.bf16.mxu1 %v15053_v50  ;;  %v15091_v57 = vld [vmem:[%s18837_s1 + $0x17a0] sm:$0xff]  }
 0x2cc   :  { %13861 = vmatpush3.bf16.msra.mxu0 %v15054_v53  ;;  %v15096_v62 = vld [vmem:[%s18837_s1 + $0x1750] sm:$0xff]  }
 0x2cd   :  { %13862 = vmatprep.subr.bf16.mxu0 %v15056_v59  ;;  %v15093_v59 = vld [vmem:[%s18837_s1 + $0x17d8] sm:$0xff]  }
 0x2ce   :  { %13883 = vmatpush3.bf16.msra.mxu1 %v15055_v56  ;;  %v15090_v56 = vld [vmem:[%s18837_s1 + $0x1720] sm:$0xff]  }
 0x2cf   :  { %13884 = vmatprep.subr.bf16.mxu1 %v15057_v61  ;;  %v15095_v61 = vld [vmem:[%s18837_s1 + $0x1798] sm:$0xff]  }
 0x2d0   :  { %13863 = vmatpush3.bf16.msra.mxu0 %v15058_v63  ;;  %v15097_v63 = vld [vmem:[%s18837_s1 + $0x17d0] sm:$0xff]  }
 0x2d1   :  { %13864 = vmatprep.subr.bf16.mxu0 %v15060_v1  ;;  %v15099_v1 = vld [vmem:[%s18837_s1 + $0x1790] sm:$0xff]  }
 0x2d2   :  { %13885 = vmatpush3.bf16.msra.mxu1 %v15059_v0  ;;  %v15098_v0 = vld [vmem:[%s18837_s1 + $0x1710] sm:$0xff]  }
 0x2d3   :  { %13886 = vmatprep.subr.bf16.mxu1 %v15061_v2  ;;  %v15100_v2 = vld [vmem:[%s18837_s1 + $0x1748] sm:$0xff]  }
 0x2d4   :  { %13865 = vmatpush3.bf16.msra.mxu0 %v15062_v3  ;;  %v15101_v3 = vld [vmem:[%s18837_s1 + $0x17c8] sm:$0xff]  }
 0x2d5   :  { %13866 = vmatprep.subr.bf16.mxu0 %v15064_v5  ;;  %v15103_v5 = vld [vmem:[%s18837_s1 + $0x1788] sm:$0xff]  }
 0x2d6   :  { %13887 = vmatpush3.bf16.msra.mxu1 %v15063_v4  ;;  %v15102_v4 = vld [vmem:[%s18837_s1 + $0x1708] sm:$0xff]  }
 0x2d7   :  { %13888 = vmatprep.subr.bf16.mxu1 %v15065_v6  ;;  %v15104_v6 = vld [vmem:[%s18837_s1 + $0x1740] sm:$0xff]  }
 0x2d8   :  { %13867 = vmatpush3.bf16.msra.mxu0 %v15066_v7  ;;  %v15105_v7 = vld [vmem:[%s18837_s1 + $0x17c0] sm:$0xff]  }
 0x2d9   :  { %13868 = vmatprep.subr.bf16.mxu0 %v15068_v9  ;;  %v15107_v9 = vld [vmem:[%s18837_s1 + $0x1780] sm:$0xff]  }
 0x2da   :  { %13889 = vmatpush3.bf16.msra.mxu1 %v15067_v8  ;;  %v15106_v8 = vld [vmem:[%s18837_s1 + $0x1700] sm:$0xff]  }
 0x2db   :  { %13890 = vmatprep.subr.bf16.mxu1 %v15069_v10  ;;  %v2678_v10 = vrot.slane %v17852_v21, %v15538_v41 }
 0x2dc   :  { %13869 = vmatpush3.bf16.msra.mxu0 %v15070_v11  ;;  %v15109_v11 = vld [vmem:[%s18837_s1 + $0x1878] sm:$0xff]  }
 0x2dd   :  { %13870 = vmatprep.subr.bf16.mxu0 %v15072_v13  ;;  %v15111_v13 = vld [vmem:[%s18837_s1 + $0x1838] sm:$0xff]  }
 0x2de   :  { %13891 = vmatpush3.bf16.msra.mxu1 %v15071_v12  ;;  %v15110_v12 = vld [vmem:[%s18837_s1 + $0x18f8] sm:$0xff]  }
 0x2df   :  { %13892 = vmatprep.subr.bf16.mxu1 %v15073_v15  ;;  %v2694_v15 = vcombine.high %v2678_v10, %v2678_v10 }
 0x2e0   :  { %13871 = vmatpush3.bf16.msra.mxu0 %v15074_v18 }
 0x2e1   :  { %13900 = vmatprep.subr.bf16.mxu0 %v15076_v23  ;;  %v15117_v23 = vld [vmem:[%s18837_s1 + $0x1868] sm:$0xff]  }
 0x2e2   :  { %13893 = vmatpush3.bf16.msra.mxu1 %v15075_v19  ;;  %v15115_v19 = vld [vmem:[%s18837_s1 + $0x1830] sm:$0xff]  }
 0x2e3   :  { %v13608_v35 = vpop.f32.mrf.mxu0  ;;  %10958 = vmatmul.mubr.bf16.vlgmr.msra.gmra.mxu0 %v2671_v22  ;;  %13922 = vmatprep.subr.bf16.mxu1 %v15077_v25  ;;  %v15118_v25 = vld [vmem:[%s18837_s1 + $0x18e8] sm:$0xff]  }
 0x2e4   :  { %13901 = vmatpush3.bf16.msra.mxu0 %v15078_v27  ;;  %11037 = vmatprep.mubr.bf16.mxu0 %v2692_v30 }
 0x2e5   :  { %v13630_v38 = vpop.f32.mrf.mxu1  ;;  %10998 = vmatmul.mubr.bf16.vlgmr.msra.gmra.mxu1 %v2693_v31  ;;  %v13609_v39 = vpop.f32.mrf.mxu0  ;;  %13902 = vmatprep.subr.bf16.mxu0 %v15080_v32  ;;  %v15120_v31 = vld [vmem:[%s18837_s1 + $0x18a8] sm:$0xff]  }
 0x2e6   :  { %13923 = vmatpush3.bf16.msra.mxu1 %v15079_v29  ;;  %v13610_v42 = vadd.f32 %v13609_v39, %v13608_v35  ;;  %11077 = vmatprep.mubr.bf16.mxu1 %v2696_v34  ;;  %v15121_v34 = vld [vmem:[%s18837_s1 + $0x1860] sm:$0xff]  }
 0x2e7   :  { %v13631_v44 = vpop.f32.mrf.mxu1  ;;  %v13611_v45 = vpop.f32.mrf.mxu0  ;;  %13924 = vmatprep.subr.bf16.mxu1 %v15081_v33  ;;  %v15124_v39 = vld [vmem:[%s18837_s1 + $0x18a0] sm:$0xff]  }
 0x2e8   :  { %v10480_v47 = vadd.f32 %v13610_v42, %v17788_v60  ;;  %v13632_v48 = vadd.f32 %v13631_v44, %v13630_v38  ;;  %13903 = vmatpush3.bf16.msra.mxu0 %v15082_v36  ;;  %v15094_v60 = vld [vmem:[%s18837_s1 + $0x1718] sm:$0xff]   ;;  %v15122_v36 = vld [vmem:[%s18837_s1 + $0x18e0] sm:$0xff]   ;;  %v15129_v45 = vld [vmem:[%s18837_s1 + $0x1850] sm:$0xff]  }
 0x2e9   :  { %v13633_v50 = vpop.f32.mrf.mxu1  ;;  %v13612_v51 = vpop.f32.mrf.mxu0  ;;  %13904 = vmatprep.subr.bf16.mxu0 %v15084_v40  ;;  %v15123_v38 = vld [vmem:[%s18837_s1 + $0x1820] sm:$0xff]   ;;  %v15125_v40 = vld [vmem:[%s18837_s1 + $0x1858] sm:$0xff]  }
 0x2ea   :  { %v17899_v53 = vadd.f32 %v13632_v48, %v10480_v47  ;;  %13925 = vmatpush3.bf16.msra.mxu1 %v15083_v37  ;;  %v15126_v42 = vld [vmem:[%s18837_s1 + $0x18d8] sm:$0xff]   ;;  %v15131_v47 = vld [vmem:[%s18837_s1 + $0x1810] sm:$0xff]   ;;  %v15134_v50 = vld [vmem:[%s18837_s1 + $0x18c8] sm:$0xff]  }
 0x2eb   :  { %v13634_v55 = vpop.f32.mrf.mxu1  ;;  %13926 = vmatprep.subr.bf16.mxu1 %v15085_v43  ;;  %v15127_v43 = vld [vmem:[%s18837_s1 + $0x1818] sm:$0xff]   ;;  %v15132_v48 = vld [vmem:[%s18837_s1 + $0x1890] sm:$0xff]   ;;  %v15135_v51 = vld [vmem:[%s18837_s1 + $0x1808] sm:$0xff]  }
 0x2ec   :  { %13905 = vmatpush3.bf16.msra.mxu0 %v15086_v46  ;;  %v15128_v44 = vld [vmem:[%s18837_s1 + $0x1898] sm:$0xff]   ;;  %v15130_v46 = vld [vmem:[%s18837_s1 + $0x18d0] sm:$0xff]   ;;  %v15138_v55 = vld [vmem:[%s18837_s1 + $0x18c0] sm:$0xff]  }
 0x2ed   :  { %13906 = vmatprep.subr.bf16.mxu0 %v15088_v52  ;;  %v15136_v52 = vld [vmem:[%s18837_s1 + $0x1888] sm:$0xff]  }
 0x2ee   :  { %13927 = vmatpush3.bf16.msra.mxu1 %v15087_v49  ;;  %v15133_v49 = vld [vmem:[%s18837_s1 + $0x1848] sm:$0xff]  }
 0x2ef   :  { %13928 = vmatprep.subr.bf16.mxu1 %v15089_v54  ;;  %v34_v54 = vld [vmem:[%s18836_s0 + $0x60] sm:$0xff] }
 0x2f0   :  { %13907 = vmatpush3.bf16.msra.mxu0 %v15090_v56  ;;  %v2704_v56 = vrot.slane %v34_v54, %v15538_v41 }
 0x2f1   :  { %13908 = vmatprep.subr.bf16.mxu0 %v15092_v58  ;;  %v15139_v58 = vld [vmem:[%s18837_s1 + $0x1800] sm:$0xff]  }
 0x2f2   :  { %13929 = vmatpush3.bf16.msra.mxu1 %v15091_v57  ;;  %v2697_v57 = vcombine.high %v34_v54, %v34_v54  ;;  %v15177_v54 = vld [vmem:[%s18837_s1 + $0x1ab8] sm:$0xff]  }
 0x2f3   :  { %13930 = vmatprep.subr.bf16.mxu1 %v15093_v59  ;;  %v15140_v59 = vld [vmem:[%s18837_s1 + $0x1880] sm:$0xff]  }
 0x2f4   :  { %13909 = vmatpush3.bf16.msra.mxu0 %v15094_v60  ;;  %v2712_v60 = vcombine.high %v2704_v56, %v2704_v56 }
 0x2f5   :  { %13910 = vmatprep.subr.bf16.mxu0 %v15096_v62  ;;  %v2720_v62 = vrot.slane %v2704_v56, %v15538_v41  ;;  %v15178_v56 = vld [vmem:[%s18837_s1 + $0x1a70] sm:$0xff]  }
 0x2f6   :  { %13931 = vmatpush3.bf16.msra.mxu1 %v15095_v61  ;;  %v18064_v61 = vrot.slane %v2697_v57, %v15538_v41  ;;  %v15179_v57 = vld [vmem:[%s18837_s1 + $0x1af0] sm:$0xff]  }
 0x2f7   :  { %13932 = vmatprep.subr.bf16.mxu1 %v15097_v63  ;;  %v15141_v63 = vld [vmem:[%s18837_s1 + $0x1978] sm:$0xff]  }
 0x2f8   :  { %13911 = vmatpush3.bf16.msra.mxu0 %v15098_v0  ;;  %v2734_v0 = vrot.slane %v2712_v60, %v15538_v41  ;;  %v15181_v60 = vld [vmem:[%s18837_s1 + $0x1ab0] sm:$0xff]  }
 0x2f9   :  { %13912 = vmatprep.subr.bf16.mxu0 %v15100_v2  ;;  %v2713_v2 = vcombine.high %v18064_v61, %v18064_v61 }
 0x2fa   :  { %13933 = vmatpush3.bf16.msra.mxu1 %v15099_v1  ;;  %v15142_v1 = vld [vmem:[%s18837_s1 + $0x19f8] sm:$0xff]  }
 0x2fb   :  { %13934 = vmatprep.subr.bf16.mxu1 %v15101_v3  ;;  %v15143_v3 = vld [vmem:[%s18837_s1 + $0x1938] sm:$0xff]  }
 0x2fc   :  { %13913 = vmatpush3.bf16.msra.mxu0 %v15102_v4  ;;  %v2744_v4 = vcombine.high %v2734_v0, %v2734_v0 }
 0x2fd   :  { %13914 = vmatprep.subr.bf16.mxu0 %v15104_v6  ;;  %v2741_v6 = vrot.slane %v2713_v2, %v15538_v41 }
 0x2fe   :  { %13935 = vmatpush3.bf16.msra.mxu1 %v15103_v5  ;;  %v15144_v5 = vld [vmem:[%s18837_s1 + $0x19b8] sm:$0xff]  }
 0x2ff   :  { %13936 = vmatprep.subr.bf16.mxu1 %v15105_v7  ;;  %v2742_v7 = vcombine.high %v2720_v62, %v2720_v62 }
 0x300   :  { %13915 = vmatpush3.bf16.msra.mxu0 %v15106_v8  ;;  %v15145_v8 = vld [vmem:[%s18837_s1 + $0x1970] sm:$0xff]  }
 0x301   :  { %13944 = vmatprep.subr.bf16.mxu0 %v15109_v11 }
 0x302   :  { %13937 = vmatpush3.bf16.msra.mxu1 %v15107_v9  ;;  %v15146_v9 = vld [vmem:[%s18837_s1 + $0x19f0] sm:$0xff]  }
 0x303   :  { %v13652_v18 = vpop.f32.mrf.mxu0  ;;  %11038 = vmatmul.mubr.bf16.vlgmr.msra.gmra.mxu0 %v2678_v10  ;;  %13966 = vmatprep.subr.bf16.mxu1 %v15110_v12  ;;  %v2745_v10 = vcombine.high %v2741_v6, %v2741_v6  ;;  %v15147_v12 = vld [vmem:[%s18837_s1 + $0x1930] sm:$0xff]  }
 0x304   :  { %13945 = vmatpush3.bf16.msra.mxu0 %v15111_v13  ;;  %11117 = vmatprep.mubr.bf16.mxu0 %v2734_v0  ;;  %v15148_v13 = vld [vmem:[%s18837_s1 + $0x19b0] sm:$0xff]  }
 0x305   :  { %v13674_v21 = vpop.f32.mrf.mxu1  ;;  %11078 = vmatmul.mubr.bf16.vlgmr.msra.gmra.mxu1 %v2694_v15  ;;  %v13653_v22 = vpop.f32.mrf.mxu0  ;;  %13946 = vmatprep.subr.bf16.mxu0 %v15113_v16  ;;  %v15149_v16 = vld [vmem:[%s18837_s1 + $0x1968] sm:$0xff]  }
 0x306   :  { %13967 = vmatpush3.bf16.msra.mxu1 %v15112_v14  ;;  %v13654_v24 = vadd.f32 %v13653_v22, %v13652_v18  ;;  %11157 = vmatprep.mubr.bf16.mxu1 %v2744_v4  ;;  %v15150_v18 = vld [vmem:[%s18837_s1 + $0x19e8] sm:$0xff]  }
 0x307   :  { %v13675_v26 = vpop.f32.mrf.mxu1  ;;  %v13655_v27 = vpop.f32.mrf.mxu0  ;;  %13968 = vmatprep.subr.bf16.mxu1 %v15114_v17  ;;  %v15184_v4 = vld [vmem:[%s18837_s1 + $0x1a28] sm:$0xff]  }
 0x308   :  { %v10560_v29 = vadd.f32 %v13654_v24, %v17899_v53  ;;  %v13676_v30 = vadd.f32 %v13675_v26, %v13674_v21  ;;  %13947 = vmatpush3.bf16.msra.mxu0 %v15115_v19  ;;  %v15137_v53 = vld [vmem:[%s18837_s1 + $0x1840] sm:$0xff]   ;;  %v15151_v21 = vld [vmem:[%s18837_s1 + $0x1928] sm:$0xff]  }
 0x309   :  { %v13677_v32 = vpop.f32.mrf.mxu1  ;;  %v13656_v33 = vpop.f32.mrf.mxu0  ;;  %13948 = vmatprep.subr.bf16.mxu0 %v15117_v23  ;;  %v15152_v24 = vld [vmem:[%s18837_s1 + $0x19a8] sm:$0xff]   ;;  %v15153_v27 = vld [vmem:[%s18837_s1 + $0x1960] sm:$0xff]  }
 0x30a   :  { %v18000_v35 = vadd.f32 %v13676_v30, %v10560_v29  ;;  %13969 = vmatpush3.bf16.msra.mxu1 %v15116_v20  ;;  %v15154_v29 = vld [vmem:[%s18837_s1 + $0x19e0] sm:$0xff]   ;;  %v15157_v33 = vld [vmem:[%s18837_s1 + $0x1958] sm:$0xff]  }
 0x30b   :  { %v13678_v37 = vpop.f32.mrf.mxu1  ;;  %13970 = vmatprep.subr.bf16.mxu1 %v15118_v25  ;;  %v15156_v32 = vld [vmem:[%s18837_s1 + $0x19a0] sm:$0xff]  }
 0x30c   :  { %13949 = vmatpush3.bf16.msra.mxu0 %v15119_v28  ;;  %v15161_v37 = vld [vmem:[%s18837_s1 + $0x1950] sm:$0xff]  }
 0x30d   :  { %13950 = vmatprep.subr.bf16.mxu0 %v15121_v34  ;;  %v15158_v34 = vld [vmem:[%s18837_s1 + $0x19d8] sm:$0xff]  }
 0x30e   :  { %13971 = vmatpush3.bf16.msra.mxu1 %v15120_v31  ;;  %v15155_v31 = vld [vmem:[%s18837_s1 + $0x1920] sm:$0xff]  }
 0x30f   :  { %13972 = vmatprep.subr.bf16.mxu1 %v15122_v36  ;;  %v15160_v36 = vld [vmem:[%s18837_s1 + $0x1998] sm:$0xff]  }
 0x310   :  { %13951 = vmatpush3.bf16.msra.mxu0 %v15123_v38  ;;  %v15162_v38 = vld [vmem:[%s18837_s1 + $0x19d0] sm:$0xff]  }
 0x311   :  { %13952 = vmatprep.subr.bf16.mxu0 %v15125_v40  ;;  %v15164_v40 = vld [vmem:[%s18837_s1 + $0x1990] sm:$0xff]  }
 0x312   :  { %13973 = vmatpush3.bf16.msra.mxu1 %v15124_v39  ;;  %v15163_v39 = vld [vmem:[%s18837_s1 + $0x1910] sm:$0xff]  }
 0x313   :  { %13974 = vmatprep.subr.bf16.mxu1 %v15126_v42  ;;  %v15165_v42 = vld [vmem:[%s18837_s1 + $0x1948] sm:$0xff]  }
 0x314   :  { %13953 = vmatpush3.bf16.msra.mxu0 %v15127_v43  ;;  %v15166_v43 = vld [vmem:[%s18837_s1 + $0x19c8] sm:$0xff]  }
 0x315   :  { %13954 = vmatprep.subr.bf16.mxu0 %v15129_v45  ;;  %v15168_v45 = vld [vmem:[%s18837_s1 + $0x1988] sm:$0xff]  }
 0x316   :  { %13975 = vmatpush3.bf16.msra.mxu1 %v15128_v44  ;;  %v15167_v44 = vld [vmem:[%s18837_s1 + $0x1908] sm:$0xff]  }
 0x317   :  { %13976 = vmatprep.subr.bf16.mxu1 %v15130_v46  ;;  %v15169_v46 = vld [vmem:[%s18837_s1 + $0x1940] sm:$0xff]  }
 0x318   :  { %13955 = vmatpush3.bf16.msra.mxu0 %v15131_v47  ;;  %v15170_v47 = vld [vmem:[%s18837_s1 + $0x19c0] sm:$0xff]  }
 0x319   :  { %13956 = vmatprep.subr.bf16.mxu0 %v15133_v49  ;;  %v15172_v49 = vld [vmem:[%s18837_s1 + $0x1980] sm:$0xff]  }
 0x31a   :  { %13977 = vmatpush3.bf16.msra.mxu1 %v15132_v48  ;;  %v15171_v48 = vld [vmem:[%s18837_s1 + $0x1900] sm:$0xff]  }
 0x31b   :  { %13978 = vmatprep.subr.bf16.mxu1 %v15134_v50  ;;  %v2727_v50 = vrot.slane %v18064_v61, %v15538_v41 }
 0x31c   :  { %13957 = vmatpush3.bf16.msra.mxu0 %v15135_v51  ;;  %v15174_v51 = vld [vmem:[%s18837_s1 + $0x1a78] sm:$0xff]  }
 0x31d   :  { %13958 = vmatprep.subr.bf16.mxu0 %v15137_v53  ;;  %v15176_v53 = vld [vmem:[%s18837_s1 + $0x1a38] sm:$0xff]  }
 0x31e   :  { %13979 = vmatpush3.bf16.msra.mxu1 %v15136_v52  ;;  %v15175_v52 = vld [vmem:[%s18837_s1 + $0x1af8] sm:$0xff]  }
 0x31f   :  { %13980 = vmatprep.subr.bf16.mxu1 %v15138_v55  ;;  %v2743_v55 = vcombine.high %v2727_v50, %v2727_v50 }
 0x320   :  { %13959 = vmatpush3.bf16.msra.mxu0 %v15139_v58 }
 0x321   :  { %13988 = vmatprep.subr.bf16.mxu0 %v15141_v63  ;;  %v15182_v63 = vld [vmem:[%s18837_s1 + $0x1a68] sm:$0xff]  }
 0x322   :  { %13981 = vmatpush3.bf16.msra.mxu1 %v15140_v59  ;;  %v15180_v59 = vld [vmem:[%s18837_s1 + $0x1a30] sm:$0xff]  }
 0x323   :  { %v13696_v11 = vpop.f32.mrf.mxu0  ;;  %11118 = vmatmul.mubr.bf16.vlgmr.msra.gmra.mxu0 %v2720_v62  ;;  %14010 = vmatprep.subr.bf16.mxu1 %v15142_v1  ;;  %v15183_v1 = vld [vmem:[%s18837_s1 + $0x1ae8] sm:$0xff]  }
 0x324   :  { %13989 = vmatpush3.bf16.msra.mxu0 %v15143_v3  ;;  %11197 = vmatprep.mubr.bf16.mxu0 %v2741_v6 }
 0x325   :  { %v13718_v14 = vpop.f32.mrf.mxu1  ;;  %11158 = vmatmul.mubr.bf16.vlgmr.msra.gmra.mxu1 %v2742_v7  ;;  %v13697_v15 = vpop.f32.mrf.mxu0  ;;  %13990 = vmatprep.subr.bf16.mxu0 %v15145_v8  ;;  %v15185_v7 = vld [vmem:[%s18837_s1 + $0x1aa8] sm:$0xff]  }
 0x326   :  { %14011 = vmatpush3.bf16.msra.mxu1 %v15144_v5  ;;  %v13698_v17 = vadd.f32 %v13697_v15, %v13696_v11  ;;  %11237 = vmatprep.mubr.bf16.mxu1 %v2745_v10  ;;  %v15186_v10 = vld [vmem:[%s18837_s1 + $0x1a60] sm:$0xff]  }
 0x327   :  { %v13719_v19 = vpop.f32.mrf.mxu1  ;;  %v13699_v20 = vpop.f32.mrf.mxu0  ;;  %14012 = vmatprep.subr.bf16.mxu1 %v15146_v9  ;;  %v15189_v15 = vld [vmem:[%s18837_s1 + $0x1aa0] sm:$0xff]  }
 0x328   :  { %v10640_v22 = vadd.f32 %v13698_v17, %v18000_v35  ;;  %v13720_v23 = vadd.f32 %v13719_v19, %v13718_v14  ;;  %13991 = vmatpush3.bf16.msra.mxu0 %v15147_v12  ;;  %v15159_v35 = vld [vmem:[%s18837_s1 + $0x1918] sm:$0xff]   ;;  %v15187_v12 = vld [vmem:[%s18837_s1 + $0x1ae0] sm:$0xff]   ;;  %v15194_v20 = vld [vmem:[%s18837_s1 + $0x1a50] sm:$0xff]  }
 0x329   :  { %v13721_v25 = vpop.f32.mrf.mxu1  ;;  %v13700_v26 = vpop.f32.mrf.mxu0  ;;  %13992 = vmatprep.subr.bf16.mxu0 %v15149_v16  ;;  %v15188_v14 = vld [vmem:[%s18837_s1 + $0x1a20] sm:$0xff]   ;;  %v15190_v16 = vld [vmem:[%s18837_s1 + $0x1a58] sm:$0xff]  }
 0x32a   :  { %v18111_v28 = vadd.f32 %v13720_v23, %v10640_v22  ;;  %14013 = vmatpush3.bf16.msra.mxu1 %v15148_v13  ;;  %v15191_v17 = vld [vmem:[%s18837_s1 + $0x1ad8] sm:$0xff]   ;;  %v15196_v22 = vld [vmem:[%s18837_s1 + $0x1a10] sm:$0xff]   ;;  %v15199_v25 = vld [vmem:[%s18837_s1 + $0x1ac8] sm:$0xff]  }
 0x32b   :  { %v13722_v30 = vpop.f32.mrf.mxu1  ;;  %14014 = vmatprep.subr.bf16.mxu1 %v15150_v18  ;;  %v15192_v18 = vld [vmem:[%s18837_s1 + $0x1a18] sm:$0xff]   ;;  %v15197_v23 = vld [vmem:[%s18837_s1 + $0x1a90] sm:$0xff]   ;;  %v15200_v26 = vld [vmem:[%s18837_s1 + $0x1a08] sm:$0xff]  }
 0x32c   :  { %13993 = vmatpush3.bf16.msra.mxu0 %v15151_v21  ;;  %v15193_v19 = vld [vmem:[%s18837_s1 + $0x1a98] sm:$0xff]   ;;  %v15195_v21 = vld [vmem:[%s18837_s1 + $0x1ad0] sm:$0xff]   ;;  %v15203_v30 = vld [vmem:[%s18837_s1 + $0x1ac0] sm:$0xff]  }
 0x32d   :  { %13994 = vmatprep.subr.bf16.mxu0 %v15153_v27  ;;  %v15201_v27 = vld [vmem:[%s18837_s1 + $0x1a88] sm:$0xff]  }
 0x32e   :  { %14015 = vmatpush3.bf16.msra.mxu1 %v15152_v24  ;;  %v15198_v24 = vld [vmem:[%s18837_s1 + $0x1a48] sm:$0xff]  }
 0x32f   :  { %14016 = vmatprep.subr.bf16.mxu1 %v15154_v29  ;;  %v35_v29 = vld [vmem:[%s18836_s0 + $0x68] sm:$0xff] }
 0x330   :  { %13995 = vmatpush3.bf16.msra.mxu0 %v15155_v31  ;;  %v2753_v31 = vrot.slane %v35_v29, %v15538_v41 }
 0x331   :  { %13996 = vmatprep.subr.bf16.mxu0 %v15157_v33  ;;  %v15204_v33 = vld [vmem:[%s18837_s1 + $0x1a00] sm:$0xff]  }
 0x332   :  { %14017 = vmatpush3.bf16.msra.mxu1 %v15156_v32  ;;  %v2746_v32 = vcombine.high %v35_v29, %v35_v29  ;;  %v15242_v29 = vld [vmem:[%s18837_s1 + $0x1cb8] sm:$0xff]  }
 0x333   :  { %14018 = vmatprep.subr.bf16.mxu1 %v15158_v34  ;;  %v15205_v34 = vld [vmem:[%s18837_s1 + $0x1a80] sm:$0xff]  }
 0x334   :  { %13997 = vmatpush3.bf16.msra.mxu0 %v15159_v35  ;;  %v2761_v35 = vcombine.high %v2753_v31, %v2753_v31 }
 0x335   :  { %13998 = vmatprep.subr.bf16.mxu0 %v15161_v37  ;;  %v2769_v37 = vrot.slane %v2753_v31, %v15538_v41  ;;  %v15243_v31 = vld [vmem:[%s18837_s1 + $0x1c70] sm:$0xff]  }
 0x336   :  { %14019 = vmatpush3.bf16.msra.mxu1 %v15160_v36  ;;  %v18276_v36 = vrot.slane %v2746_v32, %v15538_v41  ;;  %v15244_v32 = vld [vmem:[%s18837_s1 + $0x1cf0] sm:$0xff]  }
 0x337   :  { %14020 = vmatprep.subr.bf16.mxu1 %v15162_v38  ;;  %v15206_v38 = vld [vmem:[%s18837_s1 + $0x1b78] sm:$0xff]  }
 0x338   :  { %13999 = vmatpush3.bf16.msra.mxu0 %v15163_v39  ;;  %v2783_v39 = vrot.slane %v2761_v35, %v15538_v41  ;;  %v15246_v35 = vld [vmem:[%s18837_s1 + $0x1cb0] sm:$0xff]  }
 0x339   :  { %14000 = vmatprep.subr.bf16.mxu0 %v15165_v42  ;;  %v2762_v42 = vcombine.high %v18276_v36, %v18276_v36 }
 0x33a   :  { %14021 = vmatpush3.bf16.msra.mxu1 %v15164_v40  ;;  %v15207_v40 = vld [vmem:[%s18837_s1 + $0x1bf8] sm:$0xff]  }
 0x33b   :  { %14022 = vmatprep.subr.bf16.mxu1 %v15166_v43  ;;  %v15208_v43 = vld [vmem:[%s18837_s1 + $0x1b38] sm:$0xff]  }
 0x33c   :  { %14001 = vmatpush3.bf16.msra.mxu0 %v15167_v44  ;;  %v2793_v44 = vcombine.high %v2783_v39, %v2783_v39 }
 0x33d   :  { %14002 = vmatprep.subr.bf16.mxu0 %v15169_v46  ;;  %v2790_v46 = vrot.slane %v2762_v42, %v15538_v41 }
 0x33e   :  { %14023 = vmatpush3.bf16.msra.mxu1 %v15168_v45  ;;  %v15209_v45 = vld [vmem:[%s18837_s1 + $0x1bb8] sm:$0xff]  }
 0x33f   :  { %14024 = vmatprep.subr.bf16.mxu1 %v15170_v47  ;;  %v2791_v47 = vcombine.high %v2769_v37, %v2769_v37 }
 0x340   :  { %14003 = vmatpush3.bf16.msra.mxu0 %v15171_v48  ;;  %v15210_v48 = vld [vmem:[%s18837_s1 + $0x1b70] sm:$0xff]  }
 0x341   :  { %14032 = vmatprep.subr.bf16.mxu0 %v15174_v51 }
 0x342   :  { %14025 = vmatpush3.bf16.msra.mxu1 %v15172_v49  ;;  %v15211_v49 = vld [vmem:[%s18837_s1 + $0x1bf0] sm:$0xff]  }
 0x343   :  { %v13740_v58 = vpop.f32.mrf.mxu0  ;;  %11198 = vmatmul.mubr.bf16.vlgmr.msra.gmra.mxu0 %v2727_v50  ;;  %14054 = vmatprep.subr.bf16.mxu1 %v15175_v52  ;;  %v2794_v50 = vcombine.high %v2790_v46, %v2790_v46  ;;  %v15212_v52 = vld [vmem:[%s18837_s1 + $0x1b30] sm:$0xff]  }
 0x344   :  { %14033 = vmatpush3.bf16.msra.mxu0 %v15176_v53  ;;  %11277 = vmatprep.mubr.bf16.mxu0 %v2783_v39  ;;  %v15213_v53 = vld [vmem:[%s18837_s1 + $0x1bb0] sm:$0xff]  }
 0x345   :  { %v13762_v61 = vpop.f32.mrf.mxu1  ;;  %11238 = vmatmul.mubr.bf16.vlgmr.msra.gmra.mxu1 %v2743_v55  ;;  %v13741_v62 = vpop.f32.mrf.mxu0  ;;  %14034 = vmatprep.subr.bf16.mxu0 %v15178_v56  ;;  %v15214_v56 = vld [vmem:[%s18837_s1 + $0x1b68] sm:$0xff]  }
 0x346   :  { %14055 = vmatpush3.bf16.msra.mxu1 %v15177_v54  ;;  %v13742_v0 = vadd.f32 %v13741_v62, %v13740_v58  ;;  %11317 = vmatprep.mubr.bf16.mxu1 %v2793_v44  ;;  %v15215_v58 = vld [vmem:[%s18837_s1 + $0x1be8] sm:$0xff]  }
 0x347   :  { %v13763_v2 = vpop.f32.mrf.mxu1  ;;  %v13743_v3 = vpop.f32.mrf.mxu0  ;;  %14056 = vmatprep.subr.bf16.mxu1 %v15179_v57  ;;  %v15249_v44 = vld [vmem:[%s18837_s1 + $0x1c28] sm:$0xff]  }
 0x348   :  { %v10720_v5 = vadd.f32 %v13742_v0, %v18111_v28  ;;  %v13764_v6 = vadd.f32 %v13763_v2, %v13762_v61  ;;  %14035 = vmatpush3.bf16.msra.mxu0 %v15180_v59  ;;  %v15202_v28 = vld [vmem:[%s18837_s1 + $0x1a40] sm:$0xff]   ;;  %v15216_v61 = vld [vmem:[%s18837_s1 + $0x1b28] sm:$0xff]  }
 0x349   :  { %v13765_v8 = vpop.f32.mrf.mxu1  ;;  %v13744_v9 = vpop.f32.mrf.mxu0  ;;  %14036 = vmatprep.subr.bf16.mxu0 %v15182_v63  ;;  %v15217_v0 = vld [vmem:[%s18837_s1 + $0x1ba8] sm:$0xff]   ;;  %v15218_v3 = vld [vmem:[%s18837_s1 + $0x1b60] sm:$0xff]  }
 0x34a   :  { %v18212_v11 = vadd.f32 %v13764_v6, %v10720_v5  ;;  %14057 = vmatpush3.bf16.msra.mxu1 %v15181_v60  ;;  %v15219_v5 = vld [vmem:[%s18837_s1 + $0x1be0] sm:$0xff]   ;;  %v15222_v9 = vld [vmem:[%s18837_s1 + $0x1b58] sm:$0xff]  }
 0x34b   :  { %v13766_v13 = vpop.f32.mrf.mxu1  ;;  %14058 = vmatprep.subr.bf16.mxu1 %v15183_v1  ;;  %v15221_v8 = vld [vmem:[%s18837_s1 + $0x1ba0] sm:$0xff]  }
 0x34c   :  { %14037 = vmatpush3.bf16.msra.mxu0 %v15184_v4  ;;  %v15226_v13 = vld [vmem:[%s18837_s1 + $0x1b50] sm:$0xff]  }
 0x34d   :  { %14038 = vmatprep.subr.bf16.mxu0 %v15186_v10  ;;  %v15223_v10 = vld [vmem:[%s18837_s1 + $0x1bd8] sm:$0xff]  }
 0x34e   :  { %14059 = vmatpush3.bf16.msra.mxu1 %v15185_v7  ;;  %v15220_v7 = vld [vmem:[%s18837_s1 + $0x1b20] sm:$0xff]  }
 0x34f   :  { %14060 = vmatprep.subr.bf16.mxu1 %v15187_v12  ;;  %v15225_v12 = vld [vmem:[%s18837_s1 + $0x1b98] sm:$0xff]  }
 0x350   :  { %14039 = vmatpush3.bf16.msra.mxu0 %v15188_v14  ;;  %v15227_v14 = vld [vmem:[%s18837_s1 + $0x1bd0] sm:$0xff]  }
 0x351   :  { %14040 = vmatprep.subr.bf16.mxu0 %v15190_v16  ;;  %v15229_v16 = vld [vmem:[%s18837_s1 + $0x1b90] sm:$0xff]  }
 0x352   :  { %14061 = vmatpush3.bf16.msra.mxu1 %v15189_v15  ;;  %v15228_v15 = vld [vmem:[%s18837_s1 + $0x1b10] sm:$0xff]  }
 0x353   :  { %14062 = vmatprep.subr.bf16.mxu1 %v15191_v17  ;;  %v15230_v17 = vld [vmem:[%s18837_s1 + $0x1b48] sm:$0xff]  }
 0x354   :  { %14041 = vmatpush3.bf16.msra.mxu0 %v15192_v18  ;;  %v15231_v18 = vld [vmem:[%s18837_s1 + $0x1bc8] sm:$0xff]  }
 0x355   :  { %14042 = vmatprep.subr.bf16.mxu0 %v15194_v20  ;;  %v15233_v20 = vld [vmem:[%s18837_s1 + $0x1b88] sm:$0xff]  }
 0x356   :  { %14063 = vmatpush3.bf16.msra.mxu1 %v15193_v19  ;;  %v15232_v19 = vld [vmem:[%s18837_s1 + $0x1b08] sm:$0xff]  }
 0x357   :  { %14064 = vmatprep.subr.bf16.mxu1 %v15195_v21  ;;  %v15234_v21 = vld [vmem:[%s18837_s1 + $0x1b40] sm:$0xff]  }
 0x358   :  { %14043 = vmatpush3.bf16.msra.mxu0 %v15196_v22  ;;  %v15235_v22 = vld [vmem:[%s18837_s1 + $0x1bc0] sm:$0xff]  }
 0x359   :  { %14044 = vmatprep.subr.bf16.mxu0 %v15198_v24  ;;  %v15237_v24 = vld [vmem:[%s18837_s1 + $0x1b80] sm:$0xff]  }
 0x35a   :  { %14065 = vmatpush3.bf16.msra.mxu1 %v15197_v23  ;;  %v15236_v23 = vld [vmem:[%s18837_s1 + $0x1b00] sm:$0xff]  }
 0x35b   :  { %14066 = vmatprep.subr.bf16.mxu1 %v15199_v25  ;;  %v2776_v25 = vrot.slane %v18276_v36, %v15538_v41 }
 0x35c   :  { %14045 = vmatpush3.bf16.msra.mxu0 %v15200_v26  ;;  %v15239_v26 = vld [vmem:[%s18837_s1 + $0x1c78] sm:$0xff]  }
 0x35d   :  { %14046 = vmatprep.subr.bf16.mxu0 %v15202_v28  ;;  %v15241_v28 = vld [vmem:[%s18837_s1 + $0x1c38] sm:$0xff]  }
 0x35e   :  { %14067 = vmatpush3.bf16.msra.mxu1 %v15201_v27  ;;  %v15240_v27 = vld [vmem:[%s18837_s1 + $0x1cf8] sm:$0xff]  }
 0x35f   :  { %14068 = vmatprep.subr.bf16.mxu1 %v15203_v30  ;;  %v2792_v30 = vcombine.high %v2776_v25, %v2776_v25 }
 0x360   :  { %14047 = vmatpush3.bf16.msra.mxu0 %v15204_v33 }
 0x361   :  { %14076 = vmatprep.subr.bf16.mxu0 %v15206_v38  ;;  %v15247_v38 = vld [vmem:[%s18837_s1 + $0x1c68] sm:$0xff]  }
 0x362   :  { %14069 = vmatpush3.bf16.msra.mxu1 %v15205_v34  ;;  %v15245_v34 = vld [vmem:[%s18837_s1 + $0x1c30] sm:$0xff]  }
 0x363   :  { %v13784_v51 = vpop.f32.mrf.mxu0  ;;  %11278 = vmatmul.mubr.bf16.vlgmr.msra.gmra.mxu0 %v2769_v37  ;;  %14098 = vmatprep.subr.bf16.mxu1 %v15207_v40  ;;  %v15248_v40 = vld [vmem:[%s18837_s1 + $0x1ce8] sm:$0xff]  }
 0x364   :  { %14077 = vmatpush3.bf16.msra.mxu0 %v15208_v43  ;;  %11357 = vmatprep.mubr.bf16.mxu0 %v2790_v46 }
 0x365   :  { %v13806_v54 = vpop.f32.mrf.mxu1  ;;  %11318 = vmatmul.mubr.bf16.vlgmr.msra.gmra.mxu1 %v2791_v47  ;;  %v13785_v55 = vpop.f32.mrf.mxu0  ;;  %14078 = vmatprep.subr.bf16.mxu0 %v15210_v48  ;;  %v15250_v47 = vld [vmem:[%s18837_s1 + $0x1ca8] sm:$0xff]  }
 0x366   :  { %14099 = vmatpush3.bf16.msra.mxu1 %v15209_v45  ;;  %v13786_v57 = vadd.f32 %v13785_v55, %v13784_v51  ;;  %11397 = vmatprep.mubr.bf16.mxu1 %v2794_v50  ;;  %v15251_v50 = vld [vmem:[%s18837_s1 + $0x1c60] sm:$0xff]  }
 0x367   :  { %v13807_v59 = vpop.f32.mrf.mxu1  ;;  %v13787_v60 = vpop.f32.mrf.mxu0  ;;  %14100 = vmatprep.subr.bf16.mxu1 %v15211_v49  ;;  %v15254_v55 = vld [vmem:[%s18837_s1 + $0x1ca0] sm:$0xff]  }
 0x368   :  { %v10800_v62 = vadd.f32 %v13786_v57, %v18212_v11  ;;  %v13808_v63 = vadd.f32 %v13807_v59, %v13806_v54  ;;  %14079 = vmatpush3.bf16.msra.mxu0 %v15212_v52  ;;  %v15224_v11 = vld [vmem:[%s18837_s1 + $0x1b18] sm:$0xff]   ;;  %v15252_v52 = vld [vmem:[%s18837_s1 + $0x1ce0] sm:$0xff]   ;;  %v15259_v60 = vld [vmem:[%s18837_s1 + $0x1c50] sm:$0xff]  }
 0x369   :  { %v13809_v1 = vpop.f32.mrf.mxu1  ;;  %v13788_v2 = vpop.f32.mrf.mxu0  ;;  %14080 = vmatprep.subr.bf16.mxu0 %v15214_v56  ;;  %v15253_v54 = vld [vmem:[%s18837_s1 + $0x1c20] sm:$0xff]   ;;  %v15255_v56 = vld [vmem:[%s18837_s1 + $0x1c58] sm:$0xff]  }
 0x36a   :  { %v18323_v4 = vadd.f32 %v13808_v63, %v10800_v62  ;;  %14101 = vmatpush3.bf16.msra.mxu1 %v15213_v53  ;;  %v15256_v57 = vld [vmem:[%s18837_s1 + $0x1cd8] sm:$0xff]   ;;  %v15261_v62 = vld [vmem:[%s18837_s1 + $0x1c10] sm:$0xff]   ;;  %v15264_v1 = vld [vmem:[%s18837_s1 + $0x1cc8] sm:$0xff]  }
 0x36b   :  { %v13810_v6 = vpop.f32.mrf.mxu1  ;;  %14102 = vmatprep.subr.bf16.mxu1 %v15215_v58  ;;  %v15257_v58 = vld [vmem:[%s18837_s1 + $0x1c18] sm:$0xff]   ;;  %v15262_v63 = vld [vmem:[%s18837_s1 + $0x1c90] sm:$0xff]   ;;  %v15265_v2 = vld [vmem:[%s18837_s1 + $0x1c08] sm:$0xff]  }
 0x36c   :  { %14081 = vmatpush3.bf16.msra.mxu0 %v15216_v61  ;;  %v15258_v59 = vld [vmem:[%s18837_s1 + $0x1c98] sm:$0xff]   ;;  %v15260_v61 = vld [vmem:[%s18837_s1 + $0x1cd0] sm:$0xff]  }
 0x36d   :  { %14082 = vmatprep.subr.bf16.mxu0 %v15218_v3  ;;  %v15266_v3 = vld [vmem:[%s18837_s1 + $0x1c88] sm:$0xff]   ;;  %v36_v6 = vld [vmem:[%s18836_s0 + $0x70] sm:$0xff] }
 0x36e   :  { %14103 = vmatpush3.bf16.msra.mxu1 %v15217_v0  ;;  %v15263_v0 = vld [vmem:[%s18837_s1 + $0x1c48] sm:$0xff]  }
 0x36f   :  { %14104 = vmatprep.subr.bf16.mxu1 %v15219_v5  ;;  %v15268_v5 = vld [vmem:[%s18837_s1 + $0x1cc0] sm:$0xff]  }
 0x370   :  { %14083 = vmatpush3.bf16.msra.mxu0 %v15220_v7  ;;  %v15269_v7 = vld [vmem:[%s18837_s1 + $0x1c00] sm:$0xff]  }
 0x371   :  { %14084 = vmatprep.subr.bf16.mxu0 %v15222_v9  ;;  %v2795_v9 = vcombine.high %v36_v6, %v36_v6 }
 0x372   :  { %14105 = vmatpush3.bf16.msra.mxu1 %v15221_v8  ;;  %v2802_v8 = vrot.slane %v36_v6, %v15538_v41 }
 0x373   :  { %14106 = vmatprep.subr.bf16.mxu1 %v15223_v10  ;;  %v15270_v10 = vld [vmem:[%s18837_s1 + $0x1c80] sm:$0xff]  }
 0x374   :  { %14085 = vmatpush3.bf16.msra.mxu0 %v15224_v11  ;;  %v2810_v11 = vcombine.high %v2802_v8, %v2802_v8 }
 0x375   :  { %14086 = vmatprep.subr.bf16.mxu0 %v15226_v13  ;;  %v15271_v13 = vld [vmem:[%s18837_s1 + $0x1d78] sm:$0xff]  }
 0x376   :  { %14107 = vmatpush3.bf16.msra.mxu1 %v15225_v12  ;;  %v2818_v12 = vrot.slane %v2802_v8, %v15538_v41  ;;  %v15309_v8 = vld [vmem:[%s18837_s1 + $0x1ef0] sm:$0xff]  }
 0x377   :  { %14108 = vmatprep.subr.bf16.mxu1 %v15227_v14  ;;  %v18492_v14 = vrot.slane %v2795_v9, %v15538_v41 }
 0x378   :  { %14087 = vmatpush3.bf16.msra.mxu0 %v15228_v15  ;;  %v15272_v15 = vld [vmem:[%s18837_s1 + $0x1df8] sm:$0xff]  }
 0x379   :  { %14088 = vmatprep.subr.bf16.mxu0 %v15230_v17  ;;  %v15273_v17 = vld [vmem:[%s18837_s1 + $0x1d38] sm:$0xff]  }
 0x37a   :  { %14109 = vmatpush3.bf16.msra.mxu1 %v15229_v16  ;;  %v2832_v16 = vrot.slane %v2810_v11, %v15538_v41  ;;  %v15311_v11 = vld [vmem:[%s18837_s1 + $0x1eb0] sm:$0xff]  }
 0x37b   :  { %14110 = vmatprep.subr.bf16.mxu1 %v15231_v18  ;;  %v2811_v18 = vcombine.high %v18492_v14, %v18492_v14 }
 0x37c   :  { %14089 = vmatpush3.bf16.msra.mxu0 %v15232_v19  ;;  %v15274_v19 = vld [vmem:[%s18837_s1 + $0x1db8] sm:$0xff]  }
 0x37d   :  { %14090 = vmatprep.subr.bf16.mxu0 %v15234_v21  ;;  %v2840_v21 = vcombine.high %v2818_v12, %v2818_v12 }
 0x37e   :  { %14111 = vmatpush3.bf16.msra.mxu1 %v15233_v20  ;;  %v2842_v20 = vcombine.high %v2832_v16, %v2832_v16 }
 0x37f   :  { %14112 = vmatprep.subr.bf16.mxu1 %v15235_v22  ;;  %v15275_v22 = vld [vmem:[%s18837_s1 + $0x1d70] sm:$0xff]  }
 0x380   :  { %14091 = vmatpush3.bf16.msra.mxu0 %v15236_v23  ;;  %v2839_v23 = vrot.slane %v2811_v18, %v15538_v41 }
 0x381   :  { %14120 = vmatprep.subr.bf16.mxu0 %v15239_v26  ;;  %v15277_v26 = vld [vmem:[%s18837_s1 + $0x1d30] sm:$0xff]  }
 0x382   :  { %14113 = vmatpush3.bf16.msra.mxu1 %v15237_v24  ;;  %v15276_v24 = vld [vmem:[%s18837_s1 + $0x1df0] sm:$0xff]  }
 0x383   :  { %v13828_v33 = vpop.f32.mrf.mxu0  ;;  %11358 = vmatmul.mubr.bf16.vlgmr.msra.gmra.mxu0 %v2776_v25  ;;  %14142 = vmatprep.subr.bf16.mxu1 %v15240_v27  ;;  %v2843_v27 = vcombine.high %v2839_v23, %v2839_v23 }
 0x384   :  { %14121 = vmatpush3.bf16.msra.mxu0 %v15241_v28  ;;  %11437 = vmatprep.mubr.bf16.mxu0 %v2832_v16  ;;  %v15278_v28 = vld [vmem:[%s18837_s1 + $0x1db0] sm:$0xff]   ;;  %v15313_v16 = vld [vmem:[%s18837_s1 + $0x1ee8] sm:$0xff]  }
 0x385   :  { %v13850_v36 = vpop.f32.mrf.mxu1  ;;  %11398 = vmatmul.mubr.bf16.vlgmr.msra.gmra.mxu1 %v2792_v30  ;;  %v13829_v37 = vpop.f32.mrf.mxu0  ;;  %14122 = vmatprep.subr.bf16.mxu0 %v15243_v31  ;;  %v15279_v31 = vld [vmem:[%s18837_s1 + $0x1d68] sm:$0xff]  }
 0x386   :  { %14143 = vmatpush3.bf16.msra.mxu1 %v15242_v29  ;;  %v13830_v39 = vadd.f32 %v13829_v37, %v13828_v33  ;;  %11477 = vmatprep.mubr.bf16.mxu1 %v2842_v20  ;;  %v15280_v33 = vld [vmem:[%s18837_s1 + $0x1de8] sm:$0xff]  }
 0x387   :  { %v13851_v42 = vpop.f32.mrf.mxu1  ;;  %v13831_v43 = vpop.f32.mrf.mxu0  ;;  %14144 = vmatprep.subr.bf16.mxu1 %v15244_v32 }
 0x388   :  { %v10880_v45 = vadd.f32 %v13830_v39, %v18323_v4  ;;  %v13852_v46 = vadd.f32 %v13851_v42, %v13850_v36  ;;  %14123 = vmatpush3.bf16.msra.mxu0 %v15245_v34  ;;  %v15267_v4 = vld [vmem:[%s18837_s1 + $0x1c40] sm:$0xff]   ;;  %v15281_v36 = vld [vmem:[%s18837_s1 + $0x1d28] sm:$0xff]  }
 0x389   :  { %v13853_v48 = vpop.f32.mrf.mxu1  ;;  %v13832_v49 = vpop.f32.mrf.mxu0  ;;  %14124 = vmatprep.subr.bf16.mxu0 %v15247_v38  ;;  %v15282_v39 = vld [vmem:[%s18837_s1 + $0x1da8] sm:$0xff]   ;;  %v15283_v43 = vld [vmem:[%s18837_s1 + $0x1d60] sm:$0xff]  }
 0x38a   :  { %v18424_v51 = vadd.f32 %v13852_v46, %v10880_v45  ;;  %14145 = vmatpush3.bf16.msra.mxu1 %v15246_v35  ;;  %v15284_v45 = vld [vmem:[%s18837_s1 + $0x1de0] sm:$0xff]   ;;  %v15287_v49 = vld [vmem:[%s18837_s1 + $0x1d58] sm:$0xff]  }
 0x38b   :  { %v13854_v53 = vpop.f32.mrf.mxu1  ;;  %14146 = vmatprep.subr.bf16.mxu1 %v15248_v40  ;;  %v15286_v48 = vld [vmem:[%s18837_s1 + $0x1da0] sm:$0xff]  }
 0x38c   :  { %14125 = vmatpush3.bf16.msra.mxu0 %v15249_v44  ;;  %v15291_v53 = vld [vmem:[%s18837_s1 + $0x1d50] sm:$0xff]  }
 0x38d   :  { %14126 = vmatprep.subr.bf16.mxu0 %v15251_v50  ;;  %v15288_v50 = vld [vmem:[%s18837_s1 + $0x1dd8] sm:$0xff]  }
 0x38e   :  { %14147 = vmatpush3.bf16.msra.mxu1 %v15250_v47  ;;  %v15285_v47 = vld [vmem:[%s18837_s1 + $0x1d20] sm:$0xff]  }
 0x38f   :  { %14148 = vmatprep.subr.bf16.mxu1 %v15252_v52  ;;  %v15290_v52 = vld [vmem:[%s18837_s1 + $0x1d98] sm:$0xff]  }
 0x390   :  { %14127 = vmatpush3.bf16.msra.mxu0 %v15253_v54  ;;  %v15292_v54 = vld [vmem:[%s18837_s1 + $0x1dd0] sm:$0xff]  }
 0x391   :  { %14128 = vmatprep.subr.bf16.mxu0 %v15255_v56  ;;  %v15294_v56 = vld [vmem:[%s18837_s1 + $0x1d90] sm:$0xff]  }
 0x392   :  { %14149 = vmatpush3.bf16.msra.mxu1 %v15254_v55  ;;  %v15293_v55 = vld [vmem:[%s18837_s1 + $0x1d10] sm:$0xff]  }
 0x393   :  { %14150 = vmatprep.subr.bf16.mxu1 %v15256_v57  ;;  %v15295_v57 = vld [vmem:[%s18837_s1 + $0x1d48] sm:$0xff]  }
 0x394   :  { %14129 = vmatpush3.bf16.msra.mxu0 %v15257_v58  ;;  %v15296_v58 = vld [vmem:[%s18837_s1 + $0x1dc8] sm:$0xff]  }
 0x395   :  { %14130 = vmatprep.subr.bf16.mxu0 %v15259_v60  ;;  %v15298_v60 = vld [vmem:[%s18837_s1 + $0x1d88] sm:$0xff]  }
 0x396   :  { %14151 = vmatpush3.bf16.msra.mxu1 %v15258_v59  ;;  %v15297_v59 = vld [vmem:[%s18837_s1 + $0x1d08] sm:$0xff]  }
 0x397   :  { %14152 = vmatprep.subr.bf16.mxu1 %v15260_v61  ;;  %v15299_v61 = vld [vmem:[%s18837_s1 + $0x1d40] sm:$0xff]  }
 0x398   :  { %14131 = vmatpush3.bf16.msra.mxu0 %v15261_v62  ;;  %v15300_v62 = vld [vmem:[%s18837_s1 + $0x1dc0] sm:$0xff]  }
 0x399   :  { %14132 = vmatprep.subr.bf16.mxu0 %v15263_v0  ;;  %v15302_v0 = vld [vmem:[%s18837_s1 + $0x1d80] sm:$0xff]  }
 0x39a   :  { %14153 = vmatpush3.bf16.msra.mxu1 %v15262_v63  ;;  %v15301_v63 = vld [vmem:[%s18837_s1 + $0x1d00] sm:$0xff]  }
 0x39b   :  { %14154 = vmatprep.subr.bf16.mxu1 %v15264_v1  ;;  %v2825_v1 = vrot.slane %v18492_v14, %v15538_v41  ;;  %v15312_v14 = vld [vmem:[%s18837_s1 + $0x1e68] sm:$0xff]  }
 0x39c   :  { %14133 = vmatpush3.bf16.msra.mxu0 %v15265_v2  ;;  %v15304_v2 = vld [vmem:[%s18837_s1 + $0x1e78] sm:$0xff]  }
 0x39d   :  { %14134 = vmatprep.subr.bf16.mxu0 %v15267_v4  ;;  %v15306_v4 = vld [vmem:[%s18837_s1 + $0x1e38] sm:$0xff]   ;;  %v2841_v6 = vcombine.high %v2825_v1, %v2825_v1 }
 0x39e   :  { %14155 = vmatpush3.bf16.msra.mxu1 %v15266_v3  ;;  %v15305_v3 = vld [vmem:[%s18837_s1 + $0x1ef8] sm:$0xff]  }
 0x39f   :  { %14156 = vmatprep.subr.bf16.mxu1 %v15268_v5  ;;  %v15307_v5 = vld [vmem:[%s18837_s1 + $0x1eb8] sm:$0xff]  }
 0x3a0   :  { %14135 = vmatpush3.bf16.msra.mxu0 %v15269_v7  ;;  %v15308_v7 = vld [vmem:[%s18837_s1 + $0x1e70] sm:$0xff]  }
 0x3a1   :  { %14164 = vmatprep.subr.bf16.mxu0 %v15271_v13 }
 0x3a2   :  { %14157 = vmatpush3.bf16.msra.mxu1 %v15270_v10  ;;  %v15310_v10 = vld [vmem:[%s18837_s1 + $0x1e30] sm:$0xff]  }
 0x3a3   :  { %v13872_v25 = vpop.f32.mrf.mxu0  ;;  %11438 = vmatmul.mubr.bf16.vlgmr.msra.gmra.mxu0 %v2818_v12  ;;  %14186 = vmatprep.subr.bf16.mxu1 %v15272_v15 }
 0x3a4   :  { %14165 = vmatpush3.bf16.msra.mxu0 %v15273_v17  ;;  %11517 = vmatprep.mubr.bf16.mxu0 %v2839_v23 }
 0x3a5   :  { %v13894_v29 = vpop.f32.mrf.mxu1  ;;  %11478 = vmatmul.mubr.bf16.vlgmr.msra.gmra.mxu1 %v2840_v21  ;;  %v13873_v30 = vpop.f32.mrf.mxu0  ;;  %14166 = vmatprep.subr.bf16.mxu0 %v15275_v22  ;;  %v15315_v22 = vld [vmem:[%s18837_s1 + $0x1ea8] sm:$0xff]  }
 0x3a6   :  { %14187 = vmatpush3.bf16.msra.mxu1 %v15274_v19  ;;  %v13874_v32 = vadd.f32 %v13873_v30, %v13872_v25  ;;  %11557 = vmatprep.mubr.bf16.mxu1 %v2843_v27  ;;  %v15314_v19 = vld [vmem:[%s18837_s1 + $0x1e28] sm:$0xff]   ;;  %v15316_v25 = vld [vmem:[%s18837_s1 + $0x1e60] sm:$0xff]  }
 0x3a7   :  { %v13895_v34 = vpop.f32.mrf.mxu1  ;;  %v13875_v35 = vpop.f32.mrf.mxu0  ;;  %14188 = vmatprep.subr.bf16.mxu1 %v15276_v24  ;;  %v15317_v27 = vld [vmem:[%s18837_s1 + $0x1ee0] sm:$0xff]  }
 0x3a8   :  { %v10960_v37 = vadd.f32 %v13874_v32, %v18424_v51  ;;  %v13896_v38 = vadd.f32 %v13895_v34, %v13894_v29  ;;  %14167 = vmatpush3.bf16.msra.mxu0 %v15277_v26  ;;  %v15289_v51 = vld [vmem:[%s18837_s1 + $0x1d18] sm:$0xff]   ;;  %v15318_v29 = vld [vmem:[%s18837_s1 + $0x1e20] sm:$0xff]   ;;  %v15324_v35 = vld [vmem:[%s18837_s1 + $0x1e50] sm:$0xff]  }
 0x3a9   :  { %v13897_v40 = vpop.f32.mrf.mxu1  ;;  %v13876_v42 = vpop.f32.mrf.mxu0  ;;  %14168 = vmatprep.subr.bf16.mxu0 %v15279_v31  ;;  %v15319_v30 = vld [vmem:[%s18837_s1 + $0x1ea0] sm:$0xff]   ;;  %v15320_v31 = vld [vmem:[%s18837_s1 + $0x1e58] sm:$0xff]  }
 0x3aa   :  { %v18535_v44 = vadd.f32 %v13896_v38, %v10960_v37  ;;  %14189 = vmatpush3.bf16.msra.mxu1 %v15278_v28  ;;  %v15321_v32 = vld [vmem:[%s18837_s1 + $0x1ed8] sm:$0xff]   ;;  %v15326_v37 = vld [vmem:[%s18837_s1 + $0x1e10] sm:$0xff]   ;;  %v15329_v40 = vld [vmem:[%s18837_s1 + $0x1ec8] sm:$0xff]  }
 0x3ab   :  { %v13898_v46 = vpop.f32.mrf.mxu1  ;;  %14190 = vmatprep.subr.bf16.mxu1 %v15280_v33  ;;  %v15322_v33 = vld [vmem:[%s18837_s1 + $0x1e18] sm:$0xff]   ;;  %v15327_v38 = vld [vmem:[%s18837_s1 + $0x1e90] sm:$0xff]   ;;  %v15330_v42 = vld [vmem:[%s18837_s1 + $0x1e08] sm:$0xff]  }
 0x3ac   :  { %14169 = vmatpush3.bf16.msra.mxu0 %v15281_v36  ;;  %v15323_v34 = vld [vmem:[%s18837_s1 + $0x1e98] sm:$0xff]   ;;  %v15325_v36 = vld [vmem:[%s18837_s1 + $0x1ed0] sm:$0xff]  }
 0x3ad   :  { %14170 = vmatprep.subr.bf16.mxu0 %v15283_v43  ;;  %v15331_v43 = vld [vmem:[%s18837_s1 + $0x1e88] sm:$0xff]   ;;  %v37_v46 = vld [vmem:[%s18836_s0 + $0x78] sm:$0xff] }
 0x3ae   :  { %14191 = vmatpush3.bf16.msra.mxu1 %v15282_v39  ;;  %v15328_v39 = vld [vmem:[%s18837_s1 + $0x1e48] sm:$0xff]  }
 0x3af   :  { %14192 = vmatprep.subr.bf16.mxu1 %v15284_v45  ;;  %v15333_v45 = vld [vmem:[%s18837_s1 + $0x1ec0] sm:$0xff]  }
 0x3b0   :  { %14171 = vmatpush3.bf16.msra.mxu0 %v15285_v47  ;;  %v15334_v47 = vld [vmem:[%s18837_s1 + $0x1e00] sm:$0xff]  }
 0x3b1   :  { %14172 = vmatprep.subr.bf16.mxu0 %v15287_v49  ;;  %v2844_v49 = vcombine.high %v37_v46, %v37_v46 }
 0x3b2   :  { %14193 = vmatpush3.bf16.msra.mxu1 %v15286_v48  ;;  %v2851_v48 = vrot.slane %v37_v46, %v15538_v41 }
 0x3b3   :  { %14194 = vmatprep.subr.bf16.mxu1 %v15288_v50  ;;  %v15335_v50 = vld [vmem:[%s18837_s1 + $0x1e80] sm:$0xff]  }
 0x3b4   :  { %14173 = vmatpush3.bf16.msra.mxu0 %v15289_v51  ;;  %v2859_v51 = vcombine.high %v2851_v48, %v2851_v48 }
 0x3b5   :  { %14174 = vmatprep.subr.bf16.mxu0 %v15291_v53  ;;  %v15336_v53 = vld [vmem:[%s18837_s1 + $0x1f78] sm:$0xff]  }
 0x3b6   :  { %14195 = vmatpush3.bf16.msra.mxu1 %v15290_v52  ;;  %v2867_v52 = vrot.slane %v2851_v48, %v15538_v41 }
 0x3b7   :  { %14196 = vmatprep.subr.bf16.mxu1 %v15292_v54  ;;  %v18704_v54 = vrot.slane %v2844_v49, %v15538_v41 }
 0x3b8   :  { %14175 = vmatpush3.bf16.msra.mxu0 %v15293_v55  ;;  %v15337_v55 = vld [vmem:[%s18837_s1 + $0x1ff8] sm:$0xff]  }
 0x3b9   :  { %14176 = vmatprep.subr.bf16.mxu0 %v15295_v57  ;;  %v15338_v57 = vld [vmem:[%s18837_s1 + $0x1f38] sm:$0xff]  }
 0x3ba   :  { %14197 = vmatpush3.bf16.msra.mxu1 %v15294_v56  ;;  %v2881_v56 = vrot.slane %v2859_v51, %v15538_v41 }
 0x3bb   :  { %14198 = vmatprep.subr.bf16.mxu1 %v15296_v58  ;;  %v2860_v58 = vcombine.high %v18704_v54, %v18704_v54 }
 0x3bc   :  { %14177 = vmatpush3.bf16.msra.mxu0 %v15297_v59  ;;  %v15339_v59 = vld [vmem:[%s18837_s1 + $0x1fb8] sm:$0xff]  }
 0x3bd   :  { %14178 = vmatprep.subr.bf16.mxu0 %v15299_v61  ;;  %v2889_v61 = vcombine.high %v2867_v52, %v2867_v52 }
 0x3be   :  { %14199 = vmatpush3.bf16.msra.mxu1 %v15298_v60  ;;  %v2891_v60 = vcombine.high %v2881_v56, %v2881_v56 }
 0x3bf   :  { %14200 = vmatprep.subr.bf16.mxu1 %v15300_v62  ;;  %v15340_v62 = vld [vmem:[%s18837_s1 + $0x1f70] sm:$0xff]  }
 0x3c0   :  { %14179 = vmatpush3.bf16.msra.mxu0 %v15301_v63  ;;  %v2888_v63 = vrot.slane %v2860_v58, %v15538_v41 }
 0x3c1   :  { %14208 = vmatprep.subr.bf16.mxu0 %v15304_v2  ;;  %v15342_v2 = vld [vmem:[%s18837_s1 + $0x1f30] sm:$0xff]  }
 0x3c2   :  { %14201 = vmatpush3.bf16.msra.mxu1 %v15302_v0  ;;  %v15341_v0 = vld [vmem:[%s18837_s1 + $0x1ff0] sm:$0xff]  }
 0x3c3   :  { %v13916_v9 = vpop.f32.mrf.mxu0  ;;  %11518 = vmatmul.mubr.bf16.vlgmr.msra.gmra.mxu0 %v2825_v1  ;;  %14230 = vmatprep.subr.bf16.mxu1 %v15305_v3  ;;  %v2892_v3 = vcombine.high %v2888_v63, %v2888_v63 }
 0x3c4   :  { %14209 = vmatpush3.bf16.msra.mxu0 %v15306_v4  ;;  %11597 = vmatprep.mubr.bf16.mxu0 %v2881_v56  ;;  %v15343_v4 = vld [vmem:[%s18837_s1 + $0x1fb0] sm:$0xff]  }
 0x3c5   :  { %v13938_v12 = vpop.f32.mrf.mxu1  ;;  %11558 = vmatmul.mubr.bf16.vlgmr.msra.gmra.mxu1 %v2841_v6  ;;  %v13917_v13 = vpop.f32.mrf.mxu0  ;;  %14210 = vmatprep.subr.bf16.mxu0 %v15308_v7  ;;  %v15344_v7 = vld [vmem:[%s18837_s1 + $0x1f68] sm:$0xff]  }
 0x3c6   :  { %14231 = vmatpush3.bf16.msra.mxu1 %v15307_v5  ;;  %v13918_v15 = vadd.f32 %v13917_v13, %v13916_v9  ;;  %11637 = vmatprep.mubr.bf16.mxu1 %v2891_v60  ;;  %v15345_v9 = vld [vmem:[%s18837_s1 + $0x1fe8] sm:$0xff]  }
 0x3c7   :  { %v13939_v17 = vpop.f32.mrf.mxu1  ;;  %v13919_v18 = vpop.f32.mrf.mxu0  ;;  %14232 = vmatprep.subr.bf16.mxu1 %v15309_v8 }
 0x3c8   :  { %v11040_v20 = vadd.f32 %v13918_v15, %v18535_v44  ;;  %v13940_v21 = vadd.f32 %v13939_v17, %v13938_v12  ;;  %14211 = vmatpush3.bf16.msra.mxu0 %v15310_v10  ;;  %v15332_v44 = vld [vmem:[%s18837_s1 + $0x1e40] sm:$0xff]   ;;  %v15346_v12 = vld [vmem:[%s18837_s1 + $0x1f28] sm:$0xff]  }
 0x3c9   :  { %v13941_v23 = vpop.f32.mrf.mxu1  ;;  %v13920_v24 = vpop.f32.mrf.mxu0  ;;  %14212 = vmatprep.subr.bf16.mxu0 %v15312_v14  ;;  %v15347_v15 = vld [vmem:[%s18837_s1 + $0x1fa8] sm:$0xff]   ;;  %v15348_v18 = vld [vmem:[%s18837_s1 + $0x1f60] sm:$0xff]  }
 0x3ca   :  { %v18636_v26 = vadd.f32 %v13940_v21, %v11040_v20  ;;  %14233 = vmatpush3.bf16.msra.mxu1 %v15311_v11  ;;  %v15349_v20 = vld [vmem:[%s18837_s1 + $0x1fe0] sm:$0xff]   ;;  %v15352_v24 = vld [vmem:[%s18837_s1 + $0x1f58] sm:$0xff]  }
 0x3cb   :  { %v13942_v28 = vpop.f32.mrf.mxu1  ;;  %14234 = vmatprep.subr.bf16.mxu1 %v15313_v16  ;;  %v15351_v23 = vld [vmem:[%s18837_s1 + $0x1fa0] sm:$0xff]  }
 0x3cc   :  { %14213 = vmatpush3.bf16.msra.mxu0 %v15314_v19  ;;  %v15356_v28 = vld [vmem:[%s18837_s1 + $0x1f50] sm:$0xff]  }
 0x3cd   :  { %14214 = vmatprep.subr.bf16.mxu0 %v15316_v25  ;;  %v15353_v25 = vld [vmem:[%s18837_s1 + $0x1fd8] sm:$0xff]  }
 0x3ce   :  { %14235 = vmatpush3.bf16.msra.mxu1 %v15315_v22  ;;  %v15350_v22 = vld [vmem:[%s18837_s1 + $0x1f20] sm:$0xff]  }
 0x3cf   :  { %14236 = vmatprep.subr.bf16.mxu1 %v15317_v27  ;;  %v15355_v27 = vld [vmem:[%s18837_s1 + $0x1f98] sm:$0xff]  }
 0x3d0   :  { %14215 = vmatpush3.bf16.msra.mxu0 %v15318_v29  ;;  %v15357_v29 = vld [vmem:[%s18837_s1 + $0x1fd0] sm:$0xff]  }
 0x3d1   :  { %14216 = vmatprep.subr.bf16.mxu0 %v15320_v31  ;;  %v15359_v31 = vld [vmem:[%s18837_s1 + $0x1f90] sm:$0xff]  }
 0x3d2   :  { %14237 = vmatpush3.bf16.msra.mxu1 %v15319_v30  ;;  %v15358_v30 = vld [vmem:[%s18837_s1 + $0x1f10] sm:$0xff]  }
 0x3d3   :  { %14238 = vmatprep.subr.bf16.mxu1 %v15321_v32  ;;  %v15360_v32 = vld [vmem:[%s18837_s1 + $0x1f48] sm:$0xff]  }
 0x3d4   :  { %14217 = vmatpush3.bf16.msra.mxu0 %v15322_v33  ;;  %v15361_v33 = vld [vmem:[%s18837_s1 + $0x1fc8] sm:$0xff]  }
 0x3d5   :  { %14218 = vmatprep.subr.bf16.mxu0 %v15324_v35  ;;  %v15363_v35 = vld [vmem:[%s18837_s1 + $0x1f88] sm:$0xff]  }
 0x3d6   :  { %14239 = vmatpush3.bf16.msra.mxu1 %v15323_v34  ;;  %v15362_v34 = vld [vmem:[%s18837_s1 + $0x1f08] sm:$0xff]  }
 0x3d7   :  { %14240 = vmatprep.subr.bf16.mxu1 %v15325_v36  ;;  %v15364_v36 = vld [vmem:[%s18837_s1 + $0x1f40] sm:$0xff]  }
 0x3d8   :  { %14219 = vmatpush3.bf16.msra.mxu0 %v15326_v37  ;;  %v15365_v37 = vld [vmem:[%s18837_s1 + $0x1fc0] sm:$0xff]  }
 0x3d9   :  { %14220 = vmatprep.subr.bf16.mxu0 %v15328_v39  ;;  %v15367_v39 = vld [vmem:[%s18837_s1 + $0x1f80] sm:$0xff]  }
 0x3da   :  { %14241 = vmatpush3.bf16.msra.mxu1 %v15327_v38  ;;  %v15366_v38 = vld [vmem:[%s18837_s1 + $0x1f00] sm:$0xff]  }
 0x3db   :  { %14242 = vmatprep.subr.bf16.mxu1 %v15329_v40  ;;  %v2874_v40 = vrot.slane %v18704_v54, %v15538_v41 }
 0x3dc   :  { %14221 = vmatpush3.bf16.msra.mxu0 %v15330_v42 }
 0x3dd   :  { %14222 = vmatprep.subr.bf16.mxu0 %v15332_v44 }
 0x3de   :  { %14243 = vmatpush3.bf16.msra.mxu1 %v15331_v43 }
 0x3df   :  { %14244 = vmatprep.subr.bf16.mxu1 %v15333_v45 }
 0x3e0   :  { %14223 = vmatpush3.bf16.msra.mxu0 %v15334_v47 }
 0x3e1   :  { %14252 = vmatprep.subr.bf16.mxu0 %v15336_v53 }
 0x3e2   :  { %14245 = vmatpush3.bf16.msra.mxu1 %v15335_v50 }
 0x3e3   :  { %v13960_v1 = vpop.f32.mrf.mxu0  ;;  %11598 = vmatmul.mubr.bf16.vlgmr.msra.gmra.mxu0 %v2867_v52  ;;  %14274 = vmatprep.subr.bf16.mxu1 %v15337_v55 }
 0x3e4   :  { %14253 = vmatpush3.bf16.msra.mxu0 %v15338_v57  ;;  %11677 = vmatprep.mubr.bf16.mxu0 %v2888_v63 }
 0x3e5   :  { %v13982_v5 = vpop.f32.mrf.mxu1  ;;  %11638 = vmatmul.mubr.bf16.vlgmr.msra.gmra.mxu1 %v2889_v61  ;;  %v13961_v6 = vpop.f32.mrf.mxu0  ;;  %14254 = vmatprep.subr.bf16.mxu0 %v15340_v62 }
 0x3e6   :  { %14275 = vmatpush3.bf16.msra.mxu1 %v15339_v59  ;;  %v13962_v8 = vadd.f32 %v13961_v6, %v13960_v1  ;;  %11717 = vmatprep.mubr.bf16.mxu1 %v2892_v3 }
 0x3e7   :  { %v13983_v10 = vpop.f32.mrf.mxu1  ;;  %v13963_v11 = vpop.f32.mrf.mxu0  ;;  %14276 = vmatprep.subr.bf16.mxu1 %v15341_v0 }
 0x3e8   :  { %v11120_v13 = vadd.f32 %v13962_v8, %v18636_v26  ;;  %v13984_v14 = vadd.f32 %v13983_v10, %v13982_v5  ;;  %14255 = vmatpush3.bf16.msra.mxu0 %v15342_v2  ;;  %v15354_v26 = vld [vmem:[%s18837_s1 + $0x1f18] sm:$0xff]  }
 0x3e9   :  { %v13985_v16 = vpop.f32.mrf.mxu1  ;;  %v13964_v17 = vpop.f32.mrf.mxu0  ;;  %14256 = vmatprep.subr.bf16.mxu0 %v15344_v7 }
 0x3ea   :  { %v11160_v19 = vadd.f32 %v13984_v14, %v11120_v13  ;;  %14277 = vmatpush3.bf16.msra.mxu1 %v15343_v4 }
 0x3eb   :  { %v13986_v21 = vpop.f32.mrf.mxu1  ;;  %14278 = vmatprep.subr.bf16.mxu1 %v15345_v9 }
 0x3ec   :  { %14257 = vmatpush3.bf16.msra.mxu0 %v15346_v12 }
 0x3ed   :  { %14258 = vmatprep.subr.bf16.mxu0 %v15348_v18 }
 0x3ee   :  { %14279 = vmatpush3.bf16.msra.mxu1 %v15347_v15 }
 0x3ef   :  { %14280 = vmatprep.subr.bf16.mxu1 %v15349_v20 }
 0x3f0   :  { %14259 = vmatpush3.bf16.msra.mxu0 %v15350_v22 }
 0x3f1   :  { %14260 = vmatprep.subr.bf16.mxu0 %v15352_v24 }
 0x3f2   :  { %14281 = vmatpush3.bf16.msra.mxu1 %v15351_v23 }
 0x3f3   :  { %14282 = vmatprep.subr.bf16.mxu1 %v15353_v25 }
 0x3f4   :  { %14261 = vmatpush3.bf16.msra.mxu0 %v15354_v26 }
 0x3f5   :  { %14262 = vmatprep.subr.bf16.mxu0 %v15356_v28 }
 0x3f6   :  { %14283 = vmatpush3.bf16.msra.mxu1 %v15355_v27 }
 0x3f7   :  { %14284 = vmatprep.subr.bf16.mxu1 %v15357_v29 }
 0x3f8   :  { %14263 = vmatpush3.bf16.msra.mxu0 %v15358_v30 }
 0x3f9   :  { %14264 = vmatprep.subr.bf16.mxu0 %v15360_v32 }
 0x3fa   :  { %14285 = vmatpush3.bf16.msra.mxu1 %v15359_v31 }
 0x3fb   :  { %14286 = vmatprep.subr.bf16.mxu1 %v15361_v33 }
 0x3fc   :  { %14265 = vmatpush3.bf16.msra.mxu0 %v15362_v34 }
 0x3fd   :  { %14266 = vmatprep.subr.bf16.mxu0 %v15364_v36 }
 0x3fe   :  { %14287 = vmatpush3.bf16.msra.mxu1 %v15363_v35 }
 0x3ff   :  { %14288 = vmatprep.subr.bf16.mxu1 %v15365_v37 }
 0x400   :  { %14267 = vmatpush3.bf16.msra.mxu0 %v15366_v38 }
 0x401   :  { %10 = vsyncpa [#allocation3], 0  ;;  %v2890_v42 = vcombine.high %v2874_v40, %v2874_v40  ;;  %v15369_v2 = vld [vmem:[%s18839_s3 + $0x38] sm:$0xff]   ;;  %v15400_v3 = vmov 0.0   ;;  %v15370_v4 = vld [vmem:[%s18839_s3 + $0x30] sm:$0xff]   ;;  %vm15401_vm0 = vmmov 0  }
 0x402   :  { %14289 = vmatpush3.bf16.msra.mxu1 %v15367_v39  ;;  %14305 = vmatprep.subr.bf16.mxu0 %v15400_v3  ;;  %v15371_v5 = vld [vmem:[%s18839_s3 + $0x28] sm:$0xff]   ;;  %v15372_v6 = vld [vmem:[%s18839_s3 + $0x20] sm:$0xff]   ;;  %v15373_v7 = vld [vmem:[%s18839_s3 + $0x18] sm:$0xff]   ;;  %s15402_s25 = smov [#allocation2]   ;;  %vm11838_vm1 = vcmask 74752  }
 0x403   :  { %v14004_v43 = vpop.f32.mrf.mxu0  ;;  %11678 = vmatmul.mubr.bf16.vlgmr.msra.gmra.mxu0 %v2874_v40  ;;  %v15374_v11 = vld [vmem:[%s18839_s3 + $0x10] sm:$0xff]   ;;  %v15376_v22 = vld [vmem:[%s18839_s3] sm:$0xff]   ;;  %s11846_s26 = sshll.u32 %s15402_s25, 4  ;;  %s11847_s26 = int_to_ptr.vmem [resolvable:$true] %s11846_s26 }
 0x404   :  { %14306 = vmatpush3.bf16.msra.mxu0 %v15369_v2  ;;  %14321 = vmatprep.mubr.msk.bf16.mxu0 %vm15401_vm0, %v15400_v3  ;;  %s15377_s27 = scalar_lea.vmem %s11847_s26, 32  ;;  %p15382_p1 = scmp.lt.s32.totalorder %s11847_s26, %s11847_s26 }
 0x405   :  { %v14026_v44 = vpop.f32.mrf.mxu1  ;;  %11718 = vmatmul.mubr.bf16.vlgmr.msra.gmra.mxu1 %v2890_v42  ;;  %v14005_v45 = vpop.f32.mrf.mxu0  ;;  %14307 = vmatprep.subr.bf16.mxu0 %v15400_v3  ;;  %p15378_p0 = scmp.ne.s32.totalorder %s11847_s26, %s15377_s27  ;;  %p15383_p2 = scmp.lt.s32.totalorder %s15377_s27, %s15377_s27 }
 0x406   :  { %v14006_v46 = vadd.f32 %v14005_v45, %v14004_v43 }
 0x407   :  { %v14027_v47 = vpop.f32.mrf.mxu1  ;;  %v14007_v48 = vpop.f32.mrf.mxu0  ;;  %p15384_p3 = por %p15383_p2, %p15382_p1 }
 0x408   :  { %v11200_v49 = vadd.f32 %v14006_v46, %v11160_v19  ;;  %v14028_v50 = vadd.f32 %v14027_v47, %v14026_v44  ;;  %14308 = vmatpush3.bf16.msra.mxu0 %v15370_v4  ;;  %v15375_v19 = vld [vmem:[%s18839_s3 + $0x8] sm:$0xff]  }
 0x409   :  { %v14029_v51 = vpop.f32.mrf.mxu1  ;;  %v14008_v52 = vpop.f32.mrf.mxu0  ;;  %14309 = vmatprep.subr.bf16.mxu0 %v15400_v3  ;;  %p15385_p4 = pnand %p15384_p3, %p15378_p0 }
 0x40a   :  { %v11240_v53 = vadd.f32 %v14028_v50, %v11200_v49 }
 0x40b   :  { %v14030_v41 = vpop.f32.mrf.mxu1 }
 0x40c   :  { %14310 = vmatpush3.bf16.msra.mxu0 %v15371_v5 }
 0x40d   :  { %14311 = vmatprep.subr.bf16.mxu0 %v15400_v3 }
 0x410   :  { %14312 = vmatpush3.bf16.msra.mxu0 %v15372_v6 }
 0x411   :  { %14313 = vmatprep.subr.bf16.mxu0 %v15400_v3 }
 0x414   :  { %14314 = vmatpush3.bf16.msra.mxu0 %v15373_v7 }
 0x415   :  { %14315 = vmatprep.subr.bf16.mxu0 %v15400_v3 }
 0x418   :  { %14316 = vmatpush3.bf16.msra.mxu0 %v15374_v11 }
 0x419   :  { %14317 = vmatprep.subr.bf16.mxu0 %v15400_v3 }
 0x41c   :  { %14318 = vmatpush3.bf16.msra.mxu0 %v15375_v19 }
 0x41d   :  { %14319 = vmatprep.subr.bf16.mxu0 %v15400_v3 }
 0x420   :  { %14320 = vmatpush3.bf16.msra.mxu0 %v15376_v22 }
 0x423   :  { %v14048_v54 = vpop.f32.mrf.mxu0 }
 0x425   :  { %v14070_v55 = vpop.f32.mrf.mxu1  ;;  %v14049_v56 = vpop.f32.mrf.mxu0 }
 0x426   :  { %v14050_v57 = vadd.f32 %v14049_v56, %v14048_v54 }
 0x427   :  { %v14071_v58 = vpop.f32.mrf.mxu1  ;;  %v14051_v59 = vpop.f32.mrf.mxu0 }
 0x428   :  { %v11280_v60 = vadd.f32 %v14050_v57, %v11240_v53  ;;  %v14072_v61 = vadd.f32 %v14071_v58, %v14070_v55 }
 0x429   :  { %v14073_v62 = vpop.f32.mrf.mxu1  ;;  %v14052_v63 = vpop.f32.mrf.mxu0 }
 0x42a   :  { %v11320_v0 = vadd.f32 %v14072_v61, %v11280_v60 }
 0x42b   :  { %v14074_v1 = vpop.f32.mrf.mxu1 }
 0x443   :  { %v14092_v8 = vpop.f32.mrf.mxu0 }
 0x445   :  { %v14114_v9 = vpop.f32.mrf.mxu1  ;;  %v14093_v10 = vpop.f32.mrf.mxu0 }
 0x446   :  { %v14094_v12 = vadd.f32 %v14093_v10, %v14092_v8 }
 0x447   :  { %v14115_v13 = vpop.f32.mrf.mxu1  ;;  %v14095_v14 = vpop.f32.mrf.mxu0 }
 0x448   :  { %v11360_v15 = vadd.f32 %v14094_v12, %v11320_v0  ;;  %v14116_v16 = vadd.f32 %v14115_v13, %v14114_v9  ;;  %v12879_v9 = vld [vmem:[%s18840_s4] ss:$0 sm:$0xff] }
 0x449   :  { %v14117_v17 = vpop.f32.mrf.mxu1  ;;  %v14096_v18 = vpop.f32.mrf.mxu0 }
 0x44a   :  { %v11400_v20 = vadd.f32 %v14116_v16, %v11360_v15 }
 0x44b   :  { %v14118_v21 = vpop.f32.mrf.mxu1 }
 0x463   :  { %v14136_v23 = vpop.f32.mrf.mxu0 }
 0x465   :  { %v14158_v24 = vpop.f32.mrf.mxu1  ;;  %v14137_v25 = vpop.f32.mrf.mxu0 }
 0x466   :  { %v14138_v26 = vadd.f32 %v14137_v25, %v14136_v23 }
 0x467   :  { %v14159_v27 = vpop.f32.mrf.mxu1  ;;  %v14139_v28 = vpop.f32.mrf.mxu0 }
 0x468   :  { %v11440_v29 = vadd.f32 %v14138_v26, %v11400_v20  ;;  %v14160_v30 = vadd.f32 %v14159_v27, %v14158_v24 }
 0x469   :  { %v14161_v31 = vpop.f32.mrf.mxu1  ;;  %v14140_v32 = vpop.f32.mrf.mxu0 }
 0x46a   :  { %v11480_v33 = vadd.f32 %v14160_v30, %v11440_v29 }
 0x46b   :  { %v14162_v34 = vpop.f32.mrf.mxu1 }
 0x483   :  { %v14180_v35 = vpop.f32.mrf.mxu0 }
 0x485   :  { %v14202_v36 = vpop.f32.mrf.mxu1  ;;  %v14181_v37 = vpop.f32.mrf.mxu0 }
 0x486   :  { %v14182_v52 = vadd.f32 %v14181_v37, %v14180_v35 }
 0x487   :  { %v14203_v38 = vpop.f32.mrf.mxu1  ;;  %v14183_v39 = vpop.f32.mrf.mxu0 }
 0x488   :  { %v11520_v53 = vadd.f32 %v14182_v52, %v11480_v33  ;;  %v14204_v41 = vadd.f32 %v14203_v38, %v14202_v36 }
 0x489   :  { %v14205_v40 = vpop.f32.mrf.mxu1  ;;  %v14184_v42 = vpop.f32.mrf.mxu0 }
 0x48a   :  { %v11560_v55 = vadd.f32 %v14204_v41, %v11520_v53 }
 0x48b   :  { %v14206_v43 = vpop.f32.mrf.mxu1 }
 0x4a3   :  { %v14224_v44 = vpop.f32.mrf.mxu0 }
 0x4a5   :  { %v14246_v45 = vpop.f32.mrf.mxu1  ;;  %v14225_v46 = vpop.f32.mrf.mxu0 }
 0x4a6   :  { %v14226_v54 = vadd.f32 %v14225_v46, %v14224_v44 }
 0x4a7   :  { %v14247_v47 = vpop.f32.mrf.mxu1  ;;  %v14227_v48 = vpop.f32.mrf.mxu0 }
 0x4a8   :  { %v11600_v56 = vadd.f32 %v14226_v54, %v11560_v55  ;;  %v14248_v57 = vadd.f32 %v14247_v47, %v14246_v45 }
 0x4a9   :  { %v14249_v49 = vpop.f32.mrf.mxu1  ;;  %v14228_v50 = vpop.f32.mrf.mxu0 }
 0x4aa   :  { %v11640_v61 = vadd.f32 %v14248_v57, %v11600_v56 }
 0x4ab   :  { %v14250_v51 = vpop.f32.mrf.mxu1 }
 0x4c3   :  { %v14268_v58 = vpop.f32.mrf.mxu0 }
 0x4c5   :  { %v14290_v59 = vpop.f32.mrf.mxu1  ;;  %v14269_v60 = vpop.f32.mrf.mxu0 }
 0x4c6   :  { %v14270_v62 = vadd.f32 %v14269_v60, %v14268_v58 }
 0x4c7   :  { %v14291_v63 = vpop.f32.mrf.mxu1  ;;  %v14271_v0 = vpop.f32.mrf.mxu0 }
 0x4c8   :  { %v11680_v1 = vadd.f32 %v14270_v62, %v11640_v61  ;;  %v14292_v2 = vadd.f32 %v14291_v63, %v14290_v59 }
 0x4c9   :  { %v14293_v3 = vpop.f32.mrf.mxu1  ;;  %v14272_v4 = vpop.f32.mrf.mxu0 }
 0x4ca   :  { %v11720_v5 = vadd.f32 %v14292_v2, %v11680_v1 }
 0x4cb   :  { %v14294_v6 = vpop.f32.mrf.mxu1 }
 0x4cc   :  { %v11725_v7 = vmax.f32 %v11720_v5, 0.0 }
 0x4ce   :  { %v11726_v8 = vpack.c.bf16 %v11725_v7, %v11725_v7 }
 0x4d0   :  { %14322 = vmatmul.mubr.bf16.vlgmr.msra.gmra.mxu0 %v11726_v8 }
 0x590   :  { %v11832_v10 = vpop.f32.mrf.mxu0 }
 0x591   :  { %v11833_v11 = vadd.f32 %v12879_v9, %v11832_v10 }
 0x592   :  { %v14323_v12 = vpop.f32.mrf.mxu0 }
 0x593   :  { %11839 = vst.msk [vmem:[#allocation2] sm:$0x3] %vm11838_vm1, %v11833_v11 }
 0x594   :  { %v11835_v13 = vpop.f32.mrf.mxu0 }
 0x595   :  { %15388 = shalt.err (!%p15385_p4)
}
 0x596   :  { %11849 = dma.vmem_to_hbm [thread:$0]  %s11847_s26, 32, %s18841_s5, [#allocation3]   ;;  %v14324_v14 = vpop.f32.mrf.mxu0 }
 0x597   :  { %15397 = dma.done.wait [#allocation3], 32  }
 0x598   :  { %15398 = vsyncadd [#allocation3], 4294967264 }
 0x599   :  { %11853 = vsyncpa [#allocation3], 1 }

</bundles_post_ra>
